<compile_context>
chip_gen: v5e
topology: v5e:2x2
jax: 0.10.0
libtpu: 0.0.40
codegen_flags: <defaults>
</compile_context>

<pallas_src>
import functools

import jax
import jax.numpy as jnp
from jax.experimental import pallas as pl
from jax.experimental.pallas import tpu as pltpu


def _round_up(x, m):
    return ((x + m - 1) // m) * m


def _pad2d(x, rows, cols):
    if rows or cols:
        return jnp.pad(x, ((0, rows), (0, cols)))
    return x


# ------------------------------------------------------------------------
# Fused matmul + folded-BN scale/bias (+ optional residual add) (+ optional ReLU)
# ------------------------------------------------------------------------
def _matmul_bn_kernel(a_ref, b_ref, scale_ref, bias_ref, *rest,
                      apply_relu, has_residual):
    if has_residual:
        res_ref, o_ref, acc_ref = rest
    else:
        o_ref, acc_ref = rest

    @pl.when(pl.program_id(2) == 0)
    def _():
        acc_ref[...] = jnp.zeros_like(acc_ref)

    acc_ref[...] += jnp.dot(a_ref[...], b_ref[...],
                            preferred_element_type=jnp.float32)

    @pl.when(pl.program_id(2) == pl.num_programs(2) - 1)
    def _():
        y = acc_ref[...] * scale_ref[...] + bias_ref[...]
        if has_residual:
            y = y + res_ref[...].astype(jnp.float32)
        if apply_relu:
            y = jnp.maximum(y, 0.0)
        o_ref[...] = y.astype(o_ref.dtype)


def matmul_bn(a, b, scale, bias, *, apply_relu, residual=None):
    """relu?( (a @ b) * scale + bias [+ residual] ); bf16 MXU inputs, f32 accumulate."""
    M, K = a.shape
    K2, N = b.shape
    assert K == K2

    # Tile selection: MXU-friendly, lane-dense outputs, and (when cheap) keep >=2
    # parallel output blocks so both v7x TensorCores get work. v5e is fine at 128.
    tm = min(256, _round_up(M, 8))
    Mp = _round_up(M, tm)
    Np = _round_up(N, 128)
    tn = 256 if (Np % 256 == 0 and Np // 256 >= 2) else 128
    Kp = _round_up(K, 128)
    tk = 256 if Kp % 256 == 0 else 128

    a_p = _pad2d(a.astype(jnp.bfloat16), Mp - M, Kp - K)
    b_p = _pad2d(b.astype(jnp.bfloat16), Kp - K, Np - N)
    scale_p = _pad2d(scale.reshape(1, N).astype(jnp.float32), 0, Np - N)
    bias_p = _pad2d(bias.reshape(1, N).astype(jnp.float32), 0, Np - N)

    in_arrays = [a_p, b_p, scale_p, bias_p]
    in_specs = [
        pl.BlockSpec((tm, tk), lambda i, j, k: (i, k)),
        pl.BlockSpec((tk, tn), lambda i, j, k: (k, j)),
        pl.BlockSpec((1, tn), lambda i, j, k: (0, j)),
        pl.BlockSpec((1, tn), lambda i, j, k: (0, j)),
    ]
    has_residual = residual is not None
    if has_residual:
        r_p = _pad2d(residual.astype(jnp.bfloat16), Mp - M, Np - N)
        in_arrays.append(r_p)
        in_specs.append(pl.BlockSpec((tm, tn), lambda i, j, k: (i, j)))

    kernel = functools.partial(_matmul_bn_kernel, apply_relu=apply_relu,
                               has_residual=has_residual)
    out = pl.pallas_call(
        kernel,
        out_shape=jax.ShapeDtypeStruct((Mp, Np), jnp.bfloat16),
        grid_spec=pltpu.PrefetchScalarGridSpec(
            num_scalar_prefetch=0,
            grid=(Mp // tm, Np // tn, Kp // tk),
            in_specs=in_specs,
            out_specs=pl.BlockSpec((tm, tn), lambda i, j, k: (i, j)),
            scratch_shapes=[pltpu.VMEM((tm, tn), jnp.float32)],
        ),
        compiler_params=pltpu.CompilerParams(
            dimension_semantics=("parallel", "parallel", "arbitrary")),
    )(*in_arrays)
    if Mp > M or Np > N:
        out = out[:M, :N]
    return out


# ------------------------------------------------------------------------
# Max-pool 3x3 / stride 2 / pad 1: running max over 9 shifted views, tiled grid
# ------------------------------------------------------------------------
def _maxpool_kernel(*refs):
    o_ref = refs[-1]
    m = refs[0][...]
    for r in refs[1:-1]:
        m = jnp.maximum(m, r[...])
    o_ref[...] = m


def maxpool3x3_s2(x):
    N, H, W, C = x.shape
    k, s, pad = 3, 2, 1
    Ho = (H + 2 * pad - k) // s + 1
    Wo = (W + 2 * pad - k) // s + 1
    xp = jnp.pad(x, ((0, 0), (pad, pad), (pad, pad), (0, 0)),
                 constant_values=float("-inf"))
    M = N * Ho * Wo
    slices = []
    for di in range(k):
        for dj in range(k):
            sl = xp[:, di:di + s * (Ho - 1) + 1:s,
                    dj:dj + s * (Wo - 1) + 1:s, :]
            slices.append(sl.reshape(M, C))
    Mp = _round_up(M, 8)
    if Mp > M:
        slices = [jnp.pad(sl, ((0, Mp - M), (0, 0))) for sl in slices]
    tm = 256 if Mp % 256 == 0 else (128 if Mp % 128 == 0 else Mp)

    out = pl.pallas_call(
        _maxpool_kernel,
        out_shape=jax.ShapeDtypeStruct((Mp, C), x.dtype),
        grid=(Mp // tm,),
        in_specs=[pl.BlockSpec((tm, C), lambda i: (i, 0))] * len(slices),
        out_specs=pl.BlockSpec((tm, C), lambda i: (i, 0)),
        compiler_params=pltpu.CompilerParams(dimension_semantics=("parallel",)),
    )(*slices)
    if Mp > M:
        out = out[:M]
    return out.reshape(N, Ho, Wo, C)


# ------------------------------------------------------------------------
# Fused global average pool + FC head (f32 logits)
# ------------------------------------------------------------------------
def _avgpool_fc_kernel(x_ref, w_ref, b_ref, o_ref):
    feat = jnp.mean(x_ref[...].astype(jnp.float32), axis=1)          # (Np, C)
    o_ref[...] = jnp.dot(feat, w_ref[...],
                         preferred_element_type=jnp.float32) + b_ref[...]


def avgpool_fc(x, fc_w, fc_b):
    # x: (N, H, W, C) bf16 (C may include zero channel padding); fc_w: (ncls, C_real)
    N, H, W, C = x.shape
    ncls, c_real = fc_w.shape
    nclsp = _round_up(ncls, 128)
    Npad = _round_up(N, 8)

    w = jnp.pad(fc_w.T.astype(jnp.float32), ((0, C - c_real), (0, nclsp - ncls)))
    b = jnp.pad(fc_b.astype(jnp.float32), (0, nclsp - ncls)).reshape(1, nclsp)
    xr = x.reshape(N, H * W, C)
    if Npad > N:
        xr = jnp.pad(xr, ((0, Npad - N), (0, 0), (0, 0)))

    out = pl.pallas_call(
        _avgpool_fc_kernel,
        out_shape=jax.ShapeDtypeStruct((Npad, nclsp), jnp.float32),
        grid=(1,),
        in_specs=[pl.BlockSpec((Npad, H * W, C), lambda i: (0, 0, 0)),
                  pl.BlockSpec((C, nclsp), lambda i: (0, 0)),
                  pl.BlockSpec((1, nclsp), lambda i: (0, 0))],
        out_specs=pl.BlockSpec((Npad, nclsp), lambda i: (0, 0)),
    )(xr, w, b)
    return out[:N, :ncls]


# ------------------------------------------------------------------------
# Conv (im2col glue in bf16 + Pallas matmul with fused folded-BN / residual / ReLU)
# ------------------------------------------------------------------------
def _im2col(x, kh, kw, stride, pad):
    N, H, W, C = x.shape
    Ho = (H + 2 * pad - kh) // stride + 1
    Wo = (W + 2 * pad - kw) // stride + 1
    xp = jnp.pad(x, ((0, 0), (pad, pad), (pad, pad), (0, 0)))
    cols = []
    for di in range(kh):
        for dj in range(kw):
            cols.append(xp[:, di:di + stride * (Ho - 1) + 1:stride,
                           dj:dj + stride * (Wo - 1) + 1:stride, :])
    patches = jnp.stack(cols, axis=3)            # (N, Ho, Wo, kh*kw, C)
    return patches.reshape(N * Ho * Wo, kh * kw * C), Ho, Wo


def conv_bn(x, w, bn_scale, bn_bias, *, stride, pad, relu, residual=None):
    # x: NHWC bf16 with channels possibly zero-padded to a multiple of 128.
    # w: PyTorch layout (Cout, Cin, kh, kw), f32.
    N = x.shape[0]
    Cp_in = x.shape[3]
    Cout, Cin, kh, kw = w.shape
    Coutp = _round_up(Cout, 128)

    # (Cout, Cin, kh, kw) -> (kh, kw, Cp_in, Coutp), zero-padded; matches the padded
    # activation channels (which are zero) so the padding is mathematically inert.
    wt = jnp.transpose(w, (2, 3, 1, 0))
    wt = jnp.pad(wt, ((0, 0), (0, 0), (0, Cp_in - Cin), (0, Coutp - Cout)))
    wmat = wt.reshape(kh * kw * Cp_in, Coutp)
    scale = jnp.pad(bn_scale.astype(jnp.float32), (0, Coutp - Cout))
    bias = jnp.pad(bn_bias.astype(jnp.float32), (0, Coutp - Cout))

    patches, Ho, Wo = _im2col(x, kh, kw, stride, pad)
    res2d = None
    if residual is not None:
        res2d = residual.reshape(N * Ho * Wo, Coutp)

    out = matmul_bn(patches, wmat, scale, bias, apply_relu=relu, residual=res2d)
    return out.reshape(N, Ho, Wo, Coutp)


# ------------------------------------------------------------------------
# ResNet-18 definition with deterministic synthetic parameters
# ------------------------------------------------------------------------
def init_resnet18_params(key, num_classes=7):
    keys = iter(jax.random.split(key, 256))

    def conv_w(cout, cin, kh, kw):
        std = (2.0 / (cin * kh * kw)) ** 0.5
        return std * jax.random.normal(next(keys), (cout, cin, kh, kw), jnp.float32)

    def bn(c):
        gamma = 1.0 + 0.1 * jax.random.normal(next(keys), (c,), jnp.float32)
        beta = 0.1 * jax.random.normal(next(keys), (c,), jnp.float32)
        running_mean = 0.1 * jax.random.normal(next(keys), (c,), jnp.float32)
        running_var = 0.5 + jax.random.uniform(next(keys), (c,), jnp.float32)
        eps = 1e-5
        scale = gamma / jnp.sqrt(running_var + eps)
        bias = beta - running_mean * scale
        return scale, bias

    def block(cin, cout, stride):
        blk = {
            "stride": stride,
            "conv1": conv_w(cout, cin, 3, 3), "bn1": bn(cout),
            "conv2": conv_w(cout, cout, 3, 3), "bn2": bn(cout),
        }
        if stride != 1 or cin != cout:
            blk["ds_conv"] = conv_w(cout, cin, 1, 1)
            blk["ds_bn"] = bn(cout)
        return blk

    params = {
        "conv1": conv_w(64, 3, 7, 7),
        "bn1": bn(64),
        "layers": [
            [block(64, 64, 1), block(64, 64, 1)],
            [block(64, 128, 2), block(128, 128, 1)],
            [block(128, 256, 2), block(256, 256, 1)],
            [block(256, 512, 2), block(512, 512, 1)],
        ],
        "fc_w": 0.05 * jax.random.normal(next(keys), (num_classes, 512), jnp.float32),
        "fc_b": 0.05 * jax.random.normal(next(keys), (num_classes,), jnp.float32),
    }
    return params


def basic_block(x, blk):
    stride = blk["stride"]
    if "ds_conv" in blk:
        identity = conv_bn(x, blk["ds_conv"], *blk["ds_bn"],
                           stride=stride, pad=0, relu=False)
    else:
        identity = x
    out = conv_bn(x, blk["conv1"], *blk["bn1"], stride=stride, pad=1, relu=True)
    # Residual add + ReLU are fused into the second conv's matmul epilogue.
    out = conv_bn(out, blk["conv2"], *blk["bn2"], stride=1, pad=1, relu=True,
                  residual=identity)
    return out


def resnet18_forward(params, x_nchw):
    x = jnp.transpose(x_nchw, (0, 2, 3, 1)).astype(jnp.bfloat16)   # NCHW -> NHWC
    x = conv_bn(x, params["conv1"], *params["bn1"], stride=2, pad=3, relu=True)
    x = maxpool3x3_s2(x)
    for layer in params["layers"]:
        for blk in layer:
            x = basic_block(x, blk)
    logits = avgpool_fc(x, params["fc_w"], params["fc_b"])          # (N, 7) f32
    return logits


if __name__ == "__main__":
    key = jax.random.PRNGKey(0)
    pkey, xkey = jax.random.split(key)
    params = init_resnet18_params(pkey, num_classes=7)

    # Small ResNet-compatible input: batch=2, RGB, 32x32 (total stride of the net is 32).
    x = jax.random.normal(xkey, (2, 3, 32, 32), jnp.float32)

    fwd = jax.jit(functools.partial(resnet18_forward, params))
    logits = jax.block_until_ready(fwd(x))

    assert logits.shape == (2, 7) and logits.dtype == jnp.float32
    assert bool(jnp.all(jnp.isfinite(logits)))
    print("KERNEL_OK")
</pallas_src>

<mosaic_0001>
module attributes {stable_mosaic.version = 11 : i64} {
  func.func @_matmul_bn_kernel(%arg0: i32, %arg1: i32, %arg2: i32, %arg3: memref<256x256xbf16, #tpu.memory_space<vmem>>, %arg4: memref<256x128xbf16, #tpu.memory_space<vmem>>, %arg5: memref<1x128xf32, #tpu.memory_space<vmem>>, %arg6: memref<1x128xf32, #tpu.memory_space<vmem>>, %arg7: memref<256x128xbf16, #tpu.memory_space<vmem>>, %arg8: memref<256x128xf32, #tpu.memory_space<vmem>>) attributes {dimension_semantics = [#tpu.dimension_semantics<parallel>, #tpu.dimension_semantics<parallel>, #tpu.dimension_semantics<arbitrary>], iteration_bounds = array<i64: 2, 1, 1>, scalar_prefetch = 0 : i64, scratch_operands = 1 : i64, tpu.core_type = #tpu.core_type<tc>, window_params = [{transform_indices = @transform_0, window_bounds = array<i64: 256, 256>}, {transform_indices = @transform_1, window_bounds = array<i64: 256, 128>}, {transform_indices = @transform_2, window_bounds = array<i64: 1, 128>}, {transform_indices = @transform_3, window_bounds = array<i64: 1, 128>}, {transform_indices = @transform_4, window_bounds = array<i64: 256, 128>}]} {
    %c0_i32 = arith.constant 0 : i32
    %0 = arith.cmpi eq, %arg2, %c0_i32 : i32
    %1 = arith.extui %0 : i1 to i32
    %c0_i32_0 = arith.constant 0 : i32
    %2 = arith.cmpi ne, %1, %c0_i32_0 : i32
    scf.if %2 {
      %cst_10 = arith.constant 0.000000e+00 : f32
      %12 = vector.broadcast %cst_10 : f32 to vector<256x128xf32>
      %c0_11 = arith.constant 0 : index
      %c0_12 = arith.constant 0 : index
      %13 = vector.load %arg8[%c0_11, %c0_12] : memref<256x128xf32, #tpu.memory_space<vmem>>, vector<256x128xf32>
      tpu.vector_store %arg8[%c0_11, %c0_12], %12 {strides = array<i32>} : memref<256x128xf32, #tpu.memory_space<vmem>>, vector<256x128xf32>,
    } else {
    }
    %c0 = arith.constant 0 : index
    %c0_1 = arith.constant 0 : index
    %3 = vector.load %arg8[%c0, %c0_1] : memref<256x128xf32, #tpu.memory_space<vmem>>, vector<256x128xf32>
    %c0_2 = arith.constant 0 : index
    %c0_3 = arith.constant 0 : index
    %4 = vector.load %arg3[%c0_2, %c0_3] : memref<256x256xbf16, #tpu.memory_space<vmem>>, vector<256x256xbf16>
    %c0_4 = arith.constant 0 : index
    %c0_5 = arith.constant 0 : index
    %5 = vector.load %arg4[%c0_4, %c0_5] : memref<256x128xbf16, #tpu.memory_space<vmem>>, vector<256x128xbf16>
    %cst = arith.constant dense<0.000000e+00> : vector<256x128xf32>
    %6 = tpu.matmul %4, %5, %cst {dimension_numbers = #tpu.dot_dimension_numbers<[1], [0], [0], [1], [0, 0, 1, 1], [], []>} : vector<256x256xbf16>, vector<256x128xbf16>, vector<256x128xf32> -> vector<256x128xf32>
    %7 = arith.addf %3, %6 : vector<256x128xf32>
    %c0_6 = arith.constant 0 : index
    %c0_7 = arith.constant 0 : index
    %8 = vector.load %arg8[%c0_6, %c0_7] : memref<256x128xf32, #tpu.memory_space<vmem>>, vector<256x128xf32>
    tpu.vector_store %arg8[%c0_6, %c0_7], %7 {strides = array<i32>} : memref<256x128xf32, #tpu.memory_space<vmem>>, vector<256x128xf32>,
    %c0_i32_8 = arith.constant 0 : i32
    %9 = arith.cmpi eq, %arg2, %c0_i32_8 : i32
    %10 = arith.extui %9 : i1 to i32
    %c0_i32_9 = arith.constant 0 : i32
    %11 = arith.cmpi ne, %10, %c0_i32_9 : i32
    scf.if %11 {
      %c0_10 = arith.constant 0 : index
      %c0_11 = arith.constant 0 : index
      %12 = vector.load %arg8[%c0_10, %c0_11] : memref<256x128xf32, #tpu.memory_space<vmem>>, vector<256x128xf32>
      %c0_12 = arith.constant 0 : index
      %c0_13 = arith.constant 0 : index
      %13 = vector.load %arg5[%c0_12, %c0_13] : memref<1x128xf32, #tpu.memory_space<vmem>>, vector<1x128xf32>
      %14 = vector.broadcast %13 : vector<1x128xf32> to vector<256x128xf32>
      %15 = arith.mulf %12, %14 : vector<256x128xf32>
      %c0_14 = arith.constant 0 : index
      %c0_15 = arith.constant 0 : index
      %16 = vector.load %arg6[%c0_14, %c0_15] : memref<1x128xf32, #tpu.memory_space<vmem>>, vector<1x128xf32>
      %17 = vector.broadcast %16 : vector<1x128xf32> to vector<256x128xf32>
      %18 = arith.addf %15, %17 : vector<256x128xf32>
      %cst_16 = arith.constant 0.000000e+00 : f32
      %19 = vector.broadcast %cst_16 : f32 to vector<256x128xf32>
      %20 = arith.maximumf %18, %19 : vector<256x128xf32>
      %21 = arith.truncf %20 : vector<256x128xf32> to vector<256x128xbf16>
      %c0_17 = arith.constant 0 : index
      %c0_18 = arith.constant 0 : index
      %22 = vector.load %arg7[%c0_17, %c0_18] : memref<256x128xbf16, #tpu.memory_space<vmem>>, vector<256x128xbf16>
      tpu.vector_store %arg7[%c0_17, %c0_18], %21 {strides = array<i32>} : memref<256x128xbf16, #tpu.memory_space<vmem>>, vector<256x128xbf16>,
    } else {
    }
    return
  }
  func.func @transform_0(%arg0: i32, %arg1: i32, %arg2: i32) -> (i32, i32) {
    %c0_i32 = arith.constant 0 : i32
    return %arg0, %arg2 : i32, i32
  }
  func.func @transform_1(%arg0: i32, %arg1: i32, %arg2: i32) -> (i32, i32) {
    %c0_i32 = arith.constant 0 : i32
    return %arg2, %arg1 : i32, i32
  }
  func.func @transform_2(%arg0: i32, %arg1: i32, %arg2: i32) -> (i32, i32) {
    %c0_i32 = arith.constant 0 : i32
    %c0_i32_0 = arith.constant 0 : i32
    return %c0_i32, %arg1 : i32, i32
  }
  func.func @transform_3(%arg0: i32, %arg1: i32, %arg2: i32) -> (i32, i32) {
    %c0_i32 = arith.constant 0 : i32
    %c0_i32_0 = arith.constant 0 : i32
    return %c0_i32, %arg1 : i32, i32
  }
  func.func @transform_4(%arg0: i32, %arg1: i32, %arg2: i32) -> (i32, i32) {
    %c0_i32 = arith.constant 0 : i32
    return %arg0, %arg1 : i32, i32
  }
}

module attributes {stable_mosaic.version = 11 : i64} {
  func.func @_maxpool_kernel(%arg0: i32, %arg1: memref<128x128xbf16, #tpu.memory_space<vmem>>, %arg2: memref<128x128xbf16, #tpu.memory_space<vmem>>, %arg3: memref<128x128xbf16, #tpu.memory_space<vmem>>, %arg4: memref<128x128xbf16, #tpu.memory_space<vmem>>, %arg5: memref<128x128xbf16, #tpu.memory_space<vmem>>, %arg6: memref<128x128xbf16, #tpu.memory_space<vmem>>, %arg7: memref<128x128xbf16, #tpu.memory_space<vmem>>, %arg8: memref<128x128xbf16, #tpu.memory_space<vmem>>, %arg9: memref<128x128xbf16, #tpu.memory_space<vmem>>, %arg10: memref<128x128xbf16, #tpu.memory_space<vmem>>) attributes {dimension_semantics = [#tpu.dimension_semantics<parallel>], iteration_bounds = array<i64: 1>, scalar_prefetch = 0 : i64, scratch_operands = 0 : i64, tpu.core_type = #tpu.core_type<tc>, window_params = [{transform_indices = @transform_0, window_bounds = array<i64: 128, 128>}, {transform_indices = @transform_1, window_bounds = array<i64: 128, 128>}, {transform_indices = @transform_2, window_bounds = array<i64: 128, 128>}, {transform_indices = @transform_3, window_bounds = array<i64: 128, 128>}, {transform_indices = @transform_4, window_bounds = array<i64: 128, 128>}, {transform_indices = @transform_5, window_bounds = array<i64: 128, 128>}, {transform_indices = @transform_6, window_bounds = array<i64: 128, 128>}, {transform_indices = @transform_7, window_bounds = array<i64: 128, 128>}, {transform_indices = @transform_8, window_bounds = array<i64: 128, 128>}, {transform_indices = @transform_9, window_bounds = array<i64: 128, 128>}]} {
    %c0 = arith.constant 0 : index
    %c0_0 = arith.constant 0 : index
    %0 = vector.load %arg1[%c0, %c0_0] : memref<128x128xbf16, #tpu.memory_space<vmem>>, vector<128x128xbf16>
    %c0_1 = arith.constant 0 : index
    %c0_2 = arith.constant 0 : index
    %1 = vector.load %arg2[%c0_1, %c0_2] : memref<128x128xbf16, #tpu.memory_space<vmem>>, vector<128x128xbf16>
    %2 = arith.maximumf %0, %1 : vector<128x128xbf16>
    %c0_3 = arith.constant 0 : index
    %c0_4 = arith.constant 0 : index
    %3 = vector.load %arg3[%c0_3, %c0_4] : memref<128x128xbf16, #tpu.memory_space<vmem>>, vector<128x128xbf16>
    %4 = arith.maximumf %2, %3 : vector<128x128xbf16>
    %c0_5 = arith.constant 0 : index
    %c0_6 = arith.constant 0 : index
    %5 = vector.load %arg4[%c0_5, %c0_6] : memref<128x128xbf16, #tpu.memory_space<vmem>>, vector<128x128xbf16>
    %6 = arith.maximumf %4, %5 : vector<128x128xbf16>
    %c0_7 = arith.constant 0 : index
    %c0_8 = arith.constant 0 : index
    %7 = vector.load %arg5[%c0_7, %c0_8] : memref<128x128xbf16, #tpu.memory_space<vmem>>, vector<128x128xbf16>
    %8 = arith.maximumf %6, %7 : vector<128x128xbf16>
    %c0_9 = arith.constant 0 : index
    %c0_10 = arith.constant 0 : index
    %9 = vector.load %arg6[%c0_9, %c0_10] : memref<128x128xbf16, #tpu.memory_space<vmem>>, vector<128x128xbf16>
    %10 = arith.maximumf %8, %9 : vector<128x128xbf16>
    %c0_11 = arith.constant 0 : index
    %c0_12 = arith.constant 0 : index
    %11 = vector.load %arg7[%c0_11, %c0_12] : memref<128x128xbf16, #tpu.memory_space<vmem>>, vector<128x128xbf16>
    %12 = arith.maximumf %10, %11 : vector<128x128xbf16>
    %c0_13 = arith.constant 0 : index
    %c0_14 = arith.constant 0 : index
    %13 = vector.load %arg8[%c0_13, %c0_14] : memref<128x128xbf16, #tpu.memory_space<vmem>>, vector<128x128xbf16>
    %14 = arith.maximumf %12, %13 : vector<128x128xbf16>
    %c0_15 = arith.constant 0 : index
    %c0_16 = arith.constant 0 : index
    %15 = vector.load %arg9[%c0_15, %c0_16] : memref<128x128xbf16, #tpu.memory_space<vmem>>, vector<128x128xbf16>
    %16 = arith.maximumf %14, %15 : vector<128x128xbf16>
    %c0_17 = arith.constant 0 : index
    %c0_18 = arith.constant 0 : index
    %17 = vector.load %arg10[%c0_17, %c0_18] : memref<128x128xbf16, #tpu.memory_space<vmem>>, vector<128x128xbf16>
    tpu.vector_store %arg10[%c0_17, %c0_18], %16 {strides = array<i32>} : memref<128x128xbf16, #tpu.memory_space<vmem>>, vector<128x128xbf16>,
    return
  }
  func.func @transform_0(%arg0: i32) -> (i32, i32) {
    %c0_i32 = arith.constant 0 : i32
    %c0_i32_0 = arith.constant 0 : i32
    return %arg0, %c0_i32 : i32, i32
  }
  func.func @transform_1(%arg0: i32) -> (i32, i32) {
    %c0_i32 = arith.constant 0 : i32
    %c0_i32_0 = arith.constant 0 : i32
    return %arg0, %c0_i32 : i32, i32
  }
  func.func @transform_2(%arg0: i32) -> (i32, i32) {
    %c0_i32 = arith.constant 0 : i32
    %c0_i32_0 = arith.constant 0 : i32
    return %arg0, %c0_i32 : i32, i32
  }
  func.func @transform_3(%arg0: i32) -> (i32, i32) {
    %c0_i32 = arith.constant 0 : i32
    %c0_i32_0 = arith.constant 0 : i32
    return %arg0, %c0_i32 : i32, i32
  }
  func.func @transform_4(%arg0: i32) -> (i32, i32) {
    %c0_i32 = arith.constant 0 : i32
    %c0_i32_0 = arith.constant 0 : i32
    return %arg0, %c0_i32 : i32, i32
  }
  func.func @transform_5(%arg0: i32) -> (i32, i32) {
    %c0_i32 = arith.constant 0 : i32
    %c0_i32_0 = arith.constant 0 : i32
    return %arg0, %c0_i32 : i32, i32
  }
  func.func @transform_6(%arg0: i32) -> (i32, i32) {
    %c0_i32 = arith.constant 0 : i32
    %c0_i32_0 = arith.constant 0 : i32
    return %arg0, %c0_i32 : i32, i32
  }
  func.func @transform_7(%arg0: i32) -> (i32, i32) {
    %c0_i32 = arith.constant 0 : i32
    %c0_i32_0 = arith.constant 0 : i32
    return %arg0, %c0_i32 : i32, i32
  }
  func.func @transform_8(%arg0: i32) -> (i32, i32) {
    %c0_i32 = arith.constant 0 : i32
    %c0_i32_0 = arith.constant 0 : i32
    return %arg0, %c0_i32 : i32, i32
  }
  func.func @transform_9(%arg0: i32) -> (i32, i32) {
    %c0_i32 = arith.constant 0 : i32
    %c0_i32_0 = arith.constant 0 : i32
    return %arg0, %c0_i32 : i32, i32
  }
}

module attributes {stable_mosaic.version = 11 : i64} {
  func.func @_matmul_bn_kernel(%arg0: i32, %arg1: i32, %arg2: i32, %arg3: memref<128x128xbf16, #tpu.memory_space<vmem>>, %arg4: memref<128x128xbf16, #tpu.memory_space<vmem>>, %arg5: memref<1x128xf32, #tpu.memory_space<vmem>>, %arg6: memref<1x128xf32, #tpu.memory_space<vmem>>, %arg7: memref<128x128xbf16, #tpu.memory_space<vmem>>, %arg8: memref<128x128xf32, #tpu.memory_space<vmem>>) attributes {dimension_semantics = [#tpu.dimension_semantics<parallel>, #tpu.dimension_semantics<parallel>, #tpu.dimension_semantics<arbitrary>], iteration_bounds = array<i64: 1, 1, 9>, scalar_prefetch = 0 : i64, scratch_operands = 1 : i64, tpu.core_type = #tpu.core_type<tc>, window_params = [{transform_indices = @transform_0, window_bounds = array<i64: 128, 128>}, {transform_indices = @transform_1, window_bounds = array<i64: 128, 128>}, {transform_indices = @transform_2, window_bounds = array<i64: 1, 128>}, {transform_indices = @transform_3, window_bounds = array<i64: 1, 128>}, {transform_indices = @transform_4, window_bounds = array<i64: 128, 128>}]} {
    %c0_i32 = arith.constant 0 : i32
    %0 = arith.cmpi eq, %arg2, %c0_i32 : i32
    %1 = arith.extui %0 : i1 to i32
    %c0_i32_0 = arith.constant 0 : i32
    %2 = arith.cmpi ne, %1, %c0_i32_0 : i32
    scf.if %2 {
      %cst_9 = arith.constant 0.000000e+00 : f32
      %12 = vector.broadcast %cst_9 : f32 to vector<128x128xf32>
      %c0_10 = arith.constant 0 : index
      %c0_11 = arith.constant 0 : index
      %13 = vector.load %arg8[%c0_10, %c0_11] : memref<128x128xf32, #tpu.memory_space<vmem>>, vector<128x128xf32>
      tpu.vector_store %arg8[%c0_10, %c0_11], %12 {strides = array<i32>} : memref<128x128xf32, #tpu.memory_space<vmem>>, vector<128x128xf32>,
    } else {
    }
    %c0 = arith.constant 0 : index
    %c0_1 = arith.constant 0 : index
    %3 = vector.load %arg8[%c0, %c0_1] : memref<128x128xf32, #tpu.memory_space<vmem>>, vector<128x128xf32>
    %c0_2 = arith.constant 0 : index
    %c0_3 = arith.constant 0 : index
    %4 = vector.load %arg3[%c0_2, %c0_3] : memref<128x128xbf16, #tpu.memory_space<vmem>>, vector<128x128xbf16>
    %c0_4 = arith.constant 0 : index
    %c0_5 = arith.constant 0 : index
    %5 = vector.load %arg4[%c0_4, %c0_5] : memref<128x128xbf16, #tpu.memory_space<vmem>>, vector<128x128xbf16>
    %cst = arith.constant dense<0.000000e+00> : vector<128x128xf32>
    %6 = tpu.matmul %4, %5, %cst {dimension_numbers = #tpu.dot_dimension_numbers<[1], [0], [0], [1], [0, 0, 1, 1], [], []>} : vector<128x128xbf16>, vector<128x128xbf16>, vector<128x128xf32> -> vector<128x128xf32>
    %7 = arith.addf %3, %6 : vector<128x128xf32>
    %c0_6 = arith.constant 0 : index
    %c0_7 = arith.constant 0 : index
    %8 = vector.load %arg8[%c0_6, %c0_7] : memref<128x128xf32, #tpu.memory_space<vmem>>, vector<128x128xf32>
    tpu.vector_store %arg8[%c0_6, %c0_7], %7 {strides = array<i32>} : memref<128x128xf32, #tpu.memory_space<vmem>>, vector<128x128xf32>,
    %c8_i32 = arith.constant 8 : i32
    %9 = arith.cmpi eq, %arg2, %c8_i32 : i32
    %10 = arith.extui %9 : i1 to i32
    %c0_i32_8 = arith.constant 0 : i32
    %11 = arith.cmpi ne, %10, %c0_i32_8 : i32
    scf.if %11 {
      %c0_9 = arith.constant 0 : index
      %c0_10 = arith.constant 0 : index
      %12 = vector.load %arg8[%c0_9, %c0_10] : memref<128x128xf32, #tpu.memory_space<vmem>>, vector<128x128xf32>
      %c0_11 = arith.constant 0 : index
      %c0_12 = arith.constant 0 : index
      %13 = vector.load %arg5[%c0_11, %c0_12] : memref<1x128xf32, #tpu.memory_space<vmem>>, vector<1x128xf32>
      %14 = vector.broadcast %13 : vector<1x128xf32> to vector<128x128xf32>
      %15 = arith.mulf %12, %14 : vector<128x128xf32>
      %c0_13 = arith.constant 0 : index
      %c0_14 = arith.constant 0 : index
      %16 = vector.load %arg6[%c0_13, %c0_14] : memref<1x128xf32, #tpu.memory_space<vmem>>, vector<1x128xf32>
      %17 = vector.broadcast %16 : vector<1x128xf32> to vector<128x128xf32>
      %18 = arith.addf %15, %17 : vector<128x128xf32>
      %cst_15 = arith.constant 0.000000e+00 : f32
      %19 = vector.broadcast %cst_15 : f32 to vector<128x128xf32>
      %20 = arith.maximumf %18, %19 : vector<128x128xf32>
      %21 = arith.truncf %20 : vector<128x128xf32> to vector<128x128xbf16>
      %c0_16 = arith.constant 0 : index
      %c0_17 = arith.constant 0 : index
      %22 = vector.load %arg7[%c0_16, %c0_17] : memref<128x128xbf16, #tpu.memory_space<vmem>>, vector<128x128xbf16>
      tpu.vector_store %arg7[%c0_16, %c0_17], %21 {strides = array<i32>} : memref<128x128xbf16, #tpu.memory_space<vmem>>, vector<128x128xbf16>,
    } else {
    }
    return
  }
  func.func @transform_0(%arg0: i32, %arg1: i32, %arg2: i32) -> (i32, i32) {
    %c0_i32 = arith.constant 0 : i32
    return %arg0, %arg2 : i32, i32
  }
  func.func @transform_1(%arg0: i32, %arg1: i32, %arg2: i32) -> (i32, i32) {
    %c0_i32 = arith.constant 0 : i32
    return %arg2, %arg1 : i32, i32
  }
  func.func @transform_2(%arg0: i32, %arg1: i32, %arg2: i32) -> (i32, i32) {
    %c0_i32 = arith.constant 0 : i32
    %c0_i32_0 = arith.constant 0 : i32
    return %c0_i32, %arg1 : i32, i32
  }
  func.func @transform_3(%arg0: i32, %arg1: i32, %arg2: i32) -> (i32, i32) {
    %c0_i32 = arith.constant 0 : i32
    %c0_i32_0 = arith.constant 0 : i32
    return %c0_i32, %arg1 : i32, i32
  }
  func.func @transform_4(%arg0: i32, %arg1: i32, %arg2: i32) -> (i32, i32) {
    %c0_i32 = arith.constant 0 : i32
    return %arg0, %arg1 : i32, i32
  }
}

module attributes {stable_mosaic.version = 11 : i64} {
  func.func @_matmul_bn_kernel(%arg0: i32, %arg1: i32, %arg2: i32, %arg3: memref<128x128xbf16, #tpu.memory_space<vmem>>, %arg4: memref<128x128xbf16, #tpu.memory_space<vmem>>, %arg5: memref<1x128xf32, #tpu.memory_space<vmem>>, %arg6: memref<1x128xf32, #tpu.memory_space<vmem>>, %arg7: memref<128x128xbf16, #tpu.memory_space<vmem>>, %arg8: memref<128x128xbf16, #tpu.memory_space<vmem>>, %arg9: memref<128x128xf32, #tpu.memory_space<vmem>>) attributes {dimension_semantics = [#tpu.dimension_semantics<parallel>, #tpu.dimension_semantics<parallel>, #tpu.dimension_semantics<arbitrary>], iteration_bounds = array<i64: 1, 1, 9>, scalar_prefetch = 0 : i64, scratch_operands = 1 : i64, tpu.core_type = #tpu.core_type<tc>, window_params = [{transform_indices = @transform_0, window_bounds = array<i64: 128, 128>}, {transform_indices = @transform_1, window_bounds = array<i64: 128, 128>}, {transform_indices = @transform_2, window_bounds = array<i64: 1, 128>}, {transform_indices = @transform_3, window_bounds = array<i64: 1, 128>}, {transform_indices = @transform_4, window_bounds = array<i64: 128, 128>}, {transform_indices = @transform_5, window_bounds = array<i64: 128, 128>}]} {
    %c0_i32 = arith.constant 0 : i32
    %0 = arith.cmpi eq, %arg2, %c0_i32 : i32
    %1 = arith.extui %0 : i1 to i32
    %c0_i32_0 = arith.constant 0 : i32
    %2 = arith.cmpi ne, %1, %c0_i32_0 : i32
    scf.if %2 {
      %cst_9 = arith.constant 0.000000e+00 : f32
      %12 = vector.broadcast %cst_9 : f32 to vector<128x128xf32>
      %c0_10 = arith.constant 0 : index
      %c0_11 = arith.constant 0 : index
      %13 = vector.load %arg9[%c0_10, %c0_11] : memref<128x128xf32, #tpu.memory_space<vmem>>, vector<128x128xf32>
      tpu.vector_store %arg9[%c0_10, %c0_11], %12 {strides = array<i32>} : memref<128x128xf32, #tpu.memory_space<vmem>>, vector<128x128xf32>,
    } else {
    }
    %c0 = arith.constant 0 : index
    %c0_1 = arith.constant 0 : index
    %3 = vector.load %arg9[%c0, %c0_1] : memref<128x128xf32, #tpu.memory_space<vmem>>, vector<128x128xf32>
    %c0_2 = arith.constant 0 : index
    %c0_3 = arith.constant 0 : index
    %4 = vector.load %arg3[%c0_2, %c0_3] : memref<128x128xbf16, #tpu.memory_space<vmem>>, vector<128x128xbf16>
    %c0_4 = arith.constant 0 : index
    %c0_5 = arith.constant 0 : index
    %5 = vector.load %arg4[%c0_4, %c0_5] : memref<128x128xbf16, #tpu.memory_space<vmem>>, vector<128x128xbf16>
    %cst = arith.constant dense<0.000000e+00> : vector<128x128xf32>
    %6 = tpu.matmul %4, %5, %cst {dimension_numbers = #tpu.dot_dimension_numbers<[1], [0], [0], [1], [0, 0, 1, 1], [], []>} : vector<128x128xbf16>, vector<128x128xbf16>, vector<128x128xf32> -> vector<128x128xf32>
    %7 = arith.addf %3, %6 : vector<128x128xf32>
    %c0_6 = arith.constant 0 : index
    %c0_7 = arith.constant 0 : index
    %8 = vector.load %arg9[%c0_6, %c0_7] : memref<128x128xf32, #tpu.memory_space<vmem>>, vector<128x128xf32>
    tpu.vector_store %arg9[%c0_6, %c0_7], %7 {strides = array<i32>} : memref<128x128xf32, #tpu.memory_space<vmem>>, vector<128x128xf32>,
    %c8_i32 = arith.constant 8 : i32
    %9 = arith.cmpi eq, %arg2, %c8_i32 : i32
    %10 = arith.extui %9 : i1 to i32
    %c0_i32_8 = arith.constant 0 : i32
    %11 = arith.cmpi ne, %10, %c0_i32_8 : i32
    scf.if %11 {
      %c0_9 = arith.constant 0 : index
      %c0_10 = arith.constant 0 : index
      %12 = vector.load %arg9[%c0_9, %c0_10] : memref<128x128xf32, #tpu.memory_space<vmem>>, vector<128x128xf32>
      %c0_11 = arith.constant 0 : index
      %c0_12 = arith.constant 0 : index
      %13 = vector.load %arg5[%c0_11, %c0_12] : memref<1x128xf32, #tpu.memory_space<vmem>>, vector<1x128xf32>
      %14 = vector.broadcast %13 : vector<1x128xf32> to vector<128x128xf32>
      %15 = arith.mulf %12, %14 : vector<128x128xf32>
      %c0_13 = arith.constant 0 : index
      %c0_14 = arith.constant 0 : index
      %16 = vector.load %arg6[%c0_13, %c0_14] : memref<1x128xf32, #tpu.memory_space<vmem>>, vector<1x128xf32>
      %17 = vector.broadcast %16 : vector<1x128xf32> to vector<128x128xf32>
      %18 = arith.addf %15, %17 : vector<128x128xf32>
      %c0_15 = arith.constant 0 : index
      %c0_16 = arith.constant 0 : index
      %19 = vector.load %arg7[%c0_15, %c0_16] : memref<128x128xbf16, #tpu.memory_space<vmem>>, vector<128x128xbf16>
      %20 = arith.extf %19 : vector<128x128xbf16> to vector<128x128xf32>
      %21 = arith.addf %18, %20 : vector<128x128xf32>
      %cst_17 = arith.constant 0.000000e+00 : f32
      %22 = vector.broadcast %cst_17 : f32 to vector<128x128xf32>
      %23 = arith.maximumf %21, %22 : vector<128x128xf32>
      %24 = arith.truncf %23 : vector<128x128xf32> to vector<128x128xbf16>
      %c0_18 = arith.constant 0 : index
      %c0_19 = arith.constant 0 : index
      %25 = vector.load %arg8[%c0_18, %c0_19] : memref<128x128xbf16, #tpu.memory_space<vmem>>, vector<128x128xbf16>
      tpu.vector_store %arg8[%c0_18, %c0_19], %24 {strides = array<i32>} : memref<128x128xbf16, #tpu.memory_space<vmem>>, vector<128x128xbf16>,
    } else {
    }
    return
  }
  func.func @transform_0(%arg0: i32, %arg1: i32, %arg2: i32) -> (i32, i32) {
    %c0_i32 = arith.constant 0 : i32
    return %arg0, %arg2 : i32, i32
  }
  func.func @transform_1(%arg0: i32, %arg1: i32, %arg2: i32) -> (i32, i32) {
    %c0_i32 = arith.constant 0 : i32
    return %arg2, %arg1 : i32, i32
  }
  func.func @transform_2(%arg0: i32, %arg1: i32, %arg2: i32) -> (i32, i32) {
    %c0_i32 = arith.constant 0 : i32
    %c0_i32_0 = arith.constant 0 : i32
    return %c0_i32, %arg1 : i32, i32
  }
  func.func @transform_3(%arg0: i32, %arg1: i32, %arg2: i32) -> (i32, i32) {
    %c0_i32 = arith.constant 0 : i32
    %c0_i32_0 = arith.constant 0 : i32
    return %c0_i32, %arg1 : i32, i32
  }
  func.func @transform_4(%arg0: i32, %arg1: i32, %arg2: i32) -> (i32, i32) {
    %c0_i32 = arith.constant 0 : i32
    return %arg0, %arg1 : i32, i32
  }
  func.func @transform_5(%arg0: i32, %arg1: i32, %arg2: i32) -> (i32, i32) {
    %c0_i32 = arith.constant 0 : i32
    return %arg0, %arg1 : i32, i32
  }
}

module attributes {stable_mosaic.version = 11 : i64} {
  func.func @_matmul_bn_kernel(%arg0: i32, %arg1: i32, %arg2: i32, %arg3: memref<128x128xbf16, #tpu.memory_space<vmem>>, %arg4: memref<128x128xbf16, #tpu.memory_space<vmem>>, %arg5: memref<1x128xf32, #tpu.memory_space<vmem>>, %arg6: memref<1x128xf32, #tpu.memory_space<vmem>>, %arg7: memref<128x128xbf16, #tpu.memory_space<vmem>>, %arg8: memref<128x128xf32, #tpu.memory_space<vmem>>) attributes {dimension_semantics = [#tpu.dimension_semantics<parallel>, #tpu.dimension_semantics<parallel>, #tpu.dimension_semantics<arbitrary>], iteration_bounds = array<i64: 1, 1, 9>, scalar_prefetch = 0 : i64, scratch_operands = 1 : i64, tpu.core_type = #tpu.core_type<tc>, window_params = [{transform_indices = @transform_0, window_bounds = array<i64: 128, 128>}, {transform_indices = @transform_1, window_bounds = array<i64: 128, 128>}, {transform_indices = @transform_2, window_bounds = array<i64: 1, 128>}, {transform_indices = @transform_3, window_bounds = array<i64: 1, 128>}, {transform_indices = @transform_4, window_bounds = array<i64: 128, 128>}]} {
    %c0_i32 = arith.constant 0 : i32
    %0 = arith.cmpi eq, %arg2, %c0_i32 : i32
    %1 = arith.extui %0 : i1 to i32
    %c0_i32_0 = arith.constant 0 : i32
    %2 = arith.cmpi ne, %1, %c0_i32_0 : i32
    scf.if %2 {
      %cst_9 = arith.constant 0.000000e+00 : f32
      %12 = vector.broadcast %cst_9 : f32 to vector<128x128xf32>
      %c0_10 = arith.constant 0 : index
      %c0_11 = arith.constant 0 : index
      %13 = vector.load %arg8[%c0_10, %c0_11] : memref<128x128xf32, #tpu.memory_space<vmem>>, vector<128x128xf32>
      tpu.vector_store %arg8[%c0_10, %c0_11], %12 {strides = array<i32>} : memref<128x128xf32, #tpu.memory_space<vmem>>, vector<128x128xf32>,
    } else {
    }
    %c0 = arith.constant 0 : index
    %c0_1 = arith.constant 0 : index
    %3 = vector.load %arg8[%c0, %c0_1] : memref<128x128xf32, #tpu.memory_space<vmem>>, vector<128x128xf32>
    %c0_2 = arith.constant 0 : index
    %c0_3 = arith.constant 0 : index
    %4 = vector.load %arg3[%c0_2, %c0_3] : memref<128x128xbf16, #tpu.memory_space<vmem>>, vector<128x128xbf16>
    %c0_4 = arith.constant 0 : index
    %c0_5 = arith.constant 0 : index
    %5 = vector.load %arg4[%c0_4, %c0_5] : memref<128x128xbf16, #tpu.memory_space<vmem>>, vector<128x128xbf16>
    %cst = arith.constant dense<0.000000e+00> : vector<128x128xf32>
    %6 = tpu.matmul %4, %5, %cst {dimension_numbers = #tpu.dot_dimension_numbers<[1], [0], [0], [1], [0, 0, 1, 1], [], []>} : vector<128x128xbf16>, vector<128x128xbf16>, vector<128x128xf32> -> vector<128x128xf32>
    %7 = arith.addf %3, %6 : vector<128x128xf32>
    %c0_6 = arith.constant 0 : index
    %c0_7 = arith.constant 0 : index
    %8 = vector.load %arg8[%c0_6, %c0_7] : memref<128x128xf32, #tpu.memory_space<vmem>>, vector<128x128xf32>
    tpu.vector_store %arg8[%c0_6, %c0_7], %7 {strides = array<i32>} : memref<128x128xf32, #tpu.memory_space<vmem>>, vector<128x128xf32>,
    %c8_i32 = arith.constant 8 : i32
    %9 = arith.cmpi eq, %arg2, %c8_i32 : i32
    %10 = arith.extui %9 : i1 to i32
    %c0_i32_8 = arith.constant 0 : i32
    %11 = arith.cmpi ne, %10, %c0_i32_8 : i32
    scf.if %11 {
      %c0_9 = arith.constant 0 : index
      %c0_10 = arith.constant 0 : index
      %12 = vector.load %arg8[%c0_9, %c0_10] : memref<128x128xf32, #tpu.memory_space<vmem>>, vector<128x128xf32>
      %c0_11 = arith.constant 0 : index
      %c0_12 = arith.constant 0 : index
      %13 = vector.load %arg5[%c0_11, %c0_12] : memref<1x128xf32, #tpu.memory_space<vmem>>, vector<1x128xf32>
      %14 = vector.broadcast %13 : vector<1x128xf32> to vector<128x128xf32>
      %15 = arith.mulf %12, %14 : vector<128x128xf32>
      %c0_13 = arith.constant 0 : index
      %c0_14 = arith.constant 0 : index
      %16 = vector.load %arg6[%c0_13, %c0_14] : memref<1x128xf32, #tpu.memory_space<vmem>>, vector<1x128xf32>
      %17 = vector.broadcast %16 : vector<1x128xf32> to vector<128x128xf32>
      %18 = arith.addf %15, %17 : vector<128x128xf32>
      %cst_15 = arith.constant 0.000000e+00 : f32
      %19 = vector.broadcast %cst_15 : f32 to vector<128x128xf32>
      %20 = arith.maximumf %18, %19 : vector<128x128xf32>
      %21 = arith.truncf %20 : vector<128x128xf32> to vector<128x128xbf16>
      %c0_16 = arith.constant 0 : index
      %c0_17 = arith.constant 0 : index
      %22 = vector.load %arg7[%c0_16, %c0_17] : memref<128x128xbf16, #tpu.memory_space<vmem>>, vector<128x128xbf16>
      tpu.vector_store %arg7[%c0_16, %c0_17], %21 {strides = array<i32>} : memref<128x128xbf16, #tpu.memory_space<vmem>>, vector<128x128xbf16>,
    } else {
    }
    return
  }
  func.func @transform_0(%arg0: i32, %arg1: i32, %arg2: i32) -> (i32, i32) {
    %c0_i32 = arith.constant 0 : i32
    return %arg0, %arg2 : i32, i32
  }
  func.func @transform_1(%arg0: i32, %arg1: i32, %arg2: i32) -> (i32, i32) {
    %c0_i32 = arith.constant 0 : i32
    return %arg2, %arg1 : i32, i32
  }
  func.func @transform_2(%arg0: i32, %arg1: i32, %arg2: i32) -> (i32, i32) {
    %c0_i32 = arith.constant 0 : i32
    %c0_i32_0 = arith.constant 0 : i32
    return %c0_i32, %arg1 : i32, i32
  }
  func.func @transform_3(%arg0: i32, %arg1: i32, %arg2: i32) -> (i32, i32) {
    %c0_i32 = arith.constant 0 : i32
    %c0_i32_0 = arith.constant 0 : i32
    return %c0_i32, %arg1 : i32, i32
  }
  func.func @transform_4(%arg0: i32, %arg1: i32, %arg2: i32) -> (i32, i32) {
    %c0_i32 = arith.constant 0 : i32
    return %arg0, %arg1 : i32, i32
  }
}

module attributes {stable_mosaic.version = 11 : i64} {
  func.func @_matmul_bn_kernel(%arg0: i32, %arg1: i32, %arg2: i32, %arg3: memref<32x128xbf16, #tpu.memory_space<vmem>>, %arg4: memref<128x128xbf16, #tpu.memory_space<vmem>>, %arg5: memref<1x128xf32, #tpu.memory_space<vmem>>, %arg6: memref<1x128xf32, #tpu.memory_space<vmem>>, %arg7: memref<32x128xbf16, #tpu.memory_space<vmem>>, %arg8: memref<32x128xf32, #tpu.memory_space<vmem>>) attributes {dimension_semantics = [#tpu.dimension_semantics<parallel>, #tpu.dimension_semantics<parallel>, #tpu.dimension_semantics<arbitrary>], iteration_bounds = array<i64: 1, 1, 9>, scalar_prefetch = 0 : i64, scratch_operands = 1 : i64, tpu.core_type = #tpu.core_type<tc>, window_params = [{transform_indices = @transform_0, window_bounds = array<i64: 32, 128>}, {transform_indices = @transform_1, window_bounds = array<i64: 128, 128>}, {transform_indices = @transform_2, window_bounds = array<i64: 1, 128>}, {transform_indices = @transform_3, window_bounds = array<i64: 1, 128>}, {transform_indices = @transform_4, window_bounds = array<i64: 32, 128>}]} {
    %c0_i32 = arith.constant 0 : i32
    %0 = arith.cmpi eq, %arg2, %c0_i32 : i32
    %1 = arith.extui %0 : i1 to i32
    %c0_i32_0 = arith.constant 0 : i32
    %2 = arith.cmpi ne, %1, %c0_i32_0 : i32
    scf.if %2 {
      %cst_9 = arith.constant 0.000000e+00 : f32
      %12 = vector.broadcast %cst_9 : f32 to vector<32x128xf32>
      %c0_10 = arith.constant 0 : index
      %c0_11 = arith.constant 0 : index
      %13 = vector.load %arg8[%c0_10, %c0_11] : memref<32x128xf32, #tpu.memory_space<vmem>>, vector<32x128xf32>
      tpu.vector_store %arg8[%c0_10, %c0_11], %12 {strides = array<i32>} : memref<32x128xf32, #tpu.memory_space<vmem>>, vector<32x128xf32>,
    } else {
    }
    %c0 = arith.constant 0 : index
    %c0_1 = arith.constant 0 : index
    %3 = vector.load %arg8[%c0, %c0_1] : memref<32x128xf32, #tpu.memory_space<vmem>>, vector<32x128xf32>
    %c0_2 = arith.constant 0 : index
    %c0_3 = arith.constant 0 : index
    %4 = vector.load %arg3[%c0_2, %c0_3] : memref<32x128xbf16, #tpu.memory_space<vmem>>, vector<32x128xbf16>
    %c0_4 = arith.constant 0 : index
    %c0_5 = arith.constant 0 : index
    %5 = vector.load %arg4[%c0_4, %c0_5] : memref<128x128xbf16, #tpu.memory_space<vmem>>, vector<128x128xbf16>
    %cst = arith.constant dense<0.000000e+00> : vector<32x128xf32>
    %6 = tpu.matmul %4, %5, %cst {dimension_numbers = #tpu.dot_dimension_numbers<[1], [0], [0], [1], [0, 0, 1, 1], [], []>} : vector<32x128xbf16>, vector<128x128xbf16>, vector<32x128xf32> -> vector<32x128xf32>
    %7 = arith.addf %3, %6 : vector<32x128xf32>
    %c0_6 = arith.constant 0 : index
    %c0_7 = arith.constant 0 : index
    %8 = vector.load %arg8[%c0_6, %c0_7] : memref<32x128xf32, #tpu.memory_space<vmem>>, vector<32x128xf32>
    tpu.vector_store %arg8[%c0_6, %c0_7], %7 {strides = array<i32>} : memref<32x128xf32, #tpu.memory_space<vmem>>, vector<32x128xf32>,
    %c8_i32 = arith.constant 8 : i32
    %9 = arith.cmpi eq, %arg2, %c8_i32 : i32
    %10 = arith.extui %9 : i1 to i32
    %c0_i32_8 = arith.constant 0 : i32
    %11 = arith.cmpi ne, %10, %c0_i32_8 : i32
    scf.if %11 {
      %c0_9 = arith.constant 0 : index
      %c0_10 = arith.constant 0 : index
      %12 = vector.load %arg8[%c0_9, %c0_10] : memref<32x128xf32, #tpu.memory_space<vmem>>, vector<32x128xf32>
      %c0_11 = arith.constant 0 : index
      %c0_12 = arith.constant 0 : index
      %13 = vector.load %arg5[%c0_11, %c0_12] : memref<1x128xf32, #tpu.memory_space<vmem>>, vector<1x128xf32>
      %14 = vector.broadcast %13 : vector<1x128xf32> to vector<32x128xf32>
      %15 = arith.mulf %12, %14 : vector<32x128xf32>
      %c0_13 = arith.constant 0 : index
      %c0_14 = arith.constant 0 : index
      %16 = vector.load %arg6[%c0_13, %c0_14] : memref<1x128xf32, #tpu.memory_space<vmem>>, vector<1x128xf32>
      %17 = vector.broadcast %16 : vector<1x128xf32> to vector<32x128xf32>
      %18 = arith.addf %15, %17 : vector<32x128xf32>
      %cst_15 = arith.constant 0.000000e+00 : f32
      %19 = vector.broadcast %cst_15 : f32 to vector<32x128xf32>
      %20 = arith.maximumf %18, %19 : vector<32x128xf32>
      %21 = arith.truncf %20 : vector<32x128xf32> to vector<32x128xbf16>
      %c0_16 = arith.constant 0 : index
      %c0_17 = arith.constant 0 : index
      %22 = vector.load %arg7[%c0_16, %c0_17] : memref<32x128xbf16, #tpu.memory_space<vmem>>, vector<32x128xbf16>
      tpu.vector_store %arg7[%c0_16, %c0_17], %21 {strides = array<i32>} : memref<32x128xbf16, #tpu.memory_space<vmem>>, vector<32x128xbf16>,
    } else {
    }
    return
  }
  func.func @transform_0(%arg0: i32, %arg1: i32, %arg2: i32) -> (i32, i32) {
    %c0_i32 = arith.constant 0 : i32
    return %arg0, %arg2 : i32, i32
  }
  func.func @transform_1(%arg0: i32, %arg1: i32, %arg2: i32) -> (i32, i32) {
    %c0_i32 = arith.constant 0 : i32
    return %arg2, %arg1 : i32, i32
  }
  func.func @transform_2(%arg0: i32, %arg1: i32, %arg2: i32) -> (i32, i32) {
    %c0_i32 = arith.constant 0 : i32
    %c0_i32_0 = arith.constant 0 : i32
    return %c0_i32, %arg1 : i32, i32
  }
  func.func @transform_3(%arg0: i32, %arg1: i32, %arg2: i32) -> (i32, i32) {
    %c0_i32 = arith.constant 0 : i32
    %c0_i32_0 = arith.constant 0 : i32
    return %c0_i32, %arg1 : i32, i32
  }
  func.func @transform_4(%arg0: i32, %arg1: i32, %arg2: i32) -> (i32, i32) {
    %c0_i32 = arith.constant 0 : i32
    return %arg0, %arg1 : i32, i32
  }
}

module attributes {stable_mosaic.version = 11 : i64} {
  func.func @_matmul_bn_kernel(%arg0: i32, %arg1: i32, %arg2: i32, %arg3: memref<32x128xbf16, #tpu.memory_space<vmem>>, %arg4: memref<128x128xbf16, #tpu.memory_space<vmem>>, %arg5: memref<1x128xf32, #tpu.memory_space<vmem>>, %arg6: memref<1x128xf32, #tpu.memory_space<vmem>>, %arg7: memref<32x128xbf16, #tpu.memory_space<vmem>>, %arg8: memref<32x128xbf16, #tpu.memory_space<vmem>>, %arg9: memref<32x128xf32, #tpu.memory_space<vmem>>) attributes {dimension_semantics = [#tpu.dimension_semantics<parallel>, #tpu.dimension_semantics<parallel>, #tpu.dimension_semantics<arbitrary>], iteration_bounds = array<i64: 1, 1, 9>, scalar_prefetch = 0 : i64, scratch_operands = 1 : i64, tpu.core_type = #tpu.core_type<tc>, window_params = [{transform_indices = @transform_0, window_bounds = array<i64: 32, 128>}, {transform_indices = @transform_1, window_bounds = array<i64: 128, 128>}, {transform_indices = @transform_2, window_bounds = array<i64: 1, 128>}, {transform_indices = @transform_3, window_bounds = array<i64: 1, 128>}, {transform_indices = @transform_4, window_bounds = array<i64: 32, 128>}, {transform_indices = @transform_5, window_bounds = array<i64: 32, 128>}]} {
    %c0_i32 = arith.constant 0 : i32
    %0 = arith.cmpi eq, %arg2, %c0_i32 : i32
    %1 = arith.extui %0 : i1 to i32
    %c0_i32_0 = arith.constant 0 : i32
    %2 = arith.cmpi ne, %1, %c0_i32_0 : i32
    scf.if %2 {
      %cst_9 = arith.constant 0.000000e+00 : f32
      %12 = vector.broadcast %cst_9 : f32 to vector<32x128xf32>
      %c0_10 = arith.constant 0 : index
      %c0_11 = arith.constant 0 : index
      %13 = vector.load %arg9[%c0_10, %c0_11] : memref<32x128xf32, #tpu.memory_space<vmem>>, vector<32x128xf32>
      tpu.vector_store %arg9[%c0_10, %c0_11], %12 {strides = array<i32>} : memref<32x128xf32, #tpu.memory_space<vmem>>, vector<32x128xf32>,
    } else {
    }
    %c0 = arith.constant 0 : index
    %c0_1 = arith.constant 0 : index
    %3 = vector.load %arg9[%c0, %c0_1] : memref<32x128xf32, #tpu.memory_space<vmem>>, vector<32x128xf32>
    %c0_2 = arith.constant 0 : index
    %c0_3 = arith.constant 0 : index
    %4 = vector.load %arg3[%c0_2, %c0_3] : memref<32x128xbf16, #tpu.memory_space<vmem>>, vector<32x128xbf16>
    %c0_4 = arith.constant 0 : index
    %c0_5 = arith.constant 0 : index
    %5 = vector.load %arg4[%c0_4, %c0_5] : memref<128x128xbf16, #tpu.memory_space<vmem>>, vector<128x128xbf16>
    %cst = arith.constant dense<0.000000e+00> : vector<32x128xf32>
    %6 = tpu.matmul %4, %5, %cst {dimension_numbers = #tpu.dot_dimension_numbers<[1], [0], [0], [1], [0, 0, 1, 1], [], []>} : vector<32x128xbf16>, vector<128x128xbf16>, vector<32x128xf32> -> vector<32x128xf32>
    %7 = arith.addf %3, %6 : vector<32x128xf32>
    %c0_6 = arith.constant 0 : index
    %c0_7 = arith.constant 0 : index
    %8 = vector.load %arg9[%c0_6, %c0_7] : memref<32x128xf32, #tpu.memory_space<vmem>>, vector<32x128xf32>
    tpu.vector_store %arg9[%c0_6, %c0_7], %7 {strides = array<i32>} : memref<32x128xf32, #tpu.memory_space<vmem>>, vector<32x128xf32>,
    %c8_i32 = arith.constant 8 : i32
    %9 = arith.cmpi eq, %arg2, %c8_i32 : i32
    %10 = arith.extui %9 : i1 to i32
    %c0_i32_8 = arith.constant 0 : i32
    %11 = arith.cmpi ne, %10, %c0_i32_8 : i32
    scf.if %11 {
      %c0_9 = arith.constant 0 : index
      %c0_10 = arith.constant 0 : index
      %12 = vector.load %arg9[%c0_9, %c0_10] : memref<32x128xf32, #tpu.memory_space<vmem>>, vector<32x128xf32>
      %c0_11 = arith.constant 0 : index
      %c0_12 = arith.constant 0 : index
      %13 = vector.load %arg5[%c0_11, %c0_12] : memref<1x128xf32, #tpu.memory_space<vmem>>, vector<1x128xf32>
      %14 = vector.broadcast %13 : vector<1x128xf32> to vector<32x128xf32>
      %15 = arith.mulf %12, %14 : vector<32x128xf32>
      %c0_13 = arith.constant 0 : index
      %c0_14 = arith.constant 0 : index
      %16 = vector.load %arg6[%c0_13, %c0_14] : memref<1x128xf32, #tpu.memory_space<vmem>>, vector<1x128xf32>
      %17 = vector.broadcast %16 : vector<1x128xf32> to vector<32x128xf32>
      %18 = arith.addf %15, %17 : vector<32x128xf32>
      %c0_15 = arith.constant 0 : index
      %c0_16 = arith.constant 0 : index
      %19 = vector.load %arg7[%c0_15, %c0_16] : memref<32x128xbf16, #tpu.memory_space<vmem>>, vector<32x128xbf16>
      %20 = arith.extf %19 : vector<32x128xbf16> to vector<32x128xf32>
      %21 = arith.addf %18, %20 : vector<32x128xf32>
      %cst_17 = arith.constant 0.000000e+00 : f32
      %22 = vector.broadcast %cst_17 : f32 to vector<32x128xf32>
      %23 = arith.maximumf %21, %22 : vector<32x128xf32>
      %24 = arith.truncf %23 : vector<32x128xf32> to vector<32x128xbf16>
      %c0_18 = arith.constant 0 : index
      %c0_19 = arith.constant 0 : index
      %25 = vector.load %arg8[%c0_18, %c0_19] : memref<32x128xbf16, #tpu.memory_space<vmem>>, vector<32x128xbf16>
      tpu.vector_store %arg8[%c0_18, %c0_19], %24 {strides = array<i32>} : memref<32x128xbf16, #tpu.memory_space<vmem>>, vector<32x128xbf16>,
    } else {
    }
    return
  }
  func.func @transform_0(%arg0: i32, %arg1: i32, %arg2: i32) -> (i32, i32) {
    %c0_i32 = arith.constant 0 : i32
    return %arg0, %arg2 : i32, i32
  }
  func.func @transform_1(%arg0: i32, %arg1: i32, %arg2: i32) -> (i32, i32) {
    %c0_i32 = arith.constant 0 : i32
    return %arg2, %arg1 : i32, i32
  }
  func.func @transform_2(%arg0: i32, %arg1: i32, %arg2: i32) -> (i32, i32) {
    %c0_i32 = arith.constant 0 : i32
    %c0_i32_0 = arith.constant 0 : i32
    return %c0_i32, %arg1 : i32, i32
  }
  func.func @transform_3(%arg0: i32, %arg1: i32, %arg2: i32) -> (i32, i32) {
    %c0_i32 = arith.constant 0 : i32
    %c0_i32_0 = arith.constant 0 : i32
    return %c0_i32, %arg1 : i32, i32
  }
  func.func @transform_4(%arg0: i32, %arg1: i32, %arg2: i32) -> (i32, i32) {
    %c0_i32 = arith.constant 0 : i32
    return %arg0, %arg1 : i32, i32
  }
  func.func @transform_5(%arg0: i32, %arg1: i32, %arg2: i32) -> (i32, i32) {
    %c0_i32 = arith.constant 0 : i32
    return %arg0, %arg1 : i32, i32
  }
}

module attributes {stable_mosaic.version = 11 : i64} {
  func.func @_matmul_bn_kernel(%arg0: i32, %arg1: i32, %arg2: i32, %arg3: memref<32x128xbf16, #tpu.memory_space<vmem>>, %arg4: memref<128x128xbf16, #tpu.memory_space<vmem>>, %arg5: memref<1x128xf32, #tpu.memory_space<vmem>>, %arg6: memref<1x128xf32, #tpu.memory_space<vmem>>, %arg7: memref<32x128xbf16, #tpu.memory_space<vmem>>, %arg8: memref<32x128xf32, #tpu.memory_space<vmem>>) attributes {dimension_semantics = [#tpu.dimension_semantics<parallel>, #tpu.dimension_semantics<parallel>, #tpu.dimension_semantics<arbitrary>], iteration_bounds = array<i64: 1, 1, 1>, scalar_prefetch = 0 : i64, scratch_operands = 1 : i64, tpu.core_type = #tpu.core_type<tc>, window_params = [{transform_indices = @transform_0, window_bounds = array<i64: 32, 128>}, {transform_indices = @transform_1, window_bounds = array<i64: 128, 128>}, {transform_indices = @transform_2, window_bounds = array<i64: 1, 128>}, {transform_indices = @transform_3, window_bounds = array<i64: 1, 128>}, {transform_indices = @transform_4, window_bounds = array<i64: 32, 128>}]} {
    %c0_i32 = arith.constant 0 : i32
    %0 = arith.cmpi eq, %arg2, %c0_i32 : i32
    %1 = arith.extui %0 : i1 to i32
    %c0_i32_0 = arith.constant 0 : i32
    %2 = arith.cmpi ne, %1, %c0_i32_0 : i32
    scf.if %2 {
      %cst_10 = arith.constant 0.000000e+00 : f32
      %12 = vector.broadcast %cst_10 : f32 to vector<32x128xf32>
      %c0_11 = arith.constant 0 : index
      %c0_12 = arith.constant 0 : index
      %13 = vector.load %arg8[%c0_11, %c0_12] : memref<32x128xf32, #tpu.memory_space<vmem>>, vector<32x128xf32>
      tpu.vector_store %arg8[%c0_11, %c0_12], %12 {strides = array<i32>} : memref<32x128xf32, #tpu.memory_space<vmem>>, vector<32x128xf32>,
    } else {
    }
    %c0 = arith.constant 0 : index
    %c0_1 = arith.constant 0 : index
    %3 = vector.load %arg8[%c0, %c0_1] : memref<32x128xf32, #tpu.memory_space<vmem>>, vector<32x128xf32>
    %c0_2 = arith.constant 0 : index
    %c0_3 = arith.constant 0 : index
    %4 = vector.load %arg3[%c0_2, %c0_3] : memref<32x128xbf16, #tpu.memory_space<vmem>>, vector<32x128xbf16>
    %c0_4 = arith.constant 0 : index
    %c0_5 = arith.constant 0 : index
    %5 = vector.load %arg4[%c0_4, %c0_5] : memref<128x128xbf16, #tpu.memory_space<vmem>>, vector<128x128xbf16>
    %cst = arith.constant dense<0.000000e+00> : vector<32x128xf32>
    %6 = tpu.matmul %4, %5, %cst {dimension_numbers = #tpu.dot_dimension_numbers<[1], [0], [0], [1], [0, 0, 1, 1], [], []>} : vector<32x128xbf16>, vector<128x128xbf16>, vector<32x128xf32> -> vector<32x128xf32>
    %7 = arith.addf %3, %6 : vector<32x128xf32>
    %c0_6 = arith.constant 0 : index
    %c0_7 = arith.constant 0 : index
    %8 = vector.load %arg8[%c0_6, %c0_7] : memref<32x128xf32, #tpu.memory_space<vmem>>, vector<32x128xf32>
    tpu.vector_store %arg8[%c0_6, %c0_7], %7 {strides = array<i32>} : memref<32x128xf32, #tpu.memory_space<vmem>>, vector<32x128xf32>,
    %c0_i32_8 = arith.constant 0 : i32
    %9 = arith.cmpi eq, %arg2, %c0_i32_8 : i32
    %10 = arith.extui %9 : i1 to i32
    %c0_i32_9 = arith.constant 0 : i32
    %11 = arith.cmpi ne, %10, %c0_i32_9 : i32
    scf.if %11 {
      %c0_10 = arith.constant 0 : index
      %c0_11 = arith.constant 0 : index
      %12 = vector.load %arg8[%c0_10, %c0_11] : memref<32x128xf32, #tpu.memory_space<vmem>>, vector<32x128xf32>
      %c0_12 = arith.constant 0 : index
      %c0_13 = arith.constant 0 : index
      %13 = vector.load %arg5[%c0_12, %c0_13] : memref<1x128xf32, #tpu.memory_space<vmem>>, vector<1x128xf32>
      %14 = vector.broadcast %13 : vector<1x128xf32> to vector<32x128xf32>
      %15 = arith.mulf %12, %14 : vector<32x128xf32>
      %c0_14 = arith.constant 0 : index
      %c0_15 = arith.constant 0 : index
      %16 = vector.load %arg6[%c0_14, %c0_15] : memref<1x128xf32, #tpu.memory_space<vmem>>, vector<1x128xf32>
      %17 = vector.broadcast %16 : vector<1x128xf32> to vector<32x128xf32>
      %18 = arith.addf %15, %17 : vector<32x128xf32>
      %19 = arith.truncf %18 : vector<32x128xf32> to vector<32x128xbf16>
      %c0_16 = arith.constant 0 : index
      %c0_17 = arith.constant 0 : index
      %20 = vector.load %arg7[%c0_16, %c0_17] : memref<32x128xbf16, #tpu.memory_space<vmem>>, vector<32x128xbf16>
      tpu.vector_store %arg7[%c0_16, %c0_17], %19 {strides = array<i32>} : memref<32x128xbf16, #tpu.memory_space<vmem>>, vector<32x128xbf16>,
    } else {
    }
    return
  }
  func.func @transform_0(%arg0: i32, %arg1: i32, %arg2: i32) -> (i32, i32) {
    %c0_i32 = arith.constant 0 : i32
    return %arg0, %arg2 : i32, i32
  }
  func.func @transform_1(%arg0: i32, %arg1: i32, %arg2: i32) -> (i32, i32) {
    %c0_i32 = arith.constant 0 : i32
    return %arg2, %arg1 : i32, i32
  }
  func.func @transform_2(%arg0: i32, %arg1: i32, %arg2: i32) -> (i32, i32) {
    %c0_i32 = arith.constant 0 : i32
    %c0_i32_0 = arith.constant 0 : i32
    return %c0_i32, %arg1 : i32, i32
  }
  func.func @transform_3(%arg0: i32, %arg1: i32, %arg2: i32) -> (i32, i32) {
    %c0_i32 = arith.constant 0 : i32
    %c0_i32_0 = arith.constant 0 : i32
    return %c0_i32, %arg1 : i32, i32
  }
  func.func @transform_4(%arg0: i32, %arg1: i32, %arg2: i32) -> (i32, i32) {
    %c0_i32 = arith.constant 0 : i32
    return %arg0, %arg1 : i32, i32
  }
}

module attributes {stable_mosaic.version = 11 : i64} {
  func.func @_matmul_bn_kernel(%arg0: i32, %arg1: i32, %arg2: i32, %arg3: memref<32x128xbf16, #tpu.memory_space<vmem>>, %arg4: memref<128x128xbf16, #tpu.memory_space<vmem>>, %arg5: memref<1x128xf32, #tpu.memory_space<vmem>>, %arg6: memref<1x128xf32, #tpu.memory_space<vmem>>, %arg7: memref<32x128xbf16, #tpu.memory_space<vmem>>, %arg8: memref<32x128xbf16, #tpu.memory_space<vmem>>, %arg9: memref<32x128xf32, #tpu.memory_space<vmem>>) attributes {dimension_semantics = [#tpu.dimension_semantics<parallel>, #tpu.dimension_semantics<parallel>, #tpu.dimension_semantics<arbitrary>], iteration_bounds = array<i64: 1, 1, 9>, scalar_prefetch = 0 : i64, scratch_operands = 1 : i64, tpu.core_type = #tpu.core_type<tc>, window_params = [{transform_indices = @transform_0, window_bounds = array<i64: 32, 128>}, {transform_indices = @transform_1, window_bounds = array<i64: 128, 128>}, {transform_indices = @transform_2, window_bounds = array<i64: 1, 128>}, {transform_indices = @transform_3, window_bounds = array<i64: 1, 128>}, {transform_indices = @transform_4, window_bounds = array<i64: 32, 128>}, {transform_indices = @transform_5, window_bounds = array<i64: 32, 128>}]} {
    %c0_i32 = arith.constant 0 : i32
    %0 = arith.cmpi eq, %arg2, %c0_i32 : i32
    %1 = arith.extui %0 : i1 to i32
    %c0_i32_0 = arith.constant 0 : i32
    %2 = arith.cmpi ne, %1, %c0_i32_0 : i32
    scf.if %2 {
      %cst_9 = arith.constant 0.000000e+00 : f32
      %12 = vector.broadcast %cst_9 : f32 to vector<32x128xf32>
      %c0_10 = arith.constant 0 : index
      %c0_11 = arith.constant 0 : index
      %13 = vector.load %arg9[%c0_10, %c0_11] : memref<32x128xf32, #tpu.memory_space<vmem>>, vector<32x128xf32>
      tpu.vector_store %arg9[%c0_10, %c0_11], %12 {strides = array<i32>} : memref<32x128xf32, #tpu.memory_space<vmem>>, vector<32x128xf32>,
    } else {
    }
    %c0 = arith.constant 0 : index
    %c0_1 = arith.constant 0 : index
    %3 = vector.load %arg9[%c0, %c0_1] : memref<32x128xf32, #tpu.memory_space<vmem>>, vector<32x128xf32>
    %c0_2 = arith.constant 0 : index
    %c0_3 = arith.constant 0 : index
    %4 = vector.load %arg3[%c0_2, %c0_3] : memref<32x128xbf16, #tpu.memory_space<vmem>>, vector<32x128xbf16>
    %c0_4 = arith.constant 0 : index
    %c0_5 = arith.constant 0 : index
    %5 = vector.load %arg4[%c0_4, %c0_5] : memref<128x128xbf16, #tpu.memory_space<vmem>>, vector<128x128xbf16>
    %cst = arith.constant dense<0.000000e+00> : vector<32x128xf32>
    %6 = tpu.matmul %4, %5, %cst {dimension_numbers = #tpu.dot_dimension_numbers<[1], [0], [0], [1], [0, 0, 1, 1], [], []>} : vector<32x128xbf16>, vector<128x128xbf16>, vector<32x128xf32> -> vector<32x128xf32>
    %7 = arith.addf %3, %6 : vector<32x128xf32>
    %c0_6 = arith.constant 0 : index
    %c0_7 = arith.constant 0 : index
    %8 = vector.load %arg9[%c0_6, %c0_7] : memref<32x128xf32, #tpu.memory_space<vmem>>, vector<32x128xf32>
    tpu.vector_store %arg9[%c0_6, %c0_7], %7 {strides = array<i32>} : memref<32x128xf32, #tpu.memory_space<vmem>>, vector<32x128xf32>,
    %c8_i32 = arith.constant 8 : i32
    %9 = arith.cmpi eq, %arg2, %c8_i32 : i32
    %10 = arith.extui %9 : i1 to i32
    %c0_i32_8 = arith.constant 0 : i32
    %11 = arith.cmpi ne, %10, %c0_i32_8 : i32
    scf.if %11 {
      %c0_9 = arith.constant 0 : index
      %c0_10 = arith.constant 0 : index
      %12 = vector.load %arg9[%c0_9, %c0_10] : memref<32x128xf32, #tpu.memory_space<vmem>>, vector<32x128xf32>
      %c0_11 = arith.constant 0 : index
      %c0_12 = arith.constant 0 : index
      %13 = vector.load %arg5[%c0_11, %c0_12] : memref<1x128xf32, #tpu.memory_space<vmem>>, vector<1x128xf32>
      %14 = vector.broadcast %13 : vector<1x128xf32> to vector<32x128xf32>
      %15 = arith.mulf %12, %14 : vector<32x128xf32>
      %c0_13 = arith.constant 0 : index
      %c0_14 = arith.constant 0 : index
      %16 = vector.load %arg6[%c0_13, %c0_14] : memref<1x128xf32, #tpu.memory_space<vmem>>, vector<1x128xf32>
      %17 = vector.broadcast %16 : vector<1x128xf32> to vector<32x128xf32>
      %18 = arith.addf %15, %17 : vector<32x128xf32>
      %c0_15 = arith.constant 0 : index
      %c0_16 = arith.constant 0 : index
      %19 = vector.load %arg7[%c0_15, %c0_16] : memref<32x128xbf16, #tpu.memory_space<vmem>>, vector<32x128xbf16>
      %20 = arith.extf %19 : vector<32x128xbf16> to vector<32x128xf32>
      %21 = arith.addf %18, %20 : vector<32x128xf32>
      %cst_17 = arith.constant 0.000000e+00 : f32
      %22 = vector.broadcast %cst_17 : f32 to vector<32x128xf32>
      %23 = arith.maximumf %21, %22 : vector<32x128xf32>
      %24 = arith.truncf %23 : vector<32x128xf32> to vector<32x128xbf16>
      %c0_18 = arith.constant 0 : index
      %c0_19 = arith.constant 0 : index
      %25 = vector.load %arg8[%c0_18, %c0_19] : memref<32x128xbf16, #tpu.memory_space<vmem>>, vector<32x128xbf16>
      tpu.vector_store %arg8[%c0_18, %c0_19], %24 {strides = array<i32>} : memref<32x128xbf16, #tpu.memory_space<vmem>>, vector<32x128xbf16>,
    } else {
    }
    return
  }
  func.func @transform_0(%arg0: i32, %arg1: i32, %arg2: i32) -> (i32, i32) {
    %c0_i32 = arith.constant 0 : i32
    return %arg0, %arg2 : i32, i32
  }
  func.func @transform_1(%arg0: i32, %arg1: i32, %arg2: i32) -> (i32, i32) {
    %c0_i32 = arith.constant 0 : i32
    return %arg2, %arg1 : i32, i32
  }
  func.func @transform_2(%arg0: i32, %arg1: i32, %arg2: i32) -> (i32, i32) {
    %c0_i32 = arith.constant 0 : i32
    %c0_i32_0 = arith.constant 0 : i32
    return %c0_i32, %arg1 : i32, i32
  }
  func.func @transform_3(%arg0: i32, %arg1: i32, %arg2: i32) -> (i32, i32) {
    %c0_i32 = arith.constant 0 : i32
    %c0_i32_0 = arith.constant 0 : i32
    return %c0_i32, %arg1 : i32, i32
  }
  func.func @transform_4(%arg0: i32, %arg1: i32, %arg2: i32) -> (i32, i32) {
    %c0_i32 = arith.constant 0 : i32
    return %arg0, %arg1 : i32, i32
  }
  func.func @transform_5(%arg0: i32, %arg1: i32, %arg2: i32) -> (i32, i32) {
    %c0_i32 = arith.constant 0 : i32
    return %arg0, %arg1 : i32, i32
  }
}

module attributes {stable_mosaic.version = 11 : i64} {
  func.func @_matmul_bn_kernel(%arg0: i32, %arg1: i32, %arg2: i32, %arg3: memref<8x128xbf16, #tpu.memory_space<vmem>>, %arg4: memref<128x128xbf16, #tpu.memory_space<vmem>>, %arg5: memref<1x128xf32, #tpu.memory_space<vmem>>, %arg6: memref<1x128xf32, #tpu.memory_space<vmem>>, %arg7: memref<8x128xbf16, #tpu.memory_space<vmem>>, %arg8: memref<8x128xf32, #tpu.memory_space<vmem>>) attributes {dimension_semantics = [#tpu.dimension_semantics<parallel>, #tpu.dimension_semantics<parallel>, #tpu.dimension_semantics<arbitrary>], iteration_bounds = array<i64: 1, 2, 9>, scalar_prefetch = 0 : i64, scratch_operands = 1 : i64, tpu.core_type = #tpu.core_type<tc>, window_params = [{transform_indices = @transform_0, window_bounds = array<i64: 8, 128>}, {transform_indices = @transform_1, window_bounds = array<i64: 128, 128>}, {transform_indices = @transform_2, window_bounds = array<i64: 1, 128>}, {transform_indices = @transform_3, window_bounds = array<i64: 1, 128>}, {transform_indices = @transform_4, window_bounds = array<i64: 8, 128>}]} {
    %c0_i32 = arith.constant 0 : i32
    %0 = arith.cmpi eq, %arg2, %c0_i32 : i32
    %1 = arith.extui %0 : i1 to i32
    %c0_i32_0 = arith.constant 0 : i32
    %2 = arith.cmpi ne, %1, %c0_i32_0 : i32
    scf.if %2 {
      %cst_9 = arith.constant 0.000000e+00 : f32
      %12 = vector.broadcast %cst_9 : f32 to vector<8x128xf32>
      %c0_10 = arith.constant 0 : index
      %c0_11 = arith.constant 0 : index
      %13 = vector.load %arg8[%c0_10, %c0_11] : memref<8x128xf32, #tpu.memory_space<vmem>>, vector<8x128xf32>
      tpu.vector_store %arg8[%c0_10, %c0_11], %12 {strides = array<i32>} : memref<8x128xf32, #tpu.memory_space<vmem>>, vector<8x128xf32>,
    } else {
    }
    %c0 = arith.constant 0 : index
    %c0_1 = arith.constant 0 : index
    %3 = vector.load %arg8[%c0, %c0_1] : memref<8x128xf32, #tpu.memory_space<vmem>>, vector<8x128xf32>
    %c0_2 = arith.constant 0 : index
    %c0_3 = arith.constant 0 : index
    %4 = vector.load %arg3[%c0_2, %c0_3] : memref<8x128xbf16, #tpu.memory_space<vmem>>, vector<8x128xbf16>
    %c0_4 = arith.constant 0 : index
    %c0_5 = arith.constant 0 : index
    %5 = vector.load %arg4[%c0_4, %c0_5] : memref<128x128xbf16, #tpu.memory_space<vmem>>, vector<128x128xbf16>
    %cst = arith.constant dense<0.000000e+00> : vector<8x128xf32>
    %6 = tpu.matmul %4, %5, %cst {dimension_numbers = #tpu.dot_dimension_numbers<[1], [0], [0], [1], [0, 0, 1, 1], [], []>} : vector<8x128xbf16>, vector<128x128xbf16>, vector<8x128xf32> -> vector<8x128xf32>
    %7 = arith.addf %3, %6 : vector<8x128xf32>
    %c0_6 = arith.constant 0 : index
    %c0_7 = arith.constant 0 : index
    %8 = vector.load %arg8[%c0_6, %c0_7] : memref<8x128xf32, #tpu.memory_space<vmem>>, vector<8x128xf32>
    tpu.vector_store %arg8[%c0_6, %c0_7], %7 {strides = array<i32>} : memref<8x128xf32, #tpu.memory_space<vmem>>, vector<8x128xf32>,
    %c8_i32 = arith.constant 8 : i32
    %9 = arith.cmpi eq, %arg2, %c8_i32 : i32
    %10 = arith.extui %9 : i1 to i32
    %c0_i32_8 = arith.constant 0 : i32
    %11 = arith.cmpi ne, %10, %c0_i32_8 : i32
    scf.if %11 {
      %c0_9 = arith.constant 0 : index
      %c0_10 = arith.constant 0 : index
      %12 = vector.load %arg8[%c0_9, %c0_10] : memref<8x128xf32, #tpu.memory_space<vmem>>, vector<8x128xf32>
      %c0_11 = arith.constant 0 : index
      %c0_12 = arith.constant 0 : index
      %13 = vector.load %arg5[%c0_11, %c0_12] : memref<1x128xf32, #tpu.memory_space<vmem>>, vector<1x128xf32>
      %14 = vector.broadcast %13 : vector<1x128xf32> to vector<8x128xf32>
      %15 = arith.mulf %12, %14 : vector<8x128xf32>
      %c0_13 = arith.constant 0 : index
      %c0_14 = arith.constant 0 : index
      %16 = vector.load %arg6[%c0_13, %c0_14] : memref<1x128xf32, #tpu.memory_space<vmem>>, vector<1x128xf32>
      %17 = vector.broadcast %16 : vector<1x128xf32> to vector<8x128xf32>
      %18 = arith.addf %15, %17 : vector<8x128xf32>
      %cst_15 = arith.constant 0.000000e+00 : f32
      %19 = vector.broadcast %cst_15 : f32 to vector<8x128xf32>
      %20 = arith.maximumf %18, %19 : vector<8x128xf32>
      %21 = arith.truncf %20 : vector<8x128xf32> to vector<8x128xbf16>
      %c0_16 = arith.constant 0 : index
      %c0_17 = arith.constant 0 : index
      %22 = vector.load %arg7[%c0_16, %c0_17] : memref<8x128xbf16, #tpu.memory_space<vmem>>, vector<8x128xbf16>
      tpu.vector_store %arg7[%c0_16, %c0_17], %21 {strides = array<i32>} : memref<8x128xbf16, #tpu.memory_space<vmem>>, vector<8x128xbf16>,
    } else {
    }
    return
  }
  func.func @transform_0(%arg0: i32, %arg1: i32, %arg2: i32) -> (i32, i32) {
    %c0_i32 = arith.constant 0 : i32
    return %arg0, %arg2 : i32, i32
  }
  func.func @transform_1(%arg0: i32, %arg1: i32, %arg2: i32) -> (i32, i32) {
    %c0_i32 = arith.constant 0 : i32
    return %arg2, %arg1 : i32, i32
  }
  func.func @transform_2(%arg0: i32, %arg1: i32, %arg2: i32) -> (i32, i32) {
    %c0_i32 = arith.constant 0 : i32
    %c0_i32_0 = arith.constant 0 : i32
    return %c0_i32, %arg1 : i32, i32
  }
  func.func @transform_3(%arg0: i32, %arg1: i32, %arg2: i32) -> (i32, i32) {
    %c0_i32 = arith.constant 0 : i32
    %c0_i32_0 = arith.constant 0 : i32
    return %c0_i32, %arg1 : i32, i32
  }
  func.func @transform_4(%arg0: i32, %arg1: i32, %arg2: i32) -> (i32, i32) {
    %c0_i32 = arith.constant 0 : i32
    return %arg0, %arg1 : i32, i32
  }
}

module attributes {stable_mosaic.version = 11 : i64} {
  func.func @_matmul_bn_kernel(%arg0: i32, %arg1: i32, %arg2: i32, %arg3: memref<8x128xbf16, #tpu.memory_space<vmem>>, %arg4: memref<128x128xbf16, #tpu.memory_space<vmem>>, %arg5: memref<1x128xf32, #tpu.memory_space<vmem>>, %arg6: memref<1x128xf32, #tpu.memory_space<vmem>>, %arg7: memref<8x128xbf16, #tpu.memory_space<vmem>>, %arg8: memref<8x128xf32, #tpu.memory_space<vmem>>) attributes {dimension_semantics = [#tpu.dimension_semantics<parallel>, #tpu.dimension_semantics<parallel>, #tpu.dimension_semantics<arbitrary>], iteration_bounds = array<i64: 1, 2, 1>, scalar_prefetch = 0 : i64, scratch_operands = 1 : i64, tpu.core_type = #tpu.core_type<tc>, window_params = [{transform_indices = @transform_0, window_bounds = array<i64: 8, 128>}, {transform_indices = @transform_1, window_bounds = array<i64: 128, 128>}, {transform_indices = @transform_2, window_bounds = array<i64: 1, 128>}, {transform_indices = @transform_3, window_bounds = array<i64: 1, 128>}, {transform_indices = @transform_4, window_bounds = array<i64: 8, 128>}]} {
    %c0_i32 = arith.constant 0 : i32
    %0 = arith.cmpi eq, %arg2, %c0_i32 : i32
    %1 = arith.extui %0 : i1 to i32
    %c0_i32_0 = arith.constant 0 : i32
    %2 = arith.cmpi ne, %1, %c0_i32_0 : i32
    scf.if %2 {
      %cst_10 = arith.constant 0.000000e+00 : f32
      %12 = vector.broadcast %cst_10 : f32 to vector<8x128xf32>
      %c0_11 = arith.constant 0 : index
      %c0_12 = arith.constant 0 : index
      %13 = vector.load %arg8[%c0_11, %c0_12] : memref<8x128xf32, #tpu.memory_space<vmem>>, vector<8x128xf32>
      tpu.vector_store %arg8[%c0_11, %c0_12], %12 {strides = array<i32>} : memref<8x128xf32, #tpu.memory_space<vmem>>, vector<8x128xf32>,
    } else {
    }
    %c0 = arith.constant 0 : index
    %c0_1 = arith.constant 0 : index
    %3 = vector.load %arg8[%c0, %c0_1] : memref<8x128xf32, #tpu.memory_space<vmem>>, vector<8x128xf32>
    %c0_2 = arith.constant 0 : index
    %c0_3 = arith.constant 0 : index
    %4 = vector.load %arg3[%c0_2, %c0_3] : memref<8x128xbf16, #tpu.memory_space<vmem>>, vector<8x128xbf16>
    %c0_4 = arith.constant 0 : index
    %c0_5 = arith.constant 0 : index
    %5 = vector.load %arg4[%c0_4, %c0_5] : memref<128x128xbf16, #tpu.memory_space<vmem>>, vector<128x128xbf16>
    %cst = arith.constant dense<0.000000e+00> : vector<8x128xf32>
    %6 = tpu.matmul %4, %5, %cst {dimension_numbers = #tpu.dot_dimension_numbers<[1], [0], [0], [1], [0, 0, 1, 1], [], []>} : vector<8x128xbf16>, vector<128x128xbf16>, vector<8x128xf32> -> vector<8x128xf32>
    %7 = arith.addf %3, %6 : vector<8x128xf32>
    %c0_6 = arith.constant 0 : index
    %c0_7 = arith.constant 0 : index
    %8 = vector.load %arg8[%c0_6, %c0_7] : memref<8x128xf32, #tpu.memory_space<vmem>>, vector<8x128xf32>
    tpu.vector_store %arg8[%c0_6, %c0_7], %7 {strides = array<i32>} : memref<8x128xf32, #tpu.memory_space<vmem>>, vector<8x128xf32>,
    %c0_i32_8 = arith.constant 0 : i32
    %9 = arith.cmpi eq, %arg2, %c0_i32_8 : i32
    %10 = arith.extui %9 : i1 to i32
    %c0_i32_9 = arith.constant 0 : i32
    %11 = arith.cmpi ne, %10, %c0_i32_9 : i32
    scf.if %11 {
      %c0_10 = arith.constant 0 : index
      %c0_11 = arith.constant 0 : index
      %12 = vector.load %arg8[%c0_10, %c0_11] : memref<8x128xf32, #tpu.memory_space<vmem>>, vector<8x128xf32>
      %c0_12 = arith.constant 0 : index
      %c0_13 = arith.constant 0 : index
      %13 = vector.load %arg5[%c0_12, %c0_13] : memref<1x128xf32, #tpu.memory_space<vmem>>, vector<1x128xf32>
      %14 = vector.broadcast %13 : vector<1x128xf32> to vector<8x128xf32>
      %15 = arith.mulf %12, %14 : vector<8x128xf32>
      %c0_14 = arith.constant 0 : index
      %c0_15 = arith.constant 0 : index
      %16 = vector.load %arg6[%c0_14, %c0_15] : memref<1x128xf32, #tpu.memory_space<vmem>>, vector<1x128xf32>
      %17 = vector.broadcast %16 : vector<1x128xf32> to vector<8x128xf32>
      %18 = arith.addf %15, %17 : vector<8x128xf32>
      %19 = arith.truncf %18 : vector<8x128xf32> to vector<8x128xbf16>
      %c0_16 = arith.constant 0 : index
      %c0_17 = arith.constant 0 : index
      %20 = vector.load %arg7[%c0_16, %c0_17] : memref<8x128xbf16, #tpu.memory_space<vmem>>, vector<8x128xbf16>
      tpu.vector_store %arg7[%c0_16, %c0_17], %19 {strides = array<i32>} : memref<8x128xbf16, #tpu.memory_space<vmem>>, vector<8x128xbf16>,
    } else {
    }
    return
  }
  func.func @transform_0(%arg0: i32, %arg1: i32, %arg2: i32) -> (i32, i32) {
    %c0_i32 = arith.constant 0 : i32
    return %arg0, %arg2 : i32, i32
  }
  func.func @transform_1(%arg0: i32, %arg1: i32, %arg2: i32) -> (i32, i32) {
    %c0_i32 = arith.constant 0 : i32
    return %arg2, %arg1 : i32, i32
  }
  func.func @transform_2(%arg0: i32, %arg1: i32, %arg2: i32) -> (i32, i32) {
    %c0_i32 = arith.constant 0 : i32
    %c0_i32_0 = arith.constant 0 : i32
    return %c0_i32, %arg1 : i32, i32
  }
  func.func @transform_3(%arg0: i32, %arg1: i32, %arg2: i32) -> (i32, i32) {
    %c0_i32 = arith.constant 0 : i32
    %c0_i32_0 = arith.constant 0 : i32
    return %c0_i32, %arg1 : i32, i32
  }
  func.func @transform_4(%arg0: i32, %arg1: i32, %arg2: i32) -> (i32, i32) {
    %c0_i32 = arith.constant 0 : i32
    return %arg0, %arg1 : i32, i32
  }
}

module attributes {stable_mosaic.version = 11 : i64} {
  func.func @_matmul_bn_kernel(%arg0: i32, %arg1: i32, %arg2: i32, %arg3: memref<8x256xbf16, #tpu.memory_space<vmem>>, %arg4: memref<256x128xbf16, #tpu.memory_space<vmem>>, %arg5: memref<1x128xf32, #tpu.memory_space<vmem>>, %arg6: memref<1x128xf32, #tpu.memory_space<vmem>>, %arg7: memref<8x128xbf16, #tpu.memory_space<vmem>>, %arg8: memref<8x128xbf16, #tpu.memory_space<vmem>>, %arg9: memref<8x128xf32, #tpu.memory_space<vmem>>) attributes {dimension_semantics = [#tpu.dimension_semantics<parallel>, #tpu.dimension_semantics<parallel>, #tpu.dimension_semantics<arbitrary>], iteration_bounds = array<i64: 1, 2, 9>, scalar_prefetch = 0 : i64, scratch_operands = 1 : i64, tpu.core_type = #tpu.core_type<tc>, window_params = [{transform_indices = @transform_0, window_bounds = array<i64: 8, 256>}, {transform_indices = @transform_1, window_bounds = array<i64: 256, 128>}, {transform_indices = @transform_2, window_bounds = array<i64: 1, 128>}, {transform_indices = @transform_3, window_bounds = array<i64: 1, 128>}, {transform_indices = @transform_4, window_bounds = array<i64: 8, 128>}, {transform_indices = @transform_5, window_bounds = array<i64: 8, 128>}]} {
    %c0_i32 = arith.constant 0 : i32
    %0 = arith.cmpi eq, %arg2, %c0_i32 : i32
    %1 = arith.extui %0 : i1 to i32
    %c0_i32_0 = arith.constant 0 : i32
    %2 = arith.cmpi ne, %1, %c0_i32_0 : i32
    scf.if %2 {
      %cst_9 = arith.constant 0.000000e+00 : f32
      %12 = vector.broadcast %cst_9 : f32 to vector<8x128xf32>
      %c0_10 = arith.constant 0 : index
      %c0_11 = arith.constant 0 : index
      %13 = vector.load %arg9[%c0_10, %c0_11] : memref<8x128xf32, #tpu.memory_space<vmem>>, vector<8x128xf32>
      tpu.vector_store %arg9[%c0_10, %c0_11], %12 {strides = array<i32>} : memref<8x128xf32, #tpu.memory_space<vmem>>, vector<8x128xf32>,
    } else {
    }
    %c0 = arith.constant 0 : index
    %c0_1 = arith.constant 0 : index
    %3 = vector.load %arg9[%c0, %c0_1] : memref<8x128xf32, #tpu.memory_space<vmem>>, vector<8x128xf32>
    %c0_2 = arith.constant 0 : index
    %c0_3 = arith.constant 0 : index
    %4 = vector.load %arg3[%c0_2, %c0_3] : memref<8x256xbf16, #tpu.memory_space<vmem>>, vector<8x256xbf16>
    %c0_4 = arith.constant 0 : index
    %c0_5 = arith.constant 0 : index
    %5 = vector.load %arg4[%c0_4, %c0_5] : memref<256x128xbf16, #tpu.memory_space<vmem>>, vector<256x128xbf16>
    %cst = arith.constant dense<0.000000e+00> : vector<8x128xf32>
    %6 = tpu.matmul %4, %5, %cst {dimension_numbers = #tpu.dot_dimension_numbers<[1], [0], [0], [1], [0, 0, 1, 1], [], []>} : vector<8x256xbf16>, vector<256x128xbf16>, vector<8x128xf32> -> vector<8x128xf32>
    %7 = arith.addf %3, %6 : vector<8x128xf32>
    %c0_6 = arith.constant 0 : index
    %c0_7 = arith.constant 0 : index
    %8 = vector.load %arg9[%c0_6, %c0_7] : memref<8x128xf32, #tpu.memory_space<vmem>>, vector<8x128xf32>
    tpu.vector_store %arg9[%c0_6, %c0_7], %7 {strides = array<i32>} : memref<8x128xf32, #tpu.memory_space<vmem>>, vector<8x128xf32>,
    %c8_i32 = arith.constant 8 : i32
    %9 = arith.cmpi eq, %arg2, %c8_i32 : i32
    %10 = arith.extui %9 : i1 to i32
    %c0_i32_8 = arith.constant 0 : i32
    %11 = arith.cmpi ne, %10, %c0_i32_8 : i32
    scf.if %11 {
      %c0_9 = arith.constant 0 : index
      %c0_10 = arith.constant 0 : index
      %12 = vector.load %arg9[%c0_9, %c0_10] : memref<8x128xf32, #tpu.memory_space<vmem>>, vector<8x128xf32>
      %c0_11 = arith.constant 0 : index
      %c0_12 = arith.constant 0 : index
      %13 = vector.load %arg5[%c0_11, %c0_12] : memref<1x128xf32, #tpu.memory_space<vmem>>, vector<1x128xf32>
      %14 = vector.broadcast %13 : vector<1x128xf32> to vector<8x128xf32>
      %15 = arith.mulf %12, %14 : vector<8x128xf32>
      %c0_13 = arith.constant 0 : index
      %c0_14 = arith.constant 0 : index
      %16 = vector.load %arg6[%c0_13, %c0_14] : memref<1x128xf32, #tpu.memory_space<vmem>>, vector<1x128xf32>
      %17 = vector.broadcast %16 : vector<1x128xf32> to vector<8x128xf32>
      %18 = arith.addf %15, %17 : vector<8x128xf32>
      %c0_15 = arith.constant 0 : index
      %c0_16 = arith.constant 0 : index
      %19 = vector.load %arg7[%c0_15, %c0_16] : memref<8x128xbf16, #tpu.memory_space<vmem>>, vector<8x128xbf16>
      %20 = arith.extf %19 : vector<8x128xbf16> to vector<8x128xf32>
      %21 = arith.addf %18, %20 : vector<8x128xf32>
      %cst_17 = arith.constant 0.000000e+00 : f32
      %22 = vector.broadcast %cst_17 : f32 to vector<8x128xf32>
      %23 = arith.maximumf %21, %22 : vector<8x128xf32>
      %24 = arith.truncf %23 : vector<8x128xf32> to vector<8x128xbf16>
      %c0_18 = arith.constant 0 : index
      %c0_19 = arith.constant 0 : index
      %25 = vector.load %arg8[%c0_18, %c0_19] : memref<8x128xbf16, #tpu.memory_space<vmem>>, vector<8x128xbf16>
      tpu.vector_store %arg8[%c0_18, %c0_19], %24 {strides = array<i32>} : memref<8x128xbf16, #tpu.memory_space<vmem>>, vector<8x128xbf16>,
    } else {
    }
    return
  }
  func.func @transform_0(%arg0: i32, %arg1: i32, %arg2: i32) -> (i32, i32) {
    %c0_i32 = arith.constant 0 : i32
    return %arg0, %arg2 : i32, i32
  }
  func.func @transform_1(%arg0: i32, %arg1: i32, %arg2: i32) -> (i32, i32) {
    %c0_i32 = arith.constant 0 : i32
    return %arg2, %arg1 : i32, i32
  }
  func.func @transform_2(%arg0: i32, %arg1: i32, %arg2: i32) -> (i32, i32) {
    %c0_i32 = arith.constant 0 : i32
    %c0_i32_0 = arith.constant 0 : i32
    return %c0_i32, %arg1 : i32, i32
  }
  func.func @transform_3(%arg0: i32, %arg1: i32, %arg2: i32) -> (i32, i32) {
    %c0_i32 = arith.constant 0 : i32
    %c0_i32_0 = arith.constant 0 : i32
    return %c0_i32, %arg1 : i32, i32
  }
  func.func @transform_4(%arg0: i32, %arg1: i32, %arg2: i32) -> (i32, i32) {
    %c0_i32 = arith.constant 0 : i32
    return %arg0, %arg1 : i32, i32
  }
  func.func @transform_5(%arg0: i32, %arg1: i32, %arg2: i32) -> (i32, i32) {
    %c0_i32 = arith.constant 0 : i32
    return %arg0, %arg1 : i32, i32
  }
}

module attributes {stable_mosaic.version = 11 : i64} {
  func.func @_matmul_bn_kernel(%arg0: i32, %arg1: i32, %arg2: i32, %arg3: memref<8x256xbf16, #tpu.memory_space<vmem>>, %arg4: memref<256x128xbf16, #tpu.memory_space<vmem>>, %arg5: memref<1x128xf32, #tpu.memory_space<vmem>>, %arg6: memref<1x128xf32, #tpu.memory_space<vmem>>, %arg7: memref<8x128xbf16, #tpu.memory_space<vmem>>, %arg8: memref<8x128xbf16, #tpu.memory_space<vmem>>, %arg9: memref<8x128xf32, #tpu.memory_space<vmem>>) attributes {dimension_semantics = [#tpu.dimension_semantics<parallel>, #tpu.dimension_semantics<parallel>, #tpu.dimension_semantics<arbitrary>], iteration_bounds = array<i64: 1, 2, 9>, scalar_prefetch = 0 : i64, scratch_operands = 1 : i64, tpu.core_type = #tpu.core_type<tc>, window_params = [{transform_indices = @transform_0, window_bounds = array<i64: 8, 256>}, {transform_indices = @transform_1, window_bounds = array<i64: 256, 128>}, {transform_indices = @transform_2, window_bounds = array<i64: 1, 128>}, {transform_indices = @transform_3, window_bounds = array<i64: 1, 128>}, {transform_indices = @transform_4, window_bounds = array<i64: 8, 128>}, {transform_indices = @transform_5, window_bounds = array<i64: 8, 128>}]} {
    %c0_i32 = arith.constant 0 : i32
    %0 = arith.cmpi eq, %arg2, %c0_i32 : i32
    %1 = arith.extui %0 : i1 to i32
    %c0_i32_0 = arith.constant 0 : i32
    %2 = arith.cmpi ne, %1, %c0_i32_0 : i32
    scf.if %2 {
      %cst_9 = arith.constant 0.000000e+00 : f32
      %12 = vector.broadcast %cst_9 : f32 to vector<8x128xf32>
      %c0_10 = arith.constant 0 : index
      %c0_11 = arith.constant 0 : index
      %13 = vector.load %arg9[%c0_10, %c0_11] : memref<8x128xf32, #tpu.memory_space<vmem>>, vector<8x128xf32>
      tpu.vector_store %arg9[%c0_10, %c0_11], %12 {strides = array<i32>} : memref<8x128xf32, #tpu.memory_space<vmem>>, vector<8x128xf32>,
    } else {
    }
    %c0 = arith.constant 0 : index
    %c0_1 = arith.constant 0 : index
    %3 = vector.load %arg9[%c0, %c0_1] : memref<8x128xf32, #tpu.memory_space<vmem>>, vector<8x128xf32>
    %c0_2 = arith.constant 0 : index
    %c0_3 = arith.constant 0 : index
    %4 = vector.load %arg3[%c0_2, %c0_3] : memref<8x256xbf16, #tpu.memory_space<vmem>>, vector<8x256xbf16>
    %c0_4 = arith.constant 0 : index
    %c0_5 = arith.constant 0 : index
    %5 = vector.load %arg4[%c0_4, %c0_5] : memref<256x128xbf16, #tpu.memory_space<vmem>>, vector<256x128xbf16>
    %cst = arith.constant dense<0.000000e+00> : vector<8x128xf32>
    %6 = tpu.matmul %4, %5, %cst {dimension_numbers = #tpu.dot_dimension_numbers<[1], [0], [0], [1], [0, 0, 1, 1], [], []>} : vector<8x256xbf16>, vector<256x128xbf16>, vector<8x128xf32> -> vector<8x128xf32>
    %7 = arith.addf %3, %6 : vector<8x128xf32>
    %c0_6 = arith.constant 0 : index
    %c0_7 = arith.constant 0 : index
    %8 = vector.load %arg9[%c0_6, %c0_7] : memref<8x128xf32, #tpu.memory_space<vmem>>, vector<8x128xf32>
    tpu.vector_store %arg9[%c0_6, %c0_7], %7 {strides = array<i32>} : memref<8x128xf32, #tpu.memory_space<vmem>>, vector<8x128xf32>,
    %c8_i32 = arith.constant 8 : i32
    %9 = arith.cmpi eq, %arg2, %c8_i32 : i32
    %10 = arith.extui %9 : i1 to i32
    %c0_i32_8 = arith.constant 0 : i32
    %11 = arith.cmpi ne, %10, %c0_i32_8 : i32
    scf.if %11 {
      %c0_9 = arith.constant 0 : index
      %c0_10 = arith.constant 0 : index
      %12 = vector.load %arg9[%c0_9, %c0_10] : memref<8x128xf32, #tpu.memory_space<vmem>>, vector<8x128xf32>
      %c0_11 = arith.constant 0 : index
      %c0_12 = arith.constant 0 : index
      %13 = vector.load %arg5[%c0_11, %c0_12] : memref<1x128xf32, #tpu.memory_space<vmem>>, vector<1x128xf32>
      %14 = vector.broadcast %13 : vector<1x128xf32> to vector<8x128xf32>
      %15 = arith.mulf %12, %14 : vector<8x128xf32>
      %c0_13 = arith.constant 0 : index
      %c0_14 = arith.constant 0 : index
      %16 = vector.load %arg6[%c0_13, %c0_14] : memref<1x128xf32, #tpu.memory_space<vmem>>, vector<1x128xf32>
      %17 = vector.broadcast %16 : vector<1x128xf32> to vector<8x128xf32>
      %18 = arith.addf %15, %17 : vector<8x128xf32>
      %c0_15 = arith.constant 0 : index
      %c0_16 = arith.constant 0 : index
      %19 = vector.load %arg7[%c0_15, %c0_16] : memref<8x128xbf16, #tpu.memory_space<vmem>>, vector<8x128xbf16>
      %20 = arith.extf %19 : vector<8x128xbf16> to vector<8x128xf32>
      %21 = arith.addf %18, %20 : vector<8x128xf32>
      %cst_17 = arith.constant 0.000000e+00 : f32
      %22 = vector.broadcast %cst_17 : f32 to vector<8x128xf32>
      %23 = arith.maximumf %21, %22 : vector<8x128xf32>
      %24 = arith.truncf %23 : vector<8x128xf32> to vector<8x128xbf16>
      %c0_18 = arith.constant 0 : index
      %c0_19 = arith.constant 0 : index
      %25 = vector.load %arg8[%c0_18, %c0_19] : memref<8x128xbf16, #tpu.memory_space<vmem>>, vector<8x128xbf16>
      tpu.vector_store %arg8[%c0_18, %c0_19], %24 {strides = array<i32>} : memref<8x128xbf16, #tpu.memory_space<vmem>>, vector<8x128xbf16>,
    } else {
    }
    return
  }
  func.func @transform_0(%arg0: i32, %arg1: i32, %arg2: i32) -> (i32, i32) {
    %c0_i32 = arith.constant 0 : i32
    return %arg0, %arg2 : i32, i32
  }
  func.func @transform_1(%arg0: i32, %arg1: i32, %arg2: i32) -> (i32, i32) {
    %c0_i32 = arith.constant 0 : i32
    return %arg2, %arg1 : i32, i32
  }
  func.func @transform_2(%arg0: i32, %arg1: i32, %arg2: i32) -> (i32, i32) {
    %c0_i32 = arith.constant 0 : i32
    %c0_i32_0 = arith.constant 0 : i32
    return %c0_i32, %arg1 : i32, i32
  }
  func.func @transform_3(%arg0: i32, %arg1: i32, %arg2: i32) -> (i32, i32) {
    %c0_i32 = arith.constant 0 : i32
    %c0_i32_0 = arith.constant 0 : i32
    return %c0_i32, %arg1 : i32, i32
  }
  func.func @transform_4(%arg0: i32, %arg1: i32, %arg2: i32) -> (i32, i32) {
    %c0_i32 = arith.constant 0 : i32
    return %arg0, %arg1 : i32, i32
  }
  func.func @transform_5(%arg0: i32, %arg1: i32, %arg2: i32) -> (i32, i32) {
    %c0_i32 = arith.constant 0 : i32
    return %arg0, %arg1 : i32, i32
  }
}

module attributes {stable_mosaic.version = 11 : i64} {
  func.func @_matmul_bn_kernel(%arg0: i32, %arg1: i32, %arg2: i32, %arg3: memref<8x256xbf16, #tpu.memory_space<vmem>>, %arg4: memref<256x128xbf16, #tpu.memory_space<vmem>>, %arg5: memref<1x128xf32, #tpu.memory_space<vmem>>, %arg6: memref<1x128xf32, #tpu.memory_space<vmem>>, %arg7: memref<8x128xbf16, #tpu.memory_space<vmem>>, %arg8: memref<8x128xf32, #tpu.memory_space<vmem>>) attributes {dimension_semantics = [#tpu.dimension_semantics<parallel>, #tpu.dimension_semantics<parallel>, #tpu.dimension_semantics<arbitrary>], iteration_bounds = array<i64: 1, 2, 9>, scalar_prefetch = 0 : i64, scratch_operands = 1 : i64, tpu.core_type = #tpu.core_type<tc>, window_params = [{transform_indices = @transform_0, window_bounds = array<i64: 8, 256>}, {transform_indices = @transform_1, window_bounds = array<i64: 256, 128>}, {transform_indices = @transform_2, window_bounds = array<i64: 1, 128>}, {transform_indices = @transform_3, window_bounds = array<i64: 1, 128>}, {transform_indices = @transform_4, window_bounds = array<i64: 8, 128>}]} {
    %c0_i32 = arith.constant 0 : i32
    %0 = arith.cmpi eq, %arg2, %c0_i32 : i32
    %1 = arith.extui %0 : i1 to i32
    %c0_i32_0 = arith.constant 0 : i32
    %2 = arith.cmpi ne, %1, %c0_i32_0 : i32
    scf.if %2 {
      %cst_9 = arith.constant 0.000000e+00 : f32
      %12 = vector.broadcast %cst_9 : f32 to vector<8x128xf32>
      %c0_10 = arith.constant 0 : index
      %c0_11 = arith.constant 0 : index
      %13 = vector.load %arg8[%c0_10, %c0_11] : memref<8x128xf32, #tpu.memory_space<vmem>>, vector<8x128xf32>
      tpu.vector_store %arg8[%c0_10, %c0_11], %12 {strides = array<i32>} : memref<8x128xf32, #tpu.memory_space<vmem>>, vector<8x128xf32>,
    } else {
    }
    %c0 = arith.constant 0 : index
    %c0_1 = arith.constant 0 : index
    %3 = vector.load %arg8[%c0, %c0_1] : memref<8x128xf32, #tpu.memory_space<vmem>>, vector<8x128xf32>
    %c0_2 = arith.constant 0 : index
    %c0_3 = arith.constant 0 : index
    %4 = vector.load %arg3[%c0_2, %c0_3] : memref<8x256xbf16, #tpu.memory_space<vmem>>, vector<8x256xbf16>
    %c0_4 = arith.constant 0 : index
    %c0_5 = arith.constant 0 : index
    %5 = vector.load %arg4[%c0_4, %c0_5] : memref<256x128xbf16, #tpu.memory_space<vmem>>, vector<256x128xbf16>
    %cst = arith.constant dense<0.000000e+00> : vector<8x128xf32>
    %6 = tpu.matmul %4, %5, %cst {dimension_numbers = #tpu.dot_dimension_numbers<[1], [0], [0], [1], [0, 0, 1, 1], [], []>} : vector<8x256xbf16>, vector<256x128xbf16>, vector<8x128xf32> -> vector<8x128xf32>
    %7 = arith.addf %3, %6 : vector<8x128xf32>
    %c0_6 = arith.constant 0 : index
    %c0_7 = arith.constant 0 : index
    %8 = vector.load %arg8[%c0_6, %c0_7] : memref<8x128xf32, #tpu.memory_space<vmem>>, vector<8x128xf32>
    tpu.vector_store %arg8[%c0_6, %c0_7], %7 {strides = array<i32>} : memref<8x128xf32, #tpu.memory_space<vmem>>, vector<8x128xf32>,
    %c8_i32 = arith.constant 8 : i32
    %9 = arith.cmpi eq, %arg2, %c8_i32 : i32
    %10 = arith.extui %9 : i1 to i32
    %c0_i32_8 = arith.constant 0 : i32
    %11 = arith.cmpi ne, %10, %c0_i32_8 : i32
    scf.if %11 {
      %c0_9 = arith.constant 0 : index
      %c0_10 = arith.constant 0 : index
      %12 = vector.load %arg8[%c0_9, %c0_10] : memref<8x128xf32, #tpu.memory_space<vmem>>, vector<8x128xf32>
      %c0_11 = arith.constant 0 : index
      %c0_12 = arith.constant 0 : index
      %13 = vector.load %arg5[%c0_11, %c0_12] : memref<1x128xf32, #tpu.memory_space<vmem>>, vector<1x128xf32>
      %14 = vector.broadcast %13 : vector<1x128xf32> to vector<8x128xf32>
      %15 = arith.mulf %12, %14 : vector<8x128xf32>
      %c0_13 = arith.constant 0 : index
      %c0_14 = arith.constant 0 : index
      %16 = vector.load %arg6[%c0_13, %c0_14] : memref<1x128xf32, #tpu.memory_space<vmem>>, vector<1x128xf32>
      %17 = vector.broadcast %16 : vector<1x128xf32> to vector<8x128xf32>
      %18 = arith.addf %15, %17 : vector<8x128xf32>
      %cst_15 = arith.constant 0.000000e+00 : f32
      %19 = vector.broadcast %cst_15 : f32 to vector<8x128xf32>
      %20 = arith.maximumf %18, %19 : vector<8x128xf32>
      %21 = arith.truncf %20 : vector<8x128xf32> to vector<8x128xbf16>
      %c0_16 = arith.constant 0 : index
      %c0_17 = arith.constant 0 : index
      %22 = vector.load %arg7[%c0_16, %c0_17] : memref<8x128xbf16, #tpu.memory_space<vmem>>, vector<8x128xbf16>
      tpu.vector_store %arg7[%c0_16, %c0_17], %21 {strides = array<i32>} : memref<8x128xbf16, #tpu.memory_space<vmem>>, vector<8x128xbf16>,
    } else {
    }
    return
  }
  func.func @transform_0(%arg0: i32, %arg1: i32, %arg2: i32) -> (i32, i32) {
    %c0_i32 = arith.constant 0 : i32
    return %arg0, %arg2 : i32, i32
  }
  func.func @transform_1(%arg0: i32, %arg1: i32, %arg2: i32) -> (i32, i32) {
    %c0_i32 = arith.constant 0 : i32
    return %arg2, %arg1 : i32, i32
  }
  func.func @transform_2(%arg0: i32, %arg1: i32, %arg2: i32) -> (i32, i32) {
    %c0_i32 = arith.constant 0 : i32
    %c0_i32_0 = arith.constant 0 : i32
    return %c0_i32, %arg1 : i32, i32
  }
  func.func @transform_3(%arg0: i32, %arg1: i32, %arg2: i32) -> (i32, i32) {
    %c0_i32 = arith.constant 0 : i32
    %c0_i32_0 = arith.constant 0 : i32
    return %c0_i32, %arg1 : i32, i32
  }
  func.func @transform_4(%arg0: i32, %arg1: i32, %arg2: i32) -> (i32, i32) {
    %c0_i32 = arith.constant 0 : i32
    return %arg0, %arg1 : i32, i32
  }
}

module attributes {stable_mosaic.version = 11 : i64} {
  func.func @_matmul_bn_kernel(%arg0: i32, %arg1: i32, %arg2: i32, %arg3: memref<8x256xbf16, #tpu.memory_space<vmem>>, %arg4: memref<256x256xbf16, #tpu.memory_space<vmem>>, %arg5: memref<1x256xf32, #tpu.memory_space<vmem>>, %arg6: memref<1x256xf32, #tpu.memory_space<vmem>>, %arg7: memref<8x256xbf16, #tpu.memory_space<vmem>>, %arg8: memref<8x256xf32, #tpu.memory_space<vmem>>) attributes {dimension_semantics = [#tpu.dimension_semantics<parallel>, #tpu.dimension_semantics<parallel>, #tpu.dimension_semantics<arbitrary>], iteration_bounds = array<i64: 1, 2, 9>, scalar_prefetch = 0 : i64, scratch_operands = 1 : i64, tpu.core_type = #tpu.core_type<tc>, window_params = [{transform_indices = @transform_0, window_bounds = array<i64: 8, 256>}, {transform_indices = @transform_1, window_bounds = array<i64: 256, 256>}, {transform_indices = @transform_2, window_bounds = array<i64: 1, 256>}, {transform_indices = @transform_3, window_bounds = array<i64: 1, 256>}, {transform_indices = @transform_4, window_bounds = array<i64: 8, 256>}]} {
    %c0_i32 = arith.constant 0 : i32
    %0 = arith.cmpi eq, %arg2, %c0_i32 : i32
    %1 = arith.extui %0 : i1 to i32
    %c0_i32_0 = arith.constant 0 : i32
    %2 = arith.cmpi ne, %1, %c0_i32_0 : i32
    scf.if %2 {
      %cst_9 = arith.constant 0.000000e+00 : f32
      %12 = vector.broadcast %cst_9 : f32 to vector<8x256xf32>
      %c0_10 = arith.constant 0 : index
      %c0_11 = arith.constant 0 : index
      %13 = vector.load %arg8[%c0_10, %c0_11] : memref<8x256xf32, #tpu.memory_space<vmem>>, vector<8x256xf32>
      tpu.vector_store %arg8[%c0_10, %c0_11], %12 {strides = array<i32>} : memref<8x256xf32, #tpu.memory_space<vmem>>, vector<8x256xf32>,
    } else {
    }
    %c0 = arith.constant 0 : index
    %c0_1 = arith.constant 0 : index
    %3 = vector.load %arg8[%c0, %c0_1] : memref<8x256xf32, #tpu.memory_space<vmem>>, vector<8x256xf32>
    %c0_2 = arith.constant 0 : index
    %c0_3 = arith.constant 0 : index
    %4 = vector.load %arg3[%c0_2, %c0_3] : memref<8x256xbf16, #tpu.memory_space<vmem>>, vector<8x256xbf16>
    %c0_4 = arith.constant 0 : index
    %c0_5 = arith.constant 0 : index
    %5 = vector.load %arg4[%c0_4, %c0_5] : memref<256x256xbf16, #tpu.memory_space<vmem>>, vector<256x256xbf16>
    %cst = arith.constant dense<0.000000e+00> : vector<8x256xf32>
    %6 = tpu.matmul %4, %5, %cst {dimension_numbers = #tpu.dot_dimension_numbers<[1], [0], [0], [1], [0, 0, 1, 1], [], []>} : vector<8x256xbf16>, vector<256x256xbf16>, vector<8x256xf32> -> vector<8x256xf32>
    %7 = arith.addf %3, %6 : vector<8x256xf32>
    %c0_6 = arith.constant 0 : index
    %c0_7 = arith.constant 0 : index
    %8 = vector.load %arg8[%c0_6, %c0_7] : memref<8x256xf32, #tpu.memory_space<vmem>>, vector<8x256xf32>
    tpu.vector_store %arg8[%c0_6, %c0_7], %7 {strides = array<i32>} : memref<8x256xf32, #tpu.memory_space<vmem>>, vector<8x256xf32>,
    %c8_i32 = arith.constant 8 : i32
    %9 = arith.cmpi eq, %arg2, %c8_i32 : i32
    %10 = arith.extui %9 : i1 to i32
    %c0_i32_8 = arith.constant 0 : i32
    %11 = arith.cmpi ne, %10, %c0_i32_8 : i32
    scf.if %11 {
      %c0_9 = arith.constant 0 : index
      %c0_10 = arith.constant 0 : index
      %12 = vector.load %arg8[%c0_9, %c0_10] : memref<8x256xf32, #tpu.memory_space<vmem>>, vector<8x256xf32>
      %c0_11 = arith.constant 0 : index
      %c0_12 = arith.constant 0 : index
      %13 = vector.load %arg5[%c0_11, %c0_12] : memref<1x256xf32, #tpu.memory_space<vmem>>, vector<1x256xf32>
      %14 = vector.broadcast %13 : vector<1x256xf32> to vector<8x256xf32>
      %15 = arith.mulf %12, %14 : vector<8x256xf32>
      %c0_13 = arith.constant 0 : index
      %c0_14 = arith.constant 0 : index
      %16 = vector.load %arg6[%c0_13, %c0_14] : memref<1x256xf32, #tpu.memory_space<vmem>>, vector<1x256xf32>
      %17 = vector.broadcast %16 : vector<1x256xf32> to vector<8x256xf32>
      %18 = arith.addf %15, %17 : vector<8x256xf32>
      %cst_15 = arith.constant 0.000000e+00 : f32
      %19 = vector.broadcast %cst_15 : f32 to vector<8x256xf32>
      %20 = arith.maximumf %18, %19 : vector<8x256xf32>
      %21 = arith.truncf %20 : vector<8x256xf32> to vector<8x256xbf16>
      %c0_16 = arith.constant 0 : index
      %c0_17 = arith.constant 0 : index
      %22 = vector.load %arg7[%c0_16, %c0_17] : memref<8x256xbf16, #tpu.memory_space<vmem>>, vector<8x256xbf16>
      tpu.vector_store %arg7[%c0_16, %c0_17], %21 {strides = array<i32>} : memref<8x256xbf16, #tpu.memory_space<vmem>>, vector<8x256xbf16>,
    } else {
    }
    return
  }
  func.func @transform_0(%arg0: i32, %arg1: i32, %arg2: i32) -> (i32, i32) {
    %c0_i32 = arith.constant 0 : i32
    return %arg0, %arg2 : i32, i32
  }
  func.func @transform_1(%arg0: i32, %arg1: i32, %arg2: i32) -> (i32, i32) {
    %c0_i32 = arith.constant 0 : i32
    return %arg2, %arg1 : i32, i32
  }
  func.func @transform_2(%arg0: i32, %arg1: i32, %arg2: i32) -> (i32, i32) {
    %c0_i32 = arith.constant 0 : i32
    %c0_i32_0 = arith.constant 0 : i32
    return %c0_i32, %arg1 : i32, i32
  }
  func.func @transform_3(%arg0: i32, %arg1: i32, %arg2: i32) -> (i32, i32) {
    %c0_i32 = arith.constant 0 : i32
    %c0_i32_0 = arith.constant 0 : i32
    return %c0_i32, %arg1 : i32, i32
  }
  func.func @transform_4(%arg0: i32, %arg1: i32, %arg2: i32) -> (i32, i32) {
    %c0_i32 = arith.constant 0 : i32
    return %arg0, %arg1 : i32, i32
  }
}

module attributes {stable_mosaic.version = 11 : i64} {
  func.func @_matmul_bn_kernel(%arg0: i32, %arg1: i32, %arg2: i32, %arg3: memref<8x256xbf16, #tpu.memory_space<vmem>>, %arg4: memref<256x256xbf16, #tpu.memory_space<vmem>>, %arg5: memref<1x256xf32, #tpu.memory_space<vmem>>, %arg6: memref<1x256xf32, #tpu.memory_space<vmem>>, %arg7: memref<8x256xbf16, #tpu.memory_space<vmem>>, %arg8: memref<8x256xf32, #tpu.memory_space<vmem>>) attributes {dimension_semantics = [#tpu.dimension_semantics<parallel>, #tpu.dimension_semantics<parallel>, #tpu.dimension_semantics<arbitrary>], iteration_bounds = array<i64: 1, 2, 1>, scalar_prefetch = 0 : i64, scratch_operands = 1 : i64, tpu.core_type = #tpu.core_type<tc>, window_params = [{transform_indices = @transform_0, window_bounds = array<i64: 8, 256>}, {transform_indices = @transform_1, window_bounds = array<i64: 256, 256>}, {transform_indices = @transform_2, window_bounds = array<i64: 1, 256>}, {transform_indices = @transform_3, window_bounds = array<i64: 1, 256>}, {transform_indices = @transform_4, window_bounds = array<i64: 8, 256>}]} {
    %c0_i32 = arith.constant 0 : i32
    %0 = arith.cmpi eq, %arg2, %c0_i32 : i32
    %1 = arith.extui %0 : i1 to i32
    %c0_i32_0 = arith.constant 0 : i32
    %2 = arith.cmpi ne, %1, %c0_i32_0 : i32
    scf.if %2 {
      %cst_10 = arith.constant 0.000000e+00 : f32
      %12 = vector.broadcast %cst_10 : f32 to vector<8x256xf32>
      %c0_11 = arith.constant 0 : index
      %c0_12 = arith.constant 0 : index
      %13 = vector.load %arg8[%c0_11, %c0_12] : memref<8x256xf32, #tpu.memory_space<vmem>>, vector<8x256xf32>
      tpu.vector_store %arg8[%c0_11, %c0_12], %12 {strides = array<i32>} : memref<8x256xf32, #tpu.memory_space<vmem>>, vector<8x256xf32>,
    } else {
    }
    %c0 = arith.constant 0 : index
    %c0_1 = arith.constant 0 : index
    %3 = vector.load %arg8[%c0, %c0_1] : memref<8x256xf32, #tpu.memory_space<vmem>>, vector<8x256xf32>
    %c0_2 = arith.constant 0 : index
    %c0_3 = arith.constant 0 : index
    %4 = vector.load %arg3[%c0_2, %c0_3] : memref<8x256xbf16, #tpu.memory_space<vmem>>, vector<8x256xbf16>
    %c0_4 = arith.constant 0 : index
    %c0_5 = arith.constant 0 : index
    %5 = vector.load %arg4[%c0_4, %c0_5] : memref<256x256xbf16, #tpu.memory_space<vmem>>, vector<256x256xbf16>
    %cst = arith.constant dense<0.000000e+00> : vector<8x256xf32>
    %6 = tpu.matmul %4, %5, %cst {dimension_numbers = #tpu.dot_dimension_numbers<[1], [0], [0], [1], [0, 0, 1, 1], [], []>} : vector<8x256xbf16>, vector<256x256xbf16>, vector<8x256xf32> -> vector<8x256xf32>
    %7 = arith.addf %3, %6 : vector<8x256xf32>
    %c0_6 = arith.constant 0 : index
    %c0_7 = arith.constant 0 : index
    %8 = vector.load %arg8[%c0_6, %c0_7] : memref<8x256xf32, #tpu.memory_space<vmem>>, vector<8x256xf32>
    tpu.vector_store %arg8[%c0_6, %c0_7], %7 {strides = array<i32>} : memref<8x256xf32, #tpu.memory_space<vmem>>, vector<8x256xf32>,
    %c0_i32_8 = arith.constant 0 : i32
    %9 = arith.cmpi eq, %arg2, %c0_i32_8 : i32
    %10 = arith.extui %9 : i1 to i32
    %c0_i32_9 = arith.constant 0 : i32
    %11 = arith.cmpi ne, %10, %c0_i32_9 : i32
    scf.if %11 {
      %c0_10 = arith.constant 0 : index
      %c0_11 = arith.constant 0 : index
      %12 = vector.load %arg8[%c0_10, %c0_11] : memref<8x256xf32, #tpu.memory_space<vmem>>, vector<8x256xf32>
      %c0_12 = arith.constant 0 : index
      %c0_13 = arith.constant 0 : index
      %13 = vector.load %arg5[%c0_12, %c0_13] : memref<1x256xf32, #tpu.memory_space<vmem>>, vector<1x256xf32>
      %14 = vector.broadcast %13 : vector<1x256xf32> to vector<8x256xf32>
      %15 = arith.mulf %12, %14 : vector<8x256xf32>
      %c0_14 = arith.constant 0 : index
      %c0_15 = arith.constant 0 : index
      %16 = vector.load %arg6[%c0_14, %c0_15] : memref<1x256xf32, #tpu.memory_space<vmem>>, vector<1x256xf32>
      %17 = vector.broadcast %16 : vector<1x256xf32> to vector<8x256xf32>
      %18 = arith.addf %15, %17 : vector<8x256xf32>
      %19 = arith.truncf %18 : vector<8x256xf32> to vector<8x256xbf16>
      %c0_16 = arith.constant 0 : index
      %c0_17 = arith.constant 0 : index
      %20 = vector.load %arg7[%c0_16, %c0_17] : memref<8x256xbf16, #tpu.memory_space<vmem>>, vector<8x256xbf16>
      tpu.vector_store %arg7[%c0_16, %c0_17], %19 {strides = array<i32>} : memref<8x256xbf16, #tpu.memory_space<vmem>>, vector<8x256xbf16>,
    } else {
    }
    return
  }
  func.func @transform_0(%arg0: i32, %arg1: i32, %arg2: i32) -> (i32, i32) {
    %c0_i32 = arith.constant 0 : i32
    return %arg0, %arg2 : i32, i32
  }
  func.func @transform_1(%arg0: i32, %arg1: i32, %arg2: i32) -> (i32, i32) {
    %c0_i32 = arith.constant 0 : i32
    return %arg2, %arg1 : i32, i32
  }
  func.func @transform_2(%arg0: i32, %arg1: i32, %arg2: i32) -> (i32, i32) {
    %c0_i32 = arith.constant 0 : i32
    %c0_i32_0 = arith.constant 0 : i32
    return %c0_i32, %arg1 : i32, i32
  }
  func.func @transform_3(%arg0: i32, %arg1: i32, %arg2: i32) -> (i32, i32) {
    %c0_i32 = arith.constant 0 : i32
    %c0_i32_0 = arith.constant 0 : i32
    return %c0_i32, %arg1 : i32, i32
  }
  func.func @transform_4(%arg0: i32, %arg1: i32, %arg2: i32) -> (i32, i32) {
    %c0_i32 = arith.constant 0 : i32
    return %arg0, %arg1 : i32, i32
  }
}

module attributes {stable_mosaic.version = 11 : i64} {
  func.func @_matmul_bn_kernel(%arg0: i32, %arg1: i32, %arg2: i32, %arg3: memref<8x256xbf16, #tpu.memory_space<vmem>>, %arg4: memref<256x256xbf16, #tpu.memory_space<vmem>>, %arg5: memref<1x256xf32, #tpu.memory_space<vmem>>, %arg6: memref<1x256xf32, #tpu.memory_space<vmem>>, %arg7: memref<8x256xbf16, #tpu.memory_space<vmem>>, %arg8: memref<8x256xbf16, #tpu.memory_space<vmem>>, %arg9: memref<8x256xf32, #tpu.memory_space<vmem>>) attributes {dimension_semantics = [#tpu.dimension_semantics<parallel>, #tpu.dimension_semantics<parallel>, #tpu.dimension_semantics<arbitrary>], iteration_bounds = array<i64: 1, 2, 18>, scalar_prefetch = 0 : i64, scratch_operands = 1 : i64, tpu.core_type = #tpu.core_type<tc>, window_params = [{transform_indices = @transform_0, window_bounds = array<i64: 8, 256>}, {transform_indices = @transform_1, window_bounds = array<i64: 256, 256>}, {transform_indices = @transform_2, window_bounds = array<i64: 1, 256>}, {transform_indices = @transform_3, window_bounds = array<i64: 1, 256>}, {transform_indices = @transform_4, window_bounds = array<i64: 8, 256>}, {transform_indices = @transform_5, window_bounds = array<i64: 8, 256>}]} {
    %c0_i32 = arith.constant 0 : i32
    %0 = arith.cmpi eq, %arg2, %c0_i32 : i32
    %1 = arith.extui %0 : i1 to i32
    %c0_i32_0 = arith.constant 0 : i32
    %2 = arith.cmpi ne, %1, %c0_i32_0 : i32
    scf.if %2 {
      %cst_9 = arith.constant 0.000000e+00 : f32
      %12 = vector.broadcast %cst_9 : f32 to vector<8x256xf32>
      %c0_10 = arith.constant 0 : index
      %c0_11 = arith.constant 0 : index
      %13 = vector.load %arg9[%c0_10, %c0_11] : memref<8x256xf32, #tpu.memory_space<vmem>>, vector<8x256xf32>
      tpu.vector_store %arg9[%c0_10, %c0_11], %12 {strides = array<i32>} : memref<8x256xf32, #tpu.memory_space<vmem>>, vector<8x256xf32>,
    } else {
    }
    %c0 = arith.constant 0 : index
    %c0_1 = arith.constant 0 : index
    %3 = vector.load %arg9[%c0, %c0_1] : memref<8x256xf32, #tpu.memory_space<vmem>>, vector<8x256xf32>
    %c0_2 = arith.constant 0 : index
    %c0_3 = arith.constant 0 : index
    %4 = vector.load %arg3[%c0_2, %c0_3] : memref<8x256xbf16, #tpu.memory_space<vmem>>, vector<8x256xbf16>
    %c0_4 = arith.constant 0 : index
    %c0_5 = arith.constant 0 : index
    %5 = vector.load %arg4[%c0_4, %c0_5] : memref<256x256xbf16, #tpu.memory_space<vmem>>, vector<256x256xbf16>
    %cst = arith.constant dense<0.000000e+00> : vector<8x256xf32>
    %6 = tpu.matmul %4, %5, %cst {dimension_numbers = #tpu.dot_dimension_numbers<[1], [0], [0], [1], [0, 0, 1, 1], [], []>} : vector<8x256xbf16>, vector<256x256xbf16>, vector<8x256xf32> -> vector<8x256xf32>
    %7 = arith.addf %3, %6 : vector<8x256xf32>
    %c0_6 = arith.constant 0 : index
    %c0_7 = arith.constant 0 : index
    %8 = vector.load %arg9[%c0_6, %c0_7] : memref<8x256xf32, #tpu.memory_space<vmem>>, vector<8x256xf32>
    tpu.vector_store %arg9[%c0_6, %c0_7], %7 {strides = array<i32>} : memref<8x256xf32, #tpu.memory_space<vmem>>, vector<8x256xf32>,
    %c17_i32 = arith.constant 17 : i32
    %9 = arith.cmpi eq, %arg2, %c17_i32 : i32
    %10 = arith.extui %9 : i1 to i32
    %c0_i32_8 = arith.constant 0 : i32
    %11 = arith.cmpi ne, %10, %c0_i32_8 : i32
    scf.if %11 {
      %c0_9 = arith.constant 0 : index
      %c0_10 = arith.constant 0 : index
      %12 = vector.load %arg9[%c0_9, %c0_10] : memref<8x256xf32, #tpu.memory_space<vmem>>, vector<8x256xf32>
      %c0_11 = arith.constant 0 : index
      %c0_12 = arith.constant 0 : index
      %13 = vector.load %arg5[%c0_11, %c0_12] : memref<1x256xf32, #tpu.memory_space<vmem>>, vector<1x256xf32>
      %14 = vector.broadcast %13 : vector<1x256xf32> to vector<8x256xf32>
      %15 = arith.mulf %12, %14 : vector<8x256xf32>
      %c0_13 = arith.constant 0 : index
      %c0_14 = arith.constant 0 : index
      %16 = vector.load %arg6[%c0_13, %c0_14] : memref<1x256xf32, #tpu.memory_space<vmem>>, vector<1x256xf32>
      %17 = vector.broadcast %16 : vector<1x256xf32> to vector<8x256xf32>
      %18 = arith.addf %15, %17 : vector<8x256xf32>
      %c0_15 = arith.constant 0 : index
      %c0_16 = arith.constant 0 : index
      %19 = vector.load %arg7[%c0_15, %c0_16] : memref<8x256xbf16, #tpu.memory_space<vmem>>, vector<8x256xbf16>
      %20 = arith.extf %19 : vector<8x256xbf16> to vector<8x256xf32>
      %21 = arith.addf %18, %20 : vector<8x256xf32>
      %cst_17 = arith.constant 0.000000e+00 : f32
      %22 = vector.broadcast %cst_17 : f32 to vector<8x256xf32>
      %23 = arith.maximumf %21, %22 : vector<8x256xf32>
      %24 = arith.truncf %23 : vector<8x256xf32> to vector<8x256xbf16>
      %c0_18 = arith.constant 0 : index
      %c0_19 = arith.constant 0 : index
      %25 = vector.load %arg8[%c0_18, %c0_19] : memref<8x256xbf16, #tpu.memory_space<vmem>>, vector<8x256xbf16>
      tpu.vector_store %arg8[%c0_18, %c0_19], %24 {strides = array<i32>} : memref<8x256xbf16, #tpu.memory_space<vmem>>, vector<8x256xbf16>,
    } else {
    }
    return
  }
  func.func @transform_0(%arg0: i32, %arg1: i32, %arg2: i32) -> (i32, i32) {
    %c0_i32 = arith.constant 0 : i32
    return %arg0, %arg2 : i32, i32
  }
  func.func @transform_1(%arg0: i32, %arg1: i32, %arg2: i32) -> (i32, i32) {
    %c0_i32 = arith.constant 0 : i32
    return %arg2, %arg1 : i32, i32
  }
  func.func @transform_2(%arg0: i32, %arg1: i32, %arg2: i32) -> (i32, i32) {
    %c0_i32 = arith.constant 0 : i32
    %c0_i32_0 = arith.constant 0 : i32
    return %c0_i32, %arg1 : i32, i32
  }
  func.func @transform_3(%arg0: i32, %arg1: i32, %arg2: i32) -> (i32, i32) {
    %c0_i32 = arith.constant 0 : i32
    %c0_i32_0 = arith.constant 0 : i32
    return %c0_i32, %arg1 : i32, i32
  }
  func.func @transform_4(%arg0: i32, %arg1: i32, %arg2: i32) -> (i32, i32) {
    %c0_i32 = arith.constant 0 : i32
    return %arg0, %arg1 : i32, i32
  }
  func.func @transform_5(%arg0: i32, %arg1: i32, %arg2: i32) -> (i32, i32) {
    %c0_i32 = arith.constant 0 : i32
    return %arg0, %arg1 : i32, i32
  }
}

module attributes {stable_mosaic.version = 11 : i64} {
  func.func @_matmul_bn_kernel(%arg0: i32, %arg1: i32, %arg2: i32, %arg3: memref<8x256xbf16, #tpu.memory_space<vmem>>, %arg4: memref<256x256xbf16, #tpu.memory_space<vmem>>, %arg5: memref<1x256xf32, #tpu.memory_space<vmem>>, %arg6: memref<1x256xf32, #tpu.memory_space<vmem>>, %arg7: memref<8x256xbf16, #tpu.memory_space<vmem>>, %arg8: memref<8x256xf32, #tpu.memory_space<vmem>>) attributes {dimension_semantics = [#tpu.dimension_semantics<parallel>, #tpu.dimension_semantics<parallel>, #tpu.dimension_semantics<arbitrary>], iteration_bounds = array<i64: 1, 2, 18>, scalar_prefetch = 0 : i64, scratch_operands = 1 : i64, tpu.core_type = #tpu.core_type<tc>, window_params = [{transform_indices = @transform_0, window_bounds = array<i64: 8, 256>}, {transform_indices = @transform_1, window_bounds = array<i64: 256, 256>}, {transform_indices = @transform_2, window_bounds = array<i64: 1, 256>}, {transform_indices = @transform_3, window_bounds = array<i64: 1, 256>}, {transform_indices = @transform_4, window_bounds = array<i64: 8, 256>}]} {
    %c0_i32 = arith.constant 0 : i32
    %0 = arith.cmpi eq, %arg2, %c0_i32 : i32
    %1 = arith.extui %0 : i1 to i32
    %c0_i32_0 = arith.constant 0 : i32
    %2 = arith.cmpi ne, %1, %c0_i32_0 : i32
    scf.if %2 {
      %cst_9 = arith.constant 0.000000e+00 : f32
      %12 = vector.broadcast %cst_9 : f32 to vector<8x256xf32>
      %c0_10 = arith.constant 0 : index
      %c0_11 = arith.constant 0 : index
      %13 = vector.load %arg8[%c0_10, %c0_11] : memref<8x256xf32, #tpu.memory_space<vmem>>, vector<8x256xf32>
      tpu.vector_store %arg8[%c0_10, %c0_11], %12 {strides = array<i32>} : memref<8x256xf32, #tpu.memory_space<vmem>>, vector<8x256xf32>,
    } else {
    }
    %c0 = arith.constant 0 : index
    %c0_1 = arith.constant 0 : index
    %3 = vector.load %arg8[%c0, %c0_1] : memref<8x256xf32, #tpu.memory_space<vmem>>, vector<8x256xf32>
    %c0_2 = arith.constant 0 : index
    %c0_3 = arith.constant 0 : index
    %4 = vector.load %arg3[%c0_2, %c0_3] : memref<8x256xbf16, #tpu.memory_space<vmem>>, vector<8x256xbf16>
    %c0_4 = arith.constant 0 : index
    %c0_5 = arith.constant 0 : index
    %5 = vector.load %arg4[%c0_4, %c0_5] : memref<256x256xbf16, #tpu.memory_space<vmem>>, vector<256x256xbf16>
    %cst = arith.constant dense<0.000000e+00> : vector<8x256xf32>
    %6 = tpu.matmul %4, %5, %cst {dimension_numbers = #tpu.dot_dimension_numbers<[1], [0], [0], [1], [0, 0, 1, 1], [], []>} : vector<8x256xbf16>, vector<256x256xbf16>, vector<8x256xf32> -> vector<8x256xf32>
    %7 = arith.addf %3, %6 : vector<8x256xf32>
    %c0_6 = arith.constant 0 : index
    %c0_7 = arith.constant 0 : index
    %8 = vector.load %arg8[%c0_6, %c0_7] : memref<8x256xf32, #tpu.memory_space<vmem>>, vector<8x256xf32>
    tpu.vector_store %arg8[%c0_6, %c0_7], %7 {strides = array<i32>} : memref<8x256xf32, #tpu.memory_space<vmem>>, vector<8x256xf32>,
    %c17_i32 = arith.constant 17 : i32
    %9 = arith.cmpi eq, %arg2, %c17_i32 : i32
    %10 = arith.extui %9 : i1 to i32
    %c0_i32_8 = arith.constant 0 : i32
    %11 = arith.cmpi ne, %10, %c0_i32_8 : i32
    scf.if %11 {
      %c0_9 = arith.constant 0 : index
      %c0_10 = arith.constant 0 : index
      %12 = vector.load %arg8[%c0_9, %c0_10] : memref<8x256xf32, #tpu.memory_space<vmem>>, vector<8x256xf32>
      %c0_11 = arith.constant 0 : index
      %c0_12 = arith.constant 0 : index
      %13 = vector.load %arg5[%c0_11, %c0_12] : memref<1x256xf32, #tpu.memory_space<vmem>>, vector<1x256xf32>
      %14 = vector.broadcast %13 : vector<1x256xf32> to vector<8x256xf32>
      %15 = arith.mulf %12, %14 : vector<8x256xf32>
      %c0_13 = arith.constant 0 : index
      %c0_14 = arith.constant 0 : index
      %16 = vector.load %arg6[%c0_13, %c0_14] : memref<1x256xf32, #tpu.memory_space<vmem>>, vector<1x256xf32>
      %17 = vector.broadcast %16 : vector<1x256xf32> to vector<8x256xf32>
      %18 = arith.addf %15, %17 : vector<8x256xf32>
      %cst_15 = arith.constant 0.000000e+00 : f32
      %19 = vector.broadcast %cst_15 : f32 to vector<8x256xf32>
      %20 = arith.maximumf %18, %19 : vector<8x256xf32>
      %21 = arith.truncf %20 : vector<8x256xf32> to vector<8x256xbf16>
      %c0_16 = arith.constant 0 : index
      %c0_17 = arith.constant 0 : index
      %22 = vector.load %arg7[%c0_16, %c0_17] : memref<8x256xbf16, #tpu.memory_space<vmem>>, vector<8x256xbf16>
      tpu.vector_store %arg7[%c0_16, %c0_17], %21 {strides = array<i32>} : memref<8x256xbf16, #tpu.memory_space<vmem>>, vector<8x256xbf16>,
    } else {
    }
    return
  }
  func.func @transform_0(%arg0: i32, %arg1: i32, %arg2: i32) -> (i32, i32) {
    %c0_i32 = arith.constant 0 : i32
    return %arg0, %arg2 : i32, i32
  }
  func.func @transform_1(%arg0: i32, %arg1: i32, %arg2: i32) -> (i32, i32) {
    %c0_i32 = arith.constant 0 : i32
    return %arg2, %arg1 : i32, i32
  }
  func.func @transform_2(%arg0: i32, %arg1: i32, %arg2: i32) -> (i32, i32) {
    %c0_i32 = arith.constant 0 : i32
    %c0_i32_0 = arith.constant 0 : i32
    return %c0_i32, %arg1 : i32, i32
  }
  func.func @transform_3(%arg0: i32, %arg1: i32, %arg2: i32) -> (i32, i32) {
    %c0_i32 = arith.constant 0 : i32
    %c0_i32_0 = arith.constant 0 : i32
    return %c0_i32, %arg1 : i32, i32
  }
  func.func @transform_4(%arg0: i32, %arg1: i32, %arg2: i32) -> (i32, i32) {
    %c0_i32 = arith.constant 0 : i32
    return %arg0, %arg1 : i32, i32
  }
}

module attributes {stable_mosaic.version = 11 : i64} {
  func.func @_avgpool_fc_kernel(%arg0: i32, %arg1: memref<8x1x512xbf16, #tpu.memory_space<vmem>>, %arg2: memref<512x128xf32, #tpu.memory_space<vmem>>, %arg3: memref<1x128xf32, #tpu.memory_space<vmem>>, %arg4: memref<8x128xf32, #tpu.memory_space<vmem>>) attributes {dimension_semantics = [#tpu.dimension_semantics<arbitrary>], iteration_bounds = array<i64: 1>, scalar_prefetch = 0 : i64, scratch_operands = 0 : i64, tpu.core_type = #tpu.core_type<tc>, window_params = [{pipeline_mode = #tpu.pipeline_mode<synchronous>, transform_indices = @transform_0, window_bounds = array<i64: 8, 1, 512>}, {pipeline_mode = #tpu.pipeline_mode<synchronous>, transform_indices = @transform_1, window_bounds = array<i64: 512, 128>}, {pipeline_mode = #tpu.pipeline_mode<synchronous>, transform_indices = @transform_2, window_bounds = array<i64: 1, 128>}, {pipeline_mode = #tpu.pipeline_mode<synchronous>, transform_indices = @transform_3, window_bounds = array<i64: 8, 128>}]} {
    %c0 = arith.constant 0 : index
    %c0_0 = arith.constant 0 : index
    %c0_1 = arith.constant 0 : index
    %0 = vector.load %arg1[%c0, %c0_0, %c0_1] : memref<8x1x512xbf16, #tpu.memory_space<vmem>>, vector<8x1x512xbf16>
    %1 = arith.extf %0 : vector<8x1x512xbf16> to vector<8x1x512xf32>
    %cst = arith.constant dense<0.000000e+00> : vector<8x512xf32>
    %2 = vector.multi_reduction <add>, %1, %cst [1] : vector<8x1x512xf32> to vector<8x512xf32>
    %cst_2 = arith.constant 1.000000e+00 : f32
    %3 = vector.broadcast %cst_2 : f32 to vector<8x512xf32>
    %4 = arith.divf %2, %3 : vector<8x512xf32>
    %c0_3 = arith.constant 0 : index
    %c0_4 = arith.constant 0 : index
    %5 = vector.load %arg2[%c0_3, %c0_4] : memref<512x128xf32, #tpu.memory_space<vmem>>, vector<512x128xf32>
    %cst_5 = arith.constant dense<0.000000e+00> : vector<8x128xf32>
    %6 = tpu.matmul %4, %5, %cst_5 {dimension_numbers = #tpu.dot_dimension_numbers<[1], [0], [0], [1], [0, 0, 1, 1], [], []>} : vector<8x512xf32>, vector<512x128xf32>, vector<8x128xf32> -> vector<8x128xf32>
    %c0_6 = arith.constant 0 : index
    %c0_7 = arith.constant 0 : index
    %7 = vector.load %arg3[%c0_6, %c0_7] : memref<1x128xf32, #tpu.memory_space<vmem>>, vector<1x128xf32>
    %8 = vector.broadcast %7 : vector<1x128xf32> to vector<8x128xf32>
    %9 = arith.addf %6, %8 : vector<8x128xf32>
    %c0_8 = arith.constant 0 : index
    %c0_9 = arith.constant 0 : index
    %10 = vector.load %arg4[%c0_8, %c0_9] : memref<8x128xf32, #tpu.memory_space<vmem>>, vector<8x128xf32>
    tpu.vector_store %arg4[%c0_8, %c0_9], %9 {strides = array<i32>} : memref<8x128xf32, #tpu.memory_space<vmem>>, vector<8x128xf32>,
    return
  }
  func.func @transform_0(%arg0: i32) -> (i32, i32, i32) {
    %c0_i32 = arith.constant 0 : i32
    %c0_i32_0 = arith.constant 0 : i32
    %c0_i32_1 = arith.constant 0 : i32
    %c0_i32_2 = arith.constant 0 : i32
    return %c0_i32, %c0_i32_0, %c0_i32_1 : i32, i32, i32
  }
  func.func @transform_1(%arg0: i32) -> (i32, i32) {
    %c0_i32 = arith.constant 0 : i32
    %c0_i32_0 = arith.constant 0 : i32
    %c0_i32_1 = arith.constant 0 : i32
    return %c0_i32, %c0_i32_0 : i32, i32
  }
  func.func @transform_2(%arg0: i32) -> (i32, i32) {
    %c0_i32 = arith.constant 0 : i32
    %c0_i32_0 = arith.constant 0 : i32
    %c0_i32_1 = arith.constant 0 : i32
    return %c0_i32, %c0_i32_0 : i32, i32
  }
  func.func @transform_3(%arg0: i32) -> (i32, i32) {
    %c0_i32 = arith.constant 0 : i32
    %c0_i32_0 = arith.constant 0 : i32
    %c0_i32_1 = arith.constant 0 : i32
    return %c0_i32, %c0_i32_0 : i32, i32
  }
}

</mosaic_0001>

<bundles_post_ra>
// kernel: resnet18_forward.22
= control target key start
LH: loop header
LB: loop body
LE: loop exit
PB: predicated region body
PF: predicated region fallthrough
CT: control target
= control target key end

     0   :  { %9 = vsyncpa [#allocation4], 0  ;;  %s1764_s15 = smov 0   ;;  %s1766_s16 = smov 0   ;;  %s2011_s0 = inlined_call_operand.vmem [shape: bf16[512,256], index: 0, kind: input, shape index: {}]   ;;  %s2012_s1 = inlined_call_operand.vmem [shape: bf16[256,128], index: 1, kind: input, shape index: {}]   ;;  %s2013_s2 = inlined_call_operand.hbm [shape: f32[1,128], index: 2, kind: input, shape index: {}]   ;;  %s2014_s3 = inlined_call_operand.vmem [shape: f32[1,128], index: 3, kind: input, shape index: {}]   ;;  %s2015_s4 = inlined_call_operand.vmem [shape: bf16[512,128], index: 4, kind: output, shape index: {}]  }
   0x1   :  { %s1768_s17 = smov 0  }
   0x2 LB: > { %s1275_s18 = sadd.s32 4294967295, %s1736_s17   ;;  %s34_s19 = sadd.s32 1, %s1732_s16  ;;  %s1736_s17 = sphi %s1768_s17, %s15_s17   ;;  %s1732_s16 = sphi %s1766_s16, %s2017_s16   ;;  %s1728_s15 = sphi %s1764_s15, %s2016_s15  }
   0x3   : > { %p36_p0 = scmp.ge.s32.totalorder %s34_s19, 2  ;;  %p1277_p1 = scmp.ge.s32.totalorder %s1736_s17, 1 }
   0x4   : > { %p175_p2 = scmp.lt.s32.totalorder %s1736_s17, 3  ;;  %p1651_p4 = scmp.eq.s32.totalorder %s1275_s18, 0 }
   0x5   : > { %s2019_s19 = smov (%p36_p0, %s34_s19), 0  ;;  %s200_s22 = sshll.u32 %s2013_s2, 4  ;;  %s201_s22 = int_to_ptr.hbm [resolvable:$true] %s200_s22 }
   0x6   : > { %p176_p3 = pnand %p1277_p1, %p175_p2  ;;  %s1738_s23 = smov [#allocation3]  }
   0x7   : > { %s202_s24 = sshll.u32 %s1738_s23, 4  ;;  %s203_s24 = int_to_ptr.vmem [resolvable:$true] %s202_s24 }
   0x8   : > { %p1647_p5 = pneg %p176_p3  ;;  %236 = sbr.rel (%p176_p3) target bundleno = 310 (0x136), region = 36 }
   0xa   : > { %p1648_p6 = pnand %p1651_p4, %p1647_p5 }
   0xc   : > { %1650 = dma.hbm_to_vmem [thread:$0]  (!%p1648_p6), %s201_s22, 16, %s203_s24, [#allocation4]  }
   0xd   : > { %1723 = dma.done.wait (%p1651_p4), [#allocation4], 16  }
   0xe   : > { %1725 = vsyncadd (%p1651_p4), [#allocation4], 4294967280  ;;  %v1523_v0 = vld [vmem:[%s2012_s1 + $0x38] sm:$0xff]  ;;  %v1522_v2 = vld [vmem:[%s2012_s1 + $0x30] sm:$0xff]  ;;  %s1284_s11 = sshll.u32 %s1728_s15, 5 }
   0xf   : > { %v1531_v1 = vld [vmem:[%s2012_s1 + $0x78] sm:$0xff]  ;;  %703 = vmatpush.bf16.msra.mxu0 %v1523_v0  ;;  %1627 = vmatpush.bf16.msra.mxu2 %v1523_v0  ;;  %v1530_v3 = vld [vmem:[%s2012_s1 + $0x70] sm:$0xff]  ;;  %v1521_v4 = vld [vmem:[%s2012_s1 + $0x28] sm:$0xff]  ;;  %p284_p7 = scmp.lt.s32.totalorder %s1284_s11, 63 }
  0x10   : > { %792 = vmatpush.bf16.msra.mxu1 %v1531_v1  ;;  %1635 = vmatpush.bf16.msra.mxu3 %v1531_v1  ;;  %v1529_v5 = vld [vmem:[%s2012_s1 + $0x68] sm:$0xff]  ;;  %v1520_v6 = vld [vmem:[%s2012_s1 + $0x20] sm:$0xff]  ;;  %v1519_v8 = vld [vmem:[%s2012_s1 + $0x18] sm:$0xff] }
  0x11   : > { %v1528_v7 = vld [vmem:[%s2012_s1 + $0x60] sm:$0xff]  ;;  %v1527_v9 = vld [vmem:[%s2012_s1 + $0x58] sm:$0xff]  ;;  %s2021_s11 = smov (!%p284_p7, %s1284_s11), 63  ;;  %v1518_v10 = vld [vmem:[%s2012_s1 + $0x10] sm:$0xff] }
  0x12   : > { %v1526_v11 = vld [vmem:[%s2012_s1 + $0x50] sm:$0xff]  ;;  %s1483_s27 = sshll.u32 %s2021_s11, 3  ;;  %v1517_v12 = vld [vmem:[%s2012_s1 + $0x8] sm:$0xff]  ;;  %v1516_v14 = vld [vmem:[%s2012_s1] sm:$0xff]  ;;  %s1288_s20 = sshll.u32 %s2021_s11, 2 }
  0x13   : > { %704 = vmatpush.bf16.msra.mxu0 %v1522_v2  ;;  %1628 = vmatpush.bf16.msra.mxu2 %v1522_v2  ;;  %s1834_s6 = scalar_lea.vmem %s2011_s0, %s1483_s27  ;;  %v1525_v13 = vld [vmem:[%s2012_s1 + $0x48] sm:$0xff]  ;;  %v1524_v15 = vld [vmem:[%s2012_s1 + $0x40] sm:$0xff]  ;;  %s1925_s22 = scalar_lea.vmem %s2015_s4, %s1288_s20 }
  0x14   : > { %793 = vmatpush.bf16.msra.mxu1 %v1530_v3  ;;  %1636 = vmatpush.bf16.msra.mxu3 %v1530_v3  ;;  %v1291_v16 = vld [vmem:[%s1834_s6] sm:$0xf]  ;;  %v1485_v17 = vld [vmem:[%s1834_s6 + $0x4] sm:$0xf0]  ;;  %v1484_v20 = vld [vmem:[%s1834_s6 + $0x4] sm:$0xf] }
  0x15   : > { %v1355_v18 = vld [vmem:[%s1834_s6 + $0x80] sm:$0xf]  ;;  %v1501_v19 = vld [vmem:[%s1834_s6 + $0x84] sm:$0xf0]  ;;  %v1293_v21 = vld [vmem:[%s1834_s6 + $0x8] sm:$0xf0]  ;;  %v1292_v24 = vor.u32 %v1485_v17, %v1291_v16 }
  0x16   : > { %v1500_v22 = vld [vmem:[%s1834_s6 + $0x84] sm:$0xf]  ;;  %v1357_v23 = vld [vmem:[%s1834_s6 + $0x88] sm:$0xf0]  ;;  %v1356_v25 = vor.u32 %v1501_v19, %v1355_v18  ;;  %v1296_v26 = vor.u32 %v1484_v20, %v1293_v21  ;;  %v1299_v28 = vld [vmem:[%s1834_s6 + $0x10] sm:$0xf] }
  0x17   : > { %705 = vmatpush.bf16.msra.mxu0 %v1521_v4  ;;  %1629 = vmatpush.bf16.msra.mxu2 %v1521_v4  ;;  %v1360_v27 = vor.u32 %v1500_v22, %v1357_v23  ;;  %v1487_v29 = vld [vmem:[%s1834_s6 + $0x14] sm:$0xf0]  ;;  %v1363_v30 = vld [vmem:[%s1834_s6 + $0x90] sm:$0xf]  ;;  %v1486_v32 = vld [vmem:[%s1834_s6 + $0x14] sm:$0xf] }
  0x18   : > { %794 = vmatpush.bf16.msra.mxu1 %v1529_v5  ;;  %1637 = vmatpush.bf16.msra.mxu3 %v1529_v5  ;;  %v1503_v31 = vld [vmem:[%s1834_s6 + $0x94] sm:$0xf0]  ;;  %v1301_v33 = vld [vmem:[%s1834_s6 + $0x18] sm:$0xf0]  ;;  %v1502_v34 = vld [vmem:[%s1834_s6 + $0x94] sm:$0xf]  ;;  %v1300_v36 = vor.u32 %v1487_v29, %v1299_v28 }
  0x19   : > { %v1365_v35 = vld [vmem:[%s1834_s6 + $0x98] sm:$0xf0]  ;;  %v1364_v37 = vor.u32 %v1503_v31, %v1363_v30  ;;  %v1304_v38 = vor.u32 %v1486_v32, %v1301_v33  ;;  %v1307_v40 = vld [vmem:[%s1834_s6 + $0x20] sm:$0xf]  ;;  %v1489_v41 = vld [vmem:[%s1834_s6 + $0x24] sm:$0xf0] }
  0x1a   : > { %v1368_v39 = vor.u32 %v1502_v34, %v1365_v35  ;;  %v1371_v42 = vld [vmem:[%s1834_s6 + $0xa0] sm:$0xf]  ;;  %v1505_v43 = vld [vmem:[%s1834_s6 + $0xa4] sm:$0xf0]  ;;  %v1488_v44 = vld [vmem:[%s1834_s6 + $0x24] sm:$0xf]  ;;  %v1308_v48 = vor.u32 %v1489_v41, %v1307_v40 }
  0x1b   : > { %706 = vmatpush.bf16.msra.mxu0 %v1520_v6  ;;  %1630 = vmatpush.bf16.msra.mxu2 %v1520_v6  ;;  %v1309_v45 = vld [vmem:[%s1834_s6 + $0x28] sm:$0xf0]  ;;  %v1504_v46 = vld [vmem:[%s1834_s6 + $0xa4] sm:$0xf]  ;;  %v1372_v49 = vor.u32 %v1505_v43, %v1371_v42  ;;  %v1315_v52 = vld [vmem:[%s1834_s6 + $0x30] sm:$0xf] }
  0x1c   : > { %795 = vmatpush.bf16.msra.mxu1 %v1528_v7  ;;  %1638 = vmatpush.bf16.msra.mxu3 %v1528_v7  ;;  %v1373_v47 = vld [vmem:[%s1834_s6 + $0xa8] sm:$0xf0]  ;;  %v1312_v50 = vor.u32 %v1488_v44, %v1309_v45  ;;  %v1491_v53 = vld [vmem:[%s1834_s6 + $0x34] sm:$0xf0]  ;;  %v1379_v54 = vld [vmem:[%s1834_s6 + $0xb0] sm:$0xf] }
  0x1d   : > { %v1376_v51 = vor.u32 %v1504_v46, %v1373_v47  ;;  %v1507_v55 = vld [vmem:[%s1834_s6 + $0xb4] sm:$0xf0]  ;;  %v1490_v56 = vld [vmem:[%s1834_s6 + $0x34] sm:$0xf]  ;;  %v1317_v57 = vld [vmem:[%s1834_s6 + $0x38] sm:$0xf0]  ;;  %v1316_v60 = vor.u32 %v1491_v53, %v1315_v52 }
  0x1e   : > { %v1506_v58 = vld [vmem:[%s1834_s6 + $0xb4] sm:$0xf]  ;;  %v1381_v59 = vld [vmem:[%s1834_s6 + $0xb8] sm:$0xf0]  ;;  %v1380_v61 = vor.u32 %v1507_v55, %v1379_v54  ;;  %v1320_v62 = vor.u32 %v1490_v56, %v1317_v57  ;;  %v1323_v0 = vld [vmem:[%s1834_s6 + $0x40] sm:$0xf] }
  0x1f   : > { %707 = vmatpush.bf16.msra.mxu0 %v1519_v8  ;;  %1631 = vmatpush.bf16.msra.mxu2 %v1519_v8  ;;  %v1384_v63 = vor.u32 %v1506_v58, %v1381_v59  ;;  %v1493_v1 = vld [vmem:[%s1834_s6 + $0x44] sm:$0xf0]  ;;  %v1387_v2 = vld [vmem:[%s1834_s6 + $0xc0] sm:$0xf]  ;;  %v1492_v4 = vld [vmem:[%s1834_s6 + $0x44] sm:$0xf] }
  0x20   : > { %796 = vmatpush.bf16.msra.mxu1 %v1527_v9  ;;  %1639 = vmatpush.bf16.msra.mxu3 %v1527_v9  ;;  %v1509_v3 = vld [vmem:[%s1834_s6 + $0xc4] sm:$0xf0]  ;;  %v1325_v5 = vld [vmem:[%s1834_s6 + $0x48] sm:$0xf0]  ;;  %v1508_v6 = vld [vmem:[%s1834_s6 + $0xc4] sm:$0xf]  ;;  %v1324_v8 = vor.u32 %v1493_v1, %v1323_v0 }
  0x21   : > { %v1389_v7 = vld [vmem:[%s1834_s6 + $0xc8] sm:$0xf0]  ;;  %v1388_v9 = vor.u32 %v1509_v3, %v1387_v2  ;;  %v1494_v16 = vld [vmem:[%s1834_s6 + $0x54] sm:$0xf]  ;;  %v1333_v17 = vld [vmem:[%s1834_s6 + $0x58] sm:$0xf0] }
  0x22   : > { %v1510_v18 = vld [vmem:[%s1834_s6 + $0xd4] sm:$0xf]  ;;  %v1397_v19 = vld [vmem:[%s1834_s6 + $0xd8] sm:$0xf0]  ;;  %v1336_v22 = vor.u32 %v1494_v16, %v1333_v17  ;;  %v1496_v28 = vld [vmem:[%s1834_s6 + $0x64] sm:$0xf] }
  0x23   : > { %708 = vmatpush.bf16.msra.mxu0 %v1518_v10  ;;  %1632 = vmatpush.bf16.msra.mxu2 %v1518_v10  ;;  %v1328_v10 = vor.u32 %v1492_v4, %v1325_v5  ;;  %v1400_v23 = vor.u32 %v1510_v18, %v1397_v19  ;;  %v1341_v29 = vld [vmem:[%s1834_s6 + $0x68] sm:$0xf0]  ;;  %v1512_v30 = vld [vmem:[%s1834_s6 + $0xe4] sm:$0xf]  ;;  %v1498_v40 = vld [vmem:[%s1834_s6 + $0x74] sm:$0xf] }
  0x24   : > { %797 = vmatpush.bf16.msra.mxu1 %v1526_v11  ;;  %1640 = vmatpush.bf16.msra.mxu3 %v1526_v11  ;;  %v1392_v11 = vor.u32 %v1508_v6, %v1389_v7  ;;  %v1405_v31 = vld [vmem:[%s1834_s6 + $0xe8] sm:$0xf0]  ;;  %v1344_v34 = vor.u32 %v1496_v28, %v1341_v29  ;;  %v1349_v41 = vld [vmem:[%s1834_s6 + $0x78] sm:$0xf0]  ;;  %v1514_v42 = vld [vmem:[%s1834_s6 + $0xf4] sm:$0xf] }
  0x25   : > { %v1408_v35 = vor.u32 %v1512_v30, %v1405_v31  ;;  %v1413_v43 = vld [vmem:[%s1834_s6 + $0xf8] sm:$0xf0]  ;;  %v1352_v46 = vor.u32 %v1498_v40, %v1349_v41  ;;  %v1915_v55 = vld [vmem:[%s2014_s3] ss:$0 sm:$0xff] }
  0x26   : > { %v1416_v47 = vor.u32 %v1514_v42, %v1413_v43 }
  0x27   : > { %709 = vmatpush.bf16.msra.mxu0 %v1517_v12  ;;  %1633 = vmatpush.bf16.msra.mxu2 %v1517_v12  ;;  %v1331_v12 = vld [vmem:[%s1834_s6 + $0x50] sm:$0xf] }
  0x28   : > { %798 = vmatpush.bf16.msra.mxu1 %v1525_v13  ;;  %1641 = vmatpush.bf16.msra.mxu3 %v1525_v13  ;;  %v1495_v13 = vld [vmem:[%s1834_s6 + $0x54] sm:$0xf0] }
  0x29   : > { %v1332_v20 = vor.u32 %v1495_v13, %v1331_v12 }
  0x2b   : > { %710 = vmatpush.bf16.msra.mxu0 %v1516_v14  ;;  %1634 = vmatpush.bf16.msra.mxu2 %v1516_v14  ;;  %v1395_v14 = vld [vmem:[%s1834_s6 + $0xd0] sm:$0xf] }
  0x2c   : > { %799 = vmatpush.bf16.msra.mxu1 %v1524_v15  ;;  %1642 = vmatpush.bf16.msra.mxu3 %v1524_v15  ;;  %v1511_v15 = vld [vmem:[%s1834_s6 + $0xd4] sm:$0xf0] }
  0x2d   : > { %v1396_v21 = vor.u32 %v1511_v15, %v1395_v14 }
  0x2e   : > { %711 = vmatmul.bf16.vlgmr.msra.gmra.mxu0 %v1292_v24  ;;  %751 = vmatmul.bf16.vlgmr.msra.gmra.mxu2 %v1356_v25  ;;  %v1339_v24 = vld [vmem:[%s1834_s6 + $0x60] sm:$0xf]  ;;  %v1497_v25 = vld [vmem:[%s1834_s6 + $0x64] sm:$0xf0] }
  0x2f   : > { %800 = vmatmul.bf16.vlgmr.msra.gmra.mxu1 %v1296_v26  ;;  %840 = vmatmul.bf16.vlgmr.msra.gmra.mxu3 %v1360_v27  ;;  %v1403_v26 = vld [vmem:[%s1834_s6 + $0xe0] sm:$0xf]  ;;  %v1513_v27 = vld [vmem:[%s1834_s6 + $0xe4] sm:$0xf0]  ;;  %v1340_v32 = vor.u32 %v1497_v25, %v1339_v24 }
  0x30   : > { %v1404_v33 = vor.u32 %v1513_v27, %v1403_v26 }
  0x3e   : > { %716 = vmatmul.bf16.gmra.mxu0 %v1300_v36  ;;  %756 = vmatmul.bf16.gmra.mxu2 %v1364_v37  ;;  %v1347_v36 = vld [vmem:[%s1834_s6 + $0x70] sm:$0xf]  ;;  %v1499_v37 = vld [vmem:[%s1834_s6 + $0x74] sm:$0xf0] }
  0x3f   : > { %805 = vmatmul.bf16.gmra.mxu1 %v1304_v38  ;;  %845 = vmatmul.bf16.gmra.mxu3 %v1368_v39  ;;  %v1411_v38 = vld [vmem:[%s1834_s6 + $0xf0] sm:$0xf]  ;;  %v1515_v39 = vld [vmem:[%s1834_s6 + $0xf4] sm:$0xf0]  ;;  %v1348_v44 = vor.u32 %v1499_v37, %v1347_v36 }
  0x40   : > { %v1412_v45 = vor.u32 %v1515_v39, %v1411_v38 }
  0x4e   : > { %721 = vmatmul.bf16.gmra.mxu0 %v1308_v48  ;;  %761 = vmatmul.bf16.gmra.mxu2 %v1372_v49 }
  0x4f   : > { %810 = vmatmul.bf16.gmra.mxu1 %v1312_v50  ;;  %850 = vmatmul.bf16.gmra.mxu3 %v1376_v51  ;;  %v1909_v51 = vld [vmem:[#allocation3] ss:$0 sm:$0xff] }
  0x5e   : > { %726 = vmatmul.bf16.gmra.mxu0 %v1316_v60  ;;  %766 = vmatmul.bf16.gmra.mxu2 %v1380_v61 }
  0x5f   : > { %815 = vmatmul.bf16.gmra.mxu1 %v1320_v62  ;;  %855 = vmatmul.bf16.gmra.mxu3 %v1384_v63 }
  0x6e   : > { %731 = vmatmul.bf16.gmra.mxu0 %v1324_v8  ;;  %771 = vmatmul.bf16.gmra.mxu2 %v1388_v9 }
  0x6f   : > { %820 = vmatmul.bf16.gmra.mxu1 %v1328_v10  ;;  %860 = vmatmul.bf16.gmra.mxu3 %v1392_v11 }
  0x7e   : > { %736 = vmatmul.bf16.gmra.mxu0 %v1332_v20  ;;  %776 = vmatmul.bf16.gmra.mxu2 %v1396_v21 }
  0x7f   : > { %825 = vmatmul.bf16.gmra.mxu1 %v1336_v22  ;;  %865 = vmatmul.bf16.gmra.mxu3 %v1400_v23 }
  0x8e   : > { %741 = vmatmul.bf16.gmra.mxu0 %v1340_v32  ;;  %781 = vmatmul.bf16.gmra.mxu2 %v1404_v33 }
  0x8f   : > { %830 = vmatmul.bf16.gmra.mxu1 %v1344_v34  ;;  %870 = vmatmul.bf16.gmra.mxu3 %v1408_v35 }
  0x9e   : > { %746 = vmatmul.bf16.gmra.mxu0 %v1348_v44  ;;  %786 = vmatmul.bf16.gmra.mxu2 %v1412_v45 }
  0x9f   : > { %835 = vmatmul.bf16.gmra.mxu1 %v1352_v46  ;;  %875 = vmatmul.bf16.gmra.mxu3 %v1416_v47 }
  0xab   : > { %v712_v48 = vpop.f32.mrf.mxu0 }
  0xac   : > { %v801_v49 = vpop.f32.mrf.mxu1 }
  0xad   : > { %v802_v50 = vadd.f32 %v801_v49, %v712_v48 }
  0xaf   : > { %v984_v54 = vmul.f32 %v1909_v51, %v802_v50 }
  0xb1   : > { %v752_v52 = vpop.f32.mrf.mxu2  ;;  %v1020_v60 = vadd.f32 %v1915_v55, %v984_v54 }
  0xb2   : > { %v841_v53 = vpop.f32.mrf.mxu3 }
  0xb3   : > { %v714_v56 = vpop.f32.mrf.mxu0  ;;  %v842_v58 = vadd.f32 %v841_v53, %v752_v52  ;;  %v1052_v2 = vmax.f32 %v1020_v60, 0.0 }
  0xb4   : > { %v803_v57 = vpop.f32.mrf.mxu1 }
  0xb5   : > { %v804_v59 = vadd.f32 %v803_v57, %v714_v56  ;;  %v1000_v62 = vmul.f32 %v1909_v51, %v842_v58 }
  0xb7   : > { %v985_v61 = vmul.f32 %v1909_v51, %v804_v59  ;;  %v1036_v7 = vadd.f32 %v1915_v55, %v1000_v62 }
  0xb9   : > { %v1021_v63 = vadd.f32 %v1915_v55, %v985_v61  ;;  %v754_v0 = vpop.f32.mrf.mxu2  ;;  %v1068_v12 = vmax.f32 %v1036_v7, 0.0 }
  0xba   : > { %v843_v1 = vpop.f32.mrf.mxu3 }
  0xbb   : > { %v1053_v3 = vmax.f32 %v1021_v63, 0.0  ;;  %v844_v4 = vadd.f32 %v843_v1, %v754_v0  ;;  %v717_v5 = vpop.f32.mrf.mxu0 }
  0xbc   : > { %v806_v6 = vpop.f32.mrf.mxu1 }
  0xbd   : > { %v1535_v8 = vpack.c.bf16 %v1053_v3, %v1052_v2  ;;  %v1001_v9 = vmul.f32 %v1909_v51, %v844_v4  ;;  %v807_v11 = vadd.f32 %v806_v6, %v717_v5 }
  0xbf   : > { %1536 = vst [vmem:[%s1925_s22] sm:$0xff] %v1535_v8   ;;  %v1037_v10 = vadd.f32 %v1915_v55, %v1001_v9  ;;  %v986_v17 = vmul.f32 %v1909_v51, %v807_v11 }
  0xc1   : > { %v1069_v13 = vmax.f32 %v1037_v10, 0.0  ;;  %v757_v14 = vpop.f32.mrf.mxu2  ;;  %v1022_v22 = vadd.f32 %v1915_v55, %v986_v17 }
  0xc2   : > { %v846_v15 = vpop.f32.mrf.mxu3 }
  0xc3   : > { %v1575_v16 = vpack.c.bf16 %v1069_v13, %v1068_v12  ;;  %v719_v18 = vpop.f32.mrf.mxu0  ;;  %v847_v20 = vadd.f32 %v846_v15, %v757_v14  ;;  %v1054_v28 = vmax.f32 %v1022_v22, 0.0 }
  0xc4   : > { %v808_v19 = vpop.f32.mrf.mxu1 }
  0xc5   : > { %1619 = vst [vmem:[%s1925_s22 + $0x40] sm:$0xff] %v1575_v16   ;;  %v809_v21 = vadd.f32 %v808_v19, %v719_v18  ;;  %v1002_v24 = vmul.f32 %v1909_v51, %v847_v20 }
  0xc7   : > { %v987_v23 = vmul.f32 %v1909_v51, %v809_v21  ;;  %v1038_v33 = vadd.f32 %v1915_v55, %v1002_v24 }
  0xc9   : > { %v1023_v25 = vadd.f32 %v1915_v55, %v987_v23  ;;  %v759_v26 = vpop.f32.mrf.mxu2  ;;  %v1070_v38 = vmax.f32 %v1038_v33, 0.0 }
  0xca   : > { %v848_v27 = vpop.f32.mrf.mxu3 }
  0xcb   : > { %v1055_v29 = vmax.f32 %v1023_v25, 0.0  ;;  %v849_v30 = vadd.f32 %v848_v27, %v759_v26  ;;  %v722_v31 = vpop.f32.mrf.mxu0 }
  0xcc   : > { %v811_v32 = vpop.f32.mrf.mxu1 }
  0xcd   : > { %v1540_v34 = vpack.c.bf16 %v1055_v29, %v1054_v28  ;;  %v1003_v35 = vmul.f32 %v1909_v51, %v849_v30  ;;  %v812_v37 = vadd.f32 %v811_v32, %v722_v31 }
  0xcf   : > { %1612 = vst [vmem:[%s1925_s22 + $0x8] sm:$0xff] %v1540_v34   ;;  %v1039_v36 = vadd.f32 %v1915_v55, %v1003_v35  ;;  %v988_v43 = vmul.f32 %v1909_v51, %v812_v37 }
  0xd1   : > { %v1071_v39 = vmax.f32 %v1039_v36, 0.0  ;;  %v762_v40 = vpop.f32.mrf.mxu2  ;;  %v1024_v48 = vadd.f32 %v1915_v55, %v988_v43 }
  0xd2   : > { %v851_v41 = vpop.f32.mrf.mxu3 }
  0xd3   : > { %v1580_v42 = vpack.c.bf16 %v1071_v39, %v1070_v38  ;;  %v724_v44 = vpop.f32.mrf.mxu0  ;;  %v852_v46 = vadd.f32 %v851_v41, %v762_v40  ;;  %v1056_v56 = vmax.f32 %v1024_v48, 0.0 }
  0xd4   : > { %v813_v45 = vpop.f32.mrf.mxu1 }
  0xd5   : > { %1620 = vst [vmem:[%s1925_s22 + $0x48] sm:$0xff] %v1580_v42   ;;  %v814_v47 = vadd.f32 %v813_v45, %v724_v44  ;;  %v1004_v50 = vmul.f32 %v1909_v51, %v852_v46 }
  0xd7   : > { %v989_v49 = vmul.f32 %v1909_v51, %v814_v47  ;;  %v1040_v61 = vadd.f32 %v1915_v55, %v1004_v50 }
  0xd9   : > { %v1025_v52 = vadd.f32 %v1915_v55, %v989_v49  ;;  %v764_v53 = vpop.f32.mrf.mxu2  ;;  %v1072_v2 = vmax.f32 %v1040_v61, 0.0 }
  0xda   : > { %v853_v54 = vpop.f32.mrf.mxu3 }
  0xdb   : > { %v1057_v57 = vmax.f32 %v1025_v52, 0.0  ;;  %v854_v58 = vadd.f32 %v853_v54, %v764_v53  ;;  %v727_v59 = vpop.f32.mrf.mxu0 }
  0xdc   : > { %v816_v60 = vpop.f32.mrf.mxu1 }
  0xdd   : > { %v1545_v62 = vpack.c.bf16 %v1057_v57, %v1056_v56  ;;  %v1005_v63 = vmul.f32 %v1909_v51, %v854_v58  ;;  %v817_v1 = vadd.f32 %v816_v60, %v727_v59 }
  0xdf   : > { %1613 = vst [vmem:[%s1925_s22 + $0x10] sm:$0xff] %v1545_v62   ;;  %v1041_v0 = vadd.f32 %v1915_v55, %v1005_v63  ;;  %v990_v7 = vmul.f32 %v1909_v51, %v817_v1 }
  0xe1   : > { %v1073_v3 = vmax.f32 %v1041_v0, 0.0  ;;  %v767_v4 = vpop.f32.mrf.mxu2  ;;  %v1026_v12 = vadd.f32 %v1915_v55, %v990_v7 }
  0xe2   : > { %v856_v5 = vpop.f32.mrf.mxu3 }
  0xe3   : > { %v1585_v6 = vpack.c.bf16 %v1073_v3, %v1072_v2  ;;  %v729_v8 = vpop.f32.mrf.mxu0  ;;  %v857_v10 = vadd.f32 %v856_v5, %v767_v4  ;;  %v1058_v18 = vmax.f32 %v1026_v12, 0.0 }
  0xe4   : > { %v818_v9 = vpop.f32.mrf.mxu1 }
  0xe5   : > { %1621 = vst [vmem:[%s1925_s22 + $0x50] sm:$0xff] %v1585_v6   ;;  %v819_v11 = vadd.f32 %v818_v9, %v729_v8  ;;  %v1006_v14 = vmul.f32 %v1909_v51, %v857_v10 }
  0xe7   : > { %v991_v13 = vmul.f32 %v1909_v51, %v819_v11  ;;  %v1042_v23 = vadd.f32 %v1915_v55, %v1006_v14 }
  0xe9   : > { %v1027_v15 = vadd.f32 %v1915_v55, %v991_v13  ;;  %v769_v16 = vpop.f32.mrf.mxu2  ;;  %v1074_v28 = vmax.f32 %v1042_v23, 0.0 }
  0xea   : > { %v858_v17 = vpop.f32.mrf.mxu3 }
  0xeb   : > { %v1059_v19 = vmax.f32 %v1027_v15, 0.0  ;;  %v859_v20 = vadd.f32 %v858_v17, %v769_v16  ;;  %v732_v21 = vpop.f32.mrf.mxu0 }
  0xec   : > { %v821_v22 = vpop.f32.mrf.mxu1 }
  0xed   : > { %v1550_v24 = vpack.c.bf16 %v1059_v19, %v1058_v18  ;;  %v1007_v25 = vmul.f32 %v1909_v51, %v859_v20  ;;  %v822_v27 = vadd.f32 %v821_v22, %v732_v21 }
  0xef   : > { %1614 = vst [vmem:[%s1925_s22 + $0x18] sm:$0xff] %v1550_v24   ;;  %v1043_v26 = vadd.f32 %v1915_v55, %v1007_v25  ;;  %v992_v33 = vmul.f32 %v1909_v51, %v822_v27 }
  0xf1   : > { %v1075_v29 = vmax.f32 %v1043_v26, 0.0  ;;  %v772_v30 = vpop.f32.mrf.mxu2  ;;  %v1028_v38 = vadd.f32 %v1915_v55, %v992_v33 }
  0xf2   : > { %v861_v31 = vpop.f32.mrf.mxu3 }
  0xf3   : > { %v1590_v32 = vpack.c.bf16 %v1075_v29, %v1074_v28  ;;  %v734_v34 = vpop.f32.mrf.mxu0  ;;  %v862_v36 = vadd.f32 %v861_v31, %v772_v30  ;;  %v1060_v44 = vmax.f32 %v1028_v38, 0.0 }
  0xf4   : > { %v823_v35 = vpop.f32.mrf.mxu1 }
  0xf5   : > { %1622 = vst [vmem:[%s1925_s22 + $0x58] sm:$0xff] %v1590_v32   ;;  %v824_v37 = vadd.f32 %v823_v35, %v734_v34  ;;  %v1008_v40 = vmul.f32 %v1909_v51, %v862_v36 }
  0xf7   : > { %v993_v39 = vmul.f32 %v1909_v51, %v824_v37  ;;  %v1044_v49 = vadd.f32 %v1915_v55, %v1008_v40 }
  0xf9   : > { %v1029_v41 = vadd.f32 %v1915_v55, %v993_v39  ;;  %v774_v42 = vpop.f32.mrf.mxu2  ;;  %v1076_v56 = vmax.f32 %v1044_v49, 0.0 }
  0xfa   : > { %v863_v43 = vpop.f32.mrf.mxu3 }
  0xfb   : > { %v1061_v45 = vmax.f32 %v1029_v41, 0.0  ;;  %v864_v46 = vadd.f32 %v863_v43, %v774_v42  ;;  %v737_v47 = vpop.f32.mrf.mxu0 }
  0xfc   : > { %v826_v48 = vpop.f32.mrf.mxu1 }
  0xfd   : > { %v1555_v50 = vpack.c.bf16 %v1061_v45, %v1060_v44  ;;  %v1009_v52 = vmul.f32 %v1909_v51, %v864_v46  ;;  %v827_v54 = vadd.f32 %v826_v48, %v737_v47 }
  0xff   : > { %1615 = vst [vmem:[%s1925_s22 + $0x20] sm:$0xff] %v1555_v50   ;;  %v1045_v53 = vadd.f32 %v1915_v55, %v1009_v52  ;;  %v994_v61 = vmul.f32 %v1909_v51, %v827_v54 }
 0x101   : > { %v1077_v57 = vmax.f32 %v1045_v53, 0.0  ;;  %v777_v58 = vpop.f32.mrf.mxu2  ;;  %v1030_v2 = vadd.f32 %v1915_v55, %v994_v61 }
 0x102   : > { %v866_v59 = vpop.f32.mrf.mxu3 }
 0x103   : > { %v1595_v60 = vpack.c.bf16 %v1077_v57, %v1076_v56  ;;  %v739_v62 = vpop.f32.mrf.mxu0  ;;  %v867_v0 = vadd.f32 %v866_v59, %v777_v58  ;;  %v1062_v8 = vmax.f32 %v1030_v2, 0.0 }
 0x104   : > { %v828_v63 = vpop.f32.mrf.mxu1 }
 0x105   : > { %1623 = vst [vmem:[%s1925_s22 + $0x60] sm:$0xff] %v1595_v60   ;;  %v829_v1 = vadd.f32 %v828_v63, %v739_v62  ;;  %v1010_v4 = vmul.f32 %v1909_v51, %v867_v0 }
 0x107   : > { %v995_v3 = vmul.f32 %v1909_v51, %v829_v1  ;;  %v1046_v13 = vadd.f32 %v1915_v55, %v1010_v4 }
 0x109   : > { %v1031_v5 = vadd.f32 %v1915_v55, %v995_v3  ;;  %v779_v6 = vpop.f32.mrf.mxu2  ;;  %v1078_v18 = vmax.f32 %v1046_v13, 0.0 }
 0x10a   : > { %v868_v7 = vpop.f32.mrf.mxu3 }
 0x10b   : > { %v1063_v9 = vmax.f32 %v1031_v5, 0.0  ;;  %v869_v10 = vadd.f32 %v868_v7, %v779_v6  ;;  %v742_v11 = vpop.f32.mrf.mxu0 }
 0x10c   : > { %v831_v12 = vpop.f32.mrf.mxu1 }
 0x10d   : > { %v1560_v14 = vpack.c.bf16 %v1063_v9, %v1062_v8  ;;  %v1011_v15 = vmul.f32 %v1909_v51, %v869_v10  ;;  %v832_v17 = vadd.f32 %v831_v12, %v742_v11 }
 0x10f   : > { %1616 = vst [vmem:[%s1925_s22 + $0x28] sm:$0xff] %v1560_v14   ;;  %v1047_v16 = vadd.f32 %v1915_v55, %v1011_v15  ;;  %v996_v23 = vmul.f32 %v1909_v51, %v832_v17 }
 0x111   : > { %v1079_v19 = vmax.f32 %v1047_v16, 0.0  ;;  %v782_v20 = vpop.f32.mrf.mxu2  ;;  %v1032_v28 = vadd.f32 %v1915_v55, %v996_v23 }
 0x112   : > { %v871_v21 = vpop.f32.mrf.mxu3 }
 0x113   : > { %v1600_v22 = vpack.c.bf16 %v1079_v19, %v1078_v18  ;;  %v744_v24 = vpop.f32.mrf.mxu0  ;;  %v872_v26 = vadd.f32 %v871_v21, %v782_v20  ;;  %v1064_v34 = vmax.f32 %v1032_v28, 0.0 }
 0x114   : > { %v833_v25 = vpop.f32.mrf.mxu1 }
 0x115   : > { %1624 = vst [vmem:[%s1925_s22 + $0x68] sm:$0xff] %v1600_v22   ;;  %v834_v27 = vadd.f32 %v833_v25, %v744_v24  ;;  %v1012_v30 = vmul.f32 %v1909_v51, %v872_v26 }
 0x117   : > { %v997_v29 = vmul.f32 %v1909_v51, %v834_v27  ;;  %v1048_v39 = vadd.f32 %v1915_v55, %v1012_v30 }
 0x119   : > { %v1033_v31 = vadd.f32 %v1915_v55, %v997_v29  ;;  %v784_v32 = vpop.f32.mrf.mxu2  ;;  %v1080_v44 = vmax.f32 %v1048_v39, 0.0 }
 0x11a   : > { %v873_v33 = vpop.f32.mrf.mxu3 }
 0x11b   : > { %v1065_v35 = vmax.f32 %v1033_v31, 0.0  ;;  %v874_v36 = vadd.f32 %v873_v33, %v784_v32  ;;  %v747_v37 = vpop.f32.mrf.mxu0 }
 0x11c   : > { %v836_v38 = vpop.f32.mrf.mxu1 }
 0x11d   : > { %v1565_v40 = vpack.c.bf16 %v1065_v35, %v1064_v34  ;;  %v1013_v41 = vmul.f32 %v1909_v51, %v874_v36  ;;  %v837_v43 = vadd.f32 %v836_v38, %v747_v37 }
 0x11f   : > { %1617 = vst [vmem:[%s1925_s22 + $0x30] sm:$0xff] %v1565_v40   ;;  %v1049_v42 = vadd.f32 %v1915_v55, %v1013_v41  ;;  %v998_v49 = vmul.f32 %v1909_v51, %v837_v43 }
 0x121   : > { %v1081_v45 = vmax.f32 %v1049_v42, 0.0  ;;  %v787_v46 = vpop.f32.mrf.mxu2  ;;  %v1034_v56 = vadd.f32 %v1915_v55, %v998_v49 }
 0x122   : > { %v876_v47 = vpop.f32.mrf.mxu3 }
 0x123   : > { %v1605_v48 = vpack.c.bf16 %v1081_v45, %v1080_v44  ;;  %v749_v50 = vpop.f32.mrf.mxu0  ;;  %v877_v53 = vadd.f32 %v876_v47, %v787_v46  ;;  %v1066_v62 = vmax.f32 %v1034_v56, 0.0 }
 0x124   : > { %v838_v52 = vpop.f32.mrf.mxu1 }
 0x125   : > { %1625 = vst [vmem:[%s1925_s22 + $0x70] sm:$0xff] %v1605_v48   ;;  %v839_v54 = vadd.f32 %v838_v52, %v749_v50  ;;  %v1014_v58 = vmul.f32 %v1909_v51, %v877_v53 }
 0x127   : > { %v999_v57 = vmul.f32 %v1909_v51, %v839_v54  ;;  %v1050_v1 = vadd.f32 %v1915_v55, %v1014_v58 }
 0x129   : > { %v1035_v59 = vadd.f32 %v1915_v55, %v999_v57  ;;  %v789_v60 = vpop.f32.mrf.mxu2  ;;  %v1082_v5 = vmax.f32 %v1050_v1, 0.0 }
 0x12a   : > { %v878_v61 = vpop.f32.mrf.mxu3 }
 0x12b   : > { %v1067_v63 = vmax.f32 %v1035_v59, 0.0  ;;  %v879_v0 = vadd.f32 %v878_v61, %v789_v60 }
 0x12d   : > { %v1570_v2 = vpack.c.bf16 %v1067_v63, %v1066_v62  ;;  %v1015_v3 = vmul.f32 %v1909_v51, %v879_v0 }
 0x12f   : > { %1618 = vst [vmem:[%s1925_s22 + $0x38] sm:$0xff] %v1570_v2   ;;  %v1051_v4 = vadd.f32 %v1915_v55, %v1015_v3 }
 0x131   : > { %v1083_v6 = vmax.f32 %v1051_v4, 0.0 }
 0x133   : > { %v1610_v7 = vpack.c.bf16 %v1083_v6, %v1082_v5 }
 0x135   : > { %1626 = vst [vmem:[%s1925_s22 + $0x78] sm:$0xff] %v1610_v7  }
 0x136 PF: > { %s15_s17 = sadd.s32 1, %s1736_s17   ;;  %s2016_s15 = smov %s1732_s16 }
 0x137   : > { %p12_p8 = scmp.ge.s32.totalorder %s15_s17, 4   ;;  %s2017_s16 = smov %s2019_s19 }
 0x139   :  { %14 = sbr.rel (!%p12_p8) target bundleno = 2 (0x2), region = 86 }
 0x13e   :  { %1176 = vsyncpa [#allocation4], 1 }
 0x13f   :  { %1178 = vsyncpa [#allocation4 + $0x1], 1 }

// kernel: resnet18_forward.23
= control target key start
LH: loop header
LB: loop body
LE: loop exit
PB: predicated region body
PF: predicated region fallthrough
CT: control target
= control target key end

     0   :  { %s1404_s0 = inlined_call_operand.vmem [shape: bf16[128,128], index: 0, kind: input, shape index: {}]   ;;  %s1405_s1 = inlined_call_operand.vmem [shape: bf16[128,128], index: 1, kind: input, shape index: {}]   ;;  %s1406_s2 = inlined_call_operand.vmem [shape: bf16[128,128], index: 2, kind: input, shape index: {}]   ;;  %s1407_s3 = inlined_call_operand.vmem [shape: bf16[128,128], index: 3, kind: input, shape index: {}]   ;;  %s1408_s4 = inlined_call_operand.vmem [shape: bf16[128,128], index: 4, kind: input, shape index: {}]   ;;  %s1409_s5 = inlined_call_operand.vmem [shape: bf16[128,128], index: 5, kind: input, shape index: {}]   ;;  %s1410_s6 = inlined_call_operand.vmem [shape: bf16[128,128], index: 6, kind: input, shape index: {}]   ;;  %s1411_s7 = inlined_call_operand.vmem [shape: bf16[128,128], index: 7, kind: input, shape index: {}]   ;;  %s1412_s8 = inlined_call_operand.vmem [shape: bf16[128,128], index: 8, kind: input, shape index: {}]   ;;  %s1413_s9 = inlined_call_operand.vmem [shape: bf16[128,128], index: 9, kind: output, shape index: {}]  }
   0x1   :  { %v709_v0 = vld [vmem:[%s1404_s0] sm:$0xff]   ;;  %v1036_v20 = vld [vmem:[%s1404_s0 + $0x8] sm:$0xff]   ;;  %v1037_v61 = vld [vmem:[%s1404_s0 + $0x10] sm:$0xff]  }
   0x2   :  { %v741_v1 = vld [vmem:[%s1405_s1] sm:$0xff]   ;;  %v710_v3 = vunpack.c.l.bf16 %v709_v0  ;;  %v711_v4 = vunpack.c.h.bf16 %v709_v0  ;;  %v1043_v25 = vld [vmem:[%s1405_s1 + $0x8] sm:$0xff]   ;;  %v714_v34 = vunpack.c.l.bf16 %v1036_v20  ;;  %v715_v35 = vunpack.c.h.bf16 %v1036_v20 }
   0x3   :  { %v773_v2 = vld [vmem:[%s1406_s2] sm:$0xff]   ;;  %v742_v5 = vunpack.c.l.bf16 %v741_v1  ;;  %v743_v6 = vunpack.c.h.bf16 %v741_v1  ;;  %v1050_v30 = vld [vmem:[%s1406_s2 + $0x8] sm:$0xff]   ;;  %v746_v38 = vunpack.c.l.bf16 %v1043_v25  ;;  %v747_v39 = vunpack.c.h.bf16 %v1043_v25  ;;  %v1065_v25 = vld [vmem:[%s1408_s4 + $0x10] sm:$0xff]  }
   0x4   :  { %v805_v7 = vld [vmem:[%s1407_s3] sm:$0xff]   ;;  %v774_v10 = vunpack.c.l.bf16 %v773_v2  ;;  %v775_v11 = vunpack.c.h.bf16 %v773_v2  ;;  %v1057_v31 = vld [vmem:[%s1407_s3 + $0x8] sm:$0xff]   ;;  %v778_v42 = vunpack.c.l.bf16 %v1050_v30  ;;  %v779_v43 = vunpack.c.h.bf16 %v1050_v30  ;;  %v1072_v30 = vld [vmem:[%s1409_s5 + $0x10] sm:$0xff]  }
   0x5   :  { %v837_v8 = vld [vmem:[%s1408_s4] sm:$0xff]   ;;  %v806_v12 = vunpack.c.l.bf16 %v805_v7  ;;  %v96_v15 = vmax.f32 %v710_v3, %v742_v5  ;;  %v97_v16 = vmax.f32 %v711_v4, %v743_v6  ;;  %v807_v17 = vunpack.c.h.bf16 %v805_v7  ;;  %v1064_v40 = vld [vmem:[%s1408_s4 + $0x8] sm:$0xff]   ;;  %v1044_v6 = vld [vmem:[%s1405_s1 + $0x10] sm:$0xff]  }
   0x6   :  { %v869_v9 = vld [vmem:[%s1409_s5] sm:$0xff]   ;;  %v838_v18 = vunpack.c.l.bf16 %v837_v8  ;;  %v839_v21 = vunpack.c.h.bf16 %v837_v8  ;;  %v1071_v41 = vld [vmem:[%s1409_s5 + $0x8] sm:$0xff]   ;;  %v810_v44 = vunpack.c.l.bf16 %v1057_v31  ;;  %v811_v45 = vunpack.c.h.bf16 %v1057_v31  ;;  %v1051_v7 = vld [vmem:[%s1406_s2 + $0x10] sm:$0xff]  }
   0x7   :  { %v901_v13 = vld [vmem:[%s1410_s6] sm:$0xff]   ;;  %v870_v22 = vunpack.c.l.bf16 %v869_v9  ;;  %v871_v23 = vunpack.c.h.bf16 %v869_v9  ;;  %v176_v26 = vmax.f32 %v96_v15, %v774_v10  ;;  %v177_v27 = vmax.f32 %v97_v16, %v775_v11  ;;  %v1078_v50 = vld [vmem:[%s1410_s6 + $0x8] sm:$0xff]   ;;  %v1058_v16 = vld [vmem:[%s1407_s3 + $0x10] sm:$0xff]  }
   0x8   :  { %v1180_v14 = vld [vmem:[%s1411_s7] sm:$0xff]   ;;  %v902_v24 = vunpack.c.l.bf16 %v901_v13  ;;  %v903_v28 = vunpack.c.h.bf16 %v901_v13  ;;  %v98_v48 = vmax.f32 %v714_v34, %v746_v38  ;;  %v99_v49 = vmax.f32 %v715_v35, %v747_v39  ;;  %v1085_v51 = vld [vmem:[%s1411_s7 + $0x8] sm:$0xff]  }
   0x9   :  { %v1185_v19 = vld [vmem:[%s1412_s8] sm:$0xff]   ;;  %v934_v29 = vunpack.c.l.bf16 %v1180_v14  ;;  %v935_v32 = vunpack.c.h.bf16 %v1180_v14  ;;  %v256_v36 = vmax.f32 %v176_v26, %v806_v12  ;;  %v257_v37 = vmax.f32 %v177_v27, %v807_v17  ;;  %v1092_v60 = vld [vmem:[%s1412_s8 + $0x8] sm:$0xff]  }
   0xa   :  { %v966_v33 = vunpack.c.l.bf16 %v1185_v19  ;;  %v967_v52 = vunpack.c.h.bf16 %v1185_v19  ;;  %v842_v53 = vunpack.c.l.bf16 %v1064_v40  ;;  %v843_v54 = vunpack.c.h.bf16 %v1064_v40  ;;  %v1086_v40 = vld [vmem:[%s1411_s7 + $0x10] sm:$0xff]  }
   0xb   :  { %v336_v46 = vmax.f32 %v256_v36, %v838_v18  ;;  %v337_v47 = vmax.f32 %v257_v37, %v839_v21  ;;  %v874_v55 = vunpack.c.l.bf16 %v1071_v41  ;;  %v178_v58 = vmax.f32 %v98_v48, %v778_v42 }
   0xc   :  { %v179_v59 = vmax.f32 %v99_v49, %v779_v43  ;;  %v875_v62 = vunpack.c.h.bf16 %v1071_v41  ;;  %v906_v63 = vunpack.c.l.bf16 %v1078_v50  ;;  %v907_v0 = vunpack.c.h.bf16 %v1078_v50 }
   0xd   :  { %v416_v56 = vmax.f32 %v336_v46, %v870_v22  ;;  %v417_v57 = vmax.f32 %v337_v47, %v871_v23  ;;  %v938_v1 = vunpack.c.l.bf16 %v1085_v51  ;;  %v258_v4 = vmax.f32 %v178_v58, %v810_v44  ;;  %v1038_v46 = vld [vmem:[%s1404_s0 + $0x18] sm:$0xff]  }
   0xe   :  { %v259_v5 = vmax.f32 %v179_v59, %v811_v45  ;;  %v939_v8 = vunpack.c.h.bf16 %v1085_v51  ;;  %v970_v9 = vunpack.c.l.bf16 %v1092_v60  ;;  %v718_v10 = vunpack.c.l.bf16 %v1037_v61  ;;  %v1093_v45 = vld [vmem:[%s1412_s8 + $0x10] sm:$0xff]   ;;  %v1045_v51 = vld [vmem:[%s1405_s1 + $0x18] sm:$0xff]  }
   0xf   :  { %v496_v2 = vmax.f32 %v416_v56, %v902_v24  ;;  %v497_v3 = vmax.f32 %v417_v57, %v903_v28  ;;  %v719_v11 = vunpack.c.h.bf16 %v1037_v61  ;;  %v338_v14 = vmax.f32 %v258_v4, %v842_v53  ;;  %v1052_v56 = vld [vmem:[%s1406_s2 + $0x18] sm:$0xff]  }
  0x10   :  { %v339_v15 = vmax.f32 %v259_v5, %v843_v54  ;;  %v750_v17 = vunpack.c.l.bf16 %v1044_v6  ;;  %v751_v18 = vunpack.c.h.bf16 %v1044_v6  ;;  %v782_v19 = vunpack.c.l.bf16 %v1051_v7  ;;  %v1059_v61 = vld [vmem:[%s1407_s3 + $0x18] sm:$0xff]  }
  0x11   :  { %v576_v12 = vmax.f32 %v496_v2, %v934_v29  ;;  %v577_v13 = vmax.f32 %v497_v3, %v935_v32  ;;  %v783_v20 = vunpack.c.h.bf16 %v1051_v7  ;;  %v418_v23 = vmax.f32 %v338_v14, %v874_v55  ;;  %v1066_v2 = vld [vmem:[%s1408_s4 + $0x18] sm:$0xff]  }
  0x12   :  { %v419_v24 = vmax.f32 %v339_v15, %v875_v62  ;;  %v100_v26 = vmax.f32 %v718_v10, %v750_v17  ;;  %v101_v27 = vmax.f32 %v719_v11, %v751_v18  ;;  %v814_v28 = vunpack.c.l.bf16 %v1058_v16  ;;  %v1073_v7 = vld [vmem:[%s1409_s5 + $0x18] sm:$0xff]  }
  0x13   :  { %v656_v21 = vmax.f32 %v576_v12, %v966_v33  ;;  %v657_v22 = vmax.f32 %v577_v13, %v967_v52  ;;  %v815_v29 = vunpack.c.h.bf16 %v1058_v16  ;;  %v498_v32 = vmax.f32 %v418_v23, %v906_v63  ;;  %v1079_v33 = vld [vmem:[%s1410_s6 + $0x10] sm:$0xff]   ;;  %v1080_v12 = vld [vmem:[%s1410_s6 + $0x18] sm:$0xff]  }
  0x14   :  { %v499_v34 = vmax.f32 %v419_v24, %v907_v0  ;;  %v971_v35 = vunpack.c.h.bf16 %v1092_v60  ;;  %v180_v36 = vmax.f32 %v100_v26, %v782_v19  ;;  %v181_v37 = vmax.f32 %v101_v27, %v783_v20  ;;  %v1087_v17 = vld [vmem:[%s1411_s7 + $0x18] sm:$0xff]   ;;  %v1039_v27 = vld [vmem:[%s1404_s0 + $0x20] sm:$0xff]  }
  0x15   :  { %v999_v31 = vpack.c.bf16 %v657_v22, %v656_v21  ;;  %v846_v38 = vunpack.c.l.bf16 %v1065_v25  ;;  %v847_v39 = vunpack.c.h.bf16 %v1065_v25  ;;  %v578_v41 = vmax.f32 %v498_v32, %v938_v1  ;;  %v1094_v22 = vld [vmem:[%s1412_s8 + $0x18] sm:$0xff]   ;;  %v1046_v32 = vld [vmem:[%s1405_s1 + $0x20] sm:$0xff]  }
  0x16   :  { %v579_v42 = vmax.f32 %v499_v34, %v939_v8  ;;  %v878_v43 = vunpack.c.l.bf16 %v1072_v30  ;;  %v879_v44 = vunpack.c.h.bf16 %v1072_v30  ;;  %v260_v47 = vmax.f32 %v180_v36, %v814_v28  ;;  %v1053_v34 = vld [vmem:[%s1406_s2 + $0x20] sm:$0xff]  }
  0x17   :  { %1000 = vst [vmem:[%s1413_s9] sm:$0xff] %v999_v31   ;;  %v261_v48 = vmax.f32 %v181_v37, %v815_v29  ;;  %v910_v49 = vunpack.c.l.bf16 %v1079_v33  ;;  %v911_v50 = vunpack.c.h.bf16 %v1079_v33  ;;  %v658_v52 = vmax.f32 %v578_v41, %v970_v9 }
  0x18   :  { %v659_v53 = vmax.f32 %v579_v42, %v971_v35  ;;  %v942_v54 = vunpack.c.l.bf16 %v1086_v40  ;;  %v943_v55 = vunpack.c.h.bf16 %v1086_v40  ;;  %v340_v57 = vmax.f32 %v260_v47, %v846_v38  ;;  %v1060_v42 = vld [vmem:[%s1407_s3 + $0x20] sm:$0xff]  }
  0x19   :  { %v341_v58 = vmax.f32 %v261_v48, %v847_v39  ;;  %v974_v59 = vunpack.c.l.bf16 %v1093_v45  ;;  %v722_v60 = vunpack.c.l.bf16 %v1038_v46  ;;  %v723_v63 = vunpack.c.h.bf16 %v1038_v46  ;;  %v1067_v47 = vld [vmem:[%s1408_s4 + $0x20] sm:$0xff]  }
  0x1a   :  { %v1004_v62 = vpack.c.bf16 %v659_v53, %v658_v52  ;;  %v754_v0 = vunpack.c.l.bf16 %v1045_v51  ;;  %v755_v1 = vunpack.c.h.bf16 %v1045_v51  ;;  %v420_v3 = vmax.f32 %v340_v57, %v878_v43  ;;  %v1074_v52 = vld [vmem:[%s1409_s5 + $0x20] sm:$0xff]  }
  0x1b   :  { %v421_v4 = vmax.f32 %v341_v58, %v879_v44  ;;  %v786_v5 = vunpack.c.l.bf16 %v1052_v56  ;;  %v787_v6 = vunpack.c.h.bf16 %v1052_v56  ;;  %v818_v10 = vunpack.c.l.bf16 %v1059_v61  ;;  %v1081_v57 = vld [vmem:[%s1410_s6 + $0x20] sm:$0xff]  }
  0x1c   :  { %1099 = vst [vmem:[%s1413_s9 + $0x8] sm:$0xff] %v1004_v62   ;;  %v102_v8 = vmax.f32 %v722_v60, %v754_v0  ;;  %v103_v9 = vmax.f32 %v723_v63, %v755_v1  ;;  %v819_v11 = vunpack.c.h.bf16 %v1059_v61  ;;  %v500_v13 = vmax.f32 %v420_v3, %v910_v49  ;;  %v1088_v62 = vld [vmem:[%s1411_s7 + $0x20] sm:$0xff]  }
  0x1d   :  { %v501_v14 = vmax.f32 %v421_v4, %v911_v50  ;;  %v975_v15 = vunpack.c.h.bf16 %v1093_v45  ;;  %v850_v16 = vunpack.c.l.bf16 %v1066_v2  ;;  %v851_v20 = vunpack.c.h.bf16 %v1066_v2  ;;  %v1095_v3 = vld [vmem:[%s1412_s8 + $0x20] sm:$0xff]   ;;  %v1040_v4 = vld [vmem:[%s1404_s0 + $0x28] sm:$0xff]  }
  0x1e   :  { %v182_v18 = vmax.f32 %v102_v8, %v786_v5  ;;  %v183_v19 = vmax.f32 %v103_v9, %v787_v6  ;;  %v882_v21 = vunpack.c.l.bf16 %v1073_v7  ;;  %v580_v23 = vmax.f32 %v500_v13, %v942_v54  ;;  %v1047_v9 = vld [vmem:[%s1405_s1 + $0x28] sm:$0xff]  }
  0x1f   :  { %v581_v24 = vmax.f32 %v501_v14, %v943_v55  ;;  %v883_v25 = vunpack.c.h.bf16 %v1073_v7  ;;  %v914_v26 = vunpack.c.l.bf16 %v1080_v12  ;;  %v915_v30 = vunpack.c.h.bf16 %v1080_v12  ;;  %v1054_v14 = vld [vmem:[%s1406_s2 + $0x28] sm:$0xff]  }
  0x20   :  { %v262_v28 = vmax.f32 %v182_v18, %v818_v10  ;;  %v263_v29 = vmax.f32 %v183_v19, %v819_v11  ;;  %v946_v31 = vunpack.c.l.bf16 %v1087_v17  ;;  %v660_v35 = vmax.f32 %v580_v23, %v974_v59  ;;  %v1061_v19 = vld [vmem:[%s1407_s3 + $0x28] sm:$0xff]  }
  0x21   :  { %v661_v33 = vmax.f32 %v581_v24, %v975_v15  ;;  %v947_v36 = vunpack.c.h.bf16 %v1087_v17  ;;  %v978_v37 = vunpack.c.l.bf16 %v1094_v22  ;;  %v726_v40 = vunpack.c.l.bf16 %v1039_v27  ;;  %v1068_v24 = vld [vmem:[%s1408_s4 + $0x28] sm:$0xff]  }
  0x22   :  { %v342_v38 = vmax.f32 %v262_v28, %v850_v16  ;;  %v343_v39 = vmax.f32 %v263_v29, %v851_v20  ;;  %v727_v41 = vunpack.c.h.bf16 %v1039_v27  ;;  %v758_v44 = vunpack.c.l.bf16 %v1046_v32 }
  0x23   :  { %v1009_v43 = vpack.c.bf16 %v661_v33, %v660_v35  ;;  %v759_v45 = vunpack.c.h.bf16 %v1046_v32  ;;  %v790_v46 = vunpack.c.l.bf16 %v1053_v34  ;;  %v979_v50 = vunpack.c.h.bf16 %v1094_v22  ;;  %v1082_v35 = vld [vmem:[%s1410_s6 + $0x28] sm:$0xff]  }
  0x24   :  { %v422_v48 = vmax.f32 %v342_v38, %v882_v21  ;;  %v423_v49 = vmax.f32 %v343_v39, %v883_v25  ;;  %v791_v51 = vunpack.c.h.bf16 %v1053_v34  ;;  %v104_v53 = vmax.f32 %v726_v40, %v758_v44  ;;  %v1075_v34 = vld [vmem:[%s1409_s5 + $0x28] sm:$0xff]  }
  0x25   :  { %1100 = vst [vmem:[%s1413_s9 + $0x10] sm:$0xff] %v1009_v43   ;;  %v105_v54 = vmax.f32 %v727_v41, %v759_v45  ;;  %v822_v55 = vunpack.c.l.bf16 %v1060_v42  ;;  %v823_v56 = vunpack.c.h.bf16 %v1060_v42  ;;  %v854_v60 = vunpack.c.l.bf16 %v1067_v47  ;;  %v1089_v43 = vld [vmem:[%s1411_s7 + $0x28] sm:$0xff]  }
  0x26   :  { %v502_v58 = vmax.f32 %v422_v48, %v914_v26  ;;  %v503_v59 = vmax.f32 %v423_v49, %v915_v30  ;;  %v855_v61 = vunpack.c.h.bf16 %v1067_v47  ;;  %v184_v63 = vmax.f32 %v104_v53, %v790_v46  ;;  %v1096_v44 = vld [vmem:[%s1412_s8 + $0x28] sm:$0xff]   ;;  %v1041_v49 = vld [vmem:[%s1404_s0 + $0x30] sm:$0xff]  }
  0x27   :  { %v185_v0 = vmax.f32 %v105_v54, %v791_v51  ;;  %v886_v1 = vunpack.c.l.bf16 %v1074_v52  ;;  %v887_v2 = vunpack.c.h.bf16 %v1074_v52  ;;  %v918_v7 = vunpack.c.l.bf16 %v1081_v57  ;;  %v1048_v54 = vld [vmem:[%s1405_s1 + $0x30] sm:$0xff]  }
  0x28   :  { %v582_v5 = vmax.f32 %v502_v58, %v946_v31  ;;  %v583_v6 = vmax.f32 %v503_v59, %v947_v36  ;;  %v919_v8 = vunpack.c.h.bf16 %v1081_v57  ;;  %v264_v10 = vmax.f32 %v184_v63, %v822_v55  ;;  %v1055_v59 = vld [vmem:[%s1406_s2 + $0x30] sm:$0xff]  }
  0x29   :  { %v265_v11 = vmax.f32 %v185_v0, %v823_v56  ;;  %v950_v12 = vunpack.c.l.bf16 %v1088_v62  ;;  %v951_v13 = vunpack.c.h.bf16 %v1088_v62  ;;  %v982_v17 = vunpack.c.l.bf16 %v1095_v3  ;;  %v1062_v0 = vld [vmem:[%s1407_s3 + $0x30] sm:$0xff]  }
  0x2a   :  { %v662_v15 = vmax.f32 %v582_v5, %v978_v37  ;;  %v663_v16 = vmax.f32 %v583_v6, %v979_v50  ;;  %v730_v18 = vunpack.c.l.bf16 %v1040_v4  ;;  %v344_v20 = vmax.f32 %v264_v10, %v854_v60  ;;  %v1069_v5 = vld [vmem:[%s1408_s4 + $0x30] sm:$0xff]  }
  0x2b   :  { %v345_v21 = vmax.f32 %v265_v11, %v855_v61  ;;  %v731_v22 = vunpack.c.h.bf16 %v1040_v4  ;;  %v762_v23 = vunpack.c.l.bf16 %v1047_v9  ;;  %v763_v26 = vunpack.c.h.bf16 %v1047_v9 }
  0x2c   :  { %v1014_v25 = vpack.c.bf16 %v663_v16, %v662_v15  ;;  %v794_v27 = vunpack.c.l.bf16 %v1054_v14  ;;  %v795_v28 = vunpack.c.h.bf16 %v1054_v14  ;;  %v424_v29 = vmax.f32 %v344_v20, %v886_v1  ;;  %v1076_v14 = vld [vmem:[%s1409_s5 + $0x30] sm:$0xff]  }
  0x2d   :  { %v425_v30 = vmax.f32 %v345_v21, %v887_v2  ;;  %v106_v31 = vmax.f32 %v730_v18, %v762_v23  ;;  %v826_v32 = vunpack.c.l.bf16 %v1061_v19  ;;  %v983_v33 = vunpack.c.h.bf16 %v1095_v3 }
  0x2e   :  { %1101 = vst [vmem:[%s1413_s9 + $0x18] sm:$0xff] %v1014_v25   ;;  %v107_v36 = vmax.f32 %v731_v22, %v763_v26  ;;  %v827_v37 = vunpack.c.h.bf16 %v1061_v19  ;;  %v858_v38 = vunpack.c.l.bf16 %v1068_v24  ;;  %v504_v39 = vmax.f32 %v424_v29, %v918_v7  ;;  %v1083_v19 = vld [vmem:[%s1410_s6 + $0x30] sm:$0xff]  }
  0x2f   :  { %v505_v40 = vmax.f32 %v425_v30, %v919_v8  ;;  %v186_v41 = vmax.f32 %v106_v31, %v794_v27  ;;  %v859_v42 = vunpack.c.h.bf16 %v1068_v24  ;;  %v890_v46 = vunpack.c.l.bf16 %v1075_v34  ;;  %v1090_v24 = vld [vmem:[%s1411_s7 + $0x30] sm:$0xff]  }
  0x30   :  { %v187_v45 = vmax.f32 %v107_v36, %v795_v28  ;;  %v891_v47 = vunpack.c.h.bf16 %v1075_v34  ;;  %v922_v48 = vunpack.c.l.bf16 %v1082_v35  ;;  %v584_v50 = vmax.f32 %v504_v39, %v950_v12  ;;  %v1042_v28 = vld [vmem:[%s1404_s0 + $0x38] sm:$0xff]  }
  0x31   :  { %v585_v51 = vmax.f32 %v505_v40, %v951_v13  ;;  %v266_v52 = vmax.f32 %v186_v41, %v826_v32  ;;  %v923_v53 = vunpack.c.h.bf16 %v1082_v35  ;;  %v954_v56 = vunpack.c.l.bf16 %v1089_v43  ;;  %v1049_v34 = vld [vmem:[%s1405_s1 + $0x38] sm:$0xff]  }
  0x32   :  { %v267_v55 = vmax.f32 %v187_v45, %v827_v37  ;;  %v955_v57 = vunpack.c.h.bf16 %v1089_v43  ;;  %v986_v58 = vunpack.c.l.bf16 %v1096_v44  ;;  %v664_v60 = vmax.f32 %v584_v50, %v982_v17  ;;  %v1056_v35 = vld [vmem:[%s1406_s2 + $0x38] sm:$0xff]  }
  0x33   :  { %v665_v61 = vmax.f32 %v585_v51, %v983_v33  ;;  %v346_v62 = vmax.f32 %v266_v52, %v858_v38  ;;  %v734_v63 = vunpack.c.l.bf16 %v1041_v49  ;;  %v735_v2 = vunpack.c.h.bf16 %v1041_v49  ;;  %v1063_v43 = vld [vmem:[%s1407_s3 + $0x38] sm:$0xff]  }
  0x34   :  { %v347_v1 = vmax.f32 %v267_v55, %v859_v42  ;;  %v766_v3 = vunpack.c.l.bf16 %v1048_v54  ;;  %v767_v4 = vunpack.c.h.bf16 %v1048_v54  ;;  %v798_v8 = vunpack.c.l.bf16 %v1055_v59 }
  0x35   :  { %v1019_v6 = vpack.c.bf16 %v665_v61, %v664_v60  ;;  %v426_v7 = vmax.f32 %v346_v62, %v890_v46  ;;  %v799_v9 = vunpack.c.h.bf16 %v1055_v59  ;;  %v830_v13 = vunpack.c.l.bf16 %v1062_v0  ;;  %v1077_v62 = vld [vmem:[%s1409_s5 + $0x38] sm:$0xff]  }
  0x36   :  { %v427_v10 = vmax.f32 %v347_v1, %v891_v47  ;;  %v108_v11 = vmax.f32 %v734_v63, %v766_v3  ;;  %v109_v12 = vmax.f32 %v735_v2, %v767_v4  ;;  %v987_v16 = vunpack.c.h.bf16 %v1096_v44  ;;  %v1097_v44 = vld [vmem:[%s1412_s8 + $0x30] sm:$0xff]  }
  0x37   :  { %1102 = vst [vmem:[%s1413_s9 + $0x20] sm:$0xff] %v1019_v6   ;;  %v506_v15 = vmax.f32 %v426_v7, %v922_v48  ;;  %v831_v17 = vunpack.c.h.bf16 %v1062_v0  ;;  %v862_v18 = vunpack.c.l.bf16 %v1069_v5  ;;  %v863_v23 = vunpack.c.h.bf16 %v1069_v5  ;;  %v1084_v5 = vld [vmem:[%s1410_s6 + $0x38] sm:$0xff]  }
  0x38   :  { %v507_v20 = vmax.f32 %v427_v10, %v923_v53  ;;  %v188_v21 = vmax.f32 %v108_v11, %v798_v8  ;;  %v189_v22 = vmax.f32 %v109_v12, %v799_v9  ;;  %v894_v26 = vunpack.c.l.bf16 %v1076_v14  ;;  %v1070_v53 = vld [vmem:[%s1408_s4 + $0x38] sm:$0xff]  }
  0x39   :  { %v586_v25 = vmax.f32 %v506_v15, %v954_v56  ;;  %v895_v27 = vunpack.c.h.bf16 %v1076_v14  ;;  %v926_v32 = vunpack.c.l.bf16 %v1083_v19  ;;  %v927_v36 = vunpack.c.h.bf16 %v1083_v19  ;;  %v1091_v12 = vld [vmem:[%s1411_s7 + $0x38] sm:$0xff]  }
  0x3a   :  { %v587_v29 = vmax.f32 %v507_v20, %v955_v57  ;;  %v268_v30 = vmax.f32 %v188_v21, %v830_v13  ;;  %v269_v31 = vmax.f32 %v189_v22, %v831_v17  ;;  %v958_v37 = vunpack.c.l.bf16 %v1090_v24 }
  0x3b   :  { %v666_v33 = vmax.f32 %v586_v25, %v986_v58  ;;  %v959_v38 = vunpack.c.h.bf16 %v1090_v24  ;;  %v738_v42 = vunpack.c.l.bf16 %v1042_v28  ;;  %v739_v45 = vunpack.c.h.bf16 %v1042_v28 }
  0x3c   :  { %v667_v39 = vmax.f32 %v587_v29, %v987_v16  ;;  %v348_v40 = vmax.f32 %v268_v30, %v862_v18  ;;  %v349_v41 = vmax.f32 %v269_v31, %v863_v23  ;;  %v770_v46 = vunpack.c.l.bf16 %v1049_v34  ;;  %v1098_v18 = vld [vmem:[%s1412_s8 + $0x38] sm:$0xff]  }
  0x3d   :  { %v771_v47 = vunpack.c.h.bf16 %v1049_v34  ;;  %v802_v48 = vunpack.c.l.bf16 %v1056_v35  ;;  %v803_v52 = vunpack.c.h.bf16 %v1056_v35  ;;  %v834_v56 = vunpack.c.l.bf16 %v1063_v43 }
  0x3e   :  { %v1024_v49 = vpack.c.bf16 %v667_v39, %v666_v33  ;;  %v428_v50 = vmax.f32 %v348_v40, %v894_v26  ;;  %v429_v51 = vmax.f32 %v349_v41, %v895_v27  ;;  %v110_v54 = vmax.f32 %v738_v42, %v770_v46 }
  0x3f   :  { %v111_v55 = vmax.f32 %v739_v45, %v771_v47  ;;  %v835_v57 = vunpack.c.h.bf16 %v1063_v43  ;;  %v990_v60 = vunpack.c.l.bf16 %v1097_v44  ;;  %v991_v61 = vunpack.c.h.bf16 %v1097_v44 }
  0x40   :  { %1103 = vst [vmem:[%s1413_s9 + $0x28] sm:$0xff] %v1024_v49   ;;  %v508_v58 = vmax.f32 %v428_v50, %v926_v32  ;;  %v509_v59 = vmax.f32 %v429_v51, %v927_v36  ;;  %v190_v63 = vmax.f32 %v110_v54, %v802_v48  ;;  %v866_v1 = vunpack.c.l.bf16 %v1070_v53 }
  0x41   :  { %v191_v0 = vmax.f32 %v111_v55, %v803_v52  ;;  %v867_v2 = vunpack.c.h.bf16 %v1070_v53  ;;  %v898_v8 = vunpack.c.l.bf16 %v1077_v62  ;;  %v899_v9 = vunpack.c.h.bf16 %v1077_v62 }
  0x42   :  { %v588_v3 = vmax.f32 %v508_v58, %v958_v37  ;;  %v589_v4 = vmax.f32 %v509_v59, %v959_v38  ;;  %v270_v6 = vmax.f32 %v190_v63, %v834_v56  ;;  %v930_v15 = vunpack.c.l.bf16 %v1084_v5 }
  0x43   :  { %v271_v7 = vmax.f32 %v191_v0, %v835_v57  ;;  %v931_v16 = vunpack.c.h.bf16 %v1084_v5  ;;  %v962_v21 = vunpack.c.l.bf16 %v1091_v12  ;;  %v963_v22 = vunpack.c.h.bf16 %v1091_v12 }
  0x44   :  { %v668_v10 = vmax.f32 %v588_v3, %v990_v60  ;;  %v669_v11 = vmax.f32 %v589_v4, %v991_v61  ;;  %v350_v13 = vmax.f32 %v270_v6, %v866_v1  ;;  %v994_v25 = vunpack.c.l.bf16 %v1098_v18 }
  0x45   :  { %v351_v14 = vmax.f32 %v271_v7, %v867_v2  ;;  %v995_v26 = vunpack.c.h.bf16 %v1098_v18 }
  0x46   :  { %v1029_v17 = vpack.c.bf16 %v669_v11, %v668_v10  ;;  %v430_v19 = vmax.f32 %v350_v13, %v898_v8 }
  0x47   :  { %v431_v20 = vmax.f32 %v351_v14, %v899_v9 }
  0x48   :  { %1104 = vst [vmem:[%s1413_s9 + $0x30] sm:$0xff] %v1029_v17   ;;  %v510_v23 = vmax.f32 %v430_v19, %v930_v15 }
  0x49   :  { %v511_v24 = vmax.f32 %v431_v20, %v931_v16 }
  0x4a   :  { %v590_v27 = vmax.f32 %v510_v23, %v962_v21 }
  0x4b   :  { %v591_v28 = vmax.f32 %v511_v24, %v963_v22 }
  0x4c   :  { %v670_v29 = vmax.f32 %v590_v27, %v994_v25 }
  0x4d   :  { %v671_v30 = vmax.f32 %v591_v28, %v995_v26 }
  0x4f   :  { %v1034_v31 = vpack.c.bf16 %v671_v30, %v670_v29 }
  0x51   :  { %1105 = vst [vmem:[%s1413_s9 + $0x38] sm:$0xff] %v1034_v31  }

// kernel: resnet18_forward.24
= control target key start
LH: loop header
LB: loop body
LE: loop exit
PB: predicated region body
PF: predicated region fallthrough
CT: control target
= control target key end

     0   :  { %9 = vsyncpa [#allocation5], 0  ;;  %s1479_s0 = inlined_call_operand.vmem [shape: bf16[128,1152], index: 0, kind: input, shape index: {}]   ;;  %s1480_s1 = inlined_call_operand.hbm [shape: bf16[1152,128], index: 1, kind: input, shape index: {}]   ;;  %s1481_s2 = inlined_call_operand.vmem [shape: f32[1,128], index: 2, kind: input, shape index: {}]   ;;  %s1482_s3 = inlined_call_operand.hbm [shape: f32[1,128], index: 3, kind: input, shape index: {}]   ;;  %s1483_s4 = inlined_call_operand.vmem [shape: bf16[128,128], index: 4, kind: output, shape index: {}]  }
   0x1   :  { %11 = vsyncpa [#allocation5 + $0x1], 0 }
   0x2   :  { %12 = vsyncpa [#allocation7], 0  ;;  %s1281_s15 = smov 0   ;;  %s1283_s16 = smov 0  }
   0x3   :  { %s1285_s17 = smov 0   ;;  %s1287_s18 = smov 0  }
   0x4   :  { %s1289_s19 = smov 0   ;;  %s1291_s20 = smov 0  }
   0x5 LB: > { %s900_s21 = sadd.s32 4294967295, %s1250_s20   ;;  %s30_s22 = sadd.s32 1, %s1246_s19  ;;  %s1250_s20 = sphi %s1291_s20, %s18_s20   ;;  %s1246_s19 = sphi %s1289_s19, %s1492_s19   ;;  %s1242_s18 = sphi %s1287_s18, %s1491_s18   ;;  %s1238_s17 = sphi %s1285_s17, %s1490_s17   ;;  %s1234_s16 = sphi %s1283_s16, %s1489_s16   ;;  %s1230_s15 = sphi %s1281_s15, %s1488_s15  }
   0x6   : > { %p31_p0 = scmp.ge.s32.totalorder %s30_s22, 9  ;;  %s46_s23 = sadd.s32 1, %s1238_s17 }
   0x7   : > { %p53_p1 = scmp.ne.s32.totalorder %s1238_s17, %s1234_s16  ;;  %p54_p2 = scmp.eq.s32.totalorder %s1250_s20, 0 }
   0x8   : > { %s1494_s22 = smov (%p31_p0, %s30_s22), 0  ;;  %p87_p4 = scmp.ne.s32.totalorder %s1234_s16, %s1230_s15 }
   0x9   : > { %p1317_p3 = por %p54_p2, %p53_p1  ;;  %s42_s25 = ssub.s32 %s1246_s19, %s1494_s22 }
   0xa   : > { %p1324_p5 = scmp.eq.s32.totalorder %s900_s21, 0  ;;  %p44_p6 = scmp.eq.s32.totalorder %s42_s25, 0 }
   0xb   : > { %p901_p7 = scmp.ge.s32.totalorder %s1250_s20, 1  ;;  %p178_p9 = scmp.lt.s32.totalorder %s1250_s20, 10 }
   0xc   : > { %p1331_p8 = por %p1324_p5, %p87_p4  ;;  %s197_s6 = sshll.u32 %s1482_s3, 4  ;;  %s198_s6 = int_to_ptr.hbm [resolvable:$true] %s197_s6 }
   0xd   : > { %s1337_s28 = scalar_select %p44_p6, %s1238_s17, %s46_s23  }
   0xe   : > { %p1339_p10 = pnand %p901_p7, %p178_p9  ;;  %s1252_s7 = smov [#allocation6]  }
   0xf   : > { %s199_s8 = sshll.u32 %s1252_s7, 4  ;;  %p904_p13 = scmp.ge.s32.totalorder %s1250_s20, 9  ;;  %s200_s8 = int_to_ptr.vmem [resolvable:$true] %s199_s8 }
  0x10   : > { %p1078_p11 = pneg %p1339_p10 }
  0x11   : > { %206 = sbr.rel (%p904_p13) target bundleno = 48 (0x30), region = 24 }
  0x12   : > { %p1079_p12 = pnand %p1078_p11, %p1324_p5 }
  0x14   : > { %1081 = dma.hbm_to_vmem [thread:$0]  (!%p1079_p12), %s198_s6, 16, %s200_s8, [#allocation7]  }
  0x16   : > { %209 = sbr.rel (!%p1317_p3) target bundleno = 42 (0x2a), region = 28  ;;  %s211_s9 = sand.u32 (%p1317_p3), 1, %s1238_s17  }
  0x17   : > { %s906_s10 = sshll.u32 (%p1317_p3), %s1246_s19, 2  ;;  %s905_s11 = sshll.u32 (%p1317_p3), %s211_s9, 6 }
  0x18   : > { %s1358_s14 = scalar_lea.vmem (%p1317_p3), %s1479_s0, %s906_s10  ;;  %s213_s15 = scalar_lea.vmem (%p1317_p3), [#allocation3], %s905_s11 }
  0x19   : > { %v235_v0 = vld [vmem:[%s1358_s14] sm:$0xf] (%p1317_p3)  ;;  %v237_v1 = vld [vmem:[%s1358_s14 + $0x24] sm:$0xf] (%p1317_p3)  ;;  %v239_v2 = vld [vmem:[%s1358_s14 + $0x48] sm:$0xf] (%p1317_p3) }
  0x1a   : > { %236 = vst [vmem:[%s213_s15] sm:$0xf] (%p1317_p3), %v235_v0  ;;  %v241_v3 = vld [vmem:[%s1358_s14 + $0x6c] sm:$0xf] (%p1317_p3)  ;;  %v243_v4 = vld [vmem:[%s1358_s14 + $0x90] sm:$0xf] (%p1317_p3) }
  0x1b   : > { %238 = vst [vmem:[%s213_s15 + $0x4] sm:$0xf] %v237_v1  ;;  %v245_v5 = vld [vmem:[%s1358_s14 + $0xb4] sm:$0xf]  ;;  %v247_v6 = vld [vmem:[%s1358_s14 + $0xd8] sm:$0xf] }
  0x1c   : > { %240 = vst [vmem:[%s213_s15 + $0x8] sm:$0xf] %v239_v2  ;;  %v249_v7 = vld [vmem:[%s1358_s14 + $0xfc] sm:$0xf]  ;;  %v251_v8 = vld [vmem:[%s1358_s14 + $0x120] sm:$0xf] }
  0x1d   : > { %242 = vst [vmem:[%s213_s15 + $0xc] sm:$0xf] %v241_v3  ;;  %v253_v9 = vld [vmem:[%s1358_s14 + $0x144] sm:$0xf]  ;;  %v255_v10 = vld [vmem:[%s1358_s14 + $0x168] sm:$0xf] }
  0x1e   : > { %244 = vst [vmem:[%s213_s15 + $0x10] sm:$0xf] %v243_v4  ;;  %v257_v11 = vld [vmem:[%s1358_s14 + $0x18c] sm:$0xf]  ;;  %v259_v12 = vld [vmem:[%s1358_s14 + $0x1b0] sm:$0xf] }
  0x1f   : > { %246 = vst [vmem:[%s213_s15 + $0x14] sm:$0xf] %v245_v5  ;;  %v261_v13 = vld [vmem:[%s1358_s14 + $0x1d4] sm:$0xf]  ;;  %v263_v14 = vld [vmem:[%s1358_s14 + $0x1f8] sm:$0xf] }
  0x20   : > { %248 = vst [vmem:[%s213_s15 + $0x18] sm:$0xf] %v247_v6  ;;  %v265_v15 = vld [vmem:[%s1358_s14 + $0x21c] sm:$0xf] }
  0x21   : > { %250 = vst [vmem:[%s213_s15 + $0x1c] sm:$0xf] %v249_v7 }
  0x22   : > { %252 = vst [vmem:[%s213_s15 + $0x20] sm:$0xf] %v251_v8 }
  0x23   : > { %254 = vst [vmem:[%s213_s15 + $0x24] sm:$0xf] %v253_v9 }
  0x24   : > { %256 = vst [vmem:[%s213_s15 + $0x28] sm:$0xf] %v255_v10 }
  0x25   : > { %258 = vst [vmem:[%s213_s15 + $0x2c] sm:$0xf] %v257_v11 }
  0x26   : > { %260 = vst [vmem:[%s213_s15 + $0x30] sm:$0xf] %v259_v12 }
  0x27   : > { %262 = vst [vmem:[%s213_s15 + $0x34] sm:$0xf] %v261_v13 }
  0x28   : > { %264 = vst [vmem:[%s213_s15 + $0x38] sm:$0xf] %v263_v14 }
  0x29   : > { %266 = vst [vmem:[%s213_s15 + $0x3c] sm:$0xf] %v265_v15 }
  0x2a PF: > { %s323_s21 = sand.u32 1, %s1238_s17   ;;  %s984_s23 = sshll.u32 %s1246_s19, 6 }
  0x2b   : > { %s907_s25 = sshll.u32 %s323_s21, 6  ;;  %s333_s6 = scalar_lea.hbm %s1480_s1, %s984_s23 }
  0x2c   : > { %s334_s7 = sshll.u32 %s333_s6, 4  ;;  %s327_s8 = scalar_lea.vmem [#allocation4], %s907_s25  ;;  %s335_s7 = int_to_ptr.hbm [resolvable:$true] %s334_s7 }
  0x2d   : > { %s336_s9 = sshll.u32 %s327_s8, 4  ;;  %s324_s10 = scalar_lea.sflag [#allocation5], %s323_s21  ;;  %s337_s9 = int_to_ptr.vmem [resolvable:$true] %s336_s9 }
  0x2e   : > { %s1253_s11 = smov 64   ;;  %s1254_s12 = smov 4  }
  0x2f   : > { %1074 = dma.hbm_to_vmem [thread:$0]  (%p1317_p3), %s335_s7, 1024, %s337_s9, %s324_s10, %s1253_s11, %s1253_s11, %s1254_s12  }
  0x30 PF: > { %348 = sbr.rel (%p1339_p10) target bundleno = 294 (0x126), region = 73  ;;  %s351_s13 = sand.u32 (!%p1339_p10), 1, %s1234_s16  }
  0x31   : > { %s911_s14 = sshll.u32 (!%p1339_p10), %s351_s13, 6  ;;  %s358_s23 = scalar_lea.sflag (!%p1339_p10), [#allocation5], %s351_s13 }
  0x32   : > { %s1386_s15 = scalar_lea.vmem (!%p1339_p10), [#allocation3], %s911_s14  ;;  %s1388_s25 = scalar_lea.vmem (!%p1339_p10), [#allocation4], %s911_s14 }
  0x35   : > { %1221 = dma.done.wait (%p1331_p8), %s358_s23, 1024  }
  0x36   : > { %1223 = vsyncadd (%p1331_p8), %s358_s23, 4294966272 }
  0x37   : > { %1225 = dma.done.wait (%p1324_p5), [#allocation7], 16  }
  0x38   : > { %1227 = vsyncadd (%p1324_p5), [#allocation7], 4294967280  ;;  %p914_p0 = scmp.ne.s32.totalorder %s1242_s18, 0 }
  0x3a   : > { %419 = sbr.rel (%p914_p0) target bundleno = 80 (0x50), region = 89 }
  0x3f   : > { %v1255_v16 = vmov 0.0  }
  0x40   : > { %420 = vst [vmem:[#allocation2 + $0x30] sm:$0xff] %v1255_v16 }
  0x41   : > { %421 = vst [vmem:[#allocation2] sm:$0xff] %v1255_v16 }
  0x42   : > { %422 = vst [vmem:[#allocation2 + $0x58] sm:$0xff] %v1255_v16 }
  0x43   : > { %423 = vst [vmem:[#allocation2 + $0x18] sm:$0xff] %v1255_v16 }
  0x44   : > { %424 = vst [vmem:[#allocation2 + $0x50] sm:$0xff] %v1255_v16 }
  0x45   : > { %425 = vst [vmem:[#allocation2 + $0x68] sm:$0xff] %v1255_v16 }
  0x46   : > { %426 = vst [vmem:[#allocation2 + $0x8] sm:$0xff] %v1255_v16 }
  0x47   : > { %427 = vst [vmem:[#allocation2 + $0x48] sm:$0xff] %v1255_v16 }
  0x48   : > { %428 = vst [vmem:[#allocation2 + $0x40] sm:$0xff] %v1255_v16 }
  0x49   : > { %429 = vst [vmem:[#allocation2 + $0x20] sm:$0xff] %v1255_v16 }
  0x4a   : > { %430 = vst [vmem:[#allocation2 + $0x10] sm:$0xff] %v1255_v16 }
  0x4b   : > { %431 = vst [vmem:[#allocation2 + $0x38] sm:$0xff] %v1255_v16 }
  0x4c   : > { %432 = vst [vmem:[#allocation2 + $0x60] sm:$0xff] %v1255_v16 }
  0x4d   : > { %433 = vst [vmem:[#allocation2 + $0x70] sm:$0xff] %v1255_v16 }
  0x4e   : > { %434 = vst [vmem:[#allocation2 + $0x78] sm:$0xff] %v1255_v16 }
  0x4f   : > { %435 = vst [vmem:[#allocation2 + $0x28] sm:$0xff] %v1255_v16 }
  0x50 PF: > { %v1000_v17 = vld [vmem:[%s1388_s25 + $0x38] sm:$0xff]  ;;  %v999_v18 = vld [vmem:[%s1388_s25 + $0x30] sm:$0xff]  ;;  %v998_v19 = vld [vmem:[%s1388_s25 + $0x28] sm:$0xff]  ;;  %p979_p1 = scmp.ne.s32.totalorder %s1242_s18, 8 }
  0x51   : > { %580 = vmatpush.bf16.msra.mxu0 %v1000_v17  ;;  %1048 = vmatpush.bf16.msra.mxu1 %v1000_v17  ;;  %v997_v20 = vld [vmem:[%s1388_s25 + $0x20] sm:$0xff]  ;;  %v996_v21 = vld [vmem:[%s1388_s25 + $0x18] sm:$0xff]  ;;  %v995_v22 = vld [vmem:[%s1388_s25 + $0x10] sm:$0xff] }
  0x52   : > { %1049 = vmatpush.bf16.msra.mxu2 %v1000_v17  ;;  %1050 = vmatpush.bf16.msra.mxu3 %v1000_v17  ;;  %v994_v23 = vld [vmem:[%s1388_s25 + $0x8] sm:$0xff]  ;;  %v993_v24 = vld [vmem:[%s1388_s25] sm:$0xff]  ;;  %v987_v26 = vld [vmem:[%s1386_s15 + $0x10] sm:$0xff] }
  0x53   : > { %v985_v25 = vld [vmem:[%s1386_s15] sm:$0xff]  ;;  %v991_v28 = vld [vmem:[%s1386_s15 + $0x30] sm:$0xff]  ;;  %v986_v29 = vld [vmem:[%s1386_s15 + $0x8] sm:$0xff] }
  0x54   : > { %v989_v27 = vld [vmem:[%s1386_s15 + $0x20] sm:$0xff]  ;;  %v988_v30 = vld [vmem:[%s1386_s15 + $0x18] sm:$0xff]  ;;  %v990_v31 = vld [vmem:[%s1386_s15 + $0x28] sm:$0xff] }
  0x55   : > { %581 = vmatpush.bf16.msra.mxu0 %v999_v18  ;;  %1051 = vmatpush.bf16.msra.mxu1 %v999_v18  ;;  %v992_v32 = vld [vmem:[%s1386_s15 + $0x38] sm:$0xff]  ;;  %v436_v33 = vld [vmem:[#allocation2 + $0x30] sm:$0xff]  ;;  %v444_v39 = vld [vmem:[#allocation2 + $0x40] sm:$0xff] }
  0x56   : > { %1052 = vmatpush.bf16.msra.mxu2 %v999_v18  ;;  %1053 = vmatpush.bf16.msra.mxu3 %v999_v18  ;;  %v440_v34 = vld [vmem:[#allocation2 + $0x50] sm:$0xff]  ;;  %v448_v40 = vld [vmem:[#allocation2 + $0x60] sm:$0xff]  ;;  %v441_v42 = vld [vmem:[#allocation2 + $0x68] sm:$0xff] }
  0x57   : > { %v437_v41 = vld [vmem:[#allocation2] sm:$0xff]  ;;  %v449_v52 = vld [vmem:[#allocation2 + $0x70] sm:$0xff]  ;;  %v438_v53 = vld [vmem:[#allocation2 + $0x58] sm:$0xff] }
  0x58   : > { %v445_v51 = vld [vmem:[#allocation2 + $0x20] sm:$0xff]  ;;  %v442_v54 = vld [vmem:[#allocation2 + $0x8] sm:$0xff]  ;;  %v446_v63 = vld [vmem:[#allocation2 + $0x10] sm:$0xff] }
  0x59   : > { %582 = vmatpush.bf16.msra.mxu0 %v998_v19  ;;  %1054 = vmatpush.bf16.msra.mxu1 %v998_v19  ;;  %v450_v0 = vld [vmem:[#allocation2 + $0x78] sm:$0xff]  ;;  %v443_v2 = vld [vmem:[#allocation2 + $0x48] sm:$0xff] }
  0x5a   : > { %1055 = vmatpush.bf16.msra.mxu2 %v998_v19  ;;  %1056 = vmatpush.bf16.msra.mxu3 %v998_v19  ;;  %v439_v1 = vld [vmem:[#allocation2 + $0x18] sm:$0xff]  ;;  %v451_v12 = vld [vmem:[#allocation2 + $0x28] sm:$0xff] }
  0x5b   : > { %v447_v11 = vld [vmem:[#allocation2 + $0x38] sm:$0xff] }
  0x5d   : > { %583 = vmatpush.bf16.msra.mxu0 %v997_v20  ;;  %1057 = vmatpush.bf16.msra.mxu1 %v997_v20 }
  0x5e   : > { %1058 = vmatpush.bf16.msra.mxu2 %v997_v20  ;;  %1059 = vmatpush.bf16.msra.mxu3 %v997_v20 }
  0x61   : > { %584 = vmatpush.bf16.msra.mxu0 %v996_v21  ;;  %1060 = vmatpush.bf16.msra.mxu1 %v996_v21 }
  0x62   : > { %1061 = vmatpush.bf16.msra.mxu2 %v996_v21  ;;  %1062 = vmatpush.bf16.msra.mxu3 %v996_v21 }
  0x65   : > { %585 = vmatpush.bf16.msra.mxu0 %v995_v22  ;;  %1063 = vmatpush.bf16.msra.mxu1 %v995_v22 }
  0x66   : > { %1064 = vmatpush.bf16.msra.mxu2 %v995_v22  ;;  %1065 = vmatpush.bf16.msra.mxu3 %v995_v22 }
  0x69   : > { %586 = vmatpush.bf16.msra.mxu0 %v994_v23  ;;  %1066 = vmatpush.bf16.msra.mxu1 %v994_v23 }
  0x6a   : > { %1067 = vmatpush.bf16.msra.mxu2 %v994_v23  ;;  %1068 = vmatpush.bf16.msra.mxu3 %v994_v23 }
  0x6d   : > { %587 = vmatpush.bf16.msra.mxu0 %v993_v24  ;;  %1069 = vmatpush.bf16.msra.mxu1 %v993_v24 }
  0x6e   : > { %1070 = vmatpush.bf16.msra.mxu2 %v993_v24  ;;  %1071 = vmatpush.bf16.msra.mxu3 %v993_v24 }
  0x70   : > { %588 = vmatmul.bf16.vlgmr.msra.gmra.mxu0 %v985_v25  ;;  %598 = vmatmul.bf16.vlgmr.msra.gmra.mxu1 %v987_v26 }
  0x71   : > { %608 = vmatmul.bf16.vlgmr.msra.gmra.mxu2 %v989_v27  ;;  %618 = vmatmul.bf16.vlgmr.msra.gmra.mxu3 %v991_v28 }
  0x80   : > { %593 = vmatmul.bf16.gmra.mxu0 %v986_v29  ;;  %603 = vmatmul.bf16.gmra.mxu1 %v988_v30 }
  0x81   : > { %613 = vmatmul.bf16.gmra.mxu2 %v990_v31  ;;  %623 = vmatmul.bf16.gmra.mxu3 %v992_v32 }
  0xed   : > { %v589_v35 = vpop.f32.mrf.mxu0  ;;  %v599_v36 = vpop.f32.mrf.mxu1 }
  0xee   : > { %v629_v37 = vadd.f32 %v589_v35, %v436_v33  ;;  %v633_v38 = vadd.f32 %v599_v36, %v440_v34 }
  0xf0   : > { %645 = vst [vmem:[#allocation2 + $0x30] sm:$0xff] %v629_v37 }
  0xf1   : > { %649 = vst [vmem:[#allocation2 + $0x50] sm:$0xff] %v633_v38 }
  0xf4   : > { %v609_v43 = vpop.f32.mrf.mxu2  ;;  %v619_v44 = vpop.f32.mrf.mxu3 }
  0xf5   : > { %v637_v45 = vadd.f32 %v609_v43, %v444_v39  ;;  %v641_v46 = vadd.f32 %v619_v44, %v448_v40  ;;  %v591_v47 = vpop.f32.mrf.mxu0  ;;  %v601_v48 = vpop.f32.mrf.mxu1 }
  0xf6   : > { %v630_v49 = vadd.f32 %v591_v47, %v437_v41  ;;  %v634_v50 = vadd.f32 %v601_v48, %v441_v42 }
  0xf7   : > { %653 = vst [vmem:[#allocation2 + $0x40] sm:$0xff] %v637_v45 }
  0xf8   : > { %657 = vst [vmem:[#allocation2 + $0x60] sm:$0xff] %v641_v46 }
  0xf9   : > { %646 = vst [vmem:[#allocation2] sm:$0xff] %v630_v49 }
  0xfa   : > { %650 = vst [vmem:[#allocation2 + $0x68] sm:$0xff] %v634_v50 }
  0xfc   : > { %v611_v55 = vpop.f32.mrf.mxu2  ;;  %v621_v56 = vpop.f32.mrf.mxu3 }
  0xfd   : > { %v638_v57 = vadd.f32 %v611_v55, %v445_v51  ;;  %v642_v58 = vadd.f32 %v621_v56, %v449_v52  ;;  %v594_v59 = vpop.f32.mrf.mxu0  ;;  %v604_v60 = vpop.f32.mrf.mxu1 }
  0xfe   : > { %v631_v61 = vadd.f32 %v594_v59, %v438_v53  ;;  %v635_v62 = vadd.f32 %v604_v60, %v442_v54 }
  0xff   : > { %654 = vst [vmem:[#allocation2 + $0x20] sm:$0xff] %v638_v57 }
 0x100   : > { %658 = vst [vmem:[#allocation2 + $0x70] sm:$0xff] %v642_v58 }
 0x101   : > { %647 = vst [vmem:[#allocation2 + $0x58] sm:$0xff] %v631_v61 }
 0x102   : > { %651 = vst [vmem:[#allocation2 + $0x8] sm:$0xff] %v635_v62 }
 0x104   : > { %v614_v3 = vpop.f32.mrf.mxu2  ;;  %v624_v4 = vpop.f32.mrf.mxu3 }
 0x105   : > { %v639_v5 = vadd.f32 %v614_v3, %v446_v63  ;;  %v643_v6 = vadd.f32 %v624_v4, %v450_v0  ;;  %v596_v7 = vpop.f32.mrf.mxu0  ;;  %v606_v8 = vpop.f32.mrf.mxu1 }
 0x106   : > { %v632_v9 = vadd.f32 %v596_v7, %v439_v1  ;;  %v636_v10 = vadd.f32 %v606_v8, %v443_v2 }
 0x107   : > { %655 = vst [vmem:[#allocation2 + $0x10] sm:$0xff] %v639_v5 }
 0x108   : > { %659 = vst [vmem:[#allocation2 + $0x78] sm:$0xff] %v643_v6 }
 0x109   : > { %648 = vst [vmem:[#allocation2 + $0x18] sm:$0xff] %v632_v9 }
 0x10a   : > { %652 = vst [vmem:[#allocation2 + $0x48] sm:$0xff] %v636_v10 }
 0x10c   : > { %v616_v13 = vpop.f32.mrf.mxu2  ;;  %v626_v14 = vpop.f32.mrf.mxu3  ;;  %664 = sbr.rel (%p979_p1) target bundleno = 294 (0x126), region = 93 }
 0x10d   : > { %v640_v15 = vadd.f32 %v616_v13, %v447_v11  ;;  %v644_v16 = vadd.f32 %v626_v14, %v451_v12 }
 0x10f   : > { %656 = vst [vmem:[#allocation2 + $0x38] sm:$0xff] %v640_v15 }
 0x110   : > { %660 = vst [vmem:[#allocation2 + $0x28] sm:$0xff] %v644_v16 }
 0x111   : > { %v665_v17 = vld [vmem:[#allocation2 + $0x30] sm:$0xff]  ;;  %v666_v18 = vld [vmem:[#allocation2] sm:$0xff]  ;;  %v667_v21 = vld [vmem:[#allocation2 + $0x58] sm:$0xff] }
 0x112   : > { %v1136_v19 = vld [vmem:[%s1481_s2] ss:$0 sm:$0xff]  ;;  %v668_v22 = vld [vmem:[#allocation2 + $0x18] sm:$0xff]  ;;  %v669_v23 = vld [vmem:[#allocation2 + $0x50] sm:$0xff] }
 0x113   : > { %v1419_v20 = vld [vmem:[#allocation6] ss:$0 sm:$0xff]  ;;  %v685_v24 = vmul.f32 %v1136_v19, %v665_v17  ;;  %v686_v25 = vmul.f32 %v1136_v19, %v666_v18  ;;  %v687_v26 = vmul.f32 %v1136_v19, %v667_v21  ;;  %v688_v27 = vmul.f32 %v1136_v19, %v668_v22  ;;  %v670_v28 = vld [vmem:[#allocation2 + $0x68] sm:$0xff]  ;;  %v675_v49 = vld [vmem:[#allocation2 + $0x10] sm:$0xff] }
 0x114   : > { %v671_v29 = vld [vmem:[#allocation2 + $0x8] sm:$0xff]  ;;  %v689_v31 = vmul.f32 %v1136_v19, %v669_v23  ;;  %v690_v32 = vmul.f32 %v1136_v19, %v670_v28  ;;  %v673_v43 = vld [vmem:[#allocation2 + $0x40] sm:$0xff]  ;;  %v678_v56 = vld [vmem:[#allocation2 + $0x70] sm:$0xff]  ;;  %v695_v1 = vmul.f32 %v1136_v19, %v675_v49 }
 0x115   : > { %v672_v30 = vld [vmem:[#allocation2 + $0x48] sm:$0xff]  ;;  %v691_v33 = vmul.f32 %v1136_v19, %v671_v29  ;;  %v705_v35 = vadd.f32 %v1419_v20, %v685_v24  ;;  %v706_v36 = vadd.f32 %v1419_v20, %v686_v25  ;;  %v707_v37 = vadd.f32 %v1419_v20, %v687_v26  ;;  %v674_v44 = vld [vmem:[#allocation2 + $0x20] sm:$0xff]  ;;  %v679_v61 = vld [vmem:[#allocation2 + $0x78] sm:$0xff] }
 0x116   : > { %v692_v34 = vmul.f32 %v1136_v19, %v672_v30  ;;  %v708_v38 = vadd.f32 %v1419_v20, %v688_v27  ;;  %v709_v39 = vadd.f32 %v1419_v20, %v689_v31  ;;  %v710_v40 = vadd.f32 %v1419_v20, %v690_v32  ;;  %v676_v50 = vld [vmem:[#allocation2 + $0x38] sm:$0xff]  ;;  %v677_v55 = vld [vmem:[#allocation2 + $0x60] sm:$0xff] }
 0x117   : > { %v711_v41 = vadd.f32 %v1419_v20, %v691_v33  ;;  %v721_v45 = vmax.f32 %v705_v35, 0.0  ;;  %v722_v46 = vmax.f32 %v706_v36, 0.0  ;;  %v723_v47 = vmax.f32 %v707_v37, 0.0  ;;  %v680_v62 = vld [vmem:[#allocation2 + $0x28] sm:$0xff] }
 0x118   : > { %v712_v42 = vadd.f32 %v1419_v20, %v692_v34  ;;  %v724_v48 = vmax.f32 %v708_v38, 0.0  ;;  %v725_v51 = vmax.f32 %v709_v39, 0.0  ;;  %v726_v52 = vmax.f32 %v710_v40, 0.0 }
 0x119   : > { %v727_v53 = vmax.f32 %v711_v41, 0.0  ;;  %v1004_v57 = vpack.c.bf16 %v722_v46, %v721_v45  ;;  %v693_v59 = vmul.f32 %v1136_v19, %v673_v43  ;;  %v694_v60 = vmul.f32 %v1136_v19, %v674_v44 }
 0x11a   : > { %v728_v54 = vmax.f32 %v712_v42, 0.0  ;;  %v1009_v58 = vpack.c.bf16 %v724_v48, %v723_v47  ;;  %v1014_v63 = vpack.c.bf16 %v726_v52, %v725_v51  ;;  %v696_v2 = vmul.f32 %v1136_v19, %v676_v50 }
 0x11b   : > { %1005 = vst [vmem:[%s1483_s4] sm:$0xff] %v1004_v57   ;;  %v713_v3 = vadd.f32 %v1419_v20, %v693_v59  ;;  %v714_v4 = vadd.f32 %v1419_v20, %v694_v60  ;;  %v697_v5 = vmul.f32 %v1136_v19, %v677_v55  ;;  %v698_v6 = vmul.f32 %v1136_v19, %v678_v56 }
 0x11c   : > { %v1019_v0 = vpack.c.bf16 %v728_v54, %v727_v53  ;;  %1041 = vst [vmem:[%s1483_s4 + $0x8] sm:$0xff] %v1009_v58   ;;  %v715_v7 = vadd.f32 %v1419_v20, %v695_v1  ;;  %v716_v8 = vadd.f32 %v1419_v20, %v696_v2  ;;  %v699_v9 = vmul.f32 %v1136_v19, %v679_v61 }
 0x11d   : > { %v700_v10 = vmul.f32 %v1136_v19, %v680_v62  ;;  %1042 = vst [vmem:[%s1483_s4 + $0x10] sm:$0xff] %v1014_v63   ;;  %v729_v11 = vmax.f32 %v713_v3, 0.0  ;;  %v730_v12 = vmax.f32 %v714_v4, 0.0  ;;  %v717_v13 = vadd.f32 %v1419_v20, %v697_v5 }
 0x11e   : > { %v718_v14 = vadd.f32 %v1419_v20, %v698_v6  ;;  %1043 = vst [vmem:[%s1483_s4 + $0x18] sm:$0xff] %v1019_v0   ;;  %v731_v15 = vmax.f32 %v715_v7, 0.0  ;;  %v732_v16 = vmax.f32 %v716_v8, 0.0  ;;  %v719_v17 = vadd.f32 %v1419_v20, %v699_v9 }
 0x11f   : > { %v720_v18 = vadd.f32 %v1419_v20, %v700_v10  ;;  %v1024_v19 = vpack.c.bf16 %v730_v12, %v729_v11  ;;  %v733_v21 = vmax.f32 %v717_v13, 0.0 }
 0x120   : > { %v734_v22 = vmax.f32 %v718_v14, 0.0  ;;  %v1029_v23 = vpack.c.bf16 %v732_v16, %v731_v15  ;;  %v735_v24 = vmax.f32 %v719_v17, 0.0 }
 0x121   : > { %v736_v25 = vmax.f32 %v720_v18, 0.0  ;;  %1044 = vst [vmem:[%s1483_s4 + $0x20] sm:$0xff] %v1024_v19  }
 0x122   : > { %v1034_v26 = vpack.c.bf16 %v734_v22, %v733_v21  ;;  %1045 = vst [vmem:[%s1483_s4 + $0x28] sm:$0xff] %v1029_v23  }
 0x123   : > { %v1039_v27 = vpack.c.bf16 %v736_v25, %v735_v24 }
 0x124   : > { %1046 = vst [vmem:[%s1483_s4 + $0x30] sm:$0xff] %v1034_v26  }
 0x125   : > { %1047 = vst [vmem:[%s1483_s4 + $0x38] sm:$0xff] %v1039_v27  }
 0x126 PF: > { %s18_s20 = sadd.s32 1, %s1250_s20   ;;  %s1488_s15 = smov %s1234_s16 }
 0x127   : > { %p15_p2 = scmp.ge.s32.totalorder %s18_s20, 11   ;;  %s1489_s16 = smov %s1238_s17 }
 0x128   : > { %s1490_s17 = smov %s1337_s28  ;;  %s1491_s18 = smov %s1246_s19 }
 0x129   : > { %s1492_s19 = smov %s1494_s22  ;;  %17 = sbr.rel (!%p15_p2) target bundleno = 5 (0x5), region = 141 }
 0x12e   :  { %797 = vsyncpa [#allocation5], 1 }
 0x12f   :  { %799 = vsyncpa [#allocation5 + $0x1], 1 }
 0x130   :  { %800 = vsyncpa [#allocation7], 1 }

// kernel: resnet18_forward.25
= control target key start
LH: loop header
LB: loop body
LE: loop exit
PB: predicated region body
PF: predicated region fallthrough
CT: control target
= control target key end

     0   :  { %10 = vsyncpa [#allocation5], 0  ;;  %s1619_s0 = inlined_call_operand.vmem [shape: bf16[128,1152], index: 0, kind: input, shape index: {}]   ;;  %s1620_s1 = inlined_call_operand.hbm [shape: bf16[1152,128], index: 1, kind: input, shape index: {}]   ;;  %s1621_s2 = inlined_call_operand.vmem [shape: f32[1,128], index: 2, kind: input, shape index: {}]   ;;  %s1622_s3 = inlined_call_operand.vmem [shape: f32[1,128], index: 3, kind: input, shape index: {}]   ;;  %s1623_s4 = inlined_call_operand.vmem [shape: bf16[128,128], index: 4, kind: input, shape index: {}]   ;;  %s1624_s5 = inlined_call_operand.vmem [shape: bf16[128,128], index: 5, kind: output, shape index: {}]  }
   0x1   :  { %12 = vsyncpa [#allocation5 + $0x1], 0  ;;  %s1399_s18 = smov 0   ;;  %s1401_s19 = smov 0  }
   0x2   :  { %s1403_s20 = smov 0   ;;  %s1405_s21 = smov 0  }
   0x3   :  { %s1407_s22 = smov 0   ;;  %s1409_s23 = smov 0  }
   0x4 LB: > { %s1020_s24 = sadd.s32 4294967295, %s1364_s23   ;;  %s30_s25 = sadd.s32 1, %s1360_s22  ;;  %s1364_s23 = sphi %s1409_s23, %s18_s23   ;;  %s1360_s22 = sphi %s1407_s22, %s1631_s22   ;;  %s1356_s21 = sphi %s1405_s21, %s1630_s21   ;;  %s1352_s20 = sphi %s1403_s20, %s1629_s20   ;;  %s1348_s19 = sphi %s1401_s19, %s1628_s19   ;;  %s1344_s18 = sphi %s1399_s18, %s1627_s18  }
   0x5   : > { %p31_p0 = scmp.ge.s32.totalorder %s30_s25, 9  ;;  %s46_s26 = sadd.s32 1, %s1352_s20 }
   0x6   : > { %p53_p1 = scmp.ne.s32.totalorder %s1352_s20, %s1348_s19  ;;  %p54_p2 = scmp.eq.s32.totalorder %s1364_s23, 0 }
   0x7   : > { %s1633_s25 = smov (%p31_p0, %s30_s25), 0  ;;  %p87_p4 = scmp.ne.s32.totalorder %s1348_s19, %s1344_s18 }
   0x8   : > { %p1435_p3 = por %p54_p2, %p53_p1  ;;  %s42_s28 = ssub.s32 %s1360_s22, %s1633_s25 }
   0x9   : > { %p88_p5 = scmp.eq.s32.totalorder %s1020_s24, 0  ;;  %p44_p6 = scmp.eq.s32.totalorder %s42_s28, 0 }
   0xa   : > { %p1025_p8 = scmp.ge.s32.totalorder %s1364_s23, 9 }
   0xb   : > { %p1442_p7 = por %p88_p5, %p87_p4 }
   0xc   : > { %s1447_s30 = scalar_select %p44_p6, %s1352_s20, %s46_s26  }
   0xd   : > { %239 = sbr.rel (%p1025_p8) target bundleno = 44 (0x2c), region = 28 }
  0x12   : > { %242 = sbr.rel (!%p1435_p3) target bundleno = 38 (0x26), region = 32  ;;  %s244_s6 = sand.u32 (%p1435_p3), 1, %s1352_s20  }
  0x13   : > { %s1027_s7 = sshll.u32 (%p1435_p3), %s1360_s22, 2  ;;  %s1026_s8 = sshll.u32 (%p1435_p3), %s244_s6, 6 }
  0x14   : > { %s1457_s11 = scalar_lea.vmem (%p1435_p3), %s1619_s0, %s1027_s7  ;;  %s246_s12 = scalar_lea.vmem (%p1435_p3), [#allocation3], %s1026_s8 }
  0x15   : > { %v268_v0 = vld [vmem:[%s1457_s11] sm:$0xf] (%p1435_p3)  ;;  %v270_v1 = vld [vmem:[%s1457_s11 + $0x24] sm:$0xf] (%p1435_p3)  ;;  %v272_v2 = vld [vmem:[%s1457_s11 + $0x48] sm:$0xf] (%p1435_p3) }
  0x16   : > { %269 = vst [vmem:[%s246_s12] sm:$0xf] (%p1435_p3), %v268_v0  ;;  %v274_v3 = vld [vmem:[%s1457_s11 + $0x6c] sm:$0xf] (%p1435_p3)  ;;  %v276_v4 = vld [vmem:[%s1457_s11 + $0x90] sm:$0xf] (%p1435_p3) }
  0x17   : > { %271 = vst [vmem:[%s246_s12 + $0x4] sm:$0xf] %v270_v1  ;;  %v278_v5 = vld [vmem:[%s1457_s11 + $0xb4] sm:$0xf]  ;;  %v280_v6 = vld [vmem:[%s1457_s11 + $0xd8] sm:$0xf] }
  0x18   : > { %273 = vst [vmem:[%s246_s12 + $0x8] sm:$0xf] %v272_v2  ;;  %v282_v7 = vld [vmem:[%s1457_s11 + $0xfc] sm:$0xf]  ;;  %v284_v8 = vld [vmem:[%s1457_s11 + $0x120] sm:$0xf] }
  0x19   : > { %275 = vst [vmem:[%s246_s12 + $0xc] sm:$0xf] %v274_v3  ;;  %v286_v9 = vld [vmem:[%s1457_s11 + $0x144] sm:$0xf]  ;;  %v288_v10 = vld [vmem:[%s1457_s11 + $0x168] sm:$0xf] }
  0x1a   : > { %277 = vst [vmem:[%s246_s12 + $0x10] sm:$0xf] %v276_v4  ;;  %v290_v11 = vld [vmem:[%s1457_s11 + $0x18c] sm:$0xf]  ;;  %v292_v12 = vld [vmem:[%s1457_s11 + $0x1b0] sm:$0xf] }
  0x1b   : > { %279 = vst [vmem:[%s246_s12 + $0x14] sm:$0xf] %v278_v5  ;;  %v294_v13 = vld [vmem:[%s1457_s11 + $0x1d4] sm:$0xf]  ;;  %v296_v14 = vld [vmem:[%s1457_s11 + $0x1f8] sm:$0xf] }
  0x1c   : > { %281 = vst [vmem:[%s246_s12 + $0x18] sm:$0xf] %v280_v6  ;;  %v298_v15 = vld [vmem:[%s1457_s11 + $0x21c] sm:$0xf] }
  0x1d   : > { %283 = vst [vmem:[%s246_s12 + $0x1c] sm:$0xf] %v282_v7 }
  0x1e   : > { %285 = vst [vmem:[%s246_s12 + $0x20] sm:$0xf] %v284_v8 }
  0x1f   : > { %287 = vst [vmem:[%s246_s12 + $0x24] sm:$0xf] %v286_v9 }
  0x20   : > { %289 = vst [vmem:[%s246_s12 + $0x28] sm:$0xf] %v288_v10 }
  0x21   : > { %291 = vst [vmem:[%s246_s12 + $0x2c] sm:$0xf] %v290_v11 }
  0x22   : > { %293 = vst [vmem:[%s246_s12 + $0x30] sm:$0xf] %v292_v12 }
  0x23   : > { %295 = vst [vmem:[%s246_s12 + $0x34] sm:$0xf] %v294_v13 }
  0x24   : > { %297 = vst [vmem:[%s246_s12 + $0x38] sm:$0xf] %v296_v14 }
  0x25   : > { %299 = vst [vmem:[%s246_s12 + $0x3c] sm:$0xf] %v298_v15 }
  0x26 PF: > { %s356_s13 = sand.u32 1, %s1352_s20   ;;  %s1104_s14 = sshll.u32 %s1360_s22, 6 }
  0x27   : > { %s1028_s15 = sshll.u32 %s356_s13, 6  ;;  %s366_s18 = scalar_lea.hbm %s1620_s1, %s1104_s14 }
  0x28   : > { %s367_s24 = sshll.u32 %s366_s18, 4  ;;  %s360_s26 = scalar_lea.vmem [#allocation4], %s1028_s15  ;;  %s368_s24 = int_to_ptr.hbm [resolvable:$true] %s367_s24 }
  0x29   : > { %s369_s28 = sshll.u32 %s360_s26, 4  ;;  %s357_s6 = scalar_lea.sflag [#allocation5], %s356_s13  ;;  %s370_s28 = int_to_ptr.vmem [resolvable:$true] %s369_s28 }
  0x2a   : > { %s1366_s7 = smov 64   ;;  %s1367_s8 = smov 4  }
  0x2b   : > { %1231 = dma.hbm_to_vmem [thread:$0]  (%p1435_p3), %s368_s24, 1024, %s370_s28, %s357_s6, %s1366_s7, %s1366_s7, %s1367_s8  }
  0x2c PF: > { %p1031_p9 = scmp.ge.s32.totalorder %s1364_s23, 1  ;;  %p377_p10 = scmp.lt.s32.totalorder %s1364_s23, 10 }
  0x2e   : > { %p378_p11 = pnand %p1031_p9, %p377_p10 }
  0x2f   : > { %s384_s9 = sand.u32 (!%p378_p11), 1, %s1348_s19  }
  0x30   : > { %381 = sbr.rel (%p378_p11) target bundleno = 301 (0x12d), region = 77  ;;  %s1032_s10 = sshll.u32 (!%p378_p11), %s384_s9, 6 }
  0x31   : > { %s1485_s11 = scalar_lea.vmem (!%p378_p11), [#allocation3], %s1032_s10  ;;  %s391_s12 = scalar_lea.sflag (!%p378_p11), [#allocation5], %s384_s9 }
  0x32   : > { %s1487_s14 = scalar_lea.vmem (!%p378_p11), [#allocation4], %s1032_s10 }
  0x35   : > { %1339 = dma.done.wait (%p1442_p7), %s391_s12, 1024  }
  0x36   : > { %1341 = vsyncadd (%p1442_p7), %s391_s12, 4294966272  ;;  %p1034_p12 = scmp.ne.s32.totalorder %s1356_s21, 0 }
  0x38   : > { %472 = sbr.rel (%p1034_p12) target bundleno = 78 (0x4e), region = 89 }
  0x3d   : > { %v1368_v16 = vmov 0.0  }
  0x3e   : > { %473 = vst [vmem:[#allocation2 + $0x30] sm:$0xff] %v1368_v16 }
  0x3f   : > { %474 = vst [vmem:[#allocation2] sm:$0xff] %v1368_v16 }
  0x40   : > { %475 = vst [vmem:[#allocation2 + $0x58] sm:$0xff] %v1368_v16 }
  0x41   : > { %476 = vst [vmem:[#allocation2 + $0x18] sm:$0xff] %v1368_v16 }
  0x42   : > { %477 = vst [vmem:[#allocation2 + $0x50] sm:$0xff] %v1368_v16 }
  0x43   : > { %478 = vst [vmem:[#allocation2 + $0x68] sm:$0xff] %v1368_v16 }
  0x44   : > { %479 = vst [vmem:[#allocation2 + $0x8] sm:$0xff] %v1368_v16 }
  0x45   : > { %480 = vst [vmem:[#allocation2 + $0x48] sm:$0xff] %v1368_v16 }
  0x46   : > { %481 = vst [vmem:[#allocation2 + $0x40] sm:$0xff] %v1368_v16 }
  0x47   : > { %482 = vst [vmem:[#allocation2 + $0x20] sm:$0xff] %v1368_v16 }
  0x48   : > { %483 = vst [vmem:[#allocation2 + $0x10] sm:$0xff] %v1368_v16 }
  0x49   : > { %484 = vst [vmem:[#allocation2 + $0x38] sm:$0xff] %v1368_v16 }
  0x4a   : > { %485 = vst [vmem:[#allocation2 + $0x60] sm:$0xff] %v1368_v16 }
  0x4b   : > { %486 = vst [vmem:[#allocation2 + $0x70] sm:$0xff] %v1368_v16 }
  0x4c   : > { %487 = vst [vmem:[#allocation2 + $0x78] sm:$0xff] %v1368_v16 }
  0x4d   : > { %488 = vst [vmem:[#allocation2 + $0x28] sm:$0xff] %v1368_v16 }
  0x4e PF: > { %v1120_v17 = vld [vmem:[%s1487_s14 + $0x38] sm:$0xff]  ;;  %v1119_v18 = vld [vmem:[%s1487_s14 + $0x30] sm:$0xff]  ;;  %v1118_v19 = vld [vmem:[%s1487_s14 + $0x28] sm:$0xff]  ;;  %p1099_p13 = scmp.ne.s32.totalorder %s1356_s21, 8 }
  0x4f   : > { %633 = vmatpush.bf16.msra.mxu0 %v1120_v17  ;;  %1207 = vmatpush.bf16.msra.mxu1 %v1120_v17  ;;  %v1117_v20 = vld [vmem:[%s1487_s14 + $0x20] sm:$0xff]  ;;  %v1116_v21 = vld [vmem:[%s1487_s14 + $0x18] sm:$0xff]  ;;  %v1115_v22 = vld [vmem:[%s1487_s14 + $0x10] sm:$0xff] }
  0x50   : > { %1208 = vmatpush.bf16.msra.mxu2 %v1120_v17  ;;  %1209 = vmatpush.bf16.msra.mxu3 %v1120_v17  ;;  %v1114_v23 = vld [vmem:[%s1487_s14 + $0x8] sm:$0xff]  ;;  %v1113_v24 = vld [vmem:[%s1487_s14] sm:$0xff]  ;;  %v1107_v26 = vld [vmem:[%s1485_s11 + $0x10] sm:$0xff] }
  0x51   : > { %v1105_v25 = vld [vmem:[%s1485_s11] sm:$0xff]  ;;  %v1111_v28 = vld [vmem:[%s1485_s11 + $0x30] sm:$0xff]  ;;  %v1106_v29 = vld [vmem:[%s1485_s11 + $0x8] sm:$0xff] }
  0x52   : > { %v1109_v27 = vld [vmem:[%s1485_s11 + $0x20] sm:$0xff]  ;;  %v1108_v30 = vld [vmem:[%s1485_s11 + $0x18] sm:$0xff]  ;;  %v1110_v31 = vld [vmem:[%s1485_s11 + $0x28] sm:$0xff] }
  0x53   : > { %634 = vmatpush.bf16.msra.mxu0 %v1119_v18  ;;  %1210 = vmatpush.bf16.msra.mxu1 %v1119_v18  ;;  %v1112_v32 = vld [vmem:[%s1485_s11 + $0x38] sm:$0xff]  ;;  %v489_v33 = vld [vmem:[#allocation2 + $0x30] sm:$0xff]  ;;  %v497_v39 = vld [vmem:[#allocation2 + $0x40] sm:$0xff] }
  0x54   : > { %1211 = vmatpush.bf16.msra.mxu2 %v1119_v18  ;;  %1212 = vmatpush.bf16.msra.mxu3 %v1119_v18  ;;  %v493_v34 = vld [vmem:[#allocation2 + $0x50] sm:$0xff]  ;;  %v501_v40 = vld [vmem:[#allocation2 + $0x60] sm:$0xff]  ;;  %v494_v42 = vld [vmem:[#allocation2 + $0x68] sm:$0xff] }
  0x55   : > { %v490_v41 = vld [vmem:[#allocation2] sm:$0xff]  ;;  %v502_v52 = vld [vmem:[#allocation2 + $0x70] sm:$0xff]  ;;  %v491_v53 = vld [vmem:[#allocation2 + $0x58] sm:$0xff] }
  0x56   : > { %v498_v51 = vld [vmem:[#allocation2 + $0x20] sm:$0xff]  ;;  %v495_v54 = vld [vmem:[#allocation2 + $0x8] sm:$0xff]  ;;  %v499_v63 = vld [vmem:[#allocation2 + $0x10] sm:$0xff] }
  0x57   : > { %635 = vmatpush.bf16.msra.mxu0 %v1118_v19  ;;  %1213 = vmatpush.bf16.msra.mxu1 %v1118_v19  ;;  %v503_v0 = vld [vmem:[#allocation2 + $0x78] sm:$0xff]  ;;  %v496_v2 = vld [vmem:[#allocation2 + $0x48] sm:$0xff] }
  0x58   : > { %1214 = vmatpush.bf16.msra.mxu2 %v1118_v19  ;;  %1215 = vmatpush.bf16.msra.mxu3 %v1118_v19  ;;  %v492_v1 = vld [vmem:[#allocation2 + $0x18] sm:$0xff]  ;;  %v504_v12 = vld [vmem:[#allocation2 + $0x28] sm:$0xff] }
  0x59   : > { %v500_v11 = vld [vmem:[#allocation2 + $0x38] sm:$0xff] }
  0x5b   : > { %636 = vmatpush.bf16.msra.mxu0 %v1117_v20  ;;  %1216 = vmatpush.bf16.msra.mxu1 %v1117_v20 }
  0x5c   : > { %1217 = vmatpush.bf16.msra.mxu2 %v1117_v20  ;;  %1218 = vmatpush.bf16.msra.mxu3 %v1117_v20 }
  0x5f   : > { %637 = vmatpush.bf16.msra.mxu0 %v1116_v21  ;;  %1219 = vmatpush.bf16.msra.mxu1 %v1116_v21 }
  0x60   : > { %1220 = vmatpush.bf16.msra.mxu2 %v1116_v21  ;;  %1221 = vmatpush.bf16.msra.mxu3 %v1116_v21 }
  0x63   : > { %638 = vmatpush.bf16.msra.mxu0 %v1115_v22  ;;  %1222 = vmatpush.bf16.msra.mxu1 %v1115_v22 }
  0x64   : > { %1223 = vmatpush.bf16.msra.mxu2 %v1115_v22  ;;  %1224 = vmatpush.bf16.msra.mxu3 %v1115_v22 }
  0x67   : > { %639 = vmatpush.bf16.msra.mxu0 %v1114_v23  ;;  %1225 = vmatpush.bf16.msra.mxu1 %v1114_v23 }
  0x68   : > { %1226 = vmatpush.bf16.msra.mxu2 %v1114_v23  ;;  %1227 = vmatpush.bf16.msra.mxu3 %v1114_v23 }
  0x6b   : > { %640 = vmatpush.bf16.msra.mxu0 %v1113_v24  ;;  %1228 = vmatpush.bf16.msra.mxu1 %v1113_v24 }
  0x6c   : > { %1229 = vmatpush.bf16.msra.mxu2 %v1113_v24  ;;  %1230 = vmatpush.bf16.msra.mxu3 %v1113_v24 }
  0x6e   : > { %641 = vmatmul.bf16.vlgmr.msra.gmra.mxu0 %v1105_v25  ;;  %651 = vmatmul.bf16.vlgmr.msra.gmra.mxu1 %v1107_v26 }
  0x6f   : > { %661 = vmatmul.bf16.vlgmr.msra.gmra.mxu2 %v1109_v27  ;;  %671 = vmatmul.bf16.vlgmr.msra.gmra.mxu3 %v1111_v28 }
  0x7e   : > { %646 = vmatmul.bf16.gmra.mxu0 %v1106_v29  ;;  %656 = vmatmul.bf16.gmra.mxu1 %v1108_v30 }
  0x7f   : > { %666 = vmatmul.bf16.gmra.mxu2 %v1110_v31  ;;  %676 = vmatmul.bf16.gmra.mxu3 %v1112_v32 }
  0xeb   : > { %v642_v35 = vpop.f32.mrf.mxu0  ;;  %v652_v36 = vpop.f32.mrf.mxu1 }
  0xec   : > { %v682_v37 = vadd.f32 %v642_v35, %v489_v33  ;;  %v686_v38 = vadd.f32 %v652_v36, %v493_v34 }
  0xee   : > { %698 = vst [vmem:[#allocation2 + $0x30] sm:$0xff] %v682_v37 }
  0xef   : > { %702 = vst [vmem:[#allocation2 + $0x50] sm:$0xff] %v686_v38 }
  0xf2   : > { %v662_v43 = vpop.f32.mrf.mxu2  ;;  %v672_v44 = vpop.f32.mrf.mxu3 }
  0xf3   : > { %v690_v45 = vadd.f32 %v662_v43, %v497_v39  ;;  %v694_v46 = vadd.f32 %v672_v44, %v501_v40  ;;  %v644_v47 = vpop.f32.mrf.mxu0  ;;  %v654_v48 = vpop.f32.mrf.mxu1 }
  0xf4   : > { %v683_v49 = vadd.f32 %v644_v47, %v490_v41  ;;  %v687_v50 = vadd.f32 %v654_v48, %v494_v42 }
  0xf5   : > { %706 = vst [vmem:[#allocation2 + $0x40] sm:$0xff] %v690_v45 }
  0xf6   : > { %710 = vst [vmem:[#allocation2 + $0x60] sm:$0xff] %v694_v46 }
  0xf7   : > { %699 = vst [vmem:[#allocation2] sm:$0xff] %v683_v49 }
  0xf8   : > { %703 = vst [vmem:[#allocation2 + $0x68] sm:$0xff] %v687_v50 }
  0xfa   : > { %v664_v55 = vpop.f32.mrf.mxu2  ;;  %v674_v56 = vpop.f32.mrf.mxu3 }
  0xfb   : > { %v691_v57 = vadd.f32 %v664_v55, %v498_v51  ;;  %v695_v58 = vadd.f32 %v674_v56, %v502_v52  ;;  %v647_v59 = vpop.f32.mrf.mxu0  ;;  %v657_v60 = vpop.f32.mrf.mxu1 }
  0xfc   : > { %v684_v61 = vadd.f32 %v647_v59, %v491_v53  ;;  %v688_v62 = vadd.f32 %v657_v60, %v495_v54 }
  0xfd   : > { %707 = vst [vmem:[#allocation2 + $0x20] sm:$0xff] %v691_v57 }
  0xfe   : > { %711 = vst [vmem:[#allocation2 + $0x70] sm:$0xff] %v695_v58 }
  0xff   : > { %700 = vst [vmem:[#allocation2 + $0x58] sm:$0xff] %v684_v61 }
 0x100   : > { %704 = vst [vmem:[#allocation2 + $0x8] sm:$0xff] %v688_v62 }
 0x102   : > { %v667_v3 = vpop.f32.mrf.mxu2  ;;  %v677_v4 = vpop.f32.mrf.mxu3 }
 0x103   : > { %v692_v5 = vadd.f32 %v667_v3, %v499_v63  ;;  %v696_v6 = vadd.f32 %v677_v4, %v503_v0  ;;  %v649_v7 = vpop.f32.mrf.mxu0  ;;  %v659_v8 = vpop.f32.mrf.mxu1 }
 0x104   : > { %v685_v9 = vadd.f32 %v649_v7, %v492_v1  ;;  %v689_v10 = vadd.f32 %v659_v8, %v496_v2 }
 0x105   : > { %708 = vst [vmem:[#allocation2 + $0x10] sm:$0xff] %v692_v5 }
 0x106   : > { %712 = vst [vmem:[#allocation2 + $0x78] sm:$0xff] %v696_v6 }
 0x107   : > { %701 = vst [vmem:[#allocation2 + $0x18] sm:$0xff] %v685_v9 }
 0x108   : > { %705 = vst [vmem:[#allocation2 + $0x48] sm:$0xff] %v689_v10 }
 0x10a   : > { %v669_v13 = vpop.f32.mrf.mxu2  ;;  %v679_v14 = vpop.f32.mrf.mxu3  ;;  %717 = sbr.rel (%p1099_p13) target bundleno = 301 (0x12d), region = 93 }
 0x10b   : > { %v693_v15 = vadd.f32 %v669_v13, %v500_v11  ;;  %v697_v16 = vadd.f32 %v679_v14, %v504_v12 }
 0x10d   : > { %709 = vst [vmem:[#allocation2 + $0x38] sm:$0xff] %v693_v15 }
 0x10e   : > { %713 = vst [vmem:[#allocation2 + $0x28] sm:$0xff] %v697_v16 }
 0x10f   : > { %v718_v17 = vld [vmem:[#allocation2 + $0x30] sm:$0xff]  ;;  %v719_v18 = vld [vmem:[#allocation2] sm:$0xff]  ;;  %v720_v22 = vld [vmem:[#allocation2 + $0x58] sm:$0xff] }
 0x110   : > { %v1514_v19 = vld [vmem:[%s1621_s2] ss:$0 sm:$0xff]  ;;  %v721_v23 = vld [vmem:[#allocation2 + $0x18] sm:$0xff]  ;;  %v1193_v28 = vld [vmem:[%s1623_s4 + $0x8] sm:$0xff]  }
 0x111   : > { %v1519_v20 = vld [vmem:[%s1622_s3] ss:$0 sm:$0xff]  ;;  %v738_v24 = vmul.f32 %v1514_v19, %v718_v17  ;;  %v739_v25 = vmul.f32 %v1514_v19, %v719_v18  ;;  %v722_v29 = vld [vmem:[#allocation2 + $0x50] sm:$0xff]  ;;  %v723_v30 = vld [vmem:[#allocation2 + $0x68] sm:$0xff]  ;;  %v740_v31 = vmul.f32 %v1514_v19, %v720_v22  ;;  %v741_v32 = vmul.f32 %v1514_v19, %v721_v23 }
 0x112   : > { %v1122_v21 = vld [vmem:[%s1623_s4] sm:$0xff]   ;;  %v1127_v33 = vunpack.c.l.bf16 %v1193_v28  ;;  %v1128_v34 = vunpack.c.h.bf16 %v1193_v28  ;;  %v1194_v35 = vld [vmem:[%s1623_s4 + $0x10] sm:$0xff]   ;;  %v742_v38 = vmul.f32 %v1514_v19, %v722_v29  ;;  %v743_v39 = vmul.f32 %v1514_v19, %v723_v30  ;;  %v724_v40 = vld [vmem:[#allocation2 + $0x8] sm:$0xff] }
 0x113   : > { %v1123_v26 = vunpack.c.l.bf16 %v1122_v21  ;;  %v1124_v27 = vunpack.c.h.bf16 %v1122_v21  ;;  %v758_v36 = vadd.f32 %v1519_v20, %v738_v24  ;;  %v759_v37 = vadd.f32 %v1519_v20, %v739_v25  ;;  %v725_v41 = vld [vmem:[#allocation2 + $0x48] sm:$0xff]  ;;  %v1195_v54 = vld [vmem:[%s1623_s4 + $0x18] sm:$0xff]   ;;  %v726_v59 = vld [vmem:[#allocation2 + $0x40] sm:$0xff] }
 0x114   : > { %v760_v42 = vadd.f32 %v1519_v20, %v740_v31  ;;  %v761_v43 = vadd.f32 %v1519_v20, %v741_v32  ;;  %v1131_v44 = vunpack.c.l.bf16 %v1194_v35  ;;  %v1132_v45 = vunpack.c.h.bf16 %v1194_v35  ;;  %v727_v60 = vld [vmem:[#allocation2 + $0x20] sm:$0xff]  ;;  %v728_v6 = vld [vmem:[#allocation2 + $0x10] sm:$0xff]  ;;  %v729_v11 = vld [vmem:[#allocation2 + $0x38] sm:$0xff] }
 0x115   : > { %v806_v46 = vadd.f32 %v1123_v26, %v758_v36  ;;  %v807_v47 = vadd.f32 %v1124_v27, %v759_v37  ;;  %v762_v48 = vadd.f32 %v1519_v20, %v742_v38  ;;  %v763_v49 = vadd.f32 %v1519_v20, %v743_v39  ;;  %v1196_v1 = vld [vmem:[%s1623_s4 + $0x20] sm:$0xff]   ;;  %v1197_v12 = vld [vmem:[%s1623_s4 + $0x28] sm:$0xff]   ;;  %v731_v24 = vld [vmem:[#allocation2 + $0x70] sm:$0xff] }
 0x116   : > { %v808_v50 = vadd.f32 %v1127_v33, %v760_v42  ;;  %v809_v51 = vadd.f32 %v1128_v34, %v761_v43  ;;  %v744_v52 = vmul.f32 %v1514_v19, %v724_v40  ;;  %v745_v53 = vmul.f32 %v1514_v19, %v725_v41  ;;  %v730_v23 = vld [vmem:[#allocation2 + $0x60] sm:$0xff]  ;;  %v1198_v25 = vld [vmem:[%s1623_s4 + $0x30] sm:$0xff]   ;;  %v732_v38 = vld [vmem:[#allocation2 + $0x78] sm:$0xff] }
 0x117   : > { %v822_v55 = vmax.f32 %v806_v46, 0.0  ;;  %v823_v56 = vmax.f32 %v807_v47, 0.0  ;;  %v810_v57 = vadd.f32 %v1131_v44, %v762_v48  ;;  %v811_v58 = vadd.f32 %v1132_v45, %v763_v49  ;;  %v733_v39 = vld [vmem:[#allocation2 + $0x28] sm:$0xff]  ;;  %v1199_v44 = vld [vmem:[%s1623_s4 + $0x38] sm:$0xff]  }
 0x118   : > { %v824_v61 = vmax.f32 %v808_v50, 0.0  ;;  %v825_v62 = vmax.f32 %v809_v51, 0.0  ;;  %v764_v63 = vadd.f32 %v1519_v20, %v744_v52  ;;  %v765_v0 = vadd.f32 %v1519_v20, %v745_v53 }
 0x119   : > { %v1156_v2 = vpack.c.bf16 %v823_v56, %v822_v55  ;;  %v826_v3 = vmax.f32 %v810_v57, 0.0  ;;  %v827_v4 = vmax.f32 %v811_v58, 0.0  ;;  %v1135_v5 = vunpack.c.l.bf16 %v1195_v54 }
 0x11a   : > { %v1161_v7 = vpack.c.bf16 %v825_v62, %v824_v61  ;;  %v1136_v8 = vunpack.c.h.bf16 %v1195_v54  ;;  %v746_v9 = vmul.f32 %v1514_v19, %v726_v59  ;;  %v747_v10 = vmul.f32 %v1514_v19, %v727_v60 }
 0x11b   : > { %1157 = vst [vmem:[%s1624_s5] sm:$0xff] %v1156_v2   ;;  %v1166_v13 = vpack.c.bf16 %v827_v4, %v826_v3  ;;  %v812_v14 = vadd.f32 %v1135_v5, %v764_v63  ;;  %v1139_v15 = vunpack.c.l.bf16 %v1196_v1  ;;  %v1140_v16 = vunpack.c.h.bf16 %v1196_v1 }
 0x11c   : > { %1200 = vst [vmem:[%s1624_s5 + $0x8] sm:$0xff] %v1161_v7   ;;  %v813_v17 = vadd.f32 %v1136_v8, %v765_v0  ;;  %v766_v18 = vadd.f32 %v1519_v20, %v746_v9  ;;  %v767_v21 = vadd.f32 %v1519_v20, %v747_v10  ;;  %v748_v22 = vmul.f32 %v1514_v19, %v728_v6 }
 0x11d   : > { %1201 = vst [vmem:[%s1624_s5 + $0x10] sm:$0xff] %v1166_v13   ;;  %v828_v26 = vmax.f32 %v812_v14, 0.0  ;;  %v749_v27 = vmul.f32 %v1514_v19, %v729_v11  ;;  %v1143_v28 = vunpack.c.l.bf16 %v1197_v12  ;;  %v1144_v29 = vunpack.c.h.bf16 %v1197_v12 }
 0x11e   : > { %v829_v30 = vmax.f32 %v813_v17, 0.0  ;;  %v814_v31 = vadd.f32 %v1139_v15, %v766_v18  ;;  %v815_v32 = vadd.f32 %v1140_v16, %v767_v21  ;;  %v768_v33 = vadd.f32 %v1519_v20, %v748_v22 }
 0x11f   : > { %v769_v34 = vadd.f32 %v1519_v20, %v749_v27  ;;  %v750_v35 = vmul.f32 %v1514_v19, %v730_v23  ;;  %v751_v36 = vmul.f32 %v1514_v19, %v731_v24  ;;  %v1147_v37 = vunpack.c.l.bf16 %v1198_v25 }
 0x120   : > { %v1171_v40 = vpack.c.bf16 %v829_v30, %v828_v26  ;;  %v830_v41 = vmax.f32 %v814_v31, 0.0  ;;  %v831_v42 = vmax.f32 %v815_v32, 0.0  ;;  %v816_v43 = vadd.f32 %v1143_v28, %v768_v33 }
 0x121   : > { %v817_v45 = vadd.f32 %v1144_v29, %v769_v34  ;;  %v770_v46 = vadd.f32 %v1519_v20, %v750_v35  ;;  %v771_v47 = vadd.f32 %v1519_v20, %v751_v36  ;;  %v1148_v48 = vunpack.c.h.bf16 %v1198_v25 }
 0x122   : > { %1202 = vst [vmem:[%s1624_s5 + $0x18] sm:$0xff] %v1171_v40   ;;  %v1176_v49 = vpack.c.bf16 %v831_v42, %v830_v41  ;;  %v832_v50 = vmax.f32 %v816_v43, 0.0  ;;  %v752_v51 = vmul.f32 %v1514_v19, %v732_v38  ;;  %v753_v52 = vmul.f32 %v1514_v19, %v733_v39 }
 0x123   : > { %v833_v53 = vmax.f32 %v817_v45, 0.0  ;;  %v818_v54 = vadd.f32 %v1147_v37, %v770_v46  ;;  %v819_v55 = vadd.f32 %v1148_v48, %v771_v47  ;;  %v1151_v56 = vunpack.c.l.bf16 %v1199_v44 }
 0x124   : > { %1203 = vst [vmem:[%s1624_s5 + $0x20] sm:$0xff] %v1176_v49   ;;  %v772_v57 = vadd.f32 %v1519_v20, %v752_v51  ;;  %v773_v58 = vadd.f32 %v1519_v20, %v753_v52  ;;  %v1152_v59 = vunpack.c.h.bf16 %v1199_v44 }
 0x125   : > { %v1181_v60 = vpack.c.bf16 %v833_v53, %v832_v50  ;;  %v834_v61 = vmax.f32 %v818_v54, 0.0  ;;  %v835_v62 = vmax.f32 %v819_v55, 0.0 }
 0x126   : > { %v820_v63 = vadd.f32 %v1151_v56, %v772_v57  ;;  %v821_v0 = vadd.f32 %v1152_v59, %v773_v58 }
 0x127   : > { %1204 = vst [vmem:[%s1624_s5 + $0x28] sm:$0xff] %v1181_v60   ;;  %v1186_v19 = vpack.c.bf16 %v835_v62, %v834_v61 }
 0x128   : > { %v836_v1 = vmax.f32 %v820_v63, 0.0  ;;  %v837_v2 = vmax.f32 %v821_v0, 0.0 }
 0x129   : > { %1205 = vst [vmem:[%s1624_s5 + $0x30] sm:$0xff] %v1186_v19  }
 0x12a   : > { %v1191_v3 = vpack.c.bf16 %v837_v2, %v836_v1 }
 0x12c   : > { %1206 = vst [vmem:[%s1624_s5 + $0x38] sm:$0xff] %v1191_v3  }
 0x12d PF: > { %s18_s23 = sadd.s32 1, %s1364_s23   ;;  %s1627_s18 = smov %s1348_s19 }
 0x12e   : > { %p15_p0 = scmp.ge.s32.totalorder %s18_s23, 11   ;;  %s1628_s19 = smov %s1352_s20 }
 0x12f   : > { %s1629_s20 = smov %s1447_s30  ;;  %s1630_s21 = smov %s1360_s22 }
 0x130   : > { %s1631_s22 = smov %s1633_s25  ;;  %17 = sbr.rel (!%p15_p0) target bundleno = 4 (0x4), region = 146 }
 0x135   :  { %898 = vsyncpa [#allocation5], 1 }
 0x136   :  { %900 = vsyncpa [#allocation5 + $0x1], 1 }

// kernel: resnet18_forward.26
= control target key start
LH: loop header
LB: loop body
LE: loop exit
PB: predicated region body
PF: predicated region fallthrough
CT: control target
= control target key end

     0   :  { %9 = vsyncpa [#allocation5], 0  ;;  %s1406_s0 = inlined_call_operand.vmem [shape: bf16[128,1152], index: 0, kind: input, shape index: {}]   ;;  %s1407_s1 = inlined_call_operand.hbm [shape: bf16[1152,128], index: 1, kind: input, shape index: {}]   ;;  %s1408_s2 = inlined_call_operand.vmem [shape: f32[1,128], index: 2, kind: input, shape index: {}]   ;;  %s1409_s3 = inlined_call_operand.vmem [shape: f32[1,128], index: 3, kind: input, shape index: {}]   ;;  %s1410_s4 = inlined_call_operand.vmem [shape: bf16[128,128], index: 4, kind: output, shape index: {}]  }
   0x1   :  { %11 = vsyncpa [#allocation5 + $0x1], 0  ;;  %s1228_s15 = smov 0   ;;  %s1230_s16 = smov 0  }
   0x2   :  { %s1232_s17 = smov 0   ;;  %s1234_s18 = smov 0  }
   0x3   :  { %s1236_s19 = smov 0   ;;  %s1238_s20 = smov 0  }
   0x4 LB: > { %s894_s21 = sadd.s32 4294967295, %s1198_s20   ;;  %s29_s22 = sadd.s32 1, %s1194_s19  ;;  %s1198_s20 = sphi %s1238_s20, %s17_s20   ;;  %s1194_s19 = sphi %s1236_s19, %s1417_s19   ;;  %s1190_s18 = sphi %s1234_s18, %s1416_s18   ;;  %s1186_s17 = sphi %s1232_s17, %s1415_s17   ;;  %s1182_s16 = sphi %s1230_s16, %s1414_s16   ;;  %s1178_s15 = sphi %s1228_s15, %s1413_s15  }
   0x5   : > { %p30_p0 = scmp.ge.s32.totalorder %s29_s22, 9  ;;  %s45_s23 = sadd.s32 1, %s1186_s17 }
   0x6   : > { %p52_p1 = scmp.ne.s32.totalorder %s1186_s17, %s1182_s16  ;;  %p53_p2 = scmp.eq.s32.totalorder %s1198_s20, 0 }
   0x7   : > { %s1419_s22 = smov (%p30_p0, %s29_s22), 0  ;;  %p86_p4 = scmp.ne.s32.totalorder %s1182_s16, %s1178_s15 }
   0x8   : > { %p1264_p3 = por %p53_p2, %p52_p1  ;;  %s41_s25 = ssub.s32 %s1194_s19, %s1419_s22 }
   0x9   : > { %p87_p5 = scmp.eq.s32.totalorder %s894_s21, 0  ;;  %p43_p6 = scmp.eq.s32.totalorder %s41_s25, 0 }
   0xa   : > { %p898_p8 = scmp.ge.s32.totalorder %s1198_s20, 9 }
   0xb   : > { %p1271_p7 = por %p87_p5, %p86_p4 }
   0xc   : > { %s1276_s27 = scalar_select %p43_p6, %s1186_s17, %s45_s23  }
   0xd   : > { %198 = sbr.rel (%p898_p8) target bundleno = 44 (0x2c), region = 24 }
  0x12   : > { %201 = sbr.rel (!%p1264_p3) target bundleno = 38 (0x26), region = 28  ;;  %s203_s28 = sand.u32 (%p1264_p3), 1, %s1186_s17  }
  0x13   : > { %s900_s29 = sshll.u32 (%p1264_p3), %s1194_s19, 2  ;;  %s899_s30 = sshll.u32 (%p1264_p3), %s203_s28, 6 }
  0x14   : > { %s1286_s7 = scalar_lea.vmem (%p1264_p3), %s1406_s0, %s900_s29  ;;  %s205_s8 = scalar_lea.vmem (%p1264_p3), [#allocation3], %s899_s30 }
  0x15   : > { %v227_v0 = vld [vmem:[%s1286_s7] sm:$0xf] (%p1264_p3)  ;;  %v229_v1 = vld [vmem:[%s1286_s7 + $0x24] sm:$0xf] (%p1264_p3)  ;;  %v231_v2 = vld [vmem:[%s1286_s7 + $0x48] sm:$0xf] (%p1264_p3) }
  0x16   : > { %228 = vst [vmem:[%s205_s8] sm:$0xf] (%p1264_p3), %v227_v0  ;;  %v233_v3 = vld [vmem:[%s1286_s7 + $0x6c] sm:$0xf] (%p1264_p3)  ;;  %v235_v4 = vld [vmem:[%s1286_s7 + $0x90] sm:$0xf] (%p1264_p3) }
  0x17   : > { %230 = vst [vmem:[%s205_s8 + $0x4] sm:$0xf] %v229_v1  ;;  %v237_v5 = vld [vmem:[%s1286_s7 + $0xb4] sm:$0xf]  ;;  %v239_v6 = vld [vmem:[%s1286_s7 + $0xd8] sm:$0xf] }
  0x18   : > { %232 = vst [vmem:[%s205_s8 + $0x8] sm:$0xf] %v231_v2  ;;  %v241_v7 = vld [vmem:[%s1286_s7 + $0xfc] sm:$0xf]  ;;  %v243_v8 = vld [vmem:[%s1286_s7 + $0x120] sm:$0xf] }
  0x19   : > { %234 = vst [vmem:[%s205_s8 + $0xc] sm:$0xf] %v233_v3  ;;  %v245_v9 = vld [vmem:[%s1286_s7 + $0x144] sm:$0xf]  ;;  %v247_v10 = vld [vmem:[%s1286_s7 + $0x168] sm:$0xf] }
  0x1a   : > { %236 = vst [vmem:[%s205_s8 + $0x10] sm:$0xf] %v235_v4  ;;  %v249_v11 = vld [vmem:[%s1286_s7 + $0x18c] sm:$0xf]  ;;  %v251_v12 = vld [vmem:[%s1286_s7 + $0x1b0] sm:$0xf] }
  0x1b   : > { %238 = vst [vmem:[%s205_s8 + $0x14] sm:$0xf] %v237_v5  ;;  %v253_v13 = vld [vmem:[%s1286_s7 + $0x1d4] sm:$0xf]  ;;  %v255_v14 = vld [vmem:[%s1286_s7 + $0x1f8] sm:$0xf] }
  0x1c   : > { %240 = vst [vmem:[%s205_s8 + $0x18] sm:$0xf] %v239_v6  ;;  %v257_v15 = vld [vmem:[%s1286_s7 + $0x21c] sm:$0xf] }
  0x1d   : > { %242 = vst [vmem:[%s205_s8 + $0x1c] sm:$0xf] %v241_v7 }
  0x1e   : > { %244 = vst [vmem:[%s205_s8 + $0x20] sm:$0xf] %v243_v8 }
  0x1f   : > { %246 = vst [vmem:[%s205_s8 + $0x24] sm:$0xf] %v245_v9 }
  0x20   : > { %248 = vst [vmem:[%s205_s8 + $0x28] sm:$0xf] %v247_v10 }
  0x21   : > { %250 = vst [vmem:[%s205_s8 + $0x2c] sm:$0xf] %v249_v11 }
  0x22   : > { %252 = vst [vmem:[%s205_s8 + $0x30] sm:$0xf] %v251_v12 }
  0x23   : > { %254 = vst [vmem:[%s205_s8 + $0x34] sm:$0xf] %v253_v13 }
  0x24   : > { %256 = vst [vmem:[%s205_s8 + $0x38] sm:$0xf] %v255_v14 }
  0x25   : > { %258 = vst [vmem:[%s205_s8 + $0x3c] sm:$0xf] %v257_v15 }
  0x26 PF: > { %s315_s9 = sand.u32 1, %s1186_s17   ;;  %s977_s10 = sshll.u32 %s1194_s19, 6 }
  0x27   : > { %s901_s11 = sshll.u32 %s315_s9, 6  ;;  %s325_s14 = scalar_lea.hbm %s1407_s1, %s977_s10 }
  0x28   : > { %s326_s15 = sshll.u32 %s325_s14, 4  ;;  %s319_s21 = scalar_lea.vmem [#allocation4], %s901_s11  ;;  %s327_s15 = int_to_ptr.hbm [resolvable:$true] %s326_s15 }
  0x29   : > { %s328_s23 = sshll.u32 %s319_s21, 4  ;;  %s316_s25 = scalar_lea.sflag [#allocation5], %s315_s9  ;;  %s329_s23 = int_to_ptr.vmem [resolvable:$true] %s328_s23 }
  0x2a   : > { %s1200_s28 = smov 64   ;;  %s1201_s29 = smov 4  }
  0x2b   : > { %1065 = dma.hbm_to_vmem [thread:$0]  (%p1264_p3), %s327_s15, 1024, %s329_s23, %s316_s25, %s1200_s28, %s1200_s28, %s1201_s29  }
  0x2c PF: > { %p904_p9 = scmp.ge.s32.totalorder %s1198_s20, 1  ;;  %p336_p10 = scmp.lt.s32.totalorder %s1198_s20, 10 }
  0x2e   : > { %p337_p11 = pnand %p904_p9, %p336_p10 }
  0x2f   : > { %s343_s30 = sand.u32 (!%p337_p11), 1, %s1182_s16  }
  0x30   : > { %340 = sbr.rel (%p337_p11) target bundleno = 292 (0x124), region = 73  ;;  %s905_s5 = sshll.u32 (!%p337_p11), %s343_s30, 6 }
  0x31   : > { %s1314_s6 = scalar_lea.vmem (!%p337_p11), [#allocation3], %s905_s5  ;;  %s350_s7 = scalar_lea.sflag (!%p337_p11), [#allocation5], %s343_s30 }
  0x32   : > { %s1316_s8 = scalar_lea.vmem (!%p337_p11), [#allocation4], %s905_s5 }
  0x35   : > { %1173 = dma.done.wait (%p1271_p7), %s350_s7, 1024  }
  0x36   : > { %1175 = vsyncadd (%p1271_p7), %s350_s7, 4294966272  ;;  %p907_p12 = scmp.ne.s32.totalorder %s1190_s18, 0 }
  0x38   : > { %412 = sbr.rel (%p907_p12) target bundleno = 78 (0x4e), region = 85 }
  0x3d   : > { %v1202_v16 = vmov 0.0  }
  0x3e   : > { %413 = vst [vmem:[#allocation2 + $0x30] sm:$0xff] %v1202_v16 }
  0x3f   : > { %414 = vst [vmem:[#allocation2] sm:$0xff] %v1202_v16 }
  0x40   : > { %415 = vst [vmem:[#allocation2 + $0x58] sm:$0xff] %v1202_v16 }
  0x41   : > { %416 = vst [vmem:[#allocation2 + $0x18] sm:$0xff] %v1202_v16 }
  0x42   : > { %417 = vst [vmem:[#allocation2 + $0x50] sm:$0xff] %v1202_v16 }
  0x43   : > { %418 = vst [vmem:[#allocation2 + $0x68] sm:$0xff] %v1202_v16 }
  0x44   : > { %419 = vst [vmem:[#allocation2 + $0x8] sm:$0xff] %v1202_v16 }
  0x45   : > { %420 = vst [vmem:[#allocation2 + $0x48] sm:$0xff] %v1202_v16 }
  0x46   : > { %421 = vst [vmem:[#allocation2 + $0x40] sm:$0xff] %v1202_v16 }
  0x47   : > { %422 = vst [vmem:[#allocation2 + $0x20] sm:$0xff] %v1202_v16 }
  0x48   : > { %423 = vst [vmem:[#allocation2 + $0x10] sm:$0xff] %v1202_v16 }
  0x49   : > { %424 = vst [vmem:[#allocation2 + $0x38] sm:$0xff] %v1202_v16 }
  0x4a   : > { %425 = vst [vmem:[#allocation2 + $0x60] sm:$0xff] %v1202_v16 }
  0x4b   : > { %426 = vst [vmem:[#allocation2 + $0x70] sm:$0xff] %v1202_v16 }
  0x4c   : > { %427 = vst [vmem:[#allocation2 + $0x78] sm:$0xff] %v1202_v16 }
  0x4d   : > { %428 = vst [vmem:[#allocation2 + $0x28] sm:$0xff] %v1202_v16 }
  0x4e PF: > { %v993_v17 = vld [vmem:[%s1316_s8 + $0x38] sm:$0xff]  ;;  %v992_v18 = vld [vmem:[%s1316_s8 + $0x30] sm:$0xff]  ;;  %v991_v19 = vld [vmem:[%s1316_s8 + $0x28] sm:$0xff]  ;;  %p972_p13 = scmp.ne.s32.totalorder %s1190_s18, 8 }
  0x4f   : > { %573 = vmatpush.bf16.msra.mxu0 %v993_v17  ;;  %1041 = vmatpush.bf16.msra.mxu1 %v993_v17  ;;  %v990_v20 = vld [vmem:[%s1316_s8 + $0x20] sm:$0xff]  ;;  %v989_v21 = vld [vmem:[%s1316_s8 + $0x18] sm:$0xff]  ;;  %v988_v22 = vld [vmem:[%s1316_s8 + $0x10] sm:$0xff] }
  0x50   : > { %1042 = vmatpush.bf16.msra.mxu2 %v993_v17  ;;  %1043 = vmatpush.bf16.msra.mxu3 %v993_v17  ;;  %v987_v23 = vld [vmem:[%s1316_s8 + $0x8] sm:$0xff]  ;;  %v986_v24 = vld [vmem:[%s1316_s8] sm:$0xff]  ;;  %v980_v26 = vld [vmem:[%s1314_s6 + $0x10] sm:$0xff] }
  0x51   : > { %v978_v25 = vld [vmem:[%s1314_s6] sm:$0xff]  ;;  %v984_v28 = vld [vmem:[%s1314_s6 + $0x30] sm:$0xff]  ;;  %v979_v29 = vld [vmem:[%s1314_s6 + $0x8] sm:$0xff] }
  0x52   : > { %v982_v27 = vld [vmem:[%s1314_s6 + $0x20] sm:$0xff]  ;;  %v981_v30 = vld [vmem:[%s1314_s6 + $0x18] sm:$0xff]  ;;  %v983_v31 = vld [vmem:[%s1314_s6 + $0x28] sm:$0xff] }
  0x53   : > { %574 = vmatpush.bf16.msra.mxu0 %v992_v18  ;;  %1044 = vmatpush.bf16.msra.mxu1 %v992_v18  ;;  %v985_v32 = vld [vmem:[%s1314_s6 + $0x38] sm:$0xff]  ;;  %v429_v33 = vld [vmem:[#allocation2 + $0x30] sm:$0xff]  ;;  %v437_v39 = vld [vmem:[#allocation2 + $0x40] sm:$0xff] }
  0x54   : > { %1045 = vmatpush.bf16.msra.mxu2 %v992_v18  ;;  %1046 = vmatpush.bf16.msra.mxu3 %v992_v18  ;;  %v433_v34 = vld [vmem:[#allocation2 + $0x50] sm:$0xff]  ;;  %v441_v40 = vld [vmem:[#allocation2 + $0x60] sm:$0xff]  ;;  %v434_v42 = vld [vmem:[#allocation2 + $0x68] sm:$0xff] }
  0x55   : > { %v430_v41 = vld [vmem:[#allocation2] sm:$0xff]  ;;  %v442_v52 = vld [vmem:[#allocation2 + $0x70] sm:$0xff]  ;;  %v431_v53 = vld [vmem:[#allocation2 + $0x58] sm:$0xff] }
  0x56   : > { %v438_v51 = vld [vmem:[#allocation2 + $0x20] sm:$0xff]  ;;  %v435_v54 = vld [vmem:[#allocation2 + $0x8] sm:$0xff]  ;;  %v439_v63 = vld [vmem:[#allocation2 + $0x10] sm:$0xff] }
  0x57   : > { %575 = vmatpush.bf16.msra.mxu0 %v991_v19  ;;  %1047 = vmatpush.bf16.msra.mxu1 %v991_v19  ;;  %v443_v0 = vld [vmem:[#allocation2 + $0x78] sm:$0xff]  ;;  %v436_v2 = vld [vmem:[#allocation2 + $0x48] sm:$0xff] }
  0x58   : > { %1048 = vmatpush.bf16.msra.mxu2 %v991_v19  ;;  %1049 = vmatpush.bf16.msra.mxu3 %v991_v19  ;;  %v432_v1 = vld [vmem:[#allocation2 + $0x18] sm:$0xff]  ;;  %v444_v12 = vld [vmem:[#allocation2 + $0x28] sm:$0xff] }
  0x59   : > { %v440_v11 = vld [vmem:[#allocation2 + $0x38] sm:$0xff] }
  0x5b   : > { %576 = vmatpush.bf16.msra.mxu0 %v990_v20  ;;  %1050 = vmatpush.bf16.msra.mxu1 %v990_v20 }
  0x5c   : > { %1051 = vmatpush.bf16.msra.mxu2 %v990_v20  ;;  %1052 = vmatpush.bf16.msra.mxu3 %v990_v20 }
  0x5f   : > { %577 = vmatpush.bf16.msra.mxu0 %v989_v21  ;;  %1053 = vmatpush.bf16.msra.mxu1 %v989_v21 }
  0x60   : > { %1054 = vmatpush.bf16.msra.mxu2 %v989_v21  ;;  %1055 = vmatpush.bf16.msra.mxu3 %v989_v21 }
  0x63   : > { %578 = vmatpush.bf16.msra.mxu0 %v988_v22  ;;  %1056 = vmatpush.bf16.msra.mxu1 %v988_v22 }
  0x64   : > { %1057 = vmatpush.bf16.msra.mxu2 %v988_v22  ;;  %1058 = vmatpush.bf16.msra.mxu3 %v988_v22 }
  0x67   : > { %579 = vmatpush.bf16.msra.mxu0 %v987_v23  ;;  %1059 = vmatpush.bf16.msra.mxu1 %v987_v23 }
  0x68   : > { %1060 = vmatpush.bf16.msra.mxu2 %v987_v23  ;;  %1061 = vmatpush.bf16.msra.mxu3 %v987_v23 }
  0x6b   : > { %580 = vmatpush.bf16.msra.mxu0 %v986_v24  ;;  %1062 = vmatpush.bf16.msra.mxu1 %v986_v24 }
  0x6c   : > { %1063 = vmatpush.bf16.msra.mxu2 %v986_v24  ;;  %1064 = vmatpush.bf16.msra.mxu3 %v986_v24 }
  0x6e   : > { %581 = vmatmul.bf16.vlgmr.msra.gmra.mxu0 %v978_v25  ;;  %591 = vmatmul.bf16.vlgmr.msra.gmra.mxu1 %v980_v26 }
  0x6f   : > { %601 = vmatmul.bf16.vlgmr.msra.gmra.mxu2 %v982_v27  ;;  %611 = vmatmul.bf16.vlgmr.msra.gmra.mxu3 %v984_v28 }
  0x7e   : > { %586 = vmatmul.bf16.gmra.mxu0 %v979_v29  ;;  %596 = vmatmul.bf16.gmra.mxu1 %v981_v30 }
  0x7f   : > { %606 = vmatmul.bf16.gmra.mxu2 %v983_v31  ;;  %616 = vmatmul.bf16.gmra.mxu3 %v985_v32 }
  0xeb   : > { %v582_v35 = vpop.f32.mrf.mxu0  ;;  %v592_v36 = vpop.f32.mrf.mxu1 }
  0xec   : > { %v622_v37 = vadd.f32 %v582_v35, %v429_v33  ;;  %v626_v38 = vadd.f32 %v592_v36, %v433_v34 }
  0xee   : > { %638 = vst [vmem:[#allocation2 + $0x30] sm:$0xff] %v622_v37 }
  0xef   : > { %642 = vst [vmem:[#allocation2 + $0x50] sm:$0xff] %v626_v38 }
  0xf2   : > { %v602_v43 = vpop.f32.mrf.mxu2  ;;  %v612_v44 = vpop.f32.mrf.mxu3 }
  0xf3   : > { %v630_v45 = vadd.f32 %v602_v43, %v437_v39  ;;  %v634_v46 = vadd.f32 %v612_v44, %v441_v40  ;;  %v584_v47 = vpop.f32.mrf.mxu0  ;;  %v594_v48 = vpop.f32.mrf.mxu1 }
  0xf4   : > { %v623_v49 = vadd.f32 %v584_v47, %v430_v41  ;;  %v627_v50 = vadd.f32 %v594_v48, %v434_v42 }
  0xf5   : > { %646 = vst [vmem:[#allocation2 + $0x40] sm:$0xff] %v630_v45 }
  0xf6   : > { %650 = vst [vmem:[#allocation2 + $0x60] sm:$0xff] %v634_v46 }
  0xf7   : > { %639 = vst [vmem:[#allocation2] sm:$0xff] %v623_v49 }
  0xf8   : > { %643 = vst [vmem:[#allocation2 + $0x68] sm:$0xff] %v627_v50 }
  0xfa   : > { %v604_v55 = vpop.f32.mrf.mxu2  ;;  %v614_v56 = vpop.f32.mrf.mxu3 }
  0xfb   : > { %v631_v57 = vadd.f32 %v604_v55, %v438_v51  ;;  %v635_v58 = vadd.f32 %v614_v56, %v442_v52  ;;  %v587_v59 = vpop.f32.mrf.mxu0  ;;  %v597_v60 = vpop.f32.mrf.mxu1 }
  0xfc   : > { %v624_v61 = vadd.f32 %v587_v59, %v431_v53  ;;  %v628_v62 = vadd.f32 %v597_v60, %v435_v54 }
  0xfd   : > { %647 = vst [vmem:[#allocation2 + $0x20] sm:$0xff] %v631_v57 }
  0xfe   : > { %651 = vst [vmem:[#allocation2 + $0x70] sm:$0xff] %v635_v58 }
  0xff   : > { %640 = vst [vmem:[#allocation2 + $0x58] sm:$0xff] %v624_v61 }
 0x100   : > { %644 = vst [vmem:[#allocation2 + $0x8] sm:$0xff] %v628_v62 }
 0x102   : > { %v607_v3 = vpop.f32.mrf.mxu2  ;;  %v617_v4 = vpop.f32.mrf.mxu3 }
 0x103   : > { %v632_v5 = vadd.f32 %v607_v3, %v439_v63  ;;  %v636_v6 = vadd.f32 %v617_v4, %v443_v0  ;;  %v589_v7 = vpop.f32.mrf.mxu0  ;;  %v599_v8 = vpop.f32.mrf.mxu1 }
 0x104   : > { %v625_v9 = vadd.f32 %v589_v7, %v432_v1  ;;  %v629_v10 = vadd.f32 %v599_v8, %v436_v2 }
 0x105   : > { %648 = vst [vmem:[#allocation2 + $0x10] sm:$0xff] %v632_v5 }
 0x106   : > { %652 = vst [vmem:[#allocation2 + $0x78] sm:$0xff] %v636_v6 }
 0x107   : > { %641 = vst [vmem:[#allocation2 + $0x18] sm:$0xff] %v625_v9 }
 0x108   : > { %645 = vst [vmem:[#allocation2 + $0x48] sm:$0xff] %v629_v10 }
 0x10a   : > { %v609_v13 = vpop.f32.mrf.mxu2  ;;  %v619_v14 = vpop.f32.mrf.mxu3  ;;  %657 = sbr.rel (%p972_p13) target bundleno = 292 (0x124), region = 89 }
 0x10b   : > { %v633_v15 = vadd.f32 %v609_v13, %v440_v11  ;;  %v637_v16 = vadd.f32 %v619_v14, %v444_v12 }
 0x10d   : > { %649 = vst [vmem:[#allocation2 + $0x38] sm:$0xff] %v633_v15 }
 0x10e   : > { %653 = vst [vmem:[#allocation2 + $0x28] sm:$0xff] %v637_v16 }
 0x10f   : > { %v658_v17 = vld [vmem:[#allocation2 + $0x30] sm:$0xff]  ;;  %v659_v18 = vld [vmem:[#allocation2] sm:$0xff]  ;;  %v660_v21 = vld [vmem:[#allocation2 + $0x58] sm:$0xff] }
 0x110   : > { %v1118_v19 = vld [vmem:[%s1408_s2] ss:$0 sm:$0xff]  ;;  %v661_v22 = vld [vmem:[#allocation2 + $0x18] sm:$0xff]  ;;  %v662_v23 = vld [vmem:[#allocation2 + $0x50] sm:$0xff] }
 0x111   : > { %v1346_v20 = vld [vmem:[%s1409_s3] ss:$0 sm:$0xff]  ;;  %v678_v24 = vmul.f32 %v1118_v19, %v658_v17  ;;  %v679_v25 = vmul.f32 %v1118_v19, %v659_v18  ;;  %v680_v26 = vmul.f32 %v1118_v19, %v660_v21  ;;  %v681_v27 = vmul.f32 %v1118_v19, %v661_v22  ;;  %v663_v28 = vld [vmem:[#allocation2 + $0x68] sm:$0xff]  ;;  %v668_v49 = vld [vmem:[#allocation2 + $0x10] sm:$0xff] }
 0x112   : > { %v664_v29 = vld [vmem:[#allocation2 + $0x8] sm:$0xff]  ;;  %v682_v31 = vmul.f32 %v1118_v19, %v662_v23  ;;  %v683_v32 = vmul.f32 %v1118_v19, %v663_v28  ;;  %v666_v43 = vld [vmem:[#allocation2 + $0x40] sm:$0xff]  ;;  %v671_v56 = vld [vmem:[#allocation2 + $0x70] sm:$0xff]  ;;  %v688_v1 = vmul.f32 %v1118_v19, %v668_v49 }
 0x113   : > { %v665_v30 = vld [vmem:[#allocation2 + $0x48] sm:$0xff]  ;;  %v684_v33 = vmul.f32 %v1118_v19, %v664_v29  ;;  %v698_v35 = vadd.f32 %v1346_v20, %v678_v24  ;;  %v699_v36 = vadd.f32 %v1346_v20, %v679_v25  ;;  %v700_v37 = vadd.f32 %v1346_v20, %v680_v26  ;;  %v667_v44 = vld [vmem:[#allocation2 + $0x20] sm:$0xff]  ;;  %v672_v61 = vld [vmem:[#allocation2 + $0x78] sm:$0xff] }
 0x114   : > { %v685_v34 = vmul.f32 %v1118_v19, %v665_v30  ;;  %v701_v38 = vadd.f32 %v1346_v20, %v681_v27  ;;  %v702_v39 = vadd.f32 %v1346_v20, %v682_v31  ;;  %v703_v40 = vadd.f32 %v1346_v20, %v683_v32  ;;  %v669_v50 = vld [vmem:[#allocation2 + $0x38] sm:$0xff]  ;;  %v670_v55 = vld [vmem:[#allocation2 + $0x60] sm:$0xff] }
 0x115   : > { %v704_v41 = vadd.f32 %v1346_v20, %v684_v33  ;;  %v714_v45 = vmax.f32 %v698_v35, 0.0  ;;  %v715_v46 = vmax.f32 %v699_v36, 0.0  ;;  %v716_v47 = vmax.f32 %v700_v37, 0.0  ;;  %v673_v62 = vld [vmem:[#allocation2 + $0x28] sm:$0xff] }
 0x116   : > { %v705_v42 = vadd.f32 %v1346_v20, %v685_v34  ;;  %v717_v48 = vmax.f32 %v701_v38, 0.0  ;;  %v718_v51 = vmax.f32 %v702_v39, 0.0  ;;  %v719_v52 = vmax.f32 %v703_v40, 0.0 }
 0x117   : > { %v720_v53 = vmax.f32 %v704_v41, 0.0  ;;  %v997_v57 = vpack.c.bf16 %v715_v46, %v714_v45  ;;  %v686_v59 = vmul.f32 %v1118_v19, %v666_v43  ;;  %v687_v60 = vmul.f32 %v1118_v19, %v667_v44 }
 0x118   : > { %v721_v54 = vmax.f32 %v705_v42, 0.0  ;;  %v1002_v58 = vpack.c.bf16 %v717_v48, %v716_v47  ;;  %v1007_v63 = vpack.c.bf16 %v719_v52, %v718_v51  ;;  %v689_v2 = vmul.f32 %v1118_v19, %v669_v50 }
 0x119   : > { %998 = vst [vmem:[%s1410_s4] sm:$0xff] %v997_v57   ;;  %v706_v3 = vadd.f32 %v1346_v20, %v686_v59  ;;  %v707_v4 = vadd.f32 %v1346_v20, %v687_v60  ;;  %v690_v5 = vmul.f32 %v1118_v19, %v670_v55  ;;  %v691_v6 = vmul.f32 %v1118_v19, %v671_v56 }
 0x11a   : > { %v1012_v0 = vpack.c.bf16 %v721_v54, %v720_v53  ;;  %1034 = vst [vmem:[%s1410_s4 + $0x8] sm:$0xff] %v1002_v58   ;;  %v708_v7 = vadd.f32 %v1346_v20, %v688_v1  ;;  %v709_v8 = vadd.f32 %v1346_v20, %v689_v2  ;;  %v692_v9 = vmul.f32 %v1118_v19, %v672_v61 }
 0x11b   : > { %v693_v10 = vmul.f32 %v1118_v19, %v673_v62  ;;  %1035 = vst [vmem:[%s1410_s4 + $0x10] sm:$0xff] %v1007_v63   ;;  %v722_v11 = vmax.f32 %v706_v3, 0.0  ;;  %v723_v12 = vmax.f32 %v707_v4, 0.0  ;;  %v710_v13 = vadd.f32 %v1346_v20, %v690_v5 }
 0x11c   : > { %v711_v14 = vadd.f32 %v1346_v20, %v691_v6  ;;  %1036 = vst [vmem:[%s1410_s4 + $0x18] sm:$0xff] %v1012_v0   ;;  %v724_v15 = vmax.f32 %v708_v7, 0.0  ;;  %v725_v16 = vmax.f32 %v709_v8, 0.0  ;;  %v712_v17 = vadd.f32 %v1346_v20, %v692_v9 }
 0x11d   : > { %v713_v18 = vadd.f32 %v1346_v20, %v693_v10  ;;  %v1017_v19 = vpack.c.bf16 %v723_v12, %v722_v11  ;;  %v726_v21 = vmax.f32 %v710_v13, 0.0 }
 0x11e   : > { %v727_v22 = vmax.f32 %v711_v14, 0.0  ;;  %v1022_v23 = vpack.c.bf16 %v725_v16, %v724_v15  ;;  %v728_v24 = vmax.f32 %v712_v17, 0.0 }
 0x11f   : > { %v729_v25 = vmax.f32 %v713_v18, 0.0  ;;  %1037 = vst [vmem:[%s1410_s4 + $0x20] sm:$0xff] %v1017_v19  }
 0x120   : > { %v1027_v26 = vpack.c.bf16 %v727_v22, %v726_v21  ;;  %1038 = vst [vmem:[%s1410_s4 + $0x28] sm:$0xff] %v1022_v23  }
 0x121   : > { %v1032_v27 = vpack.c.bf16 %v729_v25, %v728_v24 }
 0x122   : > { %1039 = vst [vmem:[%s1410_s4 + $0x30] sm:$0xff] %v1027_v26  }
 0x123   : > { %1040 = vst [vmem:[%s1410_s4 + $0x38] sm:$0xff] %v1032_v27  }
 0x124 PF: > { %s17_s20 = sadd.s32 1, %s1198_s20   ;;  %s1413_s15 = smov %s1182_s16 }
 0x125   : > { %p14_p0 = scmp.ge.s32.totalorder %s17_s20, 11   ;;  %s1414_s16 = smov %s1186_s17 }
 0x126   : > { %s1415_s17 = smov %s1276_s27  ;;  %s1416_s18 = smov %s1194_s19 }
 0x127   : > { %s1417_s19 = smov %s1419_s22  ;;  %16 = sbr.rel (!%p14_p0) target bundleno = 4 (0x4), region = 139 }
 0x12c   :  { %790 = vsyncpa [#allocation5], 1 }
 0x12d   :  { %792 = vsyncpa [#allocation5 + $0x1], 1 }

// kernel: resnet18_forward.29
= control target key start
LH: loop header
LB: loop body
LE: loop exit
PB: predicated region body
PF: predicated region fallthrough
CT: control target
= control target key end

     0   :  { %9 = vsyncpa [#allocation5], 0  ;;  %s1018_s0 = inlined_call_operand.vmem [shape: bf16[32,1152], index: 0, kind: input, shape index: {}]   ;;  %s1019_s1 = inlined_call_operand.hbm [shape: bf16[1152,128], index: 1, kind: input, shape index: {}]   ;;  %s1020_s2 = inlined_call_operand.vmem [shape: f32[1,128], index: 2, kind: input, shape index: {}]   ;;  %s1021_s3 = inlined_call_operand.vmem [shape: f32[1,128], index: 3, kind: input, shape index: {}]   ;;  %s1022_s4 = inlined_call_operand.vmem [shape: bf16[32,128], index: 4, kind: output, shape index: {}]  }
   0x1   :  { %11 = vsyncpa [#allocation5 + $0x1], 0  ;;  %s900_s15 = smov 0   ;;  %s902_s16 = smov 0  }
   0x2   :  { %s904_s17 = smov 0   ;;  %s906_s18 = smov 0  }
   0x3   :  { %s908_s19 = smov 0   ;;  %s910_s20 = smov 0  }
   0x4 LB: > { %s648_s21 = sadd.s32 4294967295, %s870_s20   ;;  %s29_s22 = sadd.s32 1, %s866_s19  ;;  %s870_s20 = sphi %s910_s20, %s17_s20   ;;  %s866_s19 = sphi %s908_s19, %s1029_s19   ;;  %s862_s18 = sphi %s906_s18, %s1028_s18   ;;  %s858_s17 = sphi %s904_s17, %s1027_s17   ;;  %s854_s16 = sphi %s902_s16, %s1026_s16   ;;  %s850_s15 = sphi %s900_s15, %s1025_s15  }
   0x5   : > { %p30_p0 = scmp.ge.s32.totalorder %s29_s22, 9  ;;  %s45_s23 = sadd.s32 1, %s858_s17 }
   0x6   : > { %p52_p1 = scmp.ne.s32.totalorder %s858_s17, %s854_s16  ;;  %p53_p2 = scmp.eq.s32.totalorder %s870_s20, 0 }
   0x7   : > { %s1031_s22 = smov (%p30_p0, %s29_s22), 0  ;;  %p86_p4 = scmp.ne.s32.totalorder %s854_s16, %s850_s15 }
   0x8   : > { %p936_p3 = por %p53_p2, %p52_p1  ;;  %s41_s25 = ssub.s32 %s866_s19, %s1031_s22 }
   0x9   : > { %p87_p5 = scmp.eq.s32.totalorder %s648_s21, 0  ;;  %p43_p6 = scmp.eq.s32.totalorder %s41_s25, 0 }
   0xa   : > { %p652_p8 = scmp.ge.s32.totalorder %s870_s20, 9 }
   0xb   : > { %p943_p7 = por %p87_p5, %p86_p4 }
   0xc   : > { %s948_s27 = scalar_select %p43_p6, %s858_s17, %s45_s23  }
   0xd   : > { %198 = sbr.rel (%p652_p8) target bundleno = 32 (0x20), region = 24 }
  0x12   : > { %201 = sbr.rel (!%p936_p3) target bundleno = 26 (0x1a), region = 28  ;;  %s203_s28 = sand.u32 (%p936_p3), 1, %s858_s17  }
  0x13   : > { %s654_s29 = sshll.u32 (%p936_p3), %s866_s19, 2  ;;  %s653_s30 = sshll.u32 (%p936_p3), %s203_s28, 4 }
  0x14   : > { %s210_s7 = scalar_lea.vmem (%p936_p3), %s1018_s0, %s654_s29  ;;  %s205_s8 = scalar_lea.vmem (%p936_p3), [#allocation3], %s653_s30 }
  0x15   : > { %v227_v0 = vld [vmem:[%s210_s7] sm:$0xf] (%p936_p3)  ;;  %v229_v1 = vld [vmem:[%s210_s7 + $0x24] sm:$0xf] (%p936_p3)  ;;  %v231_v2 = vld [vmem:[%s210_s7 + $0x48] sm:$0xf] (%p936_p3) }
  0x16   : > { %228 = vst [vmem:[%s205_s8] sm:$0xf] (%p936_p3), %v227_v0  ;;  %v233_v3 = vld [vmem:[%s210_s7 + $0x6c] sm:$0xf] (%p936_p3) }
  0x17   : > { %230 = vst [vmem:[%s205_s8 + $0x4] sm:$0xf] %v229_v1 }
  0x18   : > { %232 = vst [vmem:[%s205_s8 + $0x8] sm:$0xf] %v231_v2 }
  0x19   : > { %234 = vst [vmem:[%s205_s8 + $0xc] sm:$0xf] %v233_v3 }
  0x1a PF: > { %s267_s9 = sand.u32 1, %s858_s17   ;;  %s707_s10 = sshll.u32 %s866_s19, 6 }
  0x1b   : > { %s655_s11 = sshll.u32 %s267_s9, 6  ;;  %s277_s14 = scalar_lea.hbm %s1019_s1, %s707_s10 }
  0x1c   : > { %s278_s15 = sshll.u32 %s277_s14, 4  ;;  %s271_s21 = scalar_lea.vmem [#allocation4], %s655_s11  ;;  %s279_s15 = int_to_ptr.hbm [resolvable:$true] %s278_s15 }
  0x1d   : > { %s280_s23 = sshll.u32 %s271_s21, 4  ;;  %s268_s25 = scalar_lea.sflag [#allocation5], %s267_s9  ;;  %s281_s23 = int_to_ptr.vmem [resolvable:$true] %s280_s23 }
  0x1e   : > { %s872_s28 = smov 64   ;;  %s873_s29 = smov 4  }
  0x1f   : > { %737 = dma.hbm_to_vmem [thread:$0]  (%p936_p3), %s279_s15, 1024, %s281_s23, %s268_s25, %s872_s28, %s872_s28, %s873_s29  }
  0x20 PF: > { %p658_p9 = scmp.ge.s32.totalorder %s870_s20, 1  ;;  %p288_p10 = scmp.lt.s32.totalorder %s870_s20, 10 }
  0x22   : > { %p289_p11 = pnand %p658_p9, %p288_p10 }
  0x23   : > { %s295_s30 = sand.u32 (!%p289_p11), 1, %s854_s16  }
  0x24   : > { %292 = sbr.rel (%p289_p11) target bundleno = 240 (0xf0), region = 73  ;;  %s659_s5 = sshll.u32 (!%p289_p11), %s295_s30, 4 }
  0x25   : > { %s660_s6 = sshll.u32 (!%p289_p11), %s295_s30, 6  ;;  %s968_s7 = scalar_lea.vmem (!%p289_p11), [#allocation3], %s659_s5 }
  0x26   : > { %s302_s8 = scalar_lea.sflag (!%p289_p11), [#allocation5], %s295_s30  ;;  %s970_s9 = scalar_lea.vmem (!%p289_p11), [#allocation4], %s660_s6 }
  0x29   : > { %845 = dma.done.wait (%p943_p7), %s302_s8, 1024  }
  0x2a   : > { %847 = vsyncadd (%p943_p7), %s302_s8, 4294966272  ;;  %p661_p12 = scmp.ne.s32.totalorder %s862_s18, 0 }
  0x2c   : > { %364 = sbr.rel (%p661_p12) target bundleno = 54 (0x36), region = 85 }
  0x31   : > { %v874_v4 = vmov 0.0  }
  0x32   : > { %365 = vst [vmem:[#allocation2 + $0x10] sm:$0xff] %v874_v4 }
  0x33   : > { %366 = vst [vmem:[#allocation2] sm:$0xff] %v874_v4 }
  0x34   : > { %367 = vst [vmem:[#allocation2 + $0x18] sm:$0xff] %v874_v4 }
  0x35   : > { %368 = vst [vmem:[#allocation2 + $0x8] sm:$0xff] %v874_v4 }
  0x36 PF: > { %v717_v5 = vld [vmem:[%s970_s9 + $0x38] sm:$0xff]  ;;  %v716_v6 = vld [vmem:[%s970_s9 + $0x30] sm:$0xff]  ;;  %v715_v7 = vld [vmem:[%s970_s9 + $0x28] sm:$0xff]  ;;  %p702_p13 = scmp.ne.s32.totalorder %s862_s18, 8 }
  0x37   : > { %453 = vmatpush.bf16.msra.mxu0 %v717_v5  ;;  %729 = vmatpush.bf16.msra.mxu1 %v717_v5  ;;  %v714_v8 = vld [vmem:[%s970_s9 + $0x20] sm:$0xff]  ;;  %v713_v9 = vld [vmem:[%s970_s9 + $0x18] sm:$0xff]  ;;  %v712_v10 = vld [vmem:[%s970_s9 + $0x10] sm:$0xff] }
  0x38   : > { %v711_v11 = vld [vmem:[%s970_s9 + $0x8] sm:$0xff]  ;;  %v710_v12 = vld [vmem:[%s970_s9] sm:$0xff] }
  0x39   : > { %v708_v13 = vld [vmem:[%s968_s7] sm:$0xff]  ;;  %v709_v14 = vld [vmem:[%s968_s7 + $0x8] sm:$0xff] }
  0x3a   : > { %v369_v15 = vld [vmem:[#allocation2 + $0x10] sm:$0xff]  ;;  %v370_v21 = vld [vmem:[#allocation2] sm:$0xff] }
  0x3b   : > { %454 = vmatpush.bf16.msra.mxu0 %v716_v6  ;;  %730 = vmatpush.bf16.msra.mxu1 %v716_v6  ;;  %v371_v16 = vld [vmem:[#allocation2 + $0x18] sm:$0xff] }
  0x3c   : > { %v372_v22 = vld [vmem:[#allocation2 + $0x8] sm:$0xff] }
  0x3f   : > { %455 = vmatpush.bf16.msra.mxu0 %v715_v7  ;;  %731 = vmatpush.bf16.msra.mxu1 %v715_v7 }
  0x43   : > { %456 = vmatpush.bf16.msra.mxu0 %v714_v8  ;;  %732 = vmatpush.bf16.msra.mxu1 %v714_v8 }
  0x47   : > { %457 = vmatpush.bf16.msra.mxu0 %v713_v9  ;;  %733 = vmatpush.bf16.msra.mxu1 %v713_v9 }
  0x4b   : > { %458 = vmatpush.bf16.msra.mxu0 %v712_v10  ;;  %734 = vmatpush.bf16.msra.mxu1 %v712_v10 }
  0x4f   : > { %459 = vmatpush.bf16.msra.mxu0 %v711_v11  ;;  %735 = vmatpush.bf16.msra.mxu1 %v711_v11 }
  0x53   : > { %460 = vmatpush.bf16.msra.mxu0 %v710_v12  ;;  %736 = vmatpush.bf16.msra.mxu1 %v710_v12 }
  0x56   : > { %461 = vmatmul.bf16.vlgmr.msra.gmra.mxu0 %v708_v13  ;;  %466 = vmatmul.bf16.vlgmr.msra.gmra.mxu1 %v709_v14 }
  0xd3   : > { %v462_v17 = vpop.f32.mrf.mxu0  ;;  %v467_v18 = vpop.f32.mrf.mxu1 }
  0xd4   : > { %v472_v19 = vadd.f32 %v462_v17, %v369_v15  ;;  %v474_v20 = vadd.f32 %v467_v18, %v371_v16 }
  0xd6   : > { %476 = vst [vmem:[#allocation2 + $0x10] sm:$0xff] %v472_v19 }
  0xd7   : > { %478 = vst [vmem:[#allocation2 + $0x18] sm:$0xff] %v474_v20 }
  0xdb   : > { %v464_v23 = vpop.f32.mrf.mxu0  ;;  %v469_v24 = vpop.f32.mrf.mxu1  ;;  %483 = sbr.rel (%p702_p13) target bundleno = 240 (0xf0), region = 89 }
  0xdc   : > { %v473_v25 = vadd.f32 %v464_v23, %v370_v21  ;;  %v475_v26 = vadd.f32 %v469_v24, %v372_v22 }
  0xde   : > { %477 = vst [vmem:[#allocation2] sm:$0xff] %v473_v25 }
  0xdf   : > { %479 = vst [vmem:[#allocation2 + $0x8] sm:$0xff] %v475_v26 }
  0xe0   : > { %v484_v27 = vld [vmem:[#allocation2 + $0x10] sm:$0xff]  ;;  %v790_v29 = vld [vmem:[%s1020_s2] ss:$0 sm:$0xff]  ;;  %v486_v31 = vld [vmem:[#allocation2 + $0x18] sm:$0xff] }
  0xe1   : > { %v791_v30 = vld [vmem:[%s1021_s3] ss:$0 sm:$0xff]  ;;  %v492_v33 = vmul.f32 %v790_v29, %v484_v27  ;;  %v494_v35 = vmul.f32 %v790_v29, %v486_v31 }
  0xe3   : > { %v500_v37 = vadd.f32 %v791_v30, %v492_v33  ;;  %v502_v39 = vadd.f32 %v791_v30, %v494_v35 }
  0xe5   : > { %v485_v28 = vld [vmem:[#allocation2] sm:$0xff]  ;;  %v504_v41 = vmax.f32 %v500_v37, 0.0  ;;  %v506_v43 = vmax.f32 %v502_v39, 0.0 }
  0xe6   : > { %v487_v32 = vld [vmem:[#allocation2 + $0x8] sm:$0xff]  ;;  %v493_v34 = vmul.f32 %v790_v29, %v485_v28 }
  0xe7   : > { %v495_v36 = vmul.f32 %v790_v29, %v487_v32 }
  0xe8   : > { %v501_v38 = vadd.f32 %v791_v30, %v493_v34 }
  0xe9   : > { %v503_v40 = vadd.f32 %v791_v30, %v495_v36 }
  0xea   : > { %v505_v42 = vmax.f32 %v501_v38, 0.0 }
  0xeb   : > { %v507_v44 = vmax.f32 %v503_v40, 0.0 }
  0xec   : > { %v721_v45 = vpack.c.bf16 %v505_v42, %v504_v41 }
  0xed   : > { %v726_v46 = vpack.c.bf16 %v507_v44, %v506_v43 }
  0xee   : > { %722 = vst [vmem:[%s1022_s4] sm:$0xff] %v721_v45  }
  0xef   : > { %728 = vst [vmem:[%s1022_s4 + $0x8] sm:$0xff] %v726_v46  }
  0xf0 PF: > { %s17_s20 = sadd.s32 1, %s870_s20   ;;  %s1025_s15 = smov %s854_s16 }
  0xf1   : > { %p14_p0 = scmp.ge.s32.totalorder %s17_s20, 11   ;;  %s1026_s16 = smov %s858_s17 }
  0xf2   : > { %s1027_s17 = smov %s948_s27  ;;  %s1028_s18 = smov %s866_s19 }
  0xf3   : > { %s1029_s19 = smov %s1031_s22  ;;  %16 = sbr.rel (!%p14_p0) target bundleno = 4 (0x4), region = 139 }
  0xf8   :  { %544 = vsyncpa [#allocation5], 1 }
  0xf9   :  { %546 = vsyncpa [#allocation5 + $0x1], 1 }

// kernel: resnet18_forward.32
= control target key start
LH: loop header
LB: loop body
LE: loop exit
PB: predicated region body
PF: predicated region fallthrough
CT: control target
= control target key end

     0   :  { %s925_s18 = smov 0   ;;  %s927_s19 = smov 0   ;;  %s1027_s0 = inlined_call_operand.vmem [shape: bf16[32,1152], index: 0, kind: input, shape index: {}]   ;;  %s1028_s1 = inlined_call_operand.vmem [shape: bf16[1152,128], index: 1, kind: input, shape index: {}]   ;;  %s1029_s2 = inlined_call_operand.vmem [shape: f32[1,128], index: 2, kind: input, shape index: {}]   ;;  %s1030_s3 = inlined_call_operand.vmem [shape: f32[1,128], index: 3, kind: input, shape index: {}]   ;;  %s1031_s4 = inlined_call_operand.vmem [shape: bf16[32,128], index: 4, kind: input, shape index: {}]   ;;  %s1032_s5 = inlined_call_operand.vmem [shape: bf16[32,128], index: 5, kind: output, shape index: {}]  }
   0x1   :  { %s929_s20 = smov 0   ;;  %s931_s21 = smov 0  }
   0x2   :  { %s933_s22 = smov 0  }
   0x3 LB: > { %s27_s23 = sadd.s32 1, %s888_s21  ;;  %p50_p1 = scmp.ne.s32.totalorder %s880_s19, %s876_s18  ;;  %s892_s22 = sphi %s933_s22, %s15_s22   ;;  %s888_s21 = sphi %s931_s21, %s1036_s21   ;;  %s884_s20 = sphi %s929_s20, %s1035_s20   ;;  %s880_s19 = sphi %s927_s19, %s1034_s19   ;;  %s876_s18 = sphi %s925_s18, %s1033_s18  }
   0x4   : > { %p28_p0 = scmp.ge.s32.totalorder %s27_s23, 9  ;;  %p51_p2 = scmp.eq.s32.totalorder %s892_s22, 0 }
   0x5   : > { %s43_s25 = sadd.s32 1, %s880_s19  ;;  %p720_p5 = scmp.ge.s32.totalorder %s892_s22, 9 }
   0x6   : > { %s1038_s23 = smov (%p28_p0, %s27_s23), 0  ;;  %p52_p3 = por %p51_p2, %p50_p1 }
   0x7   : > { %s39_s24 = ssub.s32 %s888_s21, %s1038_s23  ;;  %236 = sbr.rel (%p720_p5) target bundleno = 20 (0x14), region = 28 }
   0x8   : > { %p41_p4 = scmp.eq.s32.totalorder %s39_s24, 0 }
   0xa   : > { %s960_s26 = scalar_select %p41_p4, %s880_s19, %s43_s25  }
   0xc   : > { %239 = sbr.rel (!%p52_p3) target bundleno = 20 (0x14), region = 32  ;;  %s241_s27 = sand.u32 (%p52_p3), 1, %s880_s19  }
   0xd   : > { %s722_s28 = sshll.u32 (%p52_p3), %s888_s21, 2  ;;  %s721_s29 = sshll.u32 (%p52_p3), %s241_s27, 4 }
   0xe   : > { %s248_s7 = scalar_lea.vmem (%p52_p3), %s1027_s0, %s722_s28  ;;  %s243_s8 = scalar_lea.vmem (%p52_p3), [#allocation3], %s721_s29 }
   0xf   : > { %v265_v0 = vld [vmem:[%s248_s7] sm:$0xf] (%p52_p3)  ;;  %v267_v1 = vld [vmem:[%s248_s7 + $0x24] sm:$0xf] (%p52_p3)  ;;  %v269_v2 = vld [vmem:[%s248_s7 + $0x48] sm:$0xf] (%p52_p3) }
  0x10   : > { %266 = vst [vmem:[%s243_s8] sm:$0xf] (%p52_p3), %v265_v0  ;;  %v271_v3 = vld [vmem:[%s248_s7 + $0x6c] sm:$0xf] (%p52_p3) }
  0x11   : > { %268 = vst [vmem:[%s243_s8 + $0x4] sm:$0xf] %v267_v1 }
  0x12   : > { %270 = vst [vmem:[%s243_s8 + $0x8] sm:$0xf] %v269_v2 }
  0x13   : > { %272 = vst [vmem:[%s243_s8 + $0xc] sm:$0xf] %v271_v3 }
  0x14 PF: > { %p723_p6 = scmp.ge.s32.totalorder %s892_s22, 1  ;;  %p315_p7 = scmp.lt.s32.totalorder %s892_s22, 10 }
  0x16   : > { %p316_p8 = pnand %p723_p6, %p315_p7 }
  0x17   : > { %s322_s9 = sand.u32 (!%p316_p8), 1, %s876_s18   ;;  %s725_s10 = sshll.u32 (!%p316_p8), %s884_s20, 4 }
  0x18   : > { %319 = sbr.rel (%p316_p8) target bundleno = 227 (0xe3), region = 77  ;;  %s972_s11 = sshll.u32 (!%p316_p8), %s322_s9, 4 }
  0x19   : > { %p376_p9 = scmp.lt.s32.totalorder (!%p316_p8), %s725_s10, 143  ;;  %s324_s16 = scalar_lea.vmem (!%p316_p8), [#allocation3], %s972_s11 }
  0x1a   : > { %p727_p10 = scmp.ne.s32.totalorder (!%p316_p8), %s884_s20, 0 }
  0x1d   : > { %s1040_s10 = smov (!%p376_p9, %s725_s10), 143  ;;  %411 = sbr.rel (%p727_p10) target bundleno = 39 (0x27), region = 85 }
  0x1e   : > { %s726_s12 = sshll.u32 %s1040_s10, 2 }
  0x1f   : > { %s977_s15 = scalar_lea.vmem %s1028_s1, %s726_s12 }
  0x22   : > { %v894_v4 = vmov 0.0  }
  0x23   : > { %412 = vst [vmem:[#allocation2 + $0x10] sm:$0xff] %v894_v4 }
  0x24   : > { %413 = vst [vmem:[#allocation2] sm:$0xff] %v894_v4 }
  0x25   : > { %414 = vst [vmem:[#allocation2 + $0x18] sm:$0xff] %v894_v4 }
  0x26   : > { %415 = vst [vmem:[#allocation2 + $0x8] sm:$0xff] %v894_v4 }
  0x27 PF: > { %v782_v5 = vld [vmem:[%s977_s15 + $0x38] sm:$0xff]  ;;  %v781_v6 = vld [vmem:[%s977_s15 + $0x30] sm:$0xff]  ;;  %v780_v7 = vld [vmem:[%s977_s15 + $0x28] sm:$0xff]  ;;  %p768_p11 = scmp.ne.s32.totalorder %s884_s20, 8 }
  0x28   : > { %500 = vmatpush.bf16.msra.mxu0 %v782_v5  ;;  %803 = vmatpush.bf16.msra.mxu1 %v782_v5  ;;  %v779_v8 = vld [vmem:[%s977_s15 + $0x20] sm:$0xff]  ;;  %v778_v9 = vld [vmem:[%s977_s15 + $0x18] sm:$0xff]  ;;  %v777_v10 = vld [vmem:[%s977_s15 + $0x10] sm:$0xff] }
  0x29   : > { %v776_v11 = vld [vmem:[%s977_s15 + $0x8] sm:$0xff]  ;;  %v775_v12 = vld [vmem:[%s977_s15] sm:$0xff] }
  0x2a   : > { %v773_v13 = vld [vmem:[%s324_s16] sm:$0xff]  ;;  %v774_v14 = vld [vmem:[%s324_s16 + $0x8] sm:$0xff] }
  0x2b   : > { %v416_v15 = vld [vmem:[#allocation2 + $0x10] sm:$0xff]  ;;  %v417_v21 = vld [vmem:[#allocation2] sm:$0xff] }
  0x2c   : > { %501 = vmatpush.bf16.msra.mxu0 %v781_v6  ;;  %804 = vmatpush.bf16.msra.mxu1 %v781_v6  ;;  %v418_v16 = vld [vmem:[#allocation2 + $0x18] sm:$0xff] }
  0x2d   : > { %v419_v22 = vld [vmem:[#allocation2 + $0x8] sm:$0xff] }
  0x30   : > { %502 = vmatpush.bf16.msra.mxu0 %v780_v7  ;;  %805 = vmatpush.bf16.msra.mxu1 %v780_v7 }
  0x34   : > { %503 = vmatpush.bf16.msra.mxu0 %v779_v8  ;;  %806 = vmatpush.bf16.msra.mxu1 %v779_v8 }
  0x38   : > { %504 = vmatpush.bf16.msra.mxu0 %v778_v9  ;;  %807 = vmatpush.bf16.msra.mxu1 %v778_v9 }
  0x3c   : > { %505 = vmatpush.bf16.msra.mxu0 %v777_v10  ;;  %808 = vmatpush.bf16.msra.mxu1 %v777_v10 }
  0x40   : > { %506 = vmatpush.bf16.msra.mxu0 %v776_v11  ;;  %809 = vmatpush.bf16.msra.mxu1 %v776_v11 }
  0x44   : > { %507 = vmatpush.bf16.msra.mxu0 %v775_v12  ;;  %810 = vmatpush.bf16.msra.mxu1 %v775_v12 }
  0x47   : > { %508 = vmatmul.bf16.vlgmr.msra.gmra.mxu0 %v773_v13  ;;  %513 = vmatmul.bf16.vlgmr.msra.gmra.mxu1 %v774_v14 }
  0xc4   : > { %v509_v17 = vpop.f32.mrf.mxu0  ;;  %v514_v18 = vpop.f32.mrf.mxu1 }
  0xc5   : > { %v519_v19 = vadd.f32 %v509_v17, %v416_v15  ;;  %v521_v20 = vadd.f32 %v514_v18, %v418_v16 }
  0xc7   : > { %523 = vst [vmem:[#allocation2 + $0x10] sm:$0xff] %v519_v19 }
  0xc8   : > { %525 = vst [vmem:[#allocation2 + $0x18] sm:$0xff] %v521_v20 }
  0xcc   : > { %v511_v23 = vpop.f32.mrf.mxu0  ;;  %v516_v24 = vpop.f32.mrf.mxu1  ;;  %530 = sbr.rel (%p768_p11) target bundleno = 227 (0xe3), region = 89 }
  0xcd   : > { %v520_v25 = vadd.f32 %v511_v23, %v417_v21  ;;  %v522_v26 = vadd.f32 %v516_v24, %v419_v22 }
  0xcf   : > { %524 = vst [vmem:[#allocation2] sm:$0xff] %v520_v25 }
  0xd0   : > { %526 = vst [vmem:[#allocation2 + $0x8] sm:$0xff] %v522_v26 }
  0xd1   : > { %v531_v27 = vld [vmem:[#allocation2 + $0x10] sm:$0xff]  ;;  %v852_v29 = vld [vmem:[%s1029_s2] ss:$0 sm:$0xff]  ;;  %v533_v32 = vld [vmem:[#allocation2 + $0x18] sm:$0xff] }
  0xd2   : > { %v853_v30 = vld [vmem:[%s1030_s3] ss:$0 sm:$0xff]  ;;  %v539_v34 = vmul.f32 %v852_v29, %v531_v27  ;;  %v801_v38 = vld [vmem:[%s1031_s4 + $0x8] sm:$0xff]   ;;  %v541_v39 = vmul.f32 %v852_v29, %v533_v32 }
  0xd3   : > { %v784_v31 = vld [vmem:[%s1031_s4] sm:$0xff]   ;;  %v789_v41 = vunpack.c.l.bf16 %v801_v38  ;;  %v790_v42 = vunpack.c.h.bf16 %v801_v38 }
  0xd4   : > { %v785_v36 = vunpack.c.l.bf16 %v784_v31  ;;  %v786_v37 = vunpack.c.h.bf16 %v784_v31  ;;  %v547_v43 = vadd.f32 %v853_v30, %v539_v34  ;;  %v549_v45 = vadd.f32 %v853_v30, %v541_v39 }
  0xd6   : > { %v532_v28 = vld [vmem:[#allocation2] sm:$0xff]  ;;  %v559_v47 = vadd.f32 %v785_v36, %v547_v43  ;;  %v561_v49 = vadd.f32 %v789_v41, %v549_v45 }
  0xd7   : > { %v534_v33 = vld [vmem:[#allocation2 + $0x8] sm:$0xff]  ;;  %v540_v35 = vmul.f32 %v852_v29, %v532_v28 }
  0xd8   : > { %v542_v40 = vmul.f32 %v852_v29, %v534_v33  ;;  %v563_v51 = vmax.f32 %v559_v47, 0.0  ;;  %v565_v53 = vmax.f32 %v561_v49, 0.0 }
  0xd9   : > { %v548_v44 = vadd.f32 %v853_v30, %v540_v35 }
  0xda   : > { %v550_v46 = vadd.f32 %v853_v30, %v542_v40 }
  0xdb   : > { %v560_v48 = vadd.f32 %v786_v37, %v548_v44 }
  0xdc   : > { %v562_v50 = vadd.f32 %v790_v42, %v550_v46 }
  0xdd   : > { %v564_v52 = vmax.f32 %v560_v48, 0.0 }
  0xde   : > { %v566_v54 = vmax.f32 %v562_v50, 0.0 }
  0xdf   : > { %v794_v55 = vpack.c.bf16 %v564_v52, %v563_v51 }
  0xe0   : > { %v799_v56 = vpack.c.bf16 %v566_v54, %v565_v53 }
  0xe1   : > { %795 = vst [vmem:[%s1032_s5] sm:$0xff] %v794_v55  }
  0xe2   : > { %802 = vst [vmem:[%s1032_s5 + $0x8] sm:$0xff] %v799_v56  }
  0xe3 PF: > { %s15_s22 = sadd.s32 1, %s892_s22   ;;  %s1033_s18 = smov %s880_s19 }
  0xe4   : > { %p12_p12 = scmp.ge.s32.totalorder %s15_s22, 11   ;;  %s1034_s19 = smov %s960_s26 }
  0xe5   : > { %s1035_s20 = smov %s888_s21  ;;  %s1036_s21 = smov %s1038_s23 }
  0xe6   :  { %14 = sbr.rel (!%p12_p12) target bundleno = 3 (0x3), region = 136 }

// kernel: resnet18_forward.28
= control target key start
LH: loop header
LB: loop body
LE: loop exit
PB: predicated region body
PF: predicated region fallthrough
CT: control target
= control target key end

     0   :  { %s309_s1 = inlined_call_operand.vmem [shape: bf16[128,128], index: 1, kind: input, shape index: {}]   ;;  %s310_s2 = inlined_call_operand.vmem [shape: f32[1,128], index: 2, kind: input, shape index: {}]   ;;  %s311_s3 = inlined_call_operand.vmem [shape: f32[1,128], index: 3, kind: input, shape index: {}]   ;;  %s312_s0 = inlined_call_operand.vmem [shape: bf16[32,128], index: 0, kind: input, shape index: {}]   ;;  %s313_s4 = inlined_call_operand.vmem [shape: bf16[32,128], index: 4, kind: output, shape index: {}]  }
   0x1   :  { %v220_v0 = vld [vmem:[%s309_s1 + $0x38] sm:$0xff]  ;;  %v219_v1 = vld [vmem:[%s309_s1 + $0x30] sm:$0xff]  ;;  %v218_v2 = vld [vmem:[%s309_s1 + $0x28] sm:$0xff] }
   0x2   :  { %109 = vmatpush.bf16.msra.mxu0 %v220_v0  ;;  %232 = vmatpush.bf16.msra.mxu1 %v220_v0  ;;  %v217_v3 = vld [vmem:[%s309_s1 + $0x20] sm:$0xff]  ;;  %v216_v4 = vld [vmem:[%s309_s1 + $0x18] sm:$0xff]  ;;  %v215_v5 = vld [vmem:[%s309_s1 + $0x10] sm:$0xff] }
   0x3   :  { %v214_v6 = vld [vmem:[%s309_s1 + $0x8] sm:$0xff]  ;;  %v213_v7 = vld [vmem:[%s309_s1] sm:$0xff] }
   0x4   :  { %v211_v8 = vld [vmem:[%s312_s0] sm:$0xff]  ;;  %v212_v9 = vld [vmem:[%s312_s0 + $0x8] sm:$0xff] }
   0x5   :  { %v240_v12 = vld [vmem:[%s310_s2] ss:$0 sm:$0xff] }
   0x6   :  { %110 = vmatpush.bf16.msra.mxu0 %v219_v1  ;;  %233 = vmatpush.bf16.msra.mxu1 %v219_v1  ;;  %v241_v14 = vld [vmem:[%s311_s3] ss:$0 sm:$0xff] }
   0xa   :  { %111 = vmatpush.bf16.msra.mxu0 %v218_v2  ;;  %234 = vmatpush.bf16.msra.mxu1 %v218_v2 }
   0xe   :  { %112 = vmatpush.bf16.msra.mxu0 %v217_v3  ;;  %235 = vmatpush.bf16.msra.mxu1 %v217_v3 }
  0x12   :  { %113 = vmatpush.bf16.msra.mxu0 %v216_v4  ;;  %236 = vmatpush.bf16.msra.mxu1 %v216_v4 }
  0x16   :  { %114 = vmatpush.bf16.msra.mxu0 %v215_v5  ;;  %237 = vmatpush.bf16.msra.mxu1 %v215_v5 }
  0x1a   :  { %115 = vmatpush.bf16.msra.mxu0 %v214_v6  ;;  %238 = vmatpush.bf16.msra.mxu1 %v214_v6 }
  0x1e   :  { %116 = vmatpush.bf16.msra.mxu0 %v213_v7  ;;  %239 = vmatpush.bf16.msra.mxu1 %v213_v7 }
  0x21   :  { %117 = vmatmul.bf16.vlgmr.msra.gmra.mxu0 %v211_v8  ;;  %122 = vmatmul.bf16.vlgmr.msra.gmra.mxu1 %v212_v9 }
  0x9e   :  { %v118_v10 = vpop.f32.mrf.mxu0  ;;  %v123_v11 = vpop.f32.mrf.mxu1 }
  0x9f   :  { %v147_v13 = vmul.f32 %v240_v12, %v118_v10  ;;  %v149_v15 = vmul.f32 %v240_v12, %v123_v11 }
  0xa1   :  { %v155_v20 = vadd.f32 %v241_v14, %v147_v13  ;;  %v157_v21 = vadd.f32 %v241_v14, %v149_v15 }
  0xa6   :  { %v120_v16 = vpop.f32.mrf.mxu0  ;;  %v125_v17 = vpop.f32.mrf.mxu1 }
  0xa7   :  { %v148_v18 = vmul.f32 %v240_v12, %v120_v16  ;;  %v150_v19 = vmul.f32 %v240_v12, %v125_v17 }
  0xa9   :  { %v156_v22 = vadd.f32 %v241_v14, %v148_v18  ;;  %v158_v23 = vadd.f32 %v241_v14, %v150_v19 }
  0xab   :  { %v224_v24 = vpack.c.bf16 %v156_v22, %v155_v20  ;;  %v229_v25 = vpack.c.bf16 %v158_v23, %v157_v21 }
  0xad   :  { %225 = vst [vmem:[%s313_s4] sm:$0xff] %v224_v24  }
  0xae   :  { %231 = vst [vmem:[%s313_s4 + $0x8] sm:$0xff] %v229_v25  }

// kernel: resnet18_forward.30
= control target key start
LH: loop header
LB: loop body
LE: loop exit
PB: predicated region body
PF: predicated region fallthrough
CT: control target
= control target key end

     0   :  { %10 = vsyncpa [#allocation5], 0  ;;  %s1129_s0 = inlined_call_operand.vmem [shape: bf16[32,1152], index: 0, kind: input, shape index: {}]   ;;  %s1130_s1 = inlined_call_operand.hbm [shape: bf16[1152,128], index: 1, kind: input, shape index: {}]   ;;  %s1131_s2 = inlined_call_operand.vmem [shape: f32[1,128], index: 2, kind: input, shape index: {}]   ;;  %s1132_s3 = inlined_call_operand.vmem [shape: f32[1,128], index: 3, kind: input, shape index: {}]   ;;  %s1133_s4 = inlined_call_operand.vmem [shape: bf16[32,128], index: 4, kind: input, shape index: {}]   ;;  %s1134_s5 = inlined_call_operand.vmem [shape: bf16[32,128], index: 5, kind: output, shape index: {}]  }
   0x1   :  { %12 = vsyncpa [#allocation5 + $0x1], 0  ;;  %s1005_s18 = smov 0   ;;  %s1007_s19 = smov 0  }
   0x2   :  { %s1009_s20 = smov 0   ;;  %s1011_s21 = smov 0  }
   0x3   :  { %s1013_s22 = smov 0   ;;  %s1015_s23 = smov 0  }
   0x4 LB: > { %s738_s24 = sadd.s32 4294967295, %s970_s23   ;;  %s30_s25 = sadd.s32 1, %s966_s22  ;;  %s970_s23 = sphi %s1015_s23, %s18_s23   ;;  %s966_s22 = sphi %s1013_s22, %s1141_s22   ;;  %s962_s21 = sphi %s1011_s21, %s1140_s21   ;;  %s958_s20 = sphi %s1009_s20, %s1139_s20   ;;  %s954_s19 = sphi %s1007_s19, %s1138_s19   ;;  %s950_s18 = sphi %s1005_s18, %s1137_s18  }
   0x5   : > { %p31_p0 = scmp.ge.s32.totalorder %s30_s25, 9  ;;  %s46_s26 = sadd.s32 1, %s958_s20 }
   0x6   : > { %p53_p1 = scmp.ne.s32.totalorder %s958_s20, %s954_s19  ;;  %p54_p2 = scmp.eq.s32.totalorder %s970_s23, 0 }
   0x7   : > { %s1143_s25 = smov (%p31_p0, %s30_s25), 0  ;;  %p87_p4 = scmp.ne.s32.totalorder %s954_s19, %s950_s18 }
   0x8   : > { %p1041_p3 = por %p54_p2, %p53_p1  ;;  %s42_s28 = ssub.s32 %s966_s22, %s1143_s25 }
   0x9   : > { %p88_p5 = scmp.eq.s32.totalorder %s738_s24, 0  ;;  %p44_p6 = scmp.eq.s32.totalorder %s42_s28, 0 }
   0xa   : > { %p743_p8 = scmp.ge.s32.totalorder %s970_s23, 9 }
   0xb   : > { %p1048_p7 = por %p88_p5, %p87_p4 }
   0xc   : > { %s1053_s30 = scalar_select %p44_p6, %s958_s20, %s46_s26  }
   0xd   : > { %239 = sbr.rel (%p743_p8) target bundleno = 32 (0x20), region = 28 }
  0x12   : > { %242 = sbr.rel (!%p1041_p3) target bundleno = 26 (0x1a), region = 32  ;;  %s244_s6 = sand.u32 (%p1041_p3), 1, %s958_s20  }
  0x13   : > { %s745_s7 = sshll.u32 (%p1041_p3), %s966_s22, 2  ;;  %s744_s8 = sshll.u32 (%p1041_p3), %s244_s6, 4 }
  0x14   : > { %s251_s11 = scalar_lea.vmem (%p1041_p3), %s1129_s0, %s745_s7  ;;  %s246_s12 = scalar_lea.vmem (%p1041_p3), [#allocation3], %s744_s8 }
  0x15   : > { %v268_v0 = vld [vmem:[%s251_s11] sm:$0xf] (%p1041_p3)  ;;  %v270_v1 = vld [vmem:[%s251_s11 + $0x24] sm:$0xf] (%p1041_p3)  ;;  %v272_v2 = vld [vmem:[%s251_s11 + $0x48] sm:$0xf] (%p1041_p3) }
  0x16   : > { %269 = vst [vmem:[%s246_s12] sm:$0xf] (%p1041_p3), %v268_v0  ;;  %v274_v3 = vld [vmem:[%s251_s11 + $0x6c] sm:$0xf] (%p1041_p3) }
  0x17   : > { %271 = vst [vmem:[%s246_s12 + $0x4] sm:$0xf] %v270_v1 }
  0x18   : > { %273 = vst [vmem:[%s246_s12 + $0x8] sm:$0xf] %v272_v2 }
  0x19   : > { %275 = vst [vmem:[%s246_s12 + $0xc] sm:$0xf] %v274_v3 }
  0x1a PF: > { %s308_s13 = sand.u32 1, %s958_s20   ;;  %s798_s14 = sshll.u32 %s966_s22, 6 }
  0x1b   : > { %s746_s15 = sshll.u32 %s308_s13, 6  ;;  %s318_s18 = scalar_lea.hbm %s1130_s1, %s798_s14 }
  0x1c   : > { %s319_s24 = sshll.u32 %s318_s18, 4  ;;  %s312_s26 = scalar_lea.vmem [#allocation4], %s746_s15  ;;  %s320_s24 = int_to_ptr.hbm [resolvable:$true] %s319_s24 }
  0x1d   : > { %s321_s28 = sshll.u32 %s312_s26, 4  ;;  %s309_s6 = scalar_lea.sflag [#allocation5], %s308_s13  ;;  %s322_s28 = int_to_ptr.vmem [resolvable:$true] %s321_s28 }
  0x1e   : > { %s972_s7 = smov 64   ;;  %s973_s8 = smov 4  }
  0x1f   : > { %837 = dma.hbm_to_vmem [thread:$0]  (%p1041_p3), %s320_s24, 1024, %s322_s28, %s309_s6, %s972_s7, %s972_s7, %s973_s8  }
  0x20 PF: > { %p749_p9 = scmp.ge.s32.totalorder %s970_s23, 1  ;;  %p329_p10 = scmp.lt.s32.totalorder %s970_s23, 10 }
  0x22   : > { %p330_p11 = pnand %p749_p9, %p329_p10 }
  0x23   : > { %s336_s9 = sand.u32 (!%p330_p11), 1, %s954_s19  }
  0x24   : > { %333 = sbr.rel (%p330_p11) target bundleno = 242 (0xf2), region = 77  ;;  %s750_s10 = sshll.u32 (!%p330_p11), %s336_s9, 4 }
  0x25   : > { %s751_s11 = sshll.u32 (!%p330_p11), %s336_s9, 6  ;;  %s1073_s12 = scalar_lea.vmem (!%p330_p11), [#allocation3], %s750_s10 }
  0x26   : > { %s343_s14 = scalar_lea.sflag (!%p330_p11), [#allocation5], %s336_s9  ;;  %s1075_s13 = scalar_lea.vmem (!%p330_p11), [#allocation4], %s751_s11 }
  0x29   : > { %945 = dma.done.wait (%p1048_p7), %s343_s14, 1024  }
  0x2a   : > { %947 = vsyncadd (%p1048_p7), %s343_s14, 4294966272  ;;  %p752_p12 = scmp.ne.s32.totalorder %s962_s21, 0 }
  0x2c   : > { %424 = sbr.rel (%p752_p12) target bundleno = 54 (0x36), region = 89 }
  0x31   : > { %v974_v4 = vmov 0.0  }
  0x32   : > { %425 = vst [vmem:[#allocation2 + $0x10] sm:$0xff] %v974_v4 }
  0x33   : > { %426 = vst [vmem:[#allocation2] sm:$0xff] %v974_v4 }
  0x34   : > { %427 = vst [vmem:[#allocation2 + $0x18] sm:$0xff] %v974_v4 }
  0x35   : > { %428 = vst [vmem:[#allocation2 + $0x8] sm:$0xff] %v974_v4 }
  0x36 PF: > { %v808_v5 = vld [vmem:[%s1075_s13 + $0x38] sm:$0xff]  ;;  %v807_v6 = vld [vmem:[%s1075_s13 + $0x30] sm:$0xff]  ;;  %v806_v7 = vld [vmem:[%s1075_s13 + $0x28] sm:$0xff]  ;;  %p793_p13 = scmp.ne.s32.totalorder %s962_s21, 8 }
  0x37   : > { %513 = vmatpush.bf16.msra.mxu0 %v808_v5  ;;  %829 = vmatpush.bf16.msra.mxu1 %v808_v5  ;;  %v805_v8 = vld [vmem:[%s1075_s13 + $0x20] sm:$0xff]  ;;  %v804_v9 = vld [vmem:[%s1075_s13 + $0x18] sm:$0xff]  ;;  %v803_v10 = vld [vmem:[%s1075_s13 + $0x10] sm:$0xff] }
  0x38   : > { %v802_v11 = vld [vmem:[%s1075_s13 + $0x8] sm:$0xff]  ;;  %v801_v12 = vld [vmem:[%s1075_s13] sm:$0xff] }
  0x39   : > { %v799_v13 = vld [vmem:[%s1073_s12] sm:$0xff]  ;;  %v800_v14 = vld [vmem:[%s1073_s12 + $0x8] sm:$0xff] }
  0x3a   : > { %v429_v15 = vld [vmem:[#allocation2 + $0x10] sm:$0xff]  ;;  %v430_v21 = vld [vmem:[#allocation2] sm:$0xff] }
  0x3b   : > { %514 = vmatpush.bf16.msra.mxu0 %v807_v6  ;;  %830 = vmatpush.bf16.msra.mxu1 %v807_v6  ;;  %v431_v16 = vld [vmem:[#allocation2 + $0x18] sm:$0xff] }
  0x3c   : > { %v432_v22 = vld [vmem:[#allocation2 + $0x8] sm:$0xff] }
  0x3f   : > { %515 = vmatpush.bf16.msra.mxu0 %v806_v7  ;;  %831 = vmatpush.bf16.msra.mxu1 %v806_v7 }
  0x43   : > { %516 = vmatpush.bf16.msra.mxu0 %v805_v8  ;;  %832 = vmatpush.bf16.msra.mxu1 %v805_v8 }
  0x47   : > { %517 = vmatpush.bf16.msra.mxu0 %v804_v9  ;;  %833 = vmatpush.bf16.msra.mxu1 %v804_v9 }
  0x4b   : > { %518 = vmatpush.bf16.msra.mxu0 %v803_v10  ;;  %834 = vmatpush.bf16.msra.mxu1 %v803_v10 }
  0x4f   : > { %519 = vmatpush.bf16.msra.mxu0 %v802_v11  ;;  %835 = vmatpush.bf16.msra.mxu1 %v802_v11 }
  0x53   : > { %520 = vmatpush.bf16.msra.mxu0 %v801_v12  ;;  %836 = vmatpush.bf16.msra.mxu1 %v801_v12 }
  0x56   : > { %521 = vmatmul.bf16.vlgmr.msra.gmra.mxu0 %v799_v13  ;;  %526 = vmatmul.bf16.vlgmr.msra.gmra.mxu1 %v800_v14 }
  0xd3   : > { %v522_v17 = vpop.f32.mrf.mxu0  ;;  %v527_v18 = vpop.f32.mrf.mxu1 }
  0xd4   : > { %v532_v19 = vadd.f32 %v522_v17, %v429_v15  ;;  %v534_v20 = vadd.f32 %v527_v18, %v431_v16 }
  0xd6   : > { %536 = vst [vmem:[#allocation2 + $0x10] sm:$0xff] %v532_v19 }
  0xd7   : > { %538 = vst [vmem:[#allocation2 + $0x18] sm:$0xff] %v534_v20 }
  0xdb   : > { %v524_v23 = vpop.f32.mrf.mxu0  ;;  %v529_v24 = vpop.f32.mrf.mxu1  ;;  %543 = sbr.rel (%p793_p13) target bundleno = 242 (0xf2), region = 93 }
  0xdc   : > { %v533_v25 = vadd.f32 %v524_v23, %v430_v21  ;;  %v535_v26 = vadd.f32 %v529_v24, %v432_v22 }
  0xde   : > { %537 = vst [vmem:[#allocation2] sm:$0xff] %v533_v25 }
  0xdf   : > { %539 = vst [vmem:[#allocation2 + $0x8] sm:$0xff] %v535_v26 }
  0xe0   : > { %v544_v27 = vld [vmem:[#allocation2 + $0x10] sm:$0xff]  ;;  %v890_v29 = vld [vmem:[%s1131_s2] ss:$0 sm:$0xff]  ;;  %v546_v32 = vld [vmem:[#allocation2 + $0x18] sm:$0xff] }
  0xe1   : > { %v891_v30 = vld [vmem:[%s1132_s3] ss:$0 sm:$0xff]  ;;  %v552_v34 = vmul.f32 %v890_v29, %v544_v27  ;;  %v827_v38 = vld [vmem:[%s1133_s4 + $0x8] sm:$0xff]   ;;  %v554_v39 = vmul.f32 %v890_v29, %v546_v32 }
  0xe2   : > { %v810_v31 = vld [vmem:[%s1133_s4] sm:$0xff]   ;;  %v815_v41 = vunpack.c.l.bf16 %v827_v38  ;;  %v816_v42 = vunpack.c.h.bf16 %v827_v38 }
  0xe3   : > { %v811_v36 = vunpack.c.l.bf16 %v810_v31  ;;  %v812_v37 = vunpack.c.h.bf16 %v810_v31  ;;  %v560_v43 = vadd.f32 %v891_v30, %v552_v34  ;;  %v562_v45 = vadd.f32 %v891_v30, %v554_v39 }
  0xe5   : > { %v545_v28 = vld [vmem:[#allocation2] sm:$0xff]  ;;  %v572_v47 = vadd.f32 %v811_v36, %v560_v43  ;;  %v574_v49 = vadd.f32 %v815_v41, %v562_v45 }
  0xe6   : > { %v547_v33 = vld [vmem:[#allocation2 + $0x8] sm:$0xff]  ;;  %v553_v35 = vmul.f32 %v890_v29, %v545_v28 }
  0xe7   : > { %v555_v40 = vmul.f32 %v890_v29, %v547_v33  ;;  %v576_v51 = vmax.f32 %v572_v47, 0.0  ;;  %v578_v53 = vmax.f32 %v574_v49, 0.0 }
  0xe8   : > { %v561_v44 = vadd.f32 %v891_v30, %v553_v35 }
  0xe9   : > { %v563_v46 = vadd.f32 %v891_v30, %v555_v40 }
  0xea   : > { %v573_v48 = vadd.f32 %v812_v37, %v561_v44 }
  0xeb   : > { %v575_v50 = vadd.f32 %v816_v42, %v563_v46 }
  0xec   : > { %v577_v52 = vmax.f32 %v573_v48, 0.0 }
  0xed   : > { %v579_v54 = vmax.f32 %v575_v50, 0.0 }
  0xee   : > { %v820_v55 = vpack.c.bf16 %v577_v52, %v576_v51 }
  0xef   : > { %v825_v56 = vpack.c.bf16 %v579_v54, %v578_v53 }
  0xf0   : > { %821 = vst [vmem:[%s1134_s5] sm:$0xff] %v820_v55  }
  0xf1   : > { %828 = vst [vmem:[%s1134_s5 + $0x8] sm:$0xff] %v825_v56  }
  0xf2 PF: > { %s18_s23 = sadd.s32 1, %s970_s23   ;;  %s1137_s18 = smov %s954_s19 }
  0xf3   : > { %p15_p0 = scmp.ge.s32.totalorder %s18_s23, 11   ;;  %s1138_s19 = smov %s958_s20 }
  0xf4   : > { %s1139_s20 = smov %s1053_s30  ;;  %s1140_s21 = smov %s966_s22 }
  0xf5   : > { %s1141_s22 = smov %s1143_s25  ;;  %17 = sbr.rel (!%p15_p0) target bundleno = 4 (0x4), region = 146 }
  0xfa   :  { %616 = vsyncpa [#allocation5], 1 }
  0xfb   :  { %618 = vsyncpa [#allocation5 + $0x1], 1 }

// kernel: resnet18_forward.34
= control target key start
LH: loop header
LB: loop body
LE: loop exit
PB: predicated region body
PF: predicated region fallthrough
CT: control target
= control target key end

     0   :  { %9 = vsyncpa [#allocation4], 0  ;;  %s963_s0 = inlined_call_operand.vmem [shape: bf16[8,1152], index: 0, kind: input, shape index: {}]   ;;  %s964_s1 = inlined_call_operand.hbm [shape: bf16[1152,256], index: 1, kind: input, shape index: {}]   ;;  %s965_s2 = inlined_call_operand.vmem [shape: f32[1,256], index: 2, kind: input, shape index: {}]   ;;  %s966_s3 = inlined_call_operand.vmem [shape: f32[1,256], index: 3, kind: input, shape index: {}]   ;;  %s967_s4 = inlined_call_operand.vmem [shape: bf16[8,256], index: 4, kind: output, shape index: {}]  }
   0x1   :  { %11 = vsyncpa [#allocation4 + $0x1], 0  ;;  %s809_s15 = smov 0   ;;  %s811_s16 = smov 0  }
   0x2   :  { %s813_s17 = smov 0   ;;  %s815_s18 = smov 0  }
   0x3   :  { %s817_s19 = smov 0   ;;  %s819_s20 = smov 0  }
   0x4   :  { %s821_s21 = smov 0   ;;  %s823_s22 = smov 0  }
   0x5 LB: > { %s548_s23 = sadd.s32 4294967295, %s778_s22   ;;  %s29_s24 = sadd.s32 1, %s770_s20  ;;  %s778_s22 = sphi %s823_s22, %s17_s22   ;;  %s774_s21 = sphi %s821_s21, %s979_s21   ;;  %s770_s20 = sphi %s819_s20, %s978_s20   ;;  %s766_s19 = sphi %s817_s19, %s977_s19   ;;  %s762_s18 = sphi %s815_s18, %s976_s18   ;;  %s758_s17 = sphi %s813_s17, %s975_s17   ;;  %s754_s16 = sphi %s811_s16, %s974_s16   ;;  %s750_s15 = sphi %s809_s15, %s973_s15  }
   0x6   : > { %p30_p0 = scmp.ge.s32.totalorder %s29_s24, 9  ;;  %s32_s25 = sadd.s32 1, %s774_s21 }
   0x7   : > { %s73_s26 = sadd.s32 1, %s758_s17  ;;  %p80_p1 = scmp.ne.s32.totalorder %s758_s17, %s754_s16 }
   0x8   : > { %s981_s24 = smov (%p30_p0, %s29_s24), 0  ;;  %s983_s25 = smov (!%p30_p0, %s32_s25), %s774_s21 }
   0x9   : > { %s68_s27 = ssub.s32 %s770_s20, %s981_s24  ;;  %p81_p2 = scmp.eq.s32.totalorder %s778_s22, 0 }
   0xa   : > { %p34_p3 = scmp.ge.s32.totalorder %s983_s25, 2  ;;  %p86_p4 = scmp.ne.s32.totalorder %s754_s16, %s750_s15 }
   0xb   : > { %p860_p5 = por %p81_p2, %p80_p1  ;;  %p87_p6 = scmp.eq.s32.totalorder %s548_s23, 0 }
   0xc   : > { %s985_s25 = smov (%p34_p3, %s983_s25), 0  ;;  %p611_p8 = scmp.lt.s32.totalorder %s778_s22, 18 }
   0xd   : > { %970 = sst [smem:[#allocation6_spill]] %s985_s25  ;;  %p866_p7 = por %p87_p6, %p86_p4 }
   0xe   : > { %s69_s30 = ssub.s32 %s774_s21, %s985_s25  ;;  %s201_s6 = sand.u32 1, %s758_s17  }
   0xf   : > { %s70_s5 = sor.u32 %s69_s30, %s68_s27  ;;  %s552_s7 = sshll.u32 %s201_s6, 6 }
  0x10   : > { %p71_p9 = scmp.eq.s32.totalorder %s70_s5, 0  ;;  %s596_s8 = sshll.u32 %s770_s20, 5 }
  0x11   : > { %s210_s10 = sadd.s32 %s774_s21, %s596_s8  ;;  %s205_s12 = scalar_lea.vmem [#allocation3], %s552_s7 }
  0x12   : > { %s876_s9 = scalar_select %p71_p9, %s758_s17, %s73_s26  }
  0x13   : > { %s555_s11 = sshll.u32 %s210_s10, 2  ;;  %s215_s13 = sshll.u32 %s205_s12, 4  ;;  %s216_s13 = int_to_ptr.vmem [resolvable:$true] %s215_s13 }
  0x14   : > { %s212_s23 = scalar_lea.hbm %s964_s1, %s555_s11  ;;  %p608_p10 = pnand %p611_p8, %p860_p5 }
  0x15   : > { %s213_s25 = sshll.u32 %s212_s23, 4  ;;  %p556_p11 = scmp.ge.s32.totalorder %s778_s22, 1  ;;  %s214_s25 = int_to_ptr.hbm [resolvable:$true] %s213_s25 }
  0x16   : > { %s202_s27 = scalar_lea.sflag [#allocation4], %s201_s6  ;;  %s780_s30 = smov 128  }
  0x17   : > { %s781_s26 = smov 64   ;;  %s782_s5 = smov 4  }
  0x18   : > { %610 = dma.hbm_to_vmem [thread:$0]  (!%p608_p10), %s214_s25, 1024, %s216_s13, %s202_s27, %s780_s30, %s781_s26, %s782_s5  }
  0x19   : > { %p235_p12 = scmp.lt.s32.totalorder %s778_s22, 19 }
  0x1b   : > { %p236_p13 = pnand %p556_p11, %p235_p12 }
  0x1c   : > { %s241_s7 = sand.u32 (!%p236_p13), 1, %s754_s16  }
  0x1d   : > { %239 = sbr.rel (%p236_p13) target bundleno = 222 (0xde), region = 36  ;;  %s557_s8 = sshll.u32 (!%p236_p13), %s241_s7, 6 }
  0x1e   : > { %s242_s10 = scalar_lea.sflag (!%p236_p13), [#allocation4], %s241_s7  ;;  %s889_s11 = scalar_lea.vmem (!%p236_p13), [#allocation3], %s557_s8 }
  0x22   : > { %745 = dma.done.wait (%p866_p7), %s242_s10, 1024  }
  0x23   : > { %747 = vsyncadd (%p866_p7), %s242_s10, 4294966272  ;;  %p290_p0 = scmp.lt.s32.totalorder %s762_s18, 8  ;;  %p297_p1 = scmp.lt.s32.totalorder %s766_s19, 1 }
  0x24   : > { %p560_p2 = scmp.ne.s32.totalorder %s762_s18, 0 }
  0x25   : > { %s291_s25 = scalar_select %p290_p0, %s762_s18, 8 }
  0x26   : > { %s987_s19 = smov (!%p297_p1, %s766_s19), 1  ;;  %314 = sbr.rel (%p560_p2) target bundleno = 45 (0x2d), region = 44 }
  0x27   : > { %s558_s28 = sshll.u32 %s291_s25, 2  ;;  %s299_s15 = scalar_lea.vmem %s965_s2, %s987_s19 }
  0x28   : > { %s295_s13 = scalar_lea.vmem %s963_s0, %s558_s28  ;;  %s302_s30 = scalar_lea.vmem %s966_s3, %s987_s19 }
  0x29   : > { %s559_s26 = sshll.u32 %s987_s19, 2 }
  0x2a   : > { %s916_s8 = scalar_lea.vmem %s967_s4, %s559_s26 }
  0x2b   : > { %v783_v0 = vmov 0.0  }
  0x2c   : > { %315 = vst [vmem:[#allocation2] sm:$0xff] %v783_v0 }
  0x2d PF: > { %v604_v1 = vld [vmem:[%s889_s11 + $0x38] sm:$0xff]  ;;  %v603_v2 = vld [vmem:[%s889_s11 + $0x30] sm:$0xff]  ;;  %v602_v3 = vld [vmem:[%s889_s11 + $0x28] sm:$0xff]  ;;  %p593_p3 = scmp.ne.s32.totalorder %s762_s18, 8 }
  0x2e   : > { %382 = vmatpush.bf16.msra.mxu0 %v604_v1  ;;  %v601_v4 = vld [vmem:[%s889_s11 + $0x20] sm:$0xff]  ;;  %v600_v5 = vld [vmem:[%s889_s11 + $0x18] sm:$0xff]  ;;  %v599_v6 = vld [vmem:[%s889_s11 + $0x10] sm:$0xff] }
  0x2f   : > { %v598_v7 = vld [vmem:[%s889_s11 + $0x8] sm:$0xff]  ;;  %v597_v8 = vld [vmem:[%s889_s11] sm:$0xff]  ;;  %v317_v9 = vld [vmem:[%s295_s13] sm:$0xf] }
  0x32   : > { %383 = vmatpush.bf16.msra.mxu0 %v603_v2 }
  0x33   : > { %v316_v10 = vld [vmem:[#allocation2] sm:$0xff] }
  0x36   : > { %384 = vmatpush.bf16.msra.mxu0 %v602_v3 }
  0x3a   : > { %385 = vmatpush.bf16.msra.mxu0 %v601_v4 }
  0x3e   : > { %386 = vmatpush.bf16.msra.mxu0 %v600_v5 }
  0x42   : > { %387 = vmatpush.bf16.msra.mxu0 %v599_v6 }
  0x46   : > { %388 = vmatpush.bf16.msra.mxu0 %v598_v7 }
  0x4a   : > { %389 = vmatpush.bf16.msra.mxu0 %v597_v8 }
  0x4d   : > { %390 = vmatmul.bf16.vlgmr.msra.gmra.mxu0 %v317_v9 }
  0xca   : > { %v391_v11 = vpop.f32.mrf.mxu0 }
  0xcb   : > { %v395_v12 = vadd.f32 %v391_v11, %v316_v10 }
  0xcd   : > { %396 = vst [vmem:[#allocation2] sm:$0xff] %v395_v12 }
  0xce   : > { %400 = sbr.rel (%p593_p3) target bundleno = 222 (0xde), region = 48 }
  0xd2   : > { %v393_v13 = vpop.f32.mrf.mxu0 }
  0xd3   : > { %v680_v15 = vld [vmem:[%s299_s15] ss:$0 sm:$0xff] }
  0xd4   : > { %v401_v14 = vld [vmem:[#allocation2] sm:$0xff] }
  0xd5   : > { %v681_v16 = vld [vmem:[%s302_s30] ss:$0 sm:$0xff]  ;;  %v406_v17 = vmul.f32 %v680_v15, %v401_v14 }
  0xd7   : > { %v411_v18 = vadd.f32 %v681_v16, %v406_v17 }
  0xd9   : > { %v412_v19 = vmax.f32 %v411_v18, 0.0 }
  0xdb   : > { %v413_v20 = vpack.c.bf16 %v412_v19, %v412_v19 }
  0xdd   : > { %414 = vst [vmem:[%s916_s8] sm:$0xf] %v413_v20 }
  0xde PF: > { %s17_s22 = sadd.s32 1, %s778_s22   ;;  %s972_s6 = sld [smem:[#allocation6_spill]] }
  0xdf   : > { %p14_p4 = scmp.ge.s32.totalorder %s17_s22, 20   ;;  %s973_s15 = smov %s754_s16 }
  0xe0   : > { %s974_s16 = smov %s758_s17  ;;  %s975_s17 = smov %s876_s9 }
  0xe1   : > { %s976_s18 = smov %s770_s20  ;;  %s977_s19 = smov %s774_s21 }
  0xe2   : > { %s978_s20 = smov %s981_s24  ;;  %16 = sbr.rel (!%p14_p4) target bundleno = 5 (0x5), region = 93 }
  0xe4   : > { %s979_s21 = smov %s972_s6 }
  0xe7   :  { %442 = vsyncpa [#allocation4], 1 }
  0xe8   :  { %444 = vsyncpa [#allocation4 + $0x1], 1 }

// kernel: resnet18_forward.33
= control target key start
LH: loop header
LB: loop body
LE: loop exit
PB: predicated region body
PF: predicated region fallthrough
CT: control target
= control target key end

     0   :  { %s776_s15 = smov 0   ;;  %s778_s16 = smov 0   ;;  %s869_s0 = inlined_call_operand.vmem [shape: bf16[8,128], index: 0, kind: input, shape index: {}]   ;;  %s870_s1 = inlined_call_operand.vmem [shape: bf16[128,256], index: 1, kind: input, shape index: {}]   ;;  %s871_s2 = inlined_call_operand.vmem [shape: f32[1,256], index: 2, kind: input, shape index: {}]   ;;  %s872_s3 = inlined_call_operand.vmem [shape: f32[1,256], index: 3, kind: input, shape index: {}]   ;;  %s873_s4 = inlined_call_operand.vmem [shape: bf16[8,256], index: 4, kind: output, shape index: {}]  }
   0x1   :  { %s780_s17 = smov 0   ;;  %s782_s18 = smov 0  }
   0x2   :  { %s784_s19 = smov 0  }
   0x3 LB: > { %s29_s20 = sadd.s32 1, %s745_s18  ;;  %p77_p1 = scmp.ne.s32.totalorder %s737_s16, %s733_s15  ;;  %s749_s19 = sphi %s784_s19, %s14_s19   ;;  %s745_s18 = sphi %s782_s18, %s877_s18   ;;  %s741_s17 = sphi %s780_s17, %s876_s17   ;;  %s737_s16 = sphi %s778_s16, %s875_s16   ;;  %s733_s15 = sphi %s776_s15, %s874_s15  }
   0x4   : > { %p31_p0 = scmp.ge.s32.totalorder %s29_s20, 2  ;;  %p78_p2 = scmp.eq.s32.totalorder %s749_s19, 0 }
   0x5   : > { %s70_s22 = sadd.s32 1, %s737_s16  ;;  %p621_p5 = scmp.ge.s32.totalorder %s749_s19, 2 }
   0x6   : > { %s879_s20 = smov (%p31_p0, %s29_s20), 0  ;;  %p79_p3 = por %p78_p2, %p77_p1 }
   0x7   : > { %s66_s21 = ssub.s32 %s745_s18, %s879_s20  ;;  %193 = sbr.rel (%p621_p5) target bundleno = 32 (0x20), region = 20 }
   0x8   : > { %p68_p4 = scmp.eq.s32.totalorder %s66_s21, 0 }
   0xa   : > { %s811_s23 = scalar_select %p68_p4, %s737_s16, %s70_s22  }
   0xc   : > { %196 = sbr.rel (!%p79_p3) target bundleno = 32 (0x20), region = 24  ;;  %s198_s24 = sand.u32 (%p79_p3), 1, %s737_s16  }
   0xd   : > { %s623_s25 = sshll.u32 (%p79_p3), %s745_s18, 2  ;;  %s622_s26 = sshll.u32 (%p79_p3), %s198_s24, 6 }
   0xe   : > { %s819_s29 = scalar_lea.vmem (%p79_p3), %s870_s1, %s623_s25  ;;  %s200_s30 = scalar_lea.vmem (%p79_p3), [#allocation3], %s622_s26 }
   0xf   : > { %v222_v0 = vld [vmem:[%s819_s29] sm:$0xf] (%p79_p3)  ;;  %v224_v1 = vld [vmem:[%s819_s29 + $0x8] sm:$0xf] (%p79_p3)  ;;  %v226_v2 = vld [vmem:[%s819_s29 + $0x10] sm:$0xf] (%p79_p3) }
  0x10   : > { %223 = vst [vmem:[%s200_s30] sm:$0xf] (%p79_p3), %v222_v0  ;;  %v228_v3 = vld [vmem:[%s819_s29 + $0x18] sm:$0xf] (%p79_p3)  ;;  %v230_v4 = vld [vmem:[%s819_s29 + $0x20] sm:$0xf] (%p79_p3) }
  0x11   : > { %225 = vst [vmem:[%s200_s30 + $0x4] sm:$0xf] %v224_v1  ;;  %v232_v5 = vld [vmem:[%s819_s29 + $0x28] sm:$0xf]  ;;  %v234_v6 = vld [vmem:[%s819_s29 + $0x30] sm:$0xf] }
  0x12   : > { %227 = vst [vmem:[%s200_s30 + $0x8] sm:$0xf] %v226_v2  ;;  %v236_v7 = vld [vmem:[%s819_s29 + $0x38] sm:$0xf]  ;;  %v238_v8 = vld [vmem:[%s819_s29 + $0x40] sm:$0xf] }
  0x13   : > { %229 = vst [vmem:[%s200_s30 + $0xc] sm:$0xf] %v228_v3  ;;  %v240_v9 = vld [vmem:[%s819_s29 + $0x48] sm:$0xf]  ;;  %v242_v10 = vld [vmem:[%s819_s29 + $0x50] sm:$0xf] }
  0x14   : > { %231 = vst [vmem:[%s200_s30 + $0x10] sm:$0xf] %v230_v4  ;;  %v244_v11 = vld [vmem:[%s819_s29 + $0x58] sm:$0xf]  ;;  %v246_v12 = vld [vmem:[%s819_s29 + $0x60] sm:$0xf] }
  0x15   : > { %233 = vst [vmem:[%s200_s30 + $0x14] sm:$0xf] %v232_v5  ;;  %v248_v13 = vld [vmem:[%s819_s29 + $0x68] sm:$0xf]  ;;  %v250_v14 = vld [vmem:[%s819_s29 + $0x70] sm:$0xf] }
  0x16   : > { %235 = vst [vmem:[%s200_s30 + $0x18] sm:$0xf] %v234_v6  ;;  %v252_v15 = vld [vmem:[%s819_s29 + $0x78] sm:$0xf] }
  0x17   : > { %237 = vst [vmem:[%s200_s30 + $0x1c] sm:$0xf] %v236_v7 }
  0x18   : > { %239 = vst [vmem:[%s200_s30 + $0x20] sm:$0xf] %v238_v8 }
  0x19   : > { %241 = vst [vmem:[%s200_s30 + $0x24] sm:$0xf] %v240_v9 }
  0x1a   : > { %243 = vst [vmem:[%s200_s30 + $0x28] sm:$0xf] %v242_v10 }
  0x1b   : > { %245 = vst [vmem:[%s200_s30 + $0x2c] sm:$0xf] %v244_v11 }
  0x1c   : > { %247 = vst [vmem:[%s200_s30 + $0x30] sm:$0xf] %v246_v12 }
  0x1d   : > { %249 = vst [vmem:[%s200_s30 + $0x34] sm:$0xf] %v248_v13 }
  0x1e   : > { %251 = vst [vmem:[%s200_s30 + $0x38] sm:$0xf] %v250_v14 }
  0x1f   : > { %253 = vst [vmem:[%s200_s30 + $0x3c] sm:$0xf] %v252_v15 }
  0x20 PF: > { %p624_p6 = scmp.ge.s32.totalorder %s749_s19, 1  ;;  %p320_p7 = scmp.lt.s32.totalorder %s749_s19, 3 }
  0x22   : > { %p321_p8 = pnand %p624_p6, %p320_p7 }
  0x23   : > { %s327_s5 = sand.u32 (!%p321_p8), 1, %s733_s15   ;;  %p376_p9 = scmp.lt.s32.totalorder (!%p321_p8), %s741_s17, 1 }
  0x24   : > { %324 = sbr.rel (%p321_p8) target bundleno = 207 (0xcf), region = 73  ;;  %s625_s6 = sshll.u32 (!%p321_p8), %s327_s5, 6 }
  0x25   : > { %s329_s7 = scalar_lea.vmem (!%p321_p8), [#allocation3], %s625_s6 }
  0x29   : > { %v668_v16 = vld [vmem:[%s329_s7 + $0x38] sm:$0xff]  ;;  %s881_s17 = smov (!%p376_p9, %s741_s17), 1  ;;  %v667_v17 = vld [vmem:[%s329_s7 + $0x30] sm:$0xff]  ;;  %v666_v18 = vld [vmem:[%s329_s7 + $0x28] sm:$0xff] }
  0x2a   : > { %461 = vmatpush.bf16.msra.mxu0 %v668_v16  ;;  %s378_s10 = scalar_lea.vmem %s871_s2, %s881_s17  ;;  %s381_s13 = scalar_lea.vmem %s872_s3, %s881_s17  ;;  %v665_v19 = vld [vmem:[%s329_s7 + $0x20] sm:$0xff]  ;;  %v664_v20 = vld [vmem:[%s329_s7 + $0x18] sm:$0xff]  ;;  %v663_v21 = vld [vmem:[%s329_s7 + $0x10] sm:$0xff] }
  0x2b   : > { %v662_v22 = vld [vmem:[%s329_s7 + $0x8] sm:$0xff]  ;;  %v661_v23 = vld [vmem:[%s329_s7] sm:$0xff]  ;;  %s626_s21 = sshll.u32 %s881_s17, 2 }
  0x2c   : > { %v396_v24 = vld [vmem:[%s869_s0] sm:$0xf]  ;;  %s389_s25 = scalar_lea.vmem %s873_s4, %s626_s21 }
  0x2d   : > { %v709_v25 = vld [vmem:[%s378_s10] ss:$0 sm:$0xff] }
  0x2e   : > { %462 = vmatpush.bf16.msra.mxu0 %v667_v17  ;;  %v710_v26 = vld [vmem:[%s381_s13] ss:$0 sm:$0xff] }
  0x32   : > { %463 = vmatpush.bf16.msra.mxu0 %v666_v18 }
  0x36   : > { %464 = vmatpush.bf16.msra.mxu0 %v665_v19 }
  0x3a   : > { %465 = vmatpush.bf16.msra.mxu0 %v664_v20 }
  0x3e   : > { %466 = vmatpush.bf16.msra.mxu0 %v663_v21 }
  0x42   : > { %467 = vmatpush.bf16.msra.mxu0 %v662_v22 }
  0x46   : > { %468 = vmatpush.bf16.msra.mxu0 %v661_v23 }
  0x49   : > { %469 = vmatmul.bf16.vlgmr.msra.gmra.mxu0 %v396_v24 }
  0xc6   : > { %v470_v27 = vpop.f32.mrf.mxu0 }
  0xc7   : > { %v484_v28 = vmul.f32 %v709_v25, %v470_v27 }
  0xc9   : > { %v489_v29 = vadd.f32 %v710_v26, %v484_v28 }
  0xcb   : > { %v490_v30 = vpack.c.bf16 %v489_v29, %v489_v29 }
  0xcd   : > { %491 = vst [vmem:[%s389_s25] sm:$0xf] %v490_v30 }
  0xce   : > { %v472_v31 = vpop.f32.mrf.mxu0 }
  0xcf PF: > { %s14_s19 = sadd.s32 1, %s749_s19   ;;  %s874_s15 = smov %s737_s16 }
  0xd0   : > { %p11_p10 = scmp.ge.s32.totalorder %s14_s19, 4   ;;  %s875_s16 = smov %s811_s23 }
  0xd1   : > { %s876_s17 = smov %s745_s18  ;;  %s877_s18 = smov %s879_s20 }
  0xd2   :  { %13 = sbr.rel (!%p11_p10) target bundleno = 3 (0x3), region = 129 }

// kernel: resnet18_forward.35
= control target key start
LH: loop header
LB: loop body
LE: loop exit
PB: predicated region body
PF: predicated region fallthrough
CT: control target
= control target key end

     0   :  { %s1452_s0 = inlined_call_operand.vmem [shape: bf16[8,2304], index: 0, kind: input, shape index: {}]   ;;  %s1453_s1 = inlined_call_operand.hbm [shape: bf16[2304,256], index: 1, kind: input, shape index: {}]   ;;  %s1454_s2 = inlined_call_operand.hbm [shape: f32[1,256], index: 2, kind: input, shape index: {}]   ;;  %s1455_s3 = inlined_call_operand.hbm [shape: f32[1,256], index: 3, kind: input, shape index: {}]   ;;  %s1456_s4 = inlined_call_operand.vmem [shape: bf16[8,256], index: 4, kind: input, shape index: {}]   ;;  %s1457_s5 = inlined_call_operand.vmem [shape: bf16[8,256], index: 5, kind: output, shape index: {}]  }
   0x1   :  { %1466 = sst [smem:[#allocation18_spill]] %s1452_s0 }
   0x2   :  { %1467 = sst [smem:[#allocation19_spill]] %s1454_s2 }
   0x3   :  { %1468 = sst [smem:[#allocation20_spill]] %s1456_s4 }
   0x4   :  { %1469 = sst [smem:[#allocation21_spill]] %s1457_s5 }
   0x5   :  { %10 = vsyncpa [#allocation4], 0 }
   0x6   :  { %12 = vsyncpa [#allocation4 + $0x1], 0 }
   0x7   :  { %13 = vsyncpa [#allocation6], 0 }
   0x8   :  { %15 = vsyncpa [#allocation6 + $0x1], 0  ;;  %s1202_s18 = smov 0   ;;  %s1204_s19 = smov 0  }
   0x9   :  { %s1206_s20 = smov 0   ;;  %s1208_s21 = smov 0  }
   0xa   :  { %s1210_s22 = smov 0   ;;  %s1212_s23 = smov 0  }
   0xb   :  { %s1214_s24 = smov 0   ;;  %s1216_s25 = smov 0  }
   0xc   :  { %s1218_s26 = smov 0   ;;  %s1220_s27 = smov 0  }
   0xd   :  { %s1222_s28 = smov 0  }
   0xe LB: > { %1470 = sst [smem:[#allocation10_spill]] %s1146_s23  ;;  %s1458_s29 = sadd.s32 4294967295, %s1166_s28   ;;  %s1166_s28 = sphi %s1222_s28, %s21_s28   ;;  %s1162_s27 = sphi %s1220_s27, %s1507_s27   ;;  %s1158_s26 = sphi %s1218_s26, %s1499_s26   ;;  %s1154_s25 = sphi %s1216_s25, %s1506_s25   ;;  %s1150_s24 = sphi %s1214_s24, %s1498_s24   ;;  %s1146_s23 = sphi %s1212_s23, %s1497_s23   ;;  %s1142_s22 = sphi %s1210_s22, %s1505_s22   ;;  %s1138_s21 = sphi %s1208_s21, %s1504_s21   ;;  %s1134_s20 = sphi %s1206_s20, %s1503_s20   ;;  %s1130_s19 = sphi %s1204_s19, %s1502_s19   ;;  %s1126_s18 = sphi %s1202_s18, %s1501_s18  }
   0xf   : > { %1471 = sst [smem:[#allocation11_spill]] %s1150_s24  ;;  %s33_s30 = sadd.s32 1, %s1158_s26 }
  0x10   : > { %1472 = sst [smem:[#allocation12_spill]] %s1154_s25  ;;  %p34_p0 = scmp.ge.s32.totalorder %s33_s30, 9 }
  0x11   : > { %1473 = sst [smem:[#allocation13_spill]] %s1158_s26  ;;  %s36_s6 = sadd.s32 1, %s1162_s27 }
  0x12   : > { %s77_s7 = sadd.s32 1, %s1146_s23  ;;  %p84_p1 = scmp.ne.s32.totalorder %s1146_s23, %s1142_s22 }
  0x13   : > { %s1509_s30 = smov (%p34_p0, %s33_s30), 0  ;;  %s1511_s6 = smov (!%p34_p0, %s36_s6), %s1162_s27 }
  0x14   : > { %1474 = sst [smem:[#allocation14_spill]] %s1509_s30  ;;  %s72_s8 = ssub.s32 %s1158_s26, %s1509_s30 }
  0x15   : > { %p85_p2 = scmp.eq.s32.totalorder %s1166_s28, 0  ;;  %p38_p3 = scmp.ge.s32.totalorder %s1511_s6, 2 }
  0x16   : > { %p90_p4 = scmp.ne.s32.totalorder %s1142_s22, %s1138_s21  ;;  %p1276_p6 = scmp.eq.s32.totalorder %s1458_s29, 0 }
  0x17   : > { %p1270_p5 = por %p85_p2, %p84_p1  ;;  %s1513_s6 = smov (%p38_p3, %s1511_s6), 0 }
  0x18   : > { %1477 = sst [smem:[#allocation15_spill]] %s1513_s6  ;;  %p1284_p7 = por %p1276_p6, %p90_p4 }
  0x19   : > { %s103_s12 = sadd.s32 1, %s1134_s20  ;;  %s73_s13 = ssub.s32 %s1162_s27, %s1513_s6 }
  0x1a   : > { %p110_p8 = scmp.ne.s32.totalorder %s1134_s20, %s1130_s19  ;;  %s74_s14 = sor.u32 %s73_s13, %s72_s8 }
  0x1b   : > { %p101_p9 = scmp.eq.s32.totalorder %s73_s13, 0  ;;  %p75_p10 = scmp.eq.s32.totalorder %s74_s14, 0 }
  0x1c   : > { %p1295_p11 = por %p110_p8, %p85_p2  ;;  %p116_p12 = scmp.ne.s32.totalorder %s1130_s19, %s1126_s18 }
  0x1d   : > { %s1300_s16 = scalar_select %p101_p9, %s1134_s20, %s103_s12  }
  0x1e   : > { %s1303_s17 = scalar_select %p75_p10, %s1146_s23, %s77_s7  }
  0x1f   : > { %1480 = sst [smem:[#allocation16_spill]] %s1300_s16  ;;  %p887_p13 = scmp.lt.s32.totalorder %s1166_s28, 18 }
  0x20   : > { %1481 = sst [smem:[#allocation17_spill]] %s1303_s17  ;;  %s259_s21 = sand.u32 1, %s1166_s28  }
  0x21   : > { %p1311_p0 = por %p116_p12, %p1276_p6  ;;  %p1317_p1 = pnand %p887_p13, %p1270_p5 }
  0x22   : > { %s1461_s12 = sand.u32 1, %s1134_s20   ;;  %s1484_s2 = sld [smem:[#allocation19_spill]] }
  0x23   : > { %s262_s10 = scalar_lea.vmem [#allocation5], %s1461_s12  ;;  %p1330_p2 = pnand %p887_p13, %p1295_p11 }
  0x24   : > { %s269_s6 = sshll.u32 %s262_s10, 4  ;;  %p780_p3 = scmp.ge.s32.totalorder %s1166_s28, 1  ;;  %s270_s6 = int_to_ptr.vmem [resolvable:$true] %s269_s6 }
  0x25   : > { %p302_p4 = scmp.lt.s32.totalorder %s1166_s28, 19  ;;  %s260_s30 = scalar_lea.sflag [#allocation6], %s259_s21 }
  0x26   : > { %s235_s14 = sand.u32 1, %s1146_s23   ;;  %s854_s15 = sshll.u32 %s1158_s26, 6 }
  0x27   : > { %p1338_p5 = pnand %p780_p3, %p302_p4  ;;  %s244_s10 = sadd.s32 %s1162_s27, %s854_s15 }
  0x28   : > { %s265_s18 = scalar_lea.hbm %s1484_s2, %s1162_s27  ;;  %s779_s17 = sshll.u32 %s244_s10, 2 }
  0x29   : > { %s267_s7 = sshll.u32 %s265_s18, 4  ;;  %s776_s18 = sshll.u32 %s235_s14, 7  ;;  %s268_s7 = int_to_ptr.hbm [resolvable:$true] %s267_s7 }
  0x2a   : > { %883 = dma.hbm_to_vmem [thread:$0]  (!%p1330_p2), %s268_s7, 16, %s270_s6, %s260_s30  }
  0x2b   : > { %s239_s12 = scalar_lea.vmem [#allocation3], %s776_s18  ;;  %s246_s6 = scalar_lea.hbm %s1453_s1, %s779_s17 }
  0x2c   : > { %s249_s2 = sshll.u32 %s239_s12, 4  ;;  %s247_s7 = sshll.u32 %s246_s6, 4  ;;  %s250_s2 = int_to_ptr.vmem [resolvable:$true] %s249_s2  ;;  %s248_s7 = int_to_ptr.hbm [resolvable:$true] %s247_s7 }
  0x2d   : > { %s236_s5 = scalar_lea.sflag [#allocation4], %s235_s14  ;;  %s1168_s4 = smov 128  }
  0x2e   : > { %s1169_s0 = smov 64   ;;  %s1170_s23 = smov 4  }
  0x2f   : > { %880 = dma.hbm_to_vmem [thread:$0]  (!%p1317_p1), %s248_s7, 2048, %s250_s2, %s236_s5, %s1168_s4, %s1169_s0, %s1170_s23  }
  0x30   : > { %s282_s18 = scalar_lea.hbm %s1455_s3, %s1162_s27  ;;  %s1487_s12 = sand.u32 1, %s1134_s20  }
  0x31   : > { %s279_s15 = scalar_lea.vmem [#allocation7], %s1487_s12  ;;  %s284_s24 = sshll.u32 %s282_s18, 4  ;;  %s285_s24 = int_to_ptr.hbm [resolvable:$true] %s284_s24 }
  0x32   : > { %s286_s10 = sshll.u32 %s279_s15, 4  ;;  %306 = sbr.rel (%p1338_p5) target bundleno = 257 (0x101), region = 40  ;;  %s287_s10 = int_to_ptr.vmem [resolvable:$true] %s286_s10 }
  0x33   : > { %886 = dma.hbm_to_vmem [thread:$0]  (!%p1330_p2), %s285_s24, 16, %s287_s10, %s260_s30  }
  0x34   : > { %s308_s16 = sand.u32 (!%p1338_p5), 1, %s1142_s22  }
  0x35   : > { %s781_s17 = sshll.u32 (!%p1338_p5), %s308_s16, 7  ;;  %s309_s0 = scalar_lea.sflag (!%p1338_p5), [#allocation4], %s308_s16 }
  0x36   : > { %s1361_s2 = scalar_lea.vmem (!%p1338_p5), [#allocation3], %s781_s17 }
  0x37   : > { %1117 = dma.done.wait (%p1284_p7), %s309_s0, 2048  }
  0x38   : > { %1119 = vsyncadd (%p1284_p7), %s309_s0, 4294965248  ;;  %s1488_s4 = sadd.s32 4294967295, %s1166_s28   ;;  %s320_s23 = sand.u32 1, %s1130_s19  }
  0x39   : > { %s318_s5 = sand.u32 1, %s1488_s4   ;;  %s1370_s25 = scalar_lea.vmem [#allocation5], %s320_s23 }
  0x3a   : > { %s319_s24 = scalar_lea.sflag [#allocation6], %s318_s5 }
  0x3b   : > { %1121 = dma.done.wait (%p1311_p0), %s319_s24, 32  }
  0x3c   : > { %1123 = vsyncadd (%p1311_p0), %s319_s24, 4294967264  ;;  %s1489_s26 = sld [smem:[#allocation11_spill]]  ;;  %s1394_s0 = scalar_lea.vmem [#allocation7], %s320_s23 }
  0x3d   : > { %s1490_s30 = sld [smem:[#allocation12_spill]] }
  0x3e   : > { %s1491_s14 = sld [smem:[#allocation18_spill]] }
  0x3f   : > { %s1492_s12 = sld [smem:[#allocation20_spill]] }
  0x40   : > { %s1493_s16 = sld [smem:[#allocation21_spill]] }
  0x42   : > { %s782_s13 = sshll.u32 %s1489_s26, 1  ;;  %p786_p8 = scmp.ne.s32.totalorder %s1489_s26, 0 }
  0x43   : > { %p389_p6 = scmp.lt.s32.totalorder %s782_s13, 17  ;;  %p399_p7 = scmp.lt.s32.totalorder %s1490_s30, 1 }
  0x44   : > { %416 = sbr.rel (%p786_p8) target bundleno = 75 (0x4b), region = 56 }
  0x45   : > { %s1515_s13 = smov (!%p389_p6, %s782_s13), 17  ;;  %s1517_s30 = smov (!%p399_p7, %s1490_s30), 1 }
  0x46   : > { %s783_s11 = sshll.u32 %s1515_s13, 2  ;;  %s784_s6 = sshll.u32 %s1517_s30, 2 }
  0x47   : > { %s1382_s21 = scalar_lea.vmem %s1491_s14, %s783_s11  ;;  %s1387_s8 = scalar_lea.vmem %s1492_s12, %s784_s6 }
  0x48   : > { %s1392_s17 = scalar_lea.vmem %s1493_s16, %s784_s6 }
  0x49   : > { %v1171_v0 = vmov 0.0  }
  0x4a   : > { %417 = vst [vmem:[#allocation2] sm:$0xff] %v1171_v0 }
  0x4b PF: > { %v862_v1 = vld [vmem:[%s1361_s2 + $0x38] sm:$0xff]  ;;  %v861_v3 = vld [vmem:[%s1361_s2 + $0x30] sm:$0xff]  ;;  %v860_v5 = vld [vmem:[%s1361_s2 + $0x28] sm:$0xff]  ;;  %s1494_s4 = sld [smem:[#allocation11_spill]] }
  0x4c   : > { %v870_v2 = vld [vmem:[%s1361_s2 + $0x78] sm:$0xff]  ;;  %555 = vmatpush.bf16.msra.mxu0 %v862_v1  ;;  %v869_v4 = vld [vmem:[%s1361_s2 + $0x70] sm:$0xff]  ;;  %v868_v6 = vld [vmem:[%s1361_s2 + $0x68] sm:$0xff] }
  0x4d   : > { %568 = vmatpush.bf16.msra.mxu1 %v870_v2  ;;  %v859_v7 = vld [vmem:[%s1361_s2 + $0x20] sm:$0xff]  ;;  %v858_v9 = vld [vmem:[%s1361_s2 + $0x18] sm:$0xff]  ;;  %v857_v11 = vld [vmem:[%s1361_s2 + $0x10] sm:$0xff] }
  0x4e   : > { %v867_v8 = vld [vmem:[%s1361_s2 + $0x60] sm:$0xff]  ;;  %v866_v10 = vld [vmem:[%s1361_s2 + $0x58] sm:$0xff]  ;;  %v865_v12 = vld [vmem:[%s1361_s2 + $0x50] sm:$0xff] }
  0x4f   : > { %v856_v13 = vld [vmem:[%s1361_s2 + $0x8] sm:$0xff]  ;;  %v419_v15 = vld [vmem:[%s1382_s21] sm:$0xff]  ;;  %v855_v18 = vld [vmem:[%s1361_s2] sm:$0xff] }
  0x50   : > { %556 = vmatpush.bf16.msra.mxu0 %v861_v3  ;;  %v864_v14 = vld [vmem:[%s1361_s2 + $0x48] sm:$0xff]  ;;  %v453_v16 = vunpack.c.l.b16 %v419_v15  ;;  %v454_v17 = vunpack.c.h.b16 %v419_v15  ;;  %v863_v19 = vld [vmem:[%s1361_s2 + $0x40] sm:$0xff] }
  0x51   : > { %569 = vmatpush.bf16.msra.mxu1 %v869_v4  ;;  %v418_v23 = vld [vmem:[#allocation2] sm:$0xff]  ;;  %p851_p9 = scmp.ne.s32.totalorder %s1494_s4, 8 }
  0x52   : > { %v455_v20 = vpack.c.b16 %v453_v16, %v453_v16  ;;  %v456_v21 = vpack.c.b16 %v454_v17, %v454_v17 }
  0x54   : > { %557 = vmatpush.bf16.msra.mxu0 %v860_v5 }
  0x55   : > { %570 = vmatpush.bf16.msra.mxu1 %v868_v6 }
  0x58   : > { %558 = vmatpush.bf16.msra.mxu0 %v859_v7 }
  0x59   : > { %571 = vmatpush.bf16.msra.mxu1 %v867_v8 }
  0x5c   : > { %559 = vmatpush.bf16.msra.mxu0 %v858_v9 }
  0x5d   : > { %572 = vmatpush.bf16.msra.mxu1 %v866_v10 }
  0x60   : > { %560 = vmatpush.bf16.msra.mxu0 %v857_v11 }
  0x61   : > { %573 = vmatpush.bf16.msra.mxu1 %v865_v12 }
  0x64   : > { %561 = vmatpush.bf16.msra.mxu0 %v856_v13 }
  0x65   : > { %574 = vmatpush.bf16.msra.mxu1 %v864_v14 }
  0x68   : > { %562 = vmatpush.bf16.msra.mxu0 %v855_v18 }
  0x69   : > { %575 = vmatpush.bf16.msra.mxu1 %v863_v19 }
  0x6b   : > { %563 = vmatmul.bf16.vlgmr.msra.gmra.mxu0 %v455_v20 }
  0x6c   : > { %576 = vmatmul.bf16.vlgmr.msra.gmra.mxu1 %v456_v21 }
  0xe8   : > { %v564_v22 = vpop.f32.mrf.mxu0 }
  0xe9   : > { %v577_v24 = vpop.f32.mrf.mxu1 }
  0xea   : > { %v578_v25 = vadd.f32 %v577_v24, %v564_v22 }
  0xec   : > { %v581_v26 = vadd.f32 %v578_v25, %v418_v23 }
  0xed   : > { %586 = sbr.rel (%p851_p9) target bundleno = 257 (0x101), region = 60 }
  0xee   : > { %582 = vst [vmem:[#allocation2] sm:$0xff] %v581_v26 }
  0xf0   : > { %v566_v27 = vpop.f32.mrf.mxu0 }
  0xf1   : > { %v579_v28 = vpop.f32.mrf.mxu1 }
  0xf2   : > { %v980_v30 = vld [vmem:[%s1370_s25] ss:$0 sm:$0xff] }
  0xf3   : > { %v981_v31 = vld [vmem:[%s1394_s0] ss:$0 sm:$0xff] }
  0xf4   : > { %v598_v32 = vld [vmem:[%s1387_s8] sm:$0xf] }
  0xf5   : > { %v587_v29 = vld [vmem:[#allocation2] sm:$0xff]  ;;  %v599_v34 = vunpack.c.l.bf16 %v598_v32 }
  0xf6   : > { %v592_v33 = vmul.f32 %v980_v30, %v587_v29 }
  0xf8   : > { %v597_v35 = vadd.f32 %v981_v31, %v592_v33 }
  0xfa   : > { %v600_v36 = vadd.f32 %v599_v34, %v597_v35 }
  0xfc   : > { %v601_v37 = vmax.f32 %v600_v36, 0.0 }
  0xfe   : > { %v602_v38 = vpack.c.bf16 %v601_v37, %v601_v37 }
 0x100   : > { %603 = vst [vmem:[%s1392_s17] sm:$0xf] %v602_v38 }
 0x101 PF: > { %s21_s28 = sadd.s32 1, %s1166_s28   ;;  %s1495_s2 = sld [smem:[#allocation16_spill]] }
 0x102   : > { %p18_p10 = scmp.ge.s32.totalorder %s21_s28, 20   ;;  %s1496_s5 = sld [smem:[#allocation10_spill]] }
 0x103   : > { %s1497_s23 = sld [smem:[#allocation17_spill]]  ;;  %s1501_s18 = smov %s1130_s19 }
 0x104   : > { %s1498_s24 = sld [smem:[#allocation13_spill]]  ;;  %s1502_s19 = smov %s1134_s20 }
 0x105   : > { %s1499_s26 = sld [smem:[#allocation14_spill]]  ;;  %s1504_s21 = smov %s1142_s22 }
 0x106   : > { %s1500_s30 = sld [smem:[#allocation15_spill]]  ;;  %s1506_s25 = smov %s1162_s27 }
 0x107   : > { %s1503_s20 = smov %s1495_s2 }
 0x108   : > { %s1505_s22 = smov %s1496_s5  ;;  %20 = sbr.rel (!%p18_p10) target bundleno = 14 (0xe), region = 118 }
 0x10c   : > { %s1507_s27 = smov %s1500_s30 }
 0x10d   :  { %631 = vsyncpa [#allocation4], 1 }
 0x10e   :  { %633 = vsyncpa [#allocation4 + $0x1], 1 }
 0x10f   :  { %634 = vsyncpa [#allocation6], 1 }
 0x110   :  { %636 = vsyncpa [#allocation6 + $0x1], 1 }

// kernel: resnet18_forward.37
= control target key start
LH: loop header
LB: loop body
LE: loop exit
PB: predicated region body
PF: predicated region fallthrough
CT: control target
= control target key end

     0   :  { %s1194_s0 = inlined_call_operand.vmem [shape: bf16[8,2304], index: 0, kind: input, shape index: {}]   ;;  %s1195_s1 = inlined_call_operand.hbm [shape: bf16[2304,256], index: 1, kind: input, shape index: {}]   ;;  %s1196_s2 = inlined_call_operand.vmem [shape: f32[1,256], index: 2, kind: input, shape index: {}]   ;;  %s1197_s3 = inlined_call_operand.vmem [shape: f32[1,256], index: 3, kind: input, shape index: {}]   ;;  %s1198_s4 = inlined_call_operand.vmem [shape: bf16[8,256], index: 4, kind: input, shape index: {}]   ;;  %s1199_s5 = inlined_call_operand.vmem [shape: bf16[8,256], index: 5, kind: output, shape index: {}]  }
   0x1   :  { %1202 = sst [smem:[#allocation8_spill]] %s1195_s1 }
   0x2   :  { %10 = vsyncpa [#allocation4], 0 }
   0x3   :  { %12 = vsyncpa [#allocation4 + $0x1], 0  ;;  %s1024_s18 = smov 0   ;;  %s1026_s19 = smov 0  }
   0x4   :  { %s1028_s20 = smov 0   ;;  %s1030_s21 = smov 0  }
   0x5   :  { %s1032_s22 = smov 0   ;;  %s1034_s23 = smov 0  }
   0x6   :  { %s1036_s24 = smov 0   ;;  %s1038_s25 = smov 0  }
   0x7 LB: > { %s716_s26 = sadd.s32 4294967295, %s988_s25   ;;  %s30_s27 = sadd.s32 1, %s980_s23  ;;  %s988_s25 = sphi %s1038_s25, %s18_s25   ;;  %s984_s24 = sphi %s1036_s24, %s1216_s24   ;;  %s980_s23 = sphi %s1034_s23, %s1215_s23   ;;  %s976_s22 = sphi %s1032_s22, %s1214_s22   ;;  %s972_s21 = sphi %s1030_s21, %s1213_s21   ;;  %s968_s20 = sphi %s1028_s20, %s1212_s20   ;;  %s964_s19 = sphi %s1026_s19, %s1211_s19   ;;  %s960_s18 = sphi %s1024_s18, %s1210_s18  }
   0x8   : > { %p31_p0 = scmp.ge.s32.totalorder %s30_s27, 9  ;;  %s33_s28 = sadd.s32 1, %s984_s24 }
   0x9   : > { %s74_s29 = sadd.s32 1, %s968_s20  ;;  %p81_p1 = scmp.ne.s32.totalorder %s968_s20, %s964_s19 }
   0xa   : > { %s1218_s27 = smov (%p31_p0, %s30_s27), 0  ;;  %s1220_s28 = smov (!%p31_p0, %s33_s28), %s984_s24 }
   0xb   : > { %1203 = sst [smem:[#allocation6_spill]] %s1218_s27  ;;  %s69_s30 = ssub.s32 %s980_s23, %s1218_s27 }
   0xc   : > { %p82_p2 = scmp.eq.s32.totalorder %s988_s25, 0  ;;  %p35_p3 = scmp.ge.s32.totalorder %s1220_s28, 2 }
   0xd   : > { %p87_p4 = scmp.ne.s32.totalorder %s964_s19, %s960_s18  ;;  %p88_p6 = scmp.eq.s32.totalorder %s716_s26, 0 }
   0xe   : > { %p1075_p5 = por %p82_p2, %p81_p1  ;;  %s1222_s28 = smov (%p35_p3, %s1220_s28), 0 }
   0xf   : > { %1205 = sst [smem:[#allocation7_spill]] %s1222_s28  ;;  %p1081_p7 = por %p88_p6, %p87_p4 }
  0x10   : > { %s70_s8 = ssub.s32 %s984_s24, %s1222_s28  ;;  %p821_p8 = scmp.lt.s32.totalorder %s988_s25, 18 }
  0x11   : > { %s71_s9 = sor.u32 %s70_s8, %s69_s30  ;;  %s232_s10 = sand.u32 1, %s968_s20  }
  0x12   : > { %p72_p9 = scmp.eq.s32.totalorder %s71_s9, 0  ;;  %s720_s11 = sshll.u32 %s232_s10, 7 }
  0x13   : > { %s798_s12 = sshll.u32 %s980_s23, 6  ;;  %s236_s16 = scalar_lea.vmem [#allocation3], %s720_s11 }
  0x14   : > { %s1091_s13 = scalar_select %p72_p9, %s968_s20, %s74_s29  }
  0x15   : > { %s241_s14 = sadd.s32 %s984_s24, %s798_s12  ;;  %s246_s17 = sshll.u32 %s236_s16, 4  ;;  %s247_s17 = int_to_ptr.vmem [resolvable:$true] %s246_s17 }
  0x16   : > { %s723_s15 = sshll.u32 %s241_s14, 2  ;;  %s1207_s1 = sld [smem:[#allocation8_spill]] }
  0x17   : > { %p818_p10 = pnand %p821_p8, %p1075_p5  ;;  %p724_p11 = scmp.ge.s32.totalorder %s988_s25, 1 }
  0x18   : > { %s233_s30 = scalar_lea.sflag [#allocation4], %s232_s10  ;;  %s990_s8 = smov 128  }
  0x19   : > { %s991_s29 = smov 64   ;;  %s992_s9 = smov 4  }
  0x1a   : > { %p277_p12 = scmp.lt.s32.totalorder %s988_s25, 19 }
  0x1c   : > { %s243_s27 = scalar_lea.hbm %s1207_s1, %s723_s15  ;;  %p278_p13 = pnand %p724_p11, %p277_p12 }
  0x1d   : > { %s244_s28 = sshll.u32 %s243_s27, 4  ;;  %s283_s11 = sand.u32 (!%p278_p13), 1, %s964_s19   ;;  %s245_s28 = int_to_ptr.hbm [resolvable:$true] %s244_s28 }
  0x1e   : > { %820 = dma.hbm_to_vmem [thread:$0]  (!%p818_p10), %s245_s28, 2048, %s247_s17, %s233_s30, %s990_s8, %s991_s29, %s992_s9  }
  0x1f   : > { %281 = sbr.rel (%p278_p13) target bundleno = 233 (0xe9), region = 40  ;;  %s725_s12 = sshll.u32 (!%p278_p13), %s283_s11, 7 }
  0x20   : > { %s284_s14 = scalar_lea.sflag (!%p278_p13), [#allocation4], %s283_s11  ;;  %s1104_s15 = scalar_lea.vmem (!%p278_p13), [#allocation3], %s725_s12 }
  0x24   : > { %955 = dma.done.wait (%p1081_p7), %s284_s14, 2048  }
  0x25   : > { %957 = vsyncadd (%p1081_p7), %s284_s14, 4294965248  ;;  %s726_s27 = sshll.u32 %s972_s21, 1  ;;  %p352_p0 = scmp.lt.s32.totalorder %s976_s22, 1 }
  0x26   : > { %p344_p1 = scmp.lt.s32.totalorder %s726_s27, 17  ;;  %p730_p2 = scmp.ne.s32.totalorder %s972_s21, 0 }
  0x27   : > { %s1224_s22 = smov (!%p352_p0, %s976_s22), 1 }
  0x28   : > { %s1226_s27 = smov (!%p344_p1, %s726_s27), 17  ;;  %s354_s10 = scalar_lea.vmem %s1196_s2, %s1224_s22 }
  0x29   : > { %s357_s7 = scalar_lea.vmem %s1197_s3, %s1224_s22  ;;  %s727_s18 = sshll.u32 %s1226_s27, 2 }
  0x2a   : > { %s728_s26 = sshll.u32 %s1224_s22, 2  ;;  %s1127_s29 = scalar_lea.vmem %s1194_s0, %s727_s18 }
  0x2b   : > { %s1132_s12 = scalar_lea.vmem %s1198_s4, %s728_s26  ;;  %s1137_s28 = scalar_lea.vmem %s1199_s5, %s728_s26 }
  0x2c   : > { %377 = sbr.rel (%p730_p2) target bundleno = 51 (0x33), region = 48 }
  0x31   : > { %v993_v0 = vmov 0.0  }
  0x32   : > { %378 = vst [vmem:[#allocation2] sm:$0xff] %v993_v0 }
  0x33 PF: > { %v806_v1 = vld [vmem:[%s1104_s15 + $0x38] sm:$0xff]  ;;  %v805_v3 = vld [vmem:[%s1104_s15 + $0x30] sm:$0xff]  ;;  %v804_v5 = vld [vmem:[%s1104_s15 + $0x28] sm:$0xff]  ;;  %p795_p3 = scmp.ne.s32.totalorder %s972_s21, 8 }
  0x34   : > { %v814_v2 = vld [vmem:[%s1104_s15 + $0x78] sm:$0xff]  ;;  %516 = vmatpush.bf16.msra.mxu0 %v806_v1  ;;  %v813_v4 = vld [vmem:[%s1104_s15 + $0x70] sm:$0xff]  ;;  %v812_v6 = vld [vmem:[%s1104_s15 + $0x68] sm:$0xff] }
  0x35   : > { %529 = vmatpush.bf16.msra.mxu1 %v814_v2  ;;  %v803_v7 = vld [vmem:[%s1104_s15 + $0x20] sm:$0xff]  ;;  %v802_v9 = vld [vmem:[%s1104_s15 + $0x18] sm:$0xff]  ;;  %v801_v11 = vld [vmem:[%s1104_s15 + $0x10] sm:$0xff] }
  0x36   : > { %v811_v8 = vld [vmem:[%s1104_s15 + $0x60] sm:$0xff]  ;;  %v810_v10 = vld [vmem:[%s1104_s15 + $0x58] sm:$0xff]  ;;  %v809_v12 = vld [vmem:[%s1104_s15 + $0x50] sm:$0xff] }
  0x37   : > { %v800_v13 = vld [vmem:[%s1104_s15 + $0x8] sm:$0xff]  ;;  %v380_v15 = vld [vmem:[%s1127_s29] sm:$0xff]  ;;  %v799_v18 = vld [vmem:[%s1104_s15] sm:$0xff] }
  0x38   : > { %517 = vmatpush.bf16.msra.mxu0 %v805_v3  ;;  %v808_v14 = vld [vmem:[%s1104_s15 + $0x48] sm:$0xff]  ;;  %v414_v16 = vunpack.c.l.b16 %v380_v15  ;;  %v415_v17 = vunpack.c.h.b16 %v380_v15  ;;  %v807_v19 = vld [vmem:[%s1104_s15 + $0x40] sm:$0xff] }
  0x39   : > { %530 = vmatpush.bf16.msra.mxu1 %v813_v4  ;;  %v379_v23 = vld [vmem:[#allocation2] sm:$0xff] }
  0x3a   : > { %v416_v20 = vpack.c.b16 %v414_v16, %v414_v16  ;;  %v417_v21 = vpack.c.b16 %v415_v17, %v415_v17 }
  0x3c   : > { %518 = vmatpush.bf16.msra.mxu0 %v804_v5 }
  0x3d   : > { %531 = vmatpush.bf16.msra.mxu1 %v812_v6 }
  0x40   : > { %519 = vmatpush.bf16.msra.mxu0 %v803_v7 }
  0x41   : > { %532 = vmatpush.bf16.msra.mxu1 %v811_v8 }
  0x44   : > { %520 = vmatpush.bf16.msra.mxu0 %v802_v9 }
  0x45   : > { %533 = vmatpush.bf16.msra.mxu1 %v810_v10 }
  0x48   : > { %521 = vmatpush.bf16.msra.mxu0 %v801_v11 }
  0x49   : > { %534 = vmatpush.bf16.msra.mxu1 %v809_v12 }
  0x4c   : > { %522 = vmatpush.bf16.msra.mxu0 %v800_v13 }
  0x4d   : > { %535 = vmatpush.bf16.msra.mxu1 %v808_v14 }
  0x50   : > { %523 = vmatpush.bf16.msra.mxu0 %v799_v18 }
  0x51   : > { %536 = vmatpush.bf16.msra.mxu1 %v807_v19 }
  0x53   : > { %524 = vmatmul.bf16.vlgmr.msra.gmra.mxu0 %v416_v20 }
  0x54   : > { %537 = vmatmul.bf16.vlgmr.msra.gmra.mxu1 %v417_v21 }
  0xd0   : > { %v525_v22 = vpop.f32.mrf.mxu0 }
  0xd1   : > { %v538_v24 = vpop.f32.mrf.mxu1 }
  0xd2   : > { %v539_v25 = vadd.f32 %v538_v24, %v525_v22 }
  0xd4   : > { %v542_v26 = vadd.f32 %v539_v25, %v379_v23 }
  0xd5   : > { %547 = sbr.rel (%p795_p3) target bundleno = 233 (0xe9), region = 52 }
  0xd6   : > { %543 = vst [vmem:[#allocation2] sm:$0xff] %v542_v26 }
  0xd8   : > { %v527_v27 = vpop.f32.mrf.mxu0 }
  0xd9   : > { %v540_v28 = vpop.f32.mrf.mxu1 }
  0xda   : > { %v890_v30 = vld [vmem:[%s354_s10] ss:$0 sm:$0xff] }
  0xdb   : > { %v891_v31 = vld [vmem:[%s357_s7] ss:$0 sm:$0xff] }
  0xdc   : > { %v559_v32 = vld [vmem:[%s1132_s12] sm:$0xf] }
  0xdd   : > { %v548_v29 = vld [vmem:[#allocation2] sm:$0xff]  ;;  %v560_v34 = vunpack.c.l.bf16 %v559_v32 }
  0xde   : > { %v553_v33 = vmul.f32 %v890_v30, %v548_v29 }
  0xe0   : > { %v558_v35 = vadd.f32 %v891_v31, %v553_v33 }
  0xe2   : > { %v561_v36 = vadd.f32 %v560_v34, %v558_v35 }
  0xe4   : > { %v562_v37 = vmax.f32 %v561_v36, 0.0 }
  0xe6   : > { %v563_v38 = vpack.c.bf16 %v562_v37, %v562_v37 }
  0xe8   : > { %564 = vst [vmem:[%s1137_s28] sm:$0xf] %v563_v38 }
  0xe9 PF: > { %s18_s25 = sadd.s32 1, %s988_s25   ;;  %s1208_s10 = sld [smem:[#allocation6_spill]] }
  0xea   : > { %p15_p4 = scmp.ge.s32.totalorder %s18_s25, 20   ;;  %s1209_s16 = sld [smem:[#allocation7_spill]] }
  0xeb   : > { %s1210_s18 = smov %s964_s19  ;;  %s1211_s19 = smov %s968_s20 }
  0xec   : > { %s1212_s20 = smov %s1091_s13  ;;  %s1213_s21 = smov %s980_s23 }
  0xed   : > { %s1214_s22 = smov %s984_s24  ;;  %17 = sbr.rel (!%p15_p4) target bundleno = 7 (0x7), region = 100 }
  0xef   : > { %s1215_s23 = smov %s1208_s10 }
  0xf0   : > { %s1216_s24 = smov %s1209_s16 }
  0xf2   :  { %592 = vsyncpa [#allocation4], 1 }
  0xf3   :  { %594 = vsyncpa [#allocation4 + $0x1], 1 }

// kernel: resnet18_forward.36
= control target key start
LH: loop header
LB: loop body
LE: loop exit
PB: predicated region body
PF: predicated region fallthrough
CT: control target
= control target key end

     0   :  { %9 = vsyncpa [#allocation4], 0  ;;  %s1103_s0 = inlined_call_operand.vmem [shape: bf16[8,2304], index: 0, kind: input, shape index: {}]   ;;  %s1104_s1 = inlined_call_operand.hbm [shape: bf16[2304,256], index: 1, kind: input, shape index: {}]   ;;  %s1105_s2 = inlined_call_operand.vmem [shape: f32[1,256], index: 2, kind: input, shape index: {}]   ;;  %s1106_s3 = inlined_call_operand.vmem [shape: f32[1,256], index: 3, kind: input, shape index: {}]   ;;  %s1107_s4 = inlined_call_operand.vmem [shape: bf16[8,256], index: 4, kind: output, shape index: {}]  }
   0x1   :  { %11 = vsyncpa [#allocation4 + $0x1], 0  ;;  %s939_s15 = smov 0   ;;  %s941_s16 = smov 0  }
   0x2   :  { %s943_s17 = smov 0   ;;  %s945_s18 = smov 0  }
   0x3   :  { %s947_s19 = smov 0   ;;  %s949_s20 = smov 0  }
   0x4   :  { %s951_s21 = smov 0   ;;  %s953_s22 = smov 0  }
   0x5 LB: > { %s637_s23 = sadd.s32 4294967295, %s908_s22   ;;  %s29_s24 = sadd.s32 1, %s900_s20  ;;  %s908_s22 = sphi %s953_s22, %s17_s22   ;;  %s904_s21 = sphi %s951_s21, %s1119_s21   ;;  %s900_s20 = sphi %s949_s20, %s1118_s20   ;;  %s896_s19 = sphi %s947_s19, %s1117_s19   ;;  %s892_s18 = sphi %s945_s18, %s1116_s18   ;;  %s888_s17 = sphi %s943_s17, %s1115_s17   ;;  %s884_s16 = sphi %s941_s16, %s1114_s16   ;;  %s880_s15 = sphi %s939_s15, %s1113_s15  }
   0x6   : > { %p30_p0 = scmp.ge.s32.totalorder %s29_s24, 9  ;;  %s32_s25 = sadd.s32 1, %s904_s21 }
   0x7   : > { %s73_s26 = sadd.s32 1, %s888_s17  ;;  %p80_p1 = scmp.ne.s32.totalorder %s888_s17, %s884_s16 }
   0x8   : > { %s1121_s24 = smov (%p30_p0, %s29_s24), 0  ;;  %s1123_s25 = smov (!%p30_p0, %s32_s25), %s904_s21 }
   0x9   : > { %s68_s27 = ssub.s32 %s900_s20, %s1121_s24  ;;  %p81_p2 = scmp.eq.s32.totalorder %s908_s22, 0 }
   0xa   : > { %p34_p3 = scmp.ge.s32.totalorder %s1123_s25, 2  ;;  %p86_p4 = scmp.ne.s32.totalorder %s884_s16, %s880_s15 }
   0xb   : > { %p990_p5 = por %p81_p2, %p80_p1  ;;  %p87_p6 = scmp.eq.s32.totalorder %s637_s23, 0 }
   0xc   : > { %s1125_s25 = smov (%p34_p3, %s1123_s25), 0  ;;  %p741_p8 = scmp.lt.s32.totalorder %s908_s22, 18 }
   0xd   : > { %1110 = sst [smem:[#allocation6_spill]] %s1125_s25  ;;  %p996_p7 = por %p87_p6, %p86_p4 }
   0xe   : > { %s69_s30 = ssub.s32 %s904_s21, %s1125_s25  ;;  %s203_s6 = sand.u32 1, %s888_s17  }
   0xf   : > { %s70_s5 = sor.u32 %s69_s30, %s68_s27  ;;  %s641_s7 = sshll.u32 %s203_s6, 7 }
  0x10   : > { %p71_p9 = scmp.eq.s32.totalorder %s70_s5, 0  ;;  %s718_s8 = sshll.u32 %s900_s20, 6 }
  0x11   : > { %s212_s10 = sadd.s32 %s904_s21, %s718_s8  ;;  %s207_s12 = scalar_lea.vmem [#allocation3], %s641_s7 }
  0x12   : > { %s1006_s9 = scalar_select %p71_p9, %s888_s17, %s73_s26  }
  0x13   : > { %s644_s11 = sshll.u32 %s212_s10, 2  ;;  %s217_s13 = sshll.u32 %s207_s12, 4  ;;  %s218_s13 = int_to_ptr.vmem [resolvable:$true] %s217_s13 }
  0x14   : > { %s214_s23 = scalar_lea.hbm %s1104_s1, %s644_s11  ;;  %p738_p10 = pnand %p741_p8, %p990_p5 }
  0x15   : > { %s215_s25 = sshll.u32 %s214_s23, 4  ;;  %p645_p11 = scmp.ge.s32.totalorder %s908_s22, 1  ;;  %s216_s25 = int_to_ptr.hbm [resolvable:$true] %s215_s25 }
  0x16   : > { %s204_s27 = scalar_lea.sflag [#allocation4], %s203_s6  ;;  %s910_s30 = smov 128  }
  0x17   : > { %s911_s26 = smov 64   ;;  %s912_s5 = smov 4  }
  0x18   : > { %740 = dma.hbm_to_vmem [thread:$0]  (!%p738_p10), %s216_s25, 2048, %s218_s13, %s204_s27, %s910_s30, %s911_s26, %s912_s5  }
  0x19   : > { %p237_p12 = scmp.lt.s32.totalorder %s908_s22, 19 }
  0x1b   : > { %p238_p13 = pnand %p645_p11, %p237_p12 }
  0x1c   : > { %s243_s7 = sand.u32 (!%p238_p13), 1, %s884_s16  }
  0x1d   : > { %241 = sbr.rel (%p238_p13) target bundleno = 228 (0xe4), region = 36  ;;  %s646_s8 = sshll.u32 (!%p238_p13), %s243_s7, 7 }
  0x1e   : > { %s244_s10 = scalar_lea.sflag (!%p238_p13), [#allocation4], %s243_s7  ;;  %s1019_s11 = scalar_lea.vmem (!%p238_p13), [#allocation3], %s646_s8 }
  0x22   : > { %875 = dma.done.wait (%p996_p7), %s244_s10, 2048  }
  0x23   : > { %877 = vsyncadd (%p996_p7), %s244_s10, 4294965248  ;;  %s647_s28 = sshll.u32 %s892_s18, 1  ;;  %p302_p0 = scmp.lt.s32.totalorder %s896_s19, 1 }
  0x24   : > { %p294_p1 = scmp.lt.s32.totalorder %s647_s28, 17  ;;  %p650_p2 = scmp.ne.s32.totalorder %s892_s18, 0 }
  0x25   : > { %s1127_s19 = smov (!%p302_p0, %s896_s19), 1 }
  0x26   : > { %s1129_s28 = smov (!%p294_p1, %s647_s28), 17  ;;  %s304_s12 = scalar_lea.vmem %s1105_s2, %s1127_s19 }
  0x27   : > { %s307_s29 = scalar_lea.vmem %s1106_s3, %s1127_s19  ;;  %s648_s15 = sshll.u32 %s1129_s28, 2 }
  0x28   : > { %s649_s23 = sshll.u32 %s1127_s19, 2  ;;  %s1042_s26 = scalar_lea.vmem %s1103_s0, %s648_s15 }
  0x29   : > { %s1047_s8 = scalar_lea.vmem %s1107_s4, %s649_s23  ;;  %319 = sbr.rel (%p650_p2) target bundleno = 48 (0x30), region = 44 }
  0x2e   : > { %v913_v0 = vmov 0.0  }
  0x2f   : > { %320 = vst [vmem:[#allocation2] sm:$0xff] %v913_v0 }
  0x30 PF: > { %v726_v1 = vld [vmem:[%s1019_s11 + $0x38] sm:$0xff]  ;;  %v725_v3 = vld [vmem:[%s1019_s11 + $0x30] sm:$0xff]  ;;  %v724_v5 = vld [vmem:[%s1019_s11 + $0x28] sm:$0xff]  ;;  %p715_p3 = scmp.ne.s32.totalorder %s892_s18, 8 }
  0x31   : > { %v734_v2 = vld [vmem:[%s1019_s11 + $0x78] sm:$0xff]  ;;  %458 = vmatpush.bf16.msra.mxu0 %v726_v1  ;;  %v733_v4 = vld [vmem:[%s1019_s11 + $0x70] sm:$0xff]  ;;  %v732_v6 = vld [vmem:[%s1019_s11 + $0x68] sm:$0xff] }
  0x32   : > { %471 = vmatpush.bf16.msra.mxu1 %v734_v2  ;;  %v723_v7 = vld [vmem:[%s1019_s11 + $0x20] sm:$0xff]  ;;  %v722_v9 = vld [vmem:[%s1019_s11 + $0x18] sm:$0xff]  ;;  %v721_v11 = vld [vmem:[%s1019_s11 + $0x10] sm:$0xff] }
  0x33   : > { %v731_v8 = vld [vmem:[%s1019_s11 + $0x60] sm:$0xff]  ;;  %v730_v10 = vld [vmem:[%s1019_s11 + $0x58] sm:$0xff]  ;;  %v729_v12 = vld [vmem:[%s1019_s11 + $0x50] sm:$0xff] }
  0x34   : > { %v720_v13 = vld [vmem:[%s1019_s11 + $0x8] sm:$0xff]  ;;  %v322_v15 = vld [vmem:[%s1042_s26] sm:$0xff]  ;;  %v719_v18 = vld [vmem:[%s1019_s11] sm:$0xff] }
  0x35   : > { %459 = vmatpush.bf16.msra.mxu0 %v725_v3  ;;  %v728_v14 = vld [vmem:[%s1019_s11 + $0x48] sm:$0xff]  ;;  %v356_v16 = vunpack.c.l.b16 %v322_v15  ;;  %v357_v17 = vunpack.c.h.b16 %v322_v15  ;;  %v727_v19 = vld [vmem:[%s1019_s11 + $0x40] sm:$0xff] }
  0x36   : > { %472 = vmatpush.bf16.msra.mxu1 %v733_v4  ;;  %v321_v23 = vld [vmem:[#allocation2] sm:$0xff] }
  0x37   : > { %v358_v20 = vpack.c.b16 %v356_v16, %v356_v16  ;;  %v359_v21 = vpack.c.b16 %v357_v17, %v357_v17 }
  0x39   : > { %460 = vmatpush.bf16.msra.mxu0 %v724_v5 }
  0x3a   : > { %473 = vmatpush.bf16.msra.mxu1 %v732_v6 }
  0x3d   : > { %461 = vmatpush.bf16.msra.mxu0 %v723_v7 }
  0x3e   : > { %474 = vmatpush.bf16.msra.mxu1 %v731_v8 }
  0x41   : > { %462 = vmatpush.bf16.msra.mxu0 %v722_v9 }
  0x42   : > { %475 = vmatpush.bf16.msra.mxu1 %v730_v10 }
  0x45   : > { %463 = vmatpush.bf16.msra.mxu0 %v721_v11 }
  0x46   : > { %476 = vmatpush.bf16.msra.mxu1 %v729_v12 }
  0x49   : > { %464 = vmatpush.bf16.msra.mxu0 %v720_v13 }
  0x4a   : > { %477 = vmatpush.bf16.msra.mxu1 %v728_v14 }
  0x4d   : > { %465 = vmatpush.bf16.msra.mxu0 %v719_v18 }
  0x4e   : > { %478 = vmatpush.bf16.msra.mxu1 %v727_v19 }
  0x50   : > { %466 = vmatmul.bf16.vlgmr.msra.gmra.mxu0 %v358_v20 }
  0x51   : > { %479 = vmatmul.bf16.vlgmr.msra.gmra.mxu1 %v359_v21 }
  0xcd   : > { %v467_v22 = vpop.f32.mrf.mxu0 }
  0xce   : > { %v480_v24 = vpop.f32.mrf.mxu1 }
  0xcf   : > { %v481_v25 = vadd.f32 %v480_v24, %v467_v22 }
  0xd1   : > { %v484_v26 = vadd.f32 %v481_v25, %v321_v23 }
  0xd2   : > { %489 = sbr.rel (%p715_p3) target bundleno = 228 (0xe4), region = 48 }
  0xd3   : > { %485 = vst [vmem:[#allocation2] sm:$0xff] %v484_v26 }
  0xd5   : > { %v469_v27 = vpop.f32.mrf.mxu0 }
  0xd6   : > { %v482_v28 = vpop.f32.mrf.mxu1 }
  0xd7   : > { %v810_v30 = vld [vmem:[%s304_s12] ss:$0 sm:$0xff] }
  0xd8   : > { %v811_v31 = vld [vmem:[%s307_s29] ss:$0 sm:$0xff] }
  0xda   : > { %v490_v29 = vld [vmem:[#allocation2] sm:$0xff] }
  0xdb   : > { %v495_v32 = vmul.f32 %v810_v30, %v490_v29 }
  0xdd   : > { %v500_v33 = vadd.f32 %v811_v31, %v495_v32 }
  0xdf   : > { %v501_v34 = vmax.f32 %v500_v33, 0.0 }
  0xe1   : > { %v502_v35 = vpack.c.bf16 %v501_v34, %v501_v34 }
  0xe3   : > { %503 = vst [vmem:[%s1047_s8] sm:$0xf] %v502_v35 }
  0xe4 PF: > { %s17_s22 = sadd.s32 1, %s908_s22   ;;  %s1112_s6 = sld [smem:[#allocation6_spill]] }
  0xe5   : > { %p14_p4 = scmp.ge.s32.totalorder %s17_s22, 20   ;;  %s1113_s15 = smov %s884_s16 }
  0xe6   : > { %s1114_s16 = smov %s888_s17  ;;  %s1115_s17 = smov %s1006_s9 }
  0xe7   : > { %s1116_s18 = smov %s900_s20  ;;  %s1117_s19 = smov %s904_s21 }
  0xe8   : > { %s1118_s20 = smov %s1121_s24  ;;  %16 = sbr.rel (!%p14_p4) target bundleno = 5 (0x5), region = 93 }
  0xea   : > { %s1119_s21 = smov %s1112_s6 }
  0xed   :  { %531 = vsyncpa [#allocation4], 1 }
  0xee   :  { %533 = vsyncpa [#allocation4 + $0x1], 1 }

// kernel: resnet18_forward.39
= control target key start
LH: loop header
LB: loop body
LE: loop exit
PB: predicated region body
PF: predicated region fallthrough
CT: control target
= control target key end

     0   :  { %s1212_s15 = smov 0   ;;  %s1214_s16 = smov 0   ;;  %s1467_s0 = inlined_call_operand.vmem [shape: bf16[8,2304], index: 0, kind: input, shape index: {}]   ;;  %s1468_s1 = inlined_call_operand.vmem [shape: bf16[2304,512], index: 1, kind: input, shape index: {}]   ;;  %s1469_s2 = inlined_call_operand.vmem [shape: f32[1,512], index: 2, kind: input, shape index: {}]   ;;  %s1470_s3 = inlined_call_operand.vmem [shape: f32[1,512], index: 3, kind: input, shape index: {}]   ;;  %s1471_s4 = inlined_call_operand.vmem [shape: bf16[8,512], index: 4, kind: output, shape index: {}]  }
   0x1   :  { %s1216_s17 = smov 0   ;;  %s1218_s18 = smov 0  }
   0x2   :  { %s1220_s19 = smov 0   ;;  %s1222_s20 = smov 0  }
   0x3   :  { %s1224_s21 = smov 0  }
   0x4 LB: > { %s26_s22 = sadd.s32 1, %s1176_s19  ;;  %s29_s23 = sadd.s32 1, %s1180_s20  ;;  %s1184_s21 = sphi %s1224_s21, %s14_s21   ;;  %s1180_s20 = sphi %s1222_s20, %s1477_s20   ;;  %s1176_s19 = sphi %s1220_s19, %s1476_s19   ;;  %s1172_s18 = sphi %s1218_s18, %s1475_s18   ;;  %s1168_s17 = sphi %s1216_s17, %s1474_s17   ;;  %s1164_s16 = sphi %s1214_s16, %s1473_s16   ;;  %s1160_s15 = sphi %s1212_s15, %s1472_s15  }
   0x5   : > { %p27_p0 = scmp.ge.s32.totalorder %s26_s22, 9  ;;  %p77_p1 = scmp.ne.s32.totalorder %s1164_s16, %s1160_s15 }
   0x6   : > { %p78_p2 = scmp.eq.s32.totalorder %s1184_s21, 0  ;;  %s70_s27 = sadd.s32 1, %s1164_s16 }
   0x7   : > { %s1479_s22 = smov (%p27_p0, %s26_s22), 0  ;;  %s1481_s23 = smov (!%p27_p0, %s29_s23), %s1180_s20 }
   0x8   : > { %p79_p3 = por %p78_p2, %p77_p1  ;;  %p31_p4 = scmp.ge.s32.totalorder %s1481_s23, 2 }
   0x9   : > { %s65_s24 = ssub.s32 %s1176_s19, %s1479_s22  ;;  %p894_p6 = scmp.ge.s32.totalorder %s1184_s21, 18 }
   0xa   : > { %s1483_s23 = smov (%p31_p4, %s1481_s23), 0 }
   0xb   : > { %s66_s25 = ssub.s32 %s1180_s20, %s1483_s23  ;;  %183 = sbr.rel (%p894_p6) target bundleno = 55 (0x37), region = 16 }
   0xc   : > { %s67_s26 = sor.u32 %s66_s25, %s65_s24 }
   0xd   : > { %p68_p5 = scmp.eq.s32.totalorder %s67_s26, 0 }
   0xf   : > { %s1263_s28 = scalar_select %p68_p5, %s1164_s16, %s70_s27  }
  0x10   : > { %199 = sbr.rel (!%p79_p3) target bundleno = 55 (0x37), region = 24  ;;  %s201_s29 = sand.u32 (%p79_p3), 1, %s1164_s16  }
  0x11   : > { %s897_s30 = sshll.u32 (%p79_p3), %s1180_s20, 1  ;;  %s895_s5 = sshll.u32 (%p79_p3), %s201_s29, 8 }
  0x12   : > { %s1040_s6 = sshll.u32 (%p79_p3), %s1176_s19, 7  ;;  %s1277_s12 = scalar_lea.vmem (%p79_p3), [#allocation3], %s895_s5 }
  0x13   : > { %s207_s7 = sadd.s32 (%p79_p3), %s1040_s6, %s897_s30 }
  0x14   : > { %s899_s8 = sshll.u32 (%p79_p3), %s207_s7, 2 }
  0x15   : > { %s1272_s11 = scalar_lea.vmem %s1468_s1, %s899_s8 }
  0x16   : > { %v300_v0 = vld [vmem:[%s1272_s11] sm:$0xff]  ;;  %v302_v1 = vld [vmem:[%s1272_s11 + $0x10] sm:$0xff] }
  0x17   : > { %v304_v2 = vld [vmem:[%s1272_s11 + $0x20] sm:$0xff]  ;;  %301 = vst [vmem:[%s1277_s12] sm:$0xff] %v300_v0  ;;  %v306_v3 = vld [vmem:[%s1272_s11 + $0x30] sm:$0xff] }
  0x18   : > { %303 = vst [vmem:[%s1277_s12 + $0x8] sm:$0xff] %v302_v1  ;;  %v308_v4 = vld [vmem:[%s1272_s11 + $0x40] sm:$0xff]  ;;  %v310_v5 = vld [vmem:[%s1272_s11 + $0x50] sm:$0xff] }
  0x19   : > { %305 = vst [vmem:[%s1277_s12 + $0x10] sm:$0xff] %v304_v2  ;;  %v312_v6 = vld [vmem:[%s1272_s11 + $0x60] sm:$0xff]  ;;  %v314_v7 = vld [vmem:[%s1272_s11 + $0x70] sm:$0xff] }
  0x1a   : > { %307 = vst [vmem:[%s1277_s12 + $0x18] sm:$0xff] %v306_v3  ;;  %v316_v8 = vld [vmem:[%s1272_s11 + $0x80] sm:$0xff]  ;;  %v318_v9 = vld [vmem:[%s1272_s11 + $0x90] sm:$0xff] }
  0x1b   : > { %309 = vst [vmem:[%s1277_s12 + $0x20] sm:$0xff] %v308_v4  ;;  %v320_v10 = vld [vmem:[%s1272_s11 + $0xa0] sm:$0xff]  ;;  %v322_v11 = vld [vmem:[%s1272_s11 + $0xb0] sm:$0xff] }
  0x1c   : > { %311 = vst [vmem:[%s1277_s12 + $0x28] sm:$0xff] %v310_v5  ;;  %v324_v12 = vld [vmem:[%s1272_s11 + $0xc0] sm:$0xff]  ;;  %v326_v13 = vld [vmem:[%s1272_s11 + $0xd0] sm:$0xff] }
  0x1d   : > { %313 = vst [vmem:[%s1277_s12 + $0x30] sm:$0xff] %v312_v6  ;;  %v328_v14 = vld [vmem:[%s1272_s11 + $0xe0] sm:$0xff]  ;;  %v330_v15 = vld [vmem:[%s1272_s11 + $0xf0] sm:$0xff] }
  0x1e   : > { %315 = vst [vmem:[%s1277_s12 + $0x38] sm:$0xff] %v314_v7  ;;  %v332_v16 = vld [vmem:[%s1272_s11 + $0x100] sm:$0xff]  ;;  %v334_v17 = vld [vmem:[%s1272_s11 + $0x110] sm:$0xff] }
  0x1f   : > { %317 = vst [vmem:[%s1277_s12 + $0x40] sm:$0xff] %v316_v8  ;;  %v336_v18 = vld [vmem:[%s1272_s11 + $0x120] sm:$0xff]  ;;  %v338_v19 = vld [vmem:[%s1272_s11 + $0x130] sm:$0xff] }
  0x20   : > { %319 = vst [vmem:[%s1277_s12 + $0x48] sm:$0xff] %v318_v9  ;;  %v340_v20 = vld [vmem:[%s1272_s11 + $0x140] sm:$0xff]  ;;  %v342_v21 = vld [vmem:[%s1272_s11 + $0x150] sm:$0xff] }
  0x21   : > { %321 = vst [vmem:[%s1277_s12 + $0x50] sm:$0xff] %v320_v10  ;;  %v344_v22 = vld [vmem:[%s1272_s11 + $0x160] sm:$0xff]  ;;  %v346_v23 = vld [vmem:[%s1272_s11 + $0x170] sm:$0xff] }
  0x22   : > { %323 = vst [vmem:[%s1277_s12 + $0x58] sm:$0xff] %v322_v11  ;;  %v348_v24 = vld [vmem:[%s1272_s11 + $0x180] sm:$0xff]  ;;  %v350_v25 = vld [vmem:[%s1272_s11 + $0x190] sm:$0xff] }
  0x23   : > { %325 = vst [vmem:[%s1277_s12 + $0x60] sm:$0xff] %v324_v12  ;;  %v352_v26 = vld [vmem:[%s1272_s11 + $0x1a0] sm:$0xff]  ;;  %v354_v27 = vld [vmem:[%s1272_s11 + $0x1b0] sm:$0xff] }
  0x24   : > { %327 = vst [vmem:[%s1277_s12 + $0x68] sm:$0xff] %v326_v13  ;;  %v356_v28 = vld [vmem:[%s1272_s11 + $0x1c0] sm:$0xff]  ;;  %v358_v29 = vld [vmem:[%s1272_s11 + $0x1d0] sm:$0xff] }
  0x25   : > { %329 = vst [vmem:[%s1277_s12 + $0x70] sm:$0xff] %v328_v14  ;;  %v360_v30 = vld [vmem:[%s1272_s11 + $0x1e0] sm:$0xff]  ;;  %v362_v31 = vld [vmem:[%s1272_s11 + $0x1f0] sm:$0xff] }
  0x26   : > { %331 = vst [vmem:[%s1277_s12 + $0x78] sm:$0xff] %v330_v15 }
  0x27   : > { %333 = vst [vmem:[%s1277_s12 + $0x80] sm:$0xff] %v332_v16 }
  0x28   : > { %335 = vst [vmem:[%s1277_s12 + $0x88] sm:$0xff] %v334_v17 }
  0x29   : > { %337 = vst [vmem:[%s1277_s12 + $0x90] sm:$0xff] %v336_v18 }
  0x2a   : > { %339 = vst [vmem:[%s1277_s12 + $0x98] sm:$0xff] %v338_v19 }
  0x2b   : > { %341 = vst [vmem:[%s1277_s12 + $0xa0] sm:$0xff] %v340_v20 }
  0x2c   : > { %343 = vst [vmem:[%s1277_s12 + $0xa8] sm:$0xff] %v342_v21 }
  0x2d   : > { %345 = vst [vmem:[%s1277_s12 + $0xb0] sm:$0xff] %v344_v22 }
  0x2e   : > { %347 = vst [vmem:[%s1277_s12 + $0xb8] sm:$0xff] %v346_v23 }
  0x2f   : > { %349 = vst [vmem:[%s1277_s12 + $0xc0] sm:$0xff] %v348_v24 }
  0x30   : > { %351 = vst [vmem:[%s1277_s12 + $0xc8] sm:$0xff] %v350_v25 }
  0x31   : > { %353 = vst [vmem:[%s1277_s12 + $0xd0] sm:$0xff] %v352_v26 }
  0x32   : > { %355 = vst [vmem:[%s1277_s12 + $0xd8] sm:$0xff] %v354_v27 }
  0x33   : > { %357 = vst [vmem:[%s1277_s12 + $0xe0] sm:$0xff] %v356_v28 }
  0x34   : > { %359 = vst [vmem:[%s1277_s12 + $0xe8] sm:$0xff] %v358_v29 }
  0x35   : > { %361 = vst [vmem:[%s1277_s12 + $0xf0] sm:$0xff] %v360_v30 }
  0x36   : > { %363 = vst [vmem:[%s1277_s12 + $0xf8] sm:$0xff] %v362_v31 }
  0x37 PF: > { %p900_p7 = scmp.ge.s32.totalorder %s1184_s21, 1  ;;  %p384_p8 = scmp.lt.s32.totalorder %s1184_s21, 19 }
  0x39   : > { %p385_p9 = pnand %p900_p7, %p384_p8 }
  0x3a   : > { %s391_s13 = sand.u32 (!%p385_p9), 1, %s1160_s15   ;;  %s902_s14 = sshll.u32 (!%p385_p9), %s1168_s17, 1 }
  0x3b   : > { %388 = sbr.rel (%p385_p9) target bundleno = 264 (0x108), region = 70  ;;  %s901_s24 = sshll.u32 (!%p385_p9), %s391_s13, 8 }
  0x3c   : > { %p440_p10 = scmp.lt.s32.totalorder (!%p385_p9), %s902_s14, 17  ;;  %s904_s25 = sshll.u32 (!%p385_p9), %s1172_s18, 1 }
  0x3d   : > { %p450_p11 = scmp.lt.s32.totalorder (!%p385_p9), %s904_s25, 3  ;;  %s1366_s13 = scalar_lea.vmem (!%p385_p9), [#allocation3], %s901_s24 }
  0x3e   : > { %p908_p12 = scmp.ne.s32.totalorder (!%p385_p9), %s1168_s17, 0 }
  0x40   : > { %s1485_s14 = smov (!%p440_p10, %s902_s14), 17  ;;  %s1487_s25 = smov (!%p450_p11, %s904_s25), 3 }
  0x41   : > { %s903_s26 = sshll.u32 %s1485_s14, 2  ;;  %s452_s15 = scalar_lea.vmem %s1469_s2, %s1487_s25 }
  0x42   : > { %s1348_s30 = scalar_lea.vmem %s1467_s0, %s903_s26  ;;  %s457_s18 = scalar_lea.vmem %s1470_s3, %s1487_s25 }
  0x43   : > { %s907_s9 = sshll.u32 %s1487_s25, 2  ;;  %472 = sbr.rel (%p908_p12) target bundleno = 75 (0x4b), region = 78 }
  0x44   : > { %s1364_s12 = scalar_lea.vmem %s1471_s4, %s907_s9 }
  0x48   : > { %v1186_v32 = vmov 0.0  }
  0x49   : > { %473 = vst [vmem:[#allocation2] sm:$0xff] %v1186_v32 }
  0x4a   : > { %474 = vst [vmem:[#allocation2 + $0x8] sm:$0xff] %v1186_v32 }
  0x4b PF: > { %v967_v33 = vld [vmem:[%s1366_s13 + $0x70] sm:$0xf]  ;;  %v1056_v34 = vld [vmem:[%s1366_s13 + $0x74] sm:$0xf0]  ;;  %v1055_v38 = vld [vmem:[%s1366_s13 + $0x74] sm:$0xf] }
  0x4c   : > { %v1031_v35 = vld [vmem:[%s1366_s13 + $0xf0] sm:$0xf]  ;;  %v968_v36 = vor.u32 %v1056_v34, %v967_v33  ;;  %v1072_v37 = vld [vmem:[%s1366_s13 + $0xf4] sm:$0xf0]  ;;  %v969_v39 = vld [vmem:[%s1366_s13 + $0x78] sm:$0xf0] }
  0x4d   : > { %v1032_v40 = vor.u32 %v1072_v37, %v1031_v35  ;;  %v972_v41 = vor.u32 %v1055_v38, %v969_v39  ;;  %v1071_v42 = vld [vmem:[%s1366_s13 + $0xf4] sm:$0xf]  ;;  %v1033_v43 = vld [vmem:[%s1366_s13 + $0xf8] sm:$0xf0]  ;;  %v959_v44 = vld [vmem:[%s1366_s13 + $0x60] sm:$0xf] }
  0x4e   : > { %677 = vmatpush.bf16.msra.mxu0 %v968_v36  ;;  %v1036_v45 = vor.u32 %v1071_v42, %v1033_v43  ;;  %v1054_v46 = vld [vmem:[%s1366_s13 + $0x64] sm:$0xf0]  ;;  %v1023_v47 = vld [vmem:[%s1366_s13 + $0xe0] sm:$0xf]  ;;  %v1053_v51 = vld [vmem:[%s1366_s13 + $0x64] sm:$0xf] }
  0x4f   : > { %v1070_v48 = vld [vmem:[%s1366_s13 + $0xe4] sm:$0xf0]  ;;  %690 = vmatpush.bf16.msra.mxu1 %v1032_v40  ;;  %703 = vmatpush.bf16.msra.mxu2 %v972_v41  ;;  %v960_v49 = vor.u32 %v1054_v46, %v959_v44  ;;  %v961_v52 = vld [vmem:[%s1366_s13 + $0x68] sm:$0xf0]  ;;  %v1069_v53 = vld [vmem:[%s1366_s13 + $0xe4] sm:$0xf] }
  0x50   : > { %v1024_v50 = vor.u32 %v1070_v48, %v1023_v47  ;;  %716 = vmatpush.bf16.msra.mxu3 %v1036_v45  ;;  %v964_v54 = vor.u32 %v1053_v51, %v961_v52  ;;  %v1025_v55 = vld [vmem:[%s1366_s13 + $0xe8] sm:$0xf0]  ;;  %v951_v56 = vld [vmem:[%s1366_s13 + $0x50] sm:$0xf]  ;;  %v1052_v57 = vld [vmem:[%s1366_s13 + $0x54] sm:$0xf0] }
  0x51   : > { %v1028_v58 = vor.u32 %v1069_v53, %v1025_v55  ;;  %v1015_v59 = vld [vmem:[%s1366_s13 + $0xd0] sm:$0xf]  ;;  %v1068_v60 = vld [vmem:[%s1366_s13 + $0xd4] sm:$0xf0]  ;;  %v1051_v61 = vld [vmem:[%s1366_s13 + $0x54] sm:$0xf]  ;;  %v952_v62 = vor.u32 %v1052_v57, %v951_v56 }
  0x52   : > { %678 = vmatpush.bf16.msra.mxu0 %v960_v49  ;;  %v953_v63 = vld [vmem:[%s1366_s13 + $0x58] sm:$0xf0]  ;;  %v1067_v0 = vld [vmem:[%s1366_s13 + $0xd4] sm:$0xf]  ;;  %v1016_v2 = vor.u32 %v1068_v60, %v1015_v59  ;;  %v943_v4 = vld [vmem:[%s1366_s13 + $0x40] sm:$0xf] }
  0x53   : > { %v1017_v1 = vld [vmem:[%s1366_s13 + $0xd8] sm:$0xf0]  ;;  %691 = vmatpush.bf16.msra.mxu1 %v1024_v50  ;;  %704 = vmatpush.bf16.msra.mxu2 %v964_v54  ;;  %v956_v3 = vor.u32 %v1051_v61, %v953_v63  ;;  %v1050_v5 = vld [vmem:[%s1366_s13 + $0x44] sm:$0xf0]  ;;  %v1007_v6 = vld [vmem:[%s1366_s13 + $0xc0] sm:$0xf] }
  0x54   : > { %717 = vmatpush.bf16.msra.mxu3 %v1028_v58  ;;  %v1020_v7 = vor.u32 %v1067_v0, %v1017_v1  ;;  %v1066_v8 = vld [vmem:[%s1366_s13 + $0xc4] sm:$0xf0]  ;;  %v1049_v9 = vld [vmem:[%s1366_s13 + $0x44] sm:$0xf]  ;;  %v945_v10 = vld [vmem:[%s1366_s13 + $0x48] sm:$0xf0]  ;;  %v944_v13 = vor.u32 %v1050_v5, %v943_v4 }
  0x55   : > { %v1065_v11 = vld [vmem:[%s1366_s13 + $0xc4] sm:$0xf]  ;;  %v1009_v12 = vld [vmem:[%s1366_s13 + $0xc8] sm:$0xf0]  ;;  %v1008_v14 = vor.u32 %v1066_v8, %v1007_v6  ;;  %v948_v15 = vor.u32 %v1049_v9, %v945_v10  ;;  %v935_v16 = vld [vmem:[%s1366_s13 + $0x30] sm:$0xf] }
  0x56   : > { %679 = vmatpush.bf16.msra.mxu0 %v952_v62  ;;  %v1048_v17 = vld [vmem:[%s1366_s13 + $0x34] sm:$0xf0]  ;;  %v999_v18 = vld [vmem:[%s1366_s13 + $0xb0] sm:$0xf]  ;;  %v1012_v19 = vor.u32 %v1065_v11, %v1009_v12  ;;  %v1047_v21 = vld [vmem:[%s1366_s13 + $0x34] sm:$0xf] }
  0x57   : > { %692 = vmatpush.bf16.msra.mxu1 %v1016_v2  ;;  %705 = vmatpush.bf16.msra.mxu2 %v956_v3  ;;  %v1064_v20 = vld [vmem:[%s1366_s13 + $0xb4] sm:$0xf0]  ;;  %v937_v22 = vld [vmem:[%s1366_s13 + $0x38] sm:$0xf0]  ;;  %v1063_v23 = vld [vmem:[%s1366_s13 + $0xb4] sm:$0xf]  ;;  %v936_v25 = vor.u32 %v1048_v17, %v935_v16 }
  0x58   : > { %718 = vmatpush.bf16.msra.mxu3 %v1020_v7  ;;  %v1001_v24 = vld [vmem:[%s1366_s13 + $0xb8] sm:$0xf0]  ;;  %v1000_v26 = vor.u32 %v1064_v20, %v999_v18  ;;  %v940_v27 = vor.u32 %v1047_v21, %v937_v22  ;;  %v927_v28 = vld [vmem:[%s1366_s13 + $0x20] sm:$0xf]  ;;  %v1046_v29 = vld [vmem:[%s1366_s13 + $0x24] sm:$0xf0] }
  0x59   : > { %v991_v30 = vld [vmem:[%s1366_s13 + $0xa0] sm:$0xf]  ;;  %v1004_v31 = vor.u32 %v1063_v23, %v1001_v24  ;;  %v1062_v32 = vld [vmem:[%s1366_s13 + $0xa4] sm:$0xf0]  ;;  %v1045_v33 = vld [vmem:[%s1366_s13 + $0x24] sm:$0xf]  ;;  %v928_v37 = vor.u32 %v1046_v29, %v927_v28 }
  0x5a   : > { %680 = vmatpush.bf16.msra.mxu0 %v944_v13  ;;  %v929_v34 = vld [vmem:[%s1366_s13 + $0x28] sm:$0xf0]  ;;  %v1061_v35 = vld [vmem:[%s1366_s13 + $0xa4] sm:$0xf]  ;;  %v992_v38 = vor.u32 %v1062_v32, %v991_v30  ;;  %v919_v40 = vld [vmem:[%s1366_s13 + $0x10] sm:$0xf] }
  0x5b   : > { %693 = vmatpush.bf16.msra.mxu1 %v1008_v14  ;;  %706 = vmatpush.bf16.msra.mxu2 %v948_v15  ;;  %v993_v36 = vld [vmem:[%s1366_s13 + $0xa8] sm:$0xf0]  ;;  %v932_v39 = vor.u32 %v1045_v33, %v929_v34  ;;  %v1044_v41 = vld [vmem:[%s1366_s13 + $0x14] sm:$0xf0]  ;;  %v983_v42 = vld [vmem:[%s1366_s13 + $0x90] sm:$0xf] }
  0x5c   : > { %719 = vmatpush.bf16.msra.mxu3 %v1012_v19  ;;  %v996_v43 = vor.u32 %v1061_v35, %v993_v36  ;;  %v1060_v44 = vld [vmem:[%s1366_s13 + $0x94] sm:$0xf0]  ;;  %v1043_v45 = vld [vmem:[%s1366_s13 + $0x14] sm:$0xf]  ;;  %v921_v46 = vld [vmem:[%s1366_s13 + $0x18] sm:$0xf0]  ;;  %v920_v49 = vor.u32 %v1044_v41, %v919_v40 }
  0x5d   : > { %v1059_v47 = vld [vmem:[%s1366_s13 + $0x94] sm:$0xf]  ;;  %v985_v48 = vld [vmem:[%s1366_s13 + $0x98] sm:$0xf0]  ;;  %v984_v51 = vor.u32 %v1060_v44, %v983_v42  ;;  %v924_v52 = vor.u32 %v1043_v45, %v921_v46  ;;  %v911_v53 = vld [vmem:[%s1366_s13] sm:$0xf] }
  0x5e   : > { %681 = vmatpush.bf16.msra.mxu0 %v936_v25  ;;  %v477_v50 = vld [vmem:[%s1348_s30] sm:$0xff]  ;;  %v1042_v54 = vld [vmem:[%s1366_s13 + $0x4] sm:$0xf0]  ;;  %v975_v55 = vld [vmem:[%s1366_s13 + $0x80] sm:$0xf]  ;;  %v988_v56 = vor.u32 %v1059_v47, %v985_v48  ;;  %p1037_p13 = scmp.ne.s32.totalorder %s1168_s17, 8 }
  0x5f   : > { %694 = vmatpush.bf16.msra.mxu1 %v1000_v26  ;;  %707 = vmatpush.bf16.msra.mxu2 %v940_v27  ;;  %v1058_v57 = vld [vmem:[%s1366_s13 + $0x84] sm:$0xf0]  ;;  %v1041_v58 = vld [vmem:[%s1366_s13 + $0x4] sm:$0xf]  ;;  %v913_v59 = vld [vmem:[%s1366_s13 + $0x8] sm:$0xf0]  ;;  %v511_v62 = vunpack.c.l.b16 %v477_v50  ;;  %v912_v63 = vor.u32 %v1042_v54, %v911_v53  ;;  %v512_v0 = vunpack.c.h.b16 %v477_v50 }
  0x60   : > { %720 = vmatpush.bf16.msra.mxu3 %v1004_v31  ;;  %v1057_v60 = vld [vmem:[%s1366_s13 + $0x84] sm:$0xf]  ;;  %v977_v61 = vld [vmem:[%s1366_s13 + $0x88] sm:$0xf0]  ;;  %v976_v1 = vor.u32 %v1058_v57, %v975_v55  ;;  %v916_v2 = vor.u32 %v1041_v58, %v913_v59  ;;  %v475_v7 = vld [vmem:[#allocation2] sm:$0xff] }
  0x61   : > { %v980_v3 = vor.u32 %v1057_v60, %v977_v61  ;;  %v513_v4 = vpack.c.b16 %v511_v62, %v511_v62  ;;  %v514_v5 = vpack.c.b16 %v512_v0, %v512_v0  ;;  %v476_v12 = vld [vmem:[#allocation2 + $0x8] sm:$0xff] }
  0x62   : > { %682 = vmatpush.bf16.msra.mxu0 %v928_v37 }
  0x63   : > { %695 = vmatpush.bf16.msra.mxu1 %v992_v38  ;;  %708 = vmatpush.bf16.msra.mxu2 %v932_v39 }
  0x64   : > { %721 = vmatpush.bf16.msra.mxu3 %v996_v43 }
  0x66   : > { %683 = vmatpush.bf16.msra.mxu0 %v920_v49 }
  0x67   : > { %696 = vmatpush.bf16.msra.mxu1 %v984_v51  ;;  %709 = vmatpush.bf16.msra.mxu2 %v924_v52 }
  0x68   : > { %722 = vmatpush.bf16.msra.mxu3 %v988_v56 }
  0x6a   : > { %684 = vmatpush.bf16.msra.mxu0 %v912_v63 }
  0x6b   : > { %697 = vmatpush.bf16.msra.mxu1 %v976_v1  ;;  %710 = vmatpush.bf16.msra.mxu2 %v916_v2 }
  0x6c   : > { %723 = vmatpush.bf16.msra.mxu3 %v980_v3 }
  0x6d   : > { %685 = vmatmul.bf16.vlgmr.msra.gmra.mxu0 %v513_v4 }
  0x6e   : > { %698 = vmatmul.bf16.vlgmr.msra.gmra.mxu1 %v514_v5  ;;  %711 = vmatmul.bf16.vlgmr.msra.gmra.mxu2 %v513_v4 }
  0x6f   : > { %724 = vmatmul.bf16.vlgmr.msra.gmra.mxu3 %v514_v5 }
  0xea   : > { %v686_v6 = vpop.f32.mrf.mxu0 }
  0xeb   : > { %v699_v8 = vpop.f32.mrf.mxu1 }
  0xec   : > { %v700_v9 = vadd.f32 %v699_v8, %v686_v6 }
  0xee   : > { %v729_v10 = vadd.f32 %v700_v9, %v475_v7 }
  0xf0   : > { %731 = vst [vmem:[#allocation2] sm:$0xff] %v729_v10 }
  0xf1   : > { %v712_v11 = vpop.f32.mrf.mxu2 }
  0xf2   : > { %v725_v13 = vpop.f32.mrf.mxu3  ;;  %v688_v14 = vpop.f32.mrf.mxu0 }
  0xf3   : > { %v726_v15 = vadd.f32 %v725_v13, %v712_v11  ;;  %v701_v16 = vpop.f32.mrf.mxu1 }
  0xf5   : > { %v730_v17 = vadd.f32 %v726_v15, %v476_v12 }
  0xf6   : > { %736 = sbr.rel (%p1037_p13) target bundleno = 264 (0x108), region = 82 }
  0xf7   : > { %732 = vst [vmem:[#allocation2 + $0x8] sm:$0xff] %v730_v17 }
  0xf9   : > { %v714_v18 = vpop.f32.mrf.mxu2 }
  0xfa   : > { %v727_v19 = vpop.f32.mrf.mxu3 }
  0xfb   : > { %v737_v20 = vld [vmem:[#allocation2] sm:$0xff] }
  0xfc   : > { %v739_v22 = vld [vmem:[%s452_s15] sm:$0x3] }
  0xfd   : > { %v741_v23 = vperm.slane %v739_v22, 0  ;;  %v742_v24 = vperm.slane %v739_v22, 1  ;;  %v747_v25 = vld [vmem:[%s457_s18] sm:$0x3] }
  0xfe   : > { %v738_v21 = vld [vmem:[#allocation2 + $0x8] sm:$0xff]  ;;  %v749_v26 = vperm.slane %v747_v25, 0  ;;  %v750_v27 = vperm.slane %v747_v25, 1 }
  0xff   : > { %v745_v28 = vmul.f32 %v741_v23, %v737_v20  ;;  %v746_v29 = vmul.f32 %v742_v24, %v738_v21 }
 0x101   : > { %v753_v30 = vadd.f32 %v749_v26, %v745_v28  ;;  %v754_v31 = vadd.f32 %v750_v27, %v746_v29 }
 0x103   : > { %v755_v32 = vmax.f32 %v753_v30, 0.0  ;;  %v756_v33 = vmax.f32 %v754_v31, 0.0 }
 0x105   : > { %v757_v34 = vpack.c.bf16 %v756_v33, %v755_v32 }
 0x107   : > { %758 = vst [vmem:[%s1364_s12] sm:$0xff] %v757_v34 }
 0x108 PF: > { %s14_s21 = sadd.s32 1, %s1184_s21   ;;  %s1472_s15 = smov %s1164_s16 }
 0x109   : > { %p11_p0 = scmp.ge.s32.totalorder %s14_s21, 20   ;;  %s1473_s16 = smov %s1263_s28 }
 0x10a   : > { %s1474_s17 = smov %s1176_s19  ;;  %s1475_s18 = smov %s1180_s20 }
 0x10b   : > { %s1476_s19 = smov %s1479_s22  ;;  %s1477_s20 = smov %s1483_s23 }
 0x10c   :  { %13 = sbr.rel (!%p11_p0) target bundleno = 4 (0x4), region = 126 }

// kernel: resnet18_forward.38
= control target key start
LH: loop header
LB: loop body
LE: loop exit
PB: predicated region body
PF: predicated region fallthrough
CT: control target
= control target key end

     0   :  { %9 = vsyncpa [#allocation4], 0  ;;  %s1262_s0 = inlined_call_operand.vmem [shape: bf16[8,256], index: 0, kind: input, shape index: {}]   ;;  %s1263_s1 = inlined_call_operand.hbm [shape: bf16[256,512], index: 1, kind: input, shape index: {}]   ;;  %s1264_s2 = inlined_call_operand.vmem [shape: f32[1,512], index: 2, kind: input, shape index: {}]   ;;  %s1265_s3 = inlined_call_operand.vmem [shape: f32[1,512], index: 3, kind: input, shape index: {}]   ;;  %s1266_s4 = inlined_call_operand.vmem [shape: bf16[8,512], index: 4, kind: output, shape index: {}]  }
   0x1   :  { %11 = vsyncpa [#allocation4 + $0x1], 0  ;;  %s1100_s15 = smov 0   ;;  %s1102_s16 = smov 0  }
   0x2   :  { %s1104_s17 = smov 0   ;;  %s1106_s18 = smov 0  }
   0x3   :  { %s1108_s19 = smov 0   ;;  %s1110_s20 = smov 0  }
   0x4 LB: > { %s755_s21 = sadd.s32 4294967295, %s1070_s20   ;;  %s32_s22 = sadd.s32 1, %s1066_s19  ;;  %s1070_s20 = sphi %s1110_s20, %s17_s20   ;;  %s1066_s19 = sphi %s1108_s19, %s1273_s19   ;;  %s1062_s18 = sphi %s1106_s18, %s1272_s18   ;;  %s1058_s17 = sphi %s1104_s17, %s1271_s17   ;;  %s1054_s16 = sphi %s1102_s16, %s1270_s16   ;;  %s1050_s15 = sphi %s1100_s15, %s1269_s15  }
   0x5   : > { %p34_p0 = scmp.ge.s32.totalorder %s32_s22, 2  ;;  %s73_s23 = sadd.s32 1, %s1058_s17 }
   0x6   : > { %p80_p1 = scmp.ne.s32.totalorder %s1058_s17, %s1054_s16  ;;  %p81_p2 = scmp.eq.s32.totalorder %s1070_s20, 0 }
   0x7   : > { %s1275_s22 = smov (%p34_p0, %s32_s22), 0  ;;  %p86_p4 = scmp.ne.s32.totalorder %s1054_s16, %s1050_s15 }
   0x8   : > { %p1136_p3 = por %p81_p2, %p80_p1  ;;  %s69_s25 = ssub.s32 %s1066_s19, %s1275_s22 }
   0x9   : > { %p87_p5 = scmp.eq.s32.totalorder %s755_s21, 0  ;;  %p71_p6 = scmp.eq.s32.totalorder %s69_s25, 0 }
   0xa   : > { %p938_p8 = scmp.lt.s32.totalorder %s1070_s20, 2  ;;  %s203_s28 = sand.u32 1, %s1058_s17  }
   0xb   : > { %p1143_p7 = por %p87_p5, %p86_p4  ;;  %s899_s29 = sshll.u32 %s1066_s19, 3 }
   0xc   : > { %s1149_s27 = scalar_select %p71_p6, %s1058_s17, %s73_s23  }
   0xd   : > { %s760_s30 = sshll.u32 %s203_s28, 8  ;;  %s215_s7 = scalar_lea.hbm %s1263_s1, %s899_s29 }
   0xe   : > { %s216_s8 = sshll.u32 %s215_s7, 4  ;;  %s207_s9 = scalar_lea.vmem [#allocation3], %s760_s30  ;;  %s217_s8 = int_to_ptr.hbm [resolvable:$true] %s216_s8 }
   0xf   : > { %s218_s10 = sshll.u32 %s207_s9, 4  ;;  %p935_p9 = pnand %p938_p8, %p1136_p3  ;;  %s219_s10 = int_to_ptr.vmem [resolvable:$true] %s218_s10 }
  0x10   : > { %p763_p10 = scmp.ge.s32.totalorder %s1070_s20, 1  ;;  %s204_s11 = scalar_lea.sflag [#allocation4], %s203_s28 }
  0x11   : > { %s1072_s12 = smov 256   ;;  %s1073_s13 = smov 128  }
  0x12   : > { %s1074_s14 = smov 8   ;;  %p242_p11 = scmp.lt.s32.totalorder %s1070_s20, 3 }
  0x13   : > { %937 = dma.hbm_to_vmem [thread:$0]  (!%p935_p9), %s217_s8, 4096, %s219_s10, %s204_s11, %s1072_s12, %s1073_s13, %s1074_s14  }
  0x14   : > { %p243_p12 = pnand %p763_p10, %p242_p11 }
  0x15   : > { %s248_s15 = sand.u32 (!%p243_p12), 1, %s1054_s16  }
  0x16   : > { %246 = sbr.rel (%p243_p12) target bundleno = 206 (0xce), region = 36  ;;  %s764_s21 = sshll.u32 (!%p243_p12), %s248_s15, 8 }
  0x17   : > { %s249_s23 = scalar_lea.sflag (!%p243_p12), [#allocation4], %s248_s15  ;;  %s1161_s25 = scalar_lea.vmem (!%p243_p12), [#allocation3], %s764_s21 }
  0x1b   : > { %1045 = dma.done.wait (%p1143_p7), %s249_s23, 4096  }
  0x1c   : > { %1047 = vsyncadd (%p1143_p7), %s249_s23, 4294963200  ;;  %v827_v0 = vld [vmem:[%s1161_s25 + $0x70] sm:$0xf]  ;;  %v915_v1 = vld [vmem:[%s1161_s25 + $0x74] sm:$0xf0]  ;;  %s765_s28 = sshll.u32 %s1062_s18, 1 }
  0x1d   : > { %v891_v2 = vld [vmem:[%s1161_s25 + $0xf0] sm:$0xf]  ;;  %v828_v3 = vor.u32 %v915_v1, %v827_v0  ;;  %v931_v4 = vld [vmem:[%s1161_s25 + $0xf4] sm:$0xf0]  ;;  %v914_v5 = vld [vmem:[%s1161_s25 + $0x74] sm:$0xf] }
  0x1e   : > { %v829_v6 = vld [vmem:[%s1161_s25 + $0x78] sm:$0xf0]  ;;  %v892_v7 = vor.u32 %v931_v4, %v891_v2  ;;  %v930_v9 = vld [vmem:[%s1161_s25 + $0xf4] sm:$0xf]  ;;  %v819_v11 = vld [vmem:[%s1161_s25 + $0x60] sm:$0xf] }
  0x1f   : > { %v832_v8 = vor.u32 %v914_v5, %v829_v6  ;;  %v893_v10 = vld [vmem:[%s1161_s25 + $0xf8] sm:$0xf0]  ;;  %539 = vmatpush.bf16.msra.mxu0 %v828_v3  ;;  %v913_v13 = vld [vmem:[%s1161_s25 + $0x64] sm:$0xf0]  ;;  %v883_v14 = vld [vmem:[%s1161_s25 + $0xe0] sm:$0xf] }
  0x20   : > { %v896_v12 = vor.u32 %v930_v9, %v893_v10  ;;  %v929_v15 = vld [vmem:[%s1161_s25 + $0xe4] sm:$0xf0]  ;;  %552 = vmatpush.bf16.msra.mxu1 %v892_v7  ;;  %v820_v16 = vor.u32 %v913_v13, %v819_v11  ;;  %v912_v18 = vld [vmem:[%s1161_s25 + $0x64] sm:$0xf]  ;;  %v821_v19 = vld [vmem:[%s1161_s25 + $0x68] sm:$0xf0] }
  0x21   : > { %565 = vmatpush.bf16.msra.mxu2 %v832_v8  ;;  %v884_v17 = vor.u32 %v929_v15, %v883_v14  ;;  %v928_v20 = vld [vmem:[%s1161_s25 + $0xe4] sm:$0xf]  ;;  %v824_v21 = vor.u32 %v912_v18, %v821_v19  ;;  %v885_v22 = vld [vmem:[%s1161_s25 + $0xe8] sm:$0xf0]  ;;  %v811_v23 = vld [vmem:[%s1161_s25 + $0x50] sm:$0xf] }
  0x22   : > { %578 = vmatpush.bf16.msra.mxu3 %v896_v12  ;;  %v911_v24 = vld [vmem:[%s1161_s25 + $0x54] sm:$0xf0]  ;;  %v888_v25 = vor.u32 %v928_v20, %v885_v22  ;;  %v875_v26 = vld [vmem:[%s1161_s25 + $0xd0] sm:$0xf]  ;;  %v910_v28 = vld [vmem:[%s1161_s25 + $0x54] sm:$0xf] }
  0x23   : > { %v927_v27 = vld [vmem:[%s1161_s25 + $0xd4] sm:$0xf0]  ;;  %540 = vmatpush.bf16.msra.mxu0 %v820_v16  ;;  %v812_v29 = vor.u32 %v911_v24, %v811_v23  ;;  %v813_v30 = vld [vmem:[%s1161_s25 + $0x58] sm:$0xf0]  ;;  %v926_v31 = vld [vmem:[%s1161_s25 + $0xd4] sm:$0xf] }
  0x24   : > { %v877_v32 = vld [vmem:[%s1161_s25 + $0xd8] sm:$0xf0]  ;;  %553 = vmatpush.bf16.msra.mxu1 %v884_v17  ;;  %v876_v33 = vor.u32 %v927_v27, %v875_v26  ;;  %v816_v34 = vor.u32 %v910_v28, %v813_v30  ;;  %v803_v35 = vld [vmem:[%s1161_s25 + $0x40] sm:$0xf]  ;;  %v909_v36 = vld [vmem:[%s1161_s25 + $0x44] sm:$0xf0] }
  0x25   : > { %566 = vmatpush.bf16.msra.mxu2 %v824_v21  ;;  %v867_v37 = vld [vmem:[%s1161_s25 + $0xc0] sm:$0xf]  ;;  %v880_v38 = vor.u32 %v926_v31, %v877_v32  ;;  %v925_v39 = vld [vmem:[%s1161_s25 + $0xc4] sm:$0xf0]  ;;  %v908_v40 = vld [vmem:[%s1161_s25 + $0x44] sm:$0xf]  ;;  %v804_v44 = vor.u32 %v909_v36, %v803_v35 }
  0x26   : > { %579 = vmatpush.bf16.msra.mxu3 %v888_v25  ;;  %v805_v41 = vld [vmem:[%s1161_s25 + $0x48] sm:$0xf0]  ;;  %v924_v42 = vld [vmem:[%s1161_s25 + $0xc4] sm:$0xf]  ;;  %v868_v45 = vor.u32 %v925_v39, %v867_v37  ;;  %v795_v47 = vld [vmem:[%s1161_s25 + $0x30] sm:$0xf] }
  0x27   : > { %v869_v43 = vld [vmem:[%s1161_s25 + $0xc8] sm:$0xf0]  ;;  %541 = vmatpush.bf16.msra.mxu0 %v812_v29  ;;  %v808_v46 = vor.u32 %v908_v40, %v805_v41  ;;  %v907_v48 = vld [vmem:[%s1161_s25 + $0x34] sm:$0xf0]  ;;  %v859_v49 = vld [vmem:[%s1161_s25 + $0xb0] sm:$0xf] }
  0x28   : > { %554 = vmatpush.bf16.msra.mxu1 %v876_v33  ;;  %v872_v50 = vor.u32 %v924_v42, %v869_v43  ;;  %v923_v51 = vld [vmem:[%s1161_s25 + $0xb4] sm:$0xf0]  ;;  %v906_v52 = vld [vmem:[%s1161_s25 + $0x34] sm:$0xf]  ;;  %v797_v53 = vld [vmem:[%s1161_s25 + $0x38] sm:$0xf0]  ;;  %v796_v56 = vor.u32 %v907_v48, %v795_v47 }
  0x29   : > { %567 = vmatpush.bf16.msra.mxu2 %v816_v34  ;;  %v922_v54 = vld [vmem:[%s1161_s25 + $0xb4] sm:$0xf]  ;;  %v861_v55 = vld [vmem:[%s1161_s25 + $0xb8] sm:$0xf0]  ;;  %v860_v57 = vor.u32 %v923_v51, %v859_v49  ;;  %v800_v58 = vor.u32 %v906_v52, %v797_v53  ;;  %v787_v59 = vld [vmem:[%s1161_s25 + $0x20] sm:$0xf] }
  0x2a   : > { %580 = vmatpush.bf16.msra.mxu3 %v880_v38  ;;  %v905_v60 = vld [vmem:[%s1161_s25 + $0x24] sm:$0xf0]  ;;  %v851_v61 = vld [vmem:[%s1161_s25 + $0xa0] sm:$0xf]  ;;  %v864_v62 = vor.u32 %v922_v54, %v861_v55  ;;  %v904_v0 = vld [vmem:[%s1161_s25 + $0x24] sm:$0xf] }
  0x2b   : > { %542 = vmatpush.bf16.msra.mxu0 %v804_v44  ;;  %v921_v63 = vld [vmem:[%s1161_s25 + $0xa4] sm:$0xf0]  ;;  %v789_v1 = vld [vmem:[%s1161_s25 + $0x28] sm:$0xf0]  ;;  %v920_v2 = vld [vmem:[%s1161_s25 + $0xa4] sm:$0xf]  ;;  %v788_v4 = vor.u32 %v905_v60, %v787_v59 }
  0x2c   : > { %555 = vmatpush.bf16.msra.mxu1 %v868_v45  ;;  %v853_v3 = vld [vmem:[%s1161_s25 + $0xa8] sm:$0xf0]  ;;  %v852_v5 = vor.u32 %v921_v63, %v851_v61  ;;  %v792_v6 = vor.u32 %v904_v0, %v789_v1  ;;  %v779_v7 = vld [vmem:[%s1161_s25 + $0x10] sm:$0xf]  ;;  %v903_v8 = vld [vmem:[%s1161_s25 + $0x14] sm:$0xf0] }
  0x2d   : > { %568 = vmatpush.bf16.msra.mxu2 %v808_v46  ;;  %v843_v9 = vld [vmem:[%s1161_s25 + $0x90] sm:$0xf]  ;;  %v856_v10 = vor.u32 %v920_v2, %v853_v3  ;;  %v919_v11 = vld [vmem:[%s1161_s25 + $0x94] sm:$0xf0]  ;;  %v902_v12 = vld [vmem:[%s1161_s25 + $0x14] sm:$0xf]  ;;  %v780_v16 = vor.u32 %v903_v8, %v779_v7 }
  0x2e   : > { %581 = vmatpush.bf16.msra.mxu3 %v872_v50  ;;  %v781_v13 = vld [vmem:[%s1161_s25 + $0x18] sm:$0xf0]  ;;  %v918_v14 = vld [vmem:[%s1161_s25 + $0x94] sm:$0xf]  ;;  %v339_v17 = vld [vmem:[%s1262_s0] sm:$0xff]  ;;  %v844_v18 = vor.u32 %v919_v11, %v843_v9  ;;  %p312_p13 = scmp.lt.s32.totalorder %s765_s28, 3 }
  0x2f   : > { %543 = vmatpush.bf16.msra.mxu0 %v796_v56  ;;  %v845_v15 = vld [vmem:[%s1161_s25 + $0x98] sm:$0xf0]  ;;  %v784_v19 = vor.u32 %v902_v12, %v781_v13  ;;  %v771_v20 = vld [vmem:[%s1161_s25] sm:$0xf]  ;;  %v901_v21 = vld [vmem:[%s1161_s25 + $0x4] sm:$0xf0]  ;;  %v373_v29 = vunpack.c.l.b16 %v339_v17  ;;  %v374_v31 = vunpack.c.h.b16 %v339_v17 }
  0x30   : > { %556 = vmatpush.bf16.msra.mxu1 %v860_v57  ;;  %v835_v22 = vld [vmem:[%s1161_s25 + $0x80] sm:$0xf]  ;;  %v848_v23 = vor.u32 %v918_v14, %v845_v15  ;;  %v917_v24 = vld [vmem:[%s1161_s25 + $0x84] sm:$0xf0]  ;;  %v900_v25 = vld [vmem:[%s1161_s25 + $0x4] sm:$0xf]  ;;  %v772_v30 = vor.u32 %v901_v21, %v771_v20 }
  0x31   : > { %569 = vmatpush.bf16.msra.mxu2 %v800_v58  ;;  %v773_v26 = vld [vmem:[%s1161_s25 + $0x8] sm:$0xf0]  ;;  %v916_v27 = vld [vmem:[%s1161_s25 + $0x84] sm:$0xf]  ;;  %v836_v32 = vor.u32 %v917_v24, %v835_v22  ;;  %v375_v35 = vpack.c.b16 %v373_v29, %v373_v29  ;;  %v376_v36 = vpack.c.b16 %v374_v31, %v374_v31  ;;  %s1277_s28 = smov (!%p312_p13, %s765_s28), 3 }
  0x32   : > { %582 = vmatpush.bf16.msra.mxu3 %v864_v62  ;;  %v837_v28 = vld [vmem:[%s1161_s25 + $0x88] sm:$0xf0]  ;;  %v776_v33 = vor.u32 %v900_v25, %v773_v26  ;;  %s314_s5 = scalar_lea.vmem %s1264_s2, %s1277_s28  ;;  %s319_s8 = scalar_lea.vmem %s1265_s3, %s1277_s28 }
  0x33   : > { %544 = vmatpush.bf16.msra.mxu0 %v788_v4  ;;  %v840_v34 = vor.u32 %v916_v27, %v837_v28  ;;  %v600_v38 = vld [vmem:[%s314_s5] sm:$0x3]  ;;  %s768_s18 = sshll.u32 %s1277_s28, 2 }
  0x34   : > { %557 = vmatpush.bf16.msra.mxu1 %v852_v5  ;;  %v602_v41 = vperm.slane %v600_v38, 0  ;;  %v608_v42 = vld [vmem:[%s319_s8] sm:$0x3]  ;;  %v603_v46 = vperm.slane %v600_v38, 1  ;;  %s329_s11 = scalar_lea.vmem %s1266_s4, %s768_s18 }
  0x35   : > { %570 = vmatpush.bf16.msra.mxu2 %v792_v6  ;;  %v610_v44 = vperm.slane %v608_v42, 0  ;;  %v611_v50 = vperm.slane %v608_v42, 1 }
  0x36   : > { %583 = vmatpush.bf16.msra.mxu3 %v856_v10 }
  0x37   : > { %545 = vmatpush.bf16.msra.mxu0 %v780_v16 }
  0x38   : > { %558 = vmatpush.bf16.msra.mxu1 %v844_v18 }
  0x39   : > { %571 = vmatpush.bf16.msra.mxu2 %v784_v19 }
  0x3a   : > { %584 = vmatpush.bf16.msra.mxu3 %v848_v23 }
  0x3b   : > { %546 = vmatpush.bf16.msra.mxu0 %v772_v30 }
  0x3c   : > { %559 = vmatpush.bf16.msra.mxu1 %v836_v32 }
  0x3d   : > { %572 = vmatpush.bf16.msra.mxu2 %v776_v33 }
  0x3e   : > { %585 = vmatpush.bf16.msra.mxu3 %v840_v34  ;;  %547 = vmatmul.bf16.vlgmr.msra.gmra.mxu0 %v375_v35 }
  0x3f   : > { %560 = vmatmul.bf16.vlgmr.msra.gmra.mxu1 %v376_v36 }
  0x40   : > { %573 = vmatmul.bf16.vlgmr.msra.gmra.mxu2 %v375_v35 }
  0x41   : > { %586 = vmatmul.bf16.vlgmr.msra.gmra.mxu3 %v376_v36 }
  0xbb   : > { %v548_v37 = vpop.f32.mrf.mxu0 }
  0xbc   : > { %v561_v39 = vpop.f32.mrf.mxu1 }
  0xbd   : > { %v562_v40 = vadd.f32 %v561_v39, %v548_v37 }
  0xbf   : > { %v606_v43 = vmul.f32 %v602_v41, %v562_v40 }
  0xc1   : > { %v614_v52 = vadd.f32 %v610_v44, %v606_v43 }
  0xc3   : > { %v574_v45 = vpop.f32.mrf.mxu2  ;;  %v550_v48 = vpop.f32.mrf.mxu0 }
  0xc4   : > { %v587_v47 = vpop.f32.mrf.mxu3  ;;  %v563_v51 = vpop.f32.mrf.mxu1 }
  0xc5   : > { %v588_v49 = vadd.f32 %v587_v47, %v574_v45 }
  0xc7   : > { %v607_v53 = vmul.f32 %v603_v46, %v588_v49 }
  0xc9   : > { %v615_v54 = vadd.f32 %v611_v50, %v607_v53 }
  0xcb   : > { %v616_v55 = vpack.c.bf16 %v615_v54, %v614_v52  ;;  %v576_v56 = vpop.f32.mrf.mxu2 }
  0xcc   : > { %v589_v57 = vpop.f32.mrf.mxu3 }
  0xcd   : > { %617 = vst [vmem:[%s329_s11] sm:$0xff] %v616_v55 }
  0xce PF: > { %s17_s20 = sadd.s32 1, %s1070_s20   ;;  %s1269_s15 = smov %s1054_s16 }
  0xcf   : > { %p14_p0 = scmp.ge.s32.totalorder %s17_s20, 4   ;;  %s1270_s16 = smov %s1058_s17 }
  0xd0   : > { %s1271_s17 = smov %s1149_s27  ;;  %s1272_s18 = smov %s1066_s19 }
  0xd1   : > { %s1273_s19 = smov %s1275_s22  ;;  %16 = sbr.rel (!%p14_p0) target bundleno = 4 (0x4), region = 93 }
  0xd6   :  { %648 = vsyncpa [#allocation4], 1 }
  0xd7   :  { %650 = vsyncpa [#allocation4 + $0x1], 1 }

// kernel: resnet18_forward.40
= control target key start
LH: loop header
LB: loop body
LE: loop exit
PB: predicated region body
PF: predicated region fallthrough
CT: control target
= control target key end

     0   :  { %s1305_s18 = smov 0   ;;  %s1307_s19 = smov 0   ;;  %s1566_s0 = inlined_call_operand.vmem [shape: bf16[8,4608], index: 0, kind: input, shape index: {}]   ;;  %s1567_s1 = inlined_call_operand.vmem [shape: bf16[4608,512], index: 1, kind: input, shape index: {}]   ;;  %s1568_s2 = inlined_call_operand.vmem [shape: f32[1,512], index: 2, kind: input, shape index: {}]   ;;  %s1569_s3 = inlined_call_operand.vmem [shape: f32[1,512], index: 3, kind: input, shape index: {}]   ;;  %s1570_s4 = inlined_call_operand.vmem [shape: bf16[8,512], index: 4, kind: input, shape index: {}]   ;;  %s1571_s5 = inlined_call_operand.vmem [shape: bf16[8,512], index: 5, kind: output, shape index: {}]  }
   0x1   :  { %s1309_s20 = smov 0   ;;  %s1311_s21 = smov 0  }
   0x2   :  { %s1313_s22 = smov 0   ;;  %s1315_s23 = smov 0  }
   0x3   :  { %s1317_s24 = smov 0  }
   0x4 LB: > { %s27_s25 = sadd.s32 1, %s1264_s22  ;;  %s30_s26 = sadd.s32 1, %s1268_s23  ;;  %s1272_s24 = sphi %s1317_s24, %s15_s24   ;;  %s1268_s23 = sphi %s1315_s23, %s1577_s23   ;;  %s1264_s22 = sphi %s1313_s22, %s1576_s22   ;;  %s1260_s21 = sphi %s1311_s21, %s1575_s21   ;;  %s1256_s20 = sphi %s1309_s20, %s1574_s20   ;;  %s1252_s19 = sphi %s1307_s19, %s1573_s19   ;;  %s1248_s18 = sphi %s1305_s18, %s1572_s18  }
   0x5   : > { %p28_p0 = scmp.ge.s32.totalorder %s27_s25, 18  ;;  %p78_p1 = scmp.ne.s32.totalorder %s1252_s19, %s1248_s18 }
   0x6   : > { %p79_p2 = scmp.eq.s32.totalorder %s1272_s24, 0  ;;  %s71_s30 = sadd.s32 1, %s1252_s19 }
   0x7   : > { %s1579_s25 = smov (%p28_p0, %s27_s25), 0  ;;  %s1581_s26 = smov (!%p28_p0, %s30_s26), %s1268_s23 }
   0x8   : > { %p80_p3 = por %p79_p2, %p78_p1  ;;  %p32_p4 = scmp.ge.s32.totalorder %s1581_s26, 2 }
   0x9   : > { %s66_s27 = ssub.s32 %s1264_s22, %s1579_s25  ;;  %p980_p6 = scmp.ge.s32.totalorder %s1272_s24, 36 }
   0xa   : > { %s1583_s26 = smov (%p32_p4, %s1581_s26), 0 }
   0xb   : > { %s67_s28 = ssub.s32 %s1268_s23, %s1583_s26  ;;  %212 = sbr.rel (%p980_p6) target bundleno = 55 (0x37), region = 16 }
   0xc   : > { %s68_s29 = sor.u32 %s67_s28, %s66_s27 }
   0xd   : > { %p69_p5 = scmp.eq.s32.totalorder %s68_s29, 0 }
   0xf   : > { %s1356_s6 = scalar_select %p69_p5, %s1252_s19, %s71_s30  }
  0x10   : > { %228 = sbr.rel (!%p80_p3) target bundleno = 55 (0x37), region = 24  ;;  %s230_s7 = sand.u32 (%p80_p3), 1, %s1252_s19  }
  0x11   : > { %s983_s8 = sshll.u32 (%p80_p3), %s1268_s23, 1  ;;  %s981_s9 = sshll.u32 (%p80_p3), %s230_s7, 8 }
  0x12   : > { %s1128_s10 = sshll.u32 (%p80_p3), %s1264_s22, 7  ;;  %s1370_s16 = scalar_lea.vmem (%p80_p3), [#allocation3], %s981_s9 }
  0x13   : > { %s236_s11 = sadd.s32 (%p80_p3), %s1128_s10, %s983_s8 }
  0x14   : > { %s985_s12 = sshll.u32 (%p80_p3), %s236_s11, 2 }
  0x15   : > { %s1365_s15 = scalar_lea.vmem %s1567_s1, %s985_s12 }
  0x16   : > { %v329_v0 = vld [vmem:[%s1365_s15] sm:$0xff]  ;;  %v331_v1 = vld [vmem:[%s1365_s15 + $0x10] sm:$0xff] }
  0x17   : > { %v333_v2 = vld [vmem:[%s1365_s15 + $0x20] sm:$0xff]  ;;  %330 = vst [vmem:[%s1370_s16] sm:$0xff] %v329_v0  ;;  %v335_v3 = vld [vmem:[%s1365_s15 + $0x30] sm:$0xff] }
  0x18   : > { %332 = vst [vmem:[%s1370_s16 + $0x8] sm:$0xff] %v331_v1  ;;  %v337_v4 = vld [vmem:[%s1365_s15 + $0x40] sm:$0xff]  ;;  %v339_v5 = vld [vmem:[%s1365_s15 + $0x50] sm:$0xff] }
  0x19   : > { %334 = vst [vmem:[%s1370_s16 + $0x10] sm:$0xff] %v333_v2  ;;  %v341_v6 = vld [vmem:[%s1365_s15 + $0x60] sm:$0xff]  ;;  %v343_v7 = vld [vmem:[%s1365_s15 + $0x70] sm:$0xff] }
  0x1a   : > { %336 = vst [vmem:[%s1370_s16 + $0x18] sm:$0xff] %v335_v3  ;;  %v345_v8 = vld [vmem:[%s1365_s15 + $0x80] sm:$0xff]  ;;  %v347_v9 = vld [vmem:[%s1365_s15 + $0x90] sm:$0xff] }
  0x1b   : > { %338 = vst [vmem:[%s1370_s16 + $0x20] sm:$0xff] %v337_v4  ;;  %v349_v10 = vld [vmem:[%s1365_s15 + $0xa0] sm:$0xff]  ;;  %v351_v11 = vld [vmem:[%s1365_s15 + $0xb0] sm:$0xff] }
  0x1c   : > { %340 = vst [vmem:[%s1370_s16 + $0x28] sm:$0xff] %v339_v5  ;;  %v353_v12 = vld [vmem:[%s1365_s15 + $0xc0] sm:$0xff]  ;;  %v355_v13 = vld [vmem:[%s1365_s15 + $0xd0] sm:$0xff] }
  0x1d   : > { %342 = vst [vmem:[%s1370_s16 + $0x30] sm:$0xff] %v341_v6  ;;  %v357_v14 = vld [vmem:[%s1365_s15 + $0xe0] sm:$0xff]  ;;  %v359_v15 = vld [vmem:[%s1365_s15 + $0xf0] sm:$0xff] }
  0x1e   : > { %344 = vst [vmem:[%s1370_s16 + $0x38] sm:$0xff] %v343_v7  ;;  %v361_v16 = vld [vmem:[%s1365_s15 + $0x100] sm:$0xff]  ;;  %v363_v17 = vld [vmem:[%s1365_s15 + $0x110] sm:$0xff] }
  0x1f   : > { %346 = vst [vmem:[%s1370_s16 + $0x40] sm:$0xff] %v345_v8  ;;  %v365_v18 = vld [vmem:[%s1365_s15 + $0x120] sm:$0xff]  ;;  %v367_v19 = vld [vmem:[%s1365_s15 + $0x130] sm:$0xff] }
  0x20   : > { %348 = vst [vmem:[%s1370_s16 + $0x48] sm:$0xff] %v347_v9  ;;  %v369_v20 = vld [vmem:[%s1365_s15 + $0x140] sm:$0xff]  ;;  %v371_v21 = vld [vmem:[%s1365_s15 + $0x150] sm:$0xff] }
  0x21   : > { %350 = vst [vmem:[%s1370_s16 + $0x50] sm:$0xff] %v349_v10  ;;  %v373_v22 = vld [vmem:[%s1365_s15 + $0x160] sm:$0xff]  ;;  %v375_v23 = vld [vmem:[%s1365_s15 + $0x170] sm:$0xff] }
  0x22   : > { %352 = vst [vmem:[%s1370_s16 + $0x58] sm:$0xff] %v351_v11  ;;  %v377_v24 = vld [vmem:[%s1365_s15 + $0x180] sm:$0xff]  ;;  %v379_v25 = vld [vmem:[%s1365_s15 + $0x190] sm:$0xff] }
  0x23   : > { %354 = vst [vmem:[%s1370_s16 + $0x60] sm:$0xff] %v353_v12  ;;  %v381_v26 = vld [vmem:[%s1365_s15 + $0x1a0] sm:$0xff]  ;;  %v383_v27 = vld [vmem:[%s1365_s15 + $0x1b0] sm:$0xff] }
  0x24   : > { %356 = vst [vmem:[%s1370_s16 + $0x68] sm:$0xff] %v355_v13  ;;  %v385_v28 = vld [vmem:[%s1365_s15 + $0x1c0] sm:$0xff]  ;;  %v387_v29 = vld [vmem:[%s1365_s15 + $0x1d0] sm:$0xff] }
  0x25   : > { %358 = vst [vmem:[%s1370_s16 + $0x70] sm:$0xff] %v357_v14  ;;  %v389_v30 = vld [vmem:[%s1365_s15 + $0x1e0] sm:$0xff]  ;;  %v391_v31 = vld [vmem:[%s1365_s15 + $0x1f0] sm:$0xff] }
  0x26   : > { %360 = vst [vmem:[%s1370_s16 + $0x78] sm:$0xff] %v359_v15 }
  0x27   : > { %362 = vst [vmem:[%s1370_s16 + $0x80] sm:$0xff] %v361_v16 }
  0x28   : > { %364 = vst [vmem:[%s1370_s16 + $0x88] sm:$0xff] %v363_v17 }
  0x29   : > { %366 = vst [vmem:[%s1370_s16 + $0x90] sm:$0xff] %v365_v18 }
  0x2a   : > { %368 = vst [vmem:[%s1370_s16 + $0x98] sm:$0xff] %v367_v19 }
  0x2b   : > { %370 = vst [vmem:[%s1370_s16 + $0xa0] sm:$0xff] %v369_v20 }
  0x2c   : > { %372 = vst [vmem:[%s1370_s16 + $0xa8] sm:$0xff] %v371_v21 }
  0x2d   : > { %374 = vst [vmem:[%s1370_s16 + $0xb0] sm:$0xff] %v373_v22 }
  0x2e   : > { %376 = vst [vmem:[%s1370_s16 + $0xb8] sm:$0xff] %v375_v23 }
  0x2f   : > { %378 = vst [vmem:[%s1370_s16 + $0xc0] sm:$0xff] %v377_v24 }
  0x30   : > { %380 = vst [vmem:[%s1370_s16 + $0xc8] sm:$0xff] %v379_v25 }
  0x31   : > { %382 = vst [vmem:[%s1370_s16 + $0xd0] sm:$0xff] %v381_v26 }
  0x32   : > { %384 = vst [vmem:[%s1370_s16 + $0xd8] sm:$0xff] %v383_v27 }
  0x33   : > { %386 = vst [vmem:[%s1370_s16 + $0xe0] sm:$0xff] %v385_v28 }
  0x34   : > { %388 = vst [vmem:[%s1370_s16 + $0xe8] sm:$0xff] %v387_v29 }
  0x35   : > { %390 = vst [vmem:[%s1370_s16 + $0xf0] sm:$0xff] %v389_v30 }
  0x36   : > { %392 = vst [vmem:[%s1370_s16 + $0xf8] sm:$0xff] %v391_v31 }
  0x37 PF: > { %p986_p7 = scmp.ge.s32.totalorder %s1272_s24, 1  ;;  %p426_p8 = scmp.lt.s32.totalorder %s1272_s24, 37 }
  0x39   : > { %p427_p9 = pnand %p986_p7, %p426_p8 }
  0x3a   : > { %s433_s17 = sand.u32 (!%p427_p9), 1, %s1248_s18   ;;  %s988_s27 = sshll.u32 (!%p427_p9), %s1256_s20, 1 }
  0x3b   : > { %430 = sbr.rel (%p427_p9) target bundleno = 266 (0x10a), region = 74  ;;  %s987_s28 = sshll.u32 (!%p427_p9), %s433_s17, 8 }
  0x3c   : > { %p493_p10 = scmp.lt.s32.totalorder (!%p427_p9), %s988_s27, 35  ;;  %s990_s29 = sshll.u32 (!%p427_p9), %s1260_s21, 1 }
  0x3d   : > { %p503_p11 = scmp.lt.s32.totalorder (!%p427_p9), %s990_s29, 3  ;;  %s1464_s8 = scalar_lea.vmem (!%p427_p9), [#allocation3], %s987_s28 }
  0x3e   : > { %p996_p12 = scmp.ne.s32.totalorder (!%p427_p9), %s1256_s20, 0 }
  0x40   : > { %s1585_s27 = smov (!%p493_p10, %s988_s27), 35  ;;  %s1587_s29 = smov (!%p503_p11, %s990_s29), 3 }
  0x41   : > { %s989_s30 = sshll.u32 %s1585_s27, 2  ;;  %s505_s18 = scalar_lea.vmem %s1568_s2, %s1587_s29 }
  0x42   : > { %s1441_s9 = scalar_lea.vmem %s1566_s0, %s989_s30  ;;  %s510_s21 = scalar_lea.vmem %s1569_s3, %s1587_s29 }
  0x43   : > { %s993_s14 = sshll.u32 %s1587_s29, 2  ;;  %535 = sbr.rel (%p996_p12) target bundleno = 75 (0x4b), region = 82 }
  0x44   : > { %s1457_s17 = scalar_lea.vmem %s1570_s4, %s993_s14  ;;  %s1462_s7 = scalar_lea.vmem %s1571_s5, %s993_s14 }
  0x48   : > { %v1274_v32 = vmov 0.0  }
  0x49   : > { %536 = vst [vmem:[#allocation2] sm:$0xff] %v1274_v32 }
  0x4a   : > { %537 = vst [vmem:[#allocation2 + $0x8] sm:$0xff] %v1274_v32 }
  0x4b PF: > { %v1055_v33 = vld [vmem:[%s1464_s8 + $0x70] sm:$0xf]  ;;  %v1144_v34 = vld [vmem:[%s1464_s8 + $0x74] sm:$0xf0]  ;;  %v1143_v38 = vld [vmem:[%s1464_s8 + $0x74] sm:$0xf] }
  0x4c   : > { %v1119_v35 = vld [vmem:[%s1464_s8 + $0xf0] sm:$0xf]  ;;  %v1056_v36 = vor.u32 %v1144_v34, %v1055_v33  ;;  %v1160_v37 = vld [vmem:[%s1464_s8 + $0xf4] sm:$0xf0]  ;;  %v1057_v39 = vld [vmem:[%s1464_s8 + $0x78] sm:$0xf0] }
  0x4d   : > { %v1120_v40 = vor.u32 %v1160_v37, %v1119_v35  ;;  %v1060_v41 = vor.u32 %v1143_v38, %v1057_v39  ;;  %v1159_v42 = vld [vmem:[%s1464_s8 + $0xf4] sm:$0xf]  ;;  %v1121_v43 = vld [vmem:[%s1464_s8 + $0xf8] sm:$0xf0]  ;;  %v1047_v44 = vld [vmem:[%s1464_s8 + $0x60] sm:$0xf] }
  0x4e   : > { %740 = vmatpush.bf16.msra.mxu0 %v1056_v36  ;;  %v1124_v45 = vor.u32 %v1159_v42, %v1121_v43  ;;  %v1142_v46 = vld [vmem:[%s1464_s8 + $0x64] sm:$0xf0]  ;;  %v1111_v47 = vld [vmem:[%s1464_s8 + $0xe0] sm:$0xf]  ;;  %v1141_v51 = vld [vmem:[%s1464_s8 + $0x64] sm:$0xf] }
  0x4f   : > { %v1158_v48 = vld [vmem:[%s1464_s8 + $0xe4] sm:$0xf0]  ;;  %753 = vmatpush.bf16.msra.mxu1 %v1120_v40  ;;  %766 = vmatpush.bf16.msra.mxu2 %v1060_v41  ;;  %v1048_v49 = vor.u32 %v1142_v46, %v1047_v44  ;;  %v1049_v52 = vld [vmem:[%s1464_s8 + $0x68] sm:$0xf0]  ;;  %v1157_v53 = vld [vmem:[%s1464_s8 + $0xe4] sm:$0xf] }
  0x50   : > { %v1112_v50 = vor.u32 %v1158_v48, %v1111_v47  ;;  %779 = vmatpush.bf16.msra.mxu3 %v1124_v45  ;;  %v1052_v54 = vor.u32 %v1141_v51, %v1049_v52  ;;  %v1113_v55 = vld [vmem:[%s1464_s8 + $0xe8] sm:$0xf0]  ;;  %v1039_v56 = vld [vmem:[%s1464_s8 + $0x50] sm:$0xf]  ;;  %v1140_v57 = vld [vmem:[%s1464_s8 + $0x54] sm:$0xf0] }
  0x51   : > { %v1116_v58 = vor.u32 %v1157_v53, %v1113_v55  ;;  %v1103_v59 = vld [vmem:[%s1464_s8 + $0xd0] sm:$0xf]  ;;  %v1156_v60 = vld [vmem:[%s1464_s8 + $0xd4] sm:$0xf0]  ;;  %v1139_v61 = vld [vmem:[%s1464_s8 + $0x54] sm:$0xf]  ;;  %v1040_v62 = vor.u32 %v1140_v57, %v1039_v56 }
  0x52   : > { %741 = vmatpush.bf16.msra.mxu0 %v1048_v49  ;;  %v1041_v63 = vld [vmem:[%s1464_s8 + $0x58] sm:$0xf0]  ;;  %v1155_v0 = vld [vmem:[%s1464_s8 + $0xd4] sm:$0xf]  ;;  %v1104_v2 = vor.u32 %v1156_v60, %v1103_v59  ;;  %v1031_v4 = vld [vmem:[%s1464_s8 + $0x40] sm:$0xf] }
  0x53   : > { %v1105_v1 = vld [vmem:[%s1464_s8 + $0xd8] sm:$0xf0]  ;;  %754 = vmatpush.bf16.msra.mxu1 %v1112_v50  ;;  %767 = vmatpush.bf16.msra.mxu2 %v1052_v54  ;;  %v1044_v3 = vor.u32 %v1139_v61, %v1041_v63  ;;  %v1138_v5 = vld [vmem:[%s1464_s8 + $0x44] sm:$0xf0]  ;;  %v1095_v6 = vld [vmem:[%s1464_s8 + $0xc0] sm:$0xf] }
  0x54   : > { %780 = vmatpush.bf16.msra.mxu3 %v1116_v58  ;;  %v1108_v7 = vor.u32 %v1155_v0, %v1105_v1  ;;  %v1154_v8 = vld [vmem:[%s1464_s8 + $0xc4] sm:$0xf0]  ;;  %v1137_v9 = vld [vmem:[%s1464_s8 + $0x44] sm:$0xf]  ;;  %v1033_v10 = vld [vmem:[%s1464_s8 + $0x48] sm:$0xf0]  ;;  %v1032_v13 = vor.u32 %v1138_v5, %v1031_v4 }
  0x55   : > { %v1153_v11 = vld [vmem:[%s1464_s8 + $0xc4] sm:$0xf]  ;;  %v1097_v12 = vld [vmem:[%s1464_s8 + $0xc8] sm:$0xf0]  ;;  %v1096_v14 = vor.u32 %v1154_v8, %v1095_v6  ;;  %v1036_v15 = vor.u32 %v1137_v9, %v1033_v10  ;;  %v1023_v16 = vld [vmem:[%s1464_s8 + $0x30] sm:$0xf] }
  0x56   : > { %742 = vmatpush.bf16.msra.mxu0 %v1040_v62  ;;  %v1136_v17 = vld [vmem:[%s1464_s8 + $0x34] sm:$0xf0]  ;;  %v1087_v18 = vld [vmem:[%s1464_s8 + $0xb0] sm:$0xf]  ;;  %v1100_v19 = vor.u32 %v1153_v11, %v1097_v12  ;;  %v1135_v21 = vld [vmem:[%s1464_s8 + $0x34] sm:$0xf] }
  0x57   : > { %755 = vmatpush.bf16.msra.mxu1 %v1104_v2  ;;  %768 = vmatpush.bf16.msra.mxu2 %v1044_v3  ;;  %v1152_v20 = vld [vmem:[%s1464_s8 + $0xb4] sm:$0xf0]  ;;  %v1025_v22 = vld [vmem:[%s1464_s8 + $0x38] sm:$0xf0]  ;;  %v1151_v23 = vld [vmem:[%s1464_s8 + $0xb4] sm:$0xf]  ;;  %v1024_v25 = vor.u32 %v1136_v17, %v1023_v16 }
  0x58   : > { %781 = vmatpush.bf16.msra.mxu3 %v1108_v7  ;;  %v1089_v24 = vld [vmem:[%s1464_s8 + $0xb8] sm:$0xf0]  ;;  %v1088_v26 = vor.u32 %v1152_v20, %v1087_v18  ;;  %v1028_v27 = vor.u32 %v1135_v21, %v1025_v22  ;;  %v1015_v28 = vld [vmem:[%s1464_s8 + $0x20] sm:$0xf]  ;;  %v1134_v29 = vld [vmem:[%s1464_s8 + $0x24] sm:$0xf0] }
  0x59   : > { %v1079_v30 = vld [vmem:[%s1464_s8 + $0xa0] sm:$0xf]  ;;  %v1092_v31 = vor.u32 %v1151_v23, %v1089_v24  ;;  %v1150_v32 = vld [vmem:[%s1464_s8 + $0xa4] sm:$0xf0]  ;;  %v1133_v33 = vld [vmem:[%s1464_s8 + $0x24] sm:$0xf]  ;;  %v1016_v37 = vor.u32 %v1134_v29, %v1015_v28 }
  0x5a   : > { %743 = vmatpush.bf16.msra.mxu0 %v1032_v13  ;;  %v1017_v34 = vld [vmem:[%s1464_s8 + $0x28] sm:$0xf0]  ;;  %v1149_v35 = vld [vmem:[%s1464_s8 + $0xa4] sm:$0xf]  ;;  %v1080_v38 = vor.u32 %v1150_v32, %v1079_v30  ;;  %v1007_v40 = vld [vmem:[%s1464_s8 + $0x10] sm:$0xf] }
  0x5b   : > { %756 = vmatpush.bf16.msra.mxu1 %v1096_v14  ;;  %769 = vmatpush.bf16.msra.mxu2 %v1036_v15  ;;  %v1081_v36 = vld [vmem:[%s1464_s8 + $0xa8] sm:$0xf0]  ;;  %v1020_v39 = vor.u32 %v1133_v33, %v1017_v34  ;;  %v1132_v41 = vld [vmem:[%s1464_s8 + $0x14] sm:$0xf0]  ;;  %v1071_v42 = vld [vmem:[%s1464_s8 + $0x90] sm:$0xf] }
  0x5c   : > { %782 = vmatpush.bf16.msra.mxu3 %v1100_v19  ;;  %v1084_v43 = vor.u32 %v1149_v35, %v1081_v36  ;;  %v1148_v44 = vld [vmem:[%s1464_s8 + $0x94] sm:$0xf0]  ;;  %v1131_v45 = vld [vmem:[%s1464_s8 + $0x14] sm:$0xf]  ;;  %v1009_v46 = vld [vmem:[%s1464_s8 + $0x18] sm:$0xf0]  ;;  %v1008_v49 = vor.u32 %v1132_v41, %v1007_v40 }
  0x5d   : > { %v1147_v47 = vld [vmem:[%s1464_s8 + $0x94] sm:$0xf]  ;;  %v1073_v48 = vld [vmem:[%s1464_s8 + $0x98] sm:$0xf0]  ;;  %v1072_v51 = vor.u32 %v1148_v44, %v1071_v42  ;;  %v1012_v52 = vor.u32 %v1131_v45, %v1009_v46  ;;  %v999_v53 = vld [vmem:[%s1464_s8] sm:$0xf] }
  0x5e   : > { %744 = vmatpush.bf16.msra.mxu0 %v1024_v25  ;;  %v540_v50 = vld [vmem:[%s1441_s9] sm:$0xff]  ;;  %v1130_v54 = vld [vmem:[%s1464_s8 + $0x4] sm:$0xf0]  ;;  %v1063_v55 = vld [vmem:[%s1464_s8 + $0x80] sm:$0xf]  ;;  %v1076_v56 = vor.u32 %v1147_v47, %v1073_v48  ;;  %p1125_p13 = scmp.ne.s32.totalorder %s1256_s20, 17 }
  0x5f   : > { %757 = vmatpush.bf16.msra.mxu1 %v1088_v26  ;;  %770 = vmatpush.bf16.msra.mxu2 %v1028_v27  ;;  %v1146_v57 = vld [vmem:[%s1464_s8 + $0x84] sm:$0xf0]  ;;  %v1129_v58 = vld [vmem:[%s1464_s8 + $0x4] sm:$0xf]  ;;  %v1001_v59 = vld [vmem:[%s1464_s8 + $0x8] sm:$0xf0]  ;;  %v574_v62 = vunpack.c.l.b16 %v540_v50  ;;  %v1000_v63 = vor.u32 %v1130_v54, %v999_v53  ;;  %v575_v0 = vunpack.c.h.b16 %v540_v50 }
  0x60   : > { %783 = vmatpush.bf16.msra.mxu3 %v1092_v31  ;;  %v1145_v60 = vld [vmem:[%s1464_s8 + $0x84] sm:$0xf]  ;;  %v1065_v61 = vld [vmem:[%s1464_s8 + $0x88] sm:$0xf0]  ;;  %v1064_v1 = vor.u32 %v1146_v57, %v1063_v55  ;;  %v1004_v2 = vor.u32 %v1129_v58, %v1001_v59  ;;  %v538_v7 = vld [vmem:[#allocation2] sm:$0xff] }
  0x61   : > { %v1068_v3 = vor.u32 %v1145_v60, %v1065_v61  ;;  %v576_v4 = vpack.c.b16 %v574_v62, %v574_v62  ;;  %v577_v5 = vpack.c.b16 %v575_v0, %v575_v0  ;;  %v539_v12 = vld [vmem:[#allocation2 + $0x8] sm:$0xff] }
  0x62   : > { %745 = vmatpush.bf16.msra.mxu0 %v1016_v37 }
  0x63   : > { %758 = vmatpush.bf16.msra.mxu1 %v1080_v38  ;;  %771 = vmatpush.bf16.msra.mxu2 %v1020_v39 }
  0x64   : > { %784 = vmatpush.bf16.msra.mxu3 %v1084_v43 }
  0x66   : > { %746 = vmatpush.bf16.msra.mxu0 %v1008_v49 }
  0x67   : > { %759 = vmatpush.bf16.msra.mxu1 %v1072_v51  ;;  %772 = vmatpush.bf16.msra.mxu2 %v1012_v52 }
  0x68   : > { %785 = vmatpush.bf16.msra.mxu3 %v1076_v56 }
  0x6a   : > { %747 = vmatpush.bf16.msra.mxu0 %v1000_v63 }
  0x6b   : > { %760 = vmatpush.bf16.msra.mxu1 %v1064_v1  ;;  %773 = vmatpush.bf16.msra.mxu2 %v1004_v2 }
  0x6c   : > { %786 = vmatpush.bf16.msra.mxu3 %v1068_v3 }
  0x6d   : > { %748 = vmatmul.bf16.vlgmr.msra.gmra.mxu0 %v576_v4 }
  0x6e   : > { %761 = vmatmul.bf16.vlgmr.msra.gmra.mxu1 %v577_v5  ;;  %774 = vmatmul.bf16.vlgmr.msra.gmra.mxu2 %v576_v4 }
  0x6f   : > { %787 = vmatmul.bf16.vlgmr.msra.gmra.mxu3 %v577_v5 }
  0xea   : > { %v749_v6 = vpop.f32.mrf.mxu0 }
  0xeb   : > { %v762_v8 = vpop.f32.mrf.mxu1 }
  0xec   : > { %v763_v9 = vadd.f32 %v762_v8, %v749_v6 }
  0xee   : > { %v792_v10 = vadd.f32 %v763_v9, %v538_v7 }
  0xf0   : > { %794 = vst [vmem:[#allocation2] sm:$0xff] %v792_v10 }
  0xf1   : > { %v775_v11 = vpop.f32.mrf.mxu2 }
  0xf2   : > { %v788_v13 = vpop.f32.mrf.mxu3  ;;  %v751_v14 = vpop.f32.mrf.mxu0 }
  0xf3   : > { %v789_v15 = vadd.f32 %v788_v13, %v775_v11  ;;  %v764_v16 = vpop.f32.mrf.mxu1 }
  0xf5   : > { %v793_v17 = vadd.f32 %v789_v15, %v539_v12 }
  0xf6   : > { %799 = sbr.rel (%p1125_p13) target bundleno = 266 (0x10a), region = 86 }
  0xf7   : > { %795 = vst [vmem:[#allocation2 + $0x8] sm:$0xff] %v793_v17 }
  0xf9   : > { %v777_v18 = vpop.f32.mrf.mxu2 }
  0xfa   : > { %v790_v19 = vpop.f32.mrf.mxu3 }
  0xfb   : > { %v800_v20 = vld [vmem:[#allocation2] sm:$0xff] }
  0xfc   : > { %v802_v22 = vld [vmem:[%s505_s18] sm:$0x3] }
  0xfd   : > { %v804_v23 = vperm.slane %v802_v22, 0  ;;  %v805_v24 = vperm.slane %v802_v22, 1  ;;  %v810_v25 = vld [vmem:[%s510_s21] sm:$0x3] }
  0xfe   : > { %v801_v21 = vld [vmem:[#allocation2 + $0x8] sm:$0xff]  ;;  %v818_v26 = vld [vmem:[%s1457_s17] sm:$0xff]  ;;  %v812_v27 = vperm.slane %v810_v25, 0  ;;  %v813_v28 = vperm.slane %v810_v25, 1 }
  0xff   : > { %v808_v29 = vmul.f32 %v804_v23, %v800_v20  ;;  %v809_v30 = vmul.f32 %v805_v24, %v801_v21  ;;  %v819_v31 = vunpack.c.l.bf16 %v818_v26  ;;  %v820_v32 = vunpack.c.h.bf16 %v818_v26 }
 0x101   : > { %v816_v33 = vadd.f32 %v812_v27, %v808_v29  ;;  %v817_v34 = vadd.f32 %v813_v28, %v809_v30 }
 0x103   : > { %v821_v35 = vadd.f32 %v819_v31, %v816_v33  ;;  %v822_v36 = vadd.f32 %v820_v32, %v817_v34 }
 0x105   : > { %v823_v37 = vmax.f32 %v821_v35, 0.0  ;;  %v824_v38 = vmax.f32 %v822_v36, 0.0 }
 0x107   : > { %v825_v39 = vpack.c.bf16 %v824_v38, %v823_v37 }
 0x109   : > { %826 = vst [vmem:[%s1462_s7] sm:$0xff] %v825_v39 }
 0x10a PF: > { %s15_s24 = sadd.s32 1, %s1272_s24   ;;  %s1572_s18 = smov %s1252_s19 }
 0x10b   : > { %p12_p0 = scmp.ge.s32.totalorder %s15_s24, 38   ;;  %s1573_s19 = smov %s1356_s6 }
 0x10c   : > { %s1574_s20 = smov %s1264_s22  ;;  %s1575_s21 = smov %s1268_s23 }
 0x10d   : > { %s1576_s22 = smov %s1579_s25  ;;  %s1577_s23 = smov %s1583_s26 }
 0x10e   :  { %14 = sbr.rel (!%p12_p0) target bundleno = 4 (0x4), region = 133 }

// kernel: resnet18_forward.41
= control target key start
LH: loop header
LB: loop body
LE: loop exit
PB: predicated region body
PF: predicated region fallthrough
CT: control target
= control target key end

     0   :  { %s1212_s15 = smov 0   ;;  %s1214_s16 = smov 0   ;;  %s1467_s0 = inlined_call_operand.vmem [shape: bf16[8,4608], index: 0, kind: input, shape index: {}]   ;;  %s1468_s1 = inlined_call_operand.vmem [shape: bf16[4608,512], index: 1, kind: input, shape index: {}]   ;;  %s1469_s2 = inlined_call_operand.vmem [shape: f32[1,512], index: 2, kind: input, shape index: {}]   ;;  %s1470_s3 = inlined_call_operand.vmem [shape: f32[1,512], index: 3, kind: input, shape index: {}]   ;;  %s1471_s4 = inlined_call_operand.vmem [shape: bf16[8,512], index: 4, kind: output, shape index: {}]  }
   0x1   :  { %s1216_s17 = smov 0   ;;  %s1218_s18 = smov 0  }
   0x2   :  { %s1220_s19 = smov 0   ;;  %s1222_s20 = smov 0  }
   0x3   :  { %s1224_s21 = smov 0  }
   0x4 LB: > { %s26_s22 = sadd.s32 1, %s1176_s19  ;;  %s29_s23 = sadd.s32 1, %s1180_s20  ;;  %s1184_s21 = sphi %s1224_s21, %s14_s21   ;;  %s1180_s20 = sphi %s1222_s20, %s1477_s20   ;;  %s1176_s19 = sphi %s1220_s19, %s1476_s19   ;;  %s1172_s18 = sphi %s1218_s18, %s1475_s18   ;;  %s1168_s17 = sphi %s1216_s17, %s1474_s17   ;;  %s1164_s16 = sphi %s1214_s16, %s1473_s16   ;;  %s1160_s15 = sphi %s1212_s15, %s1472_s15  }
   0x5   : > { %p27_p0 = scmp.ge.s32.totalorder %s26_s22, 18  ;;  %p77_p1 = scmp.ne.s32.totalorder %s1164_s16, %s1160_s15 }
   0x6   : > { %p78_p2 = scmp.eq.s32.totalorder %s1184_s21, 0  ;;  %s70_s27 = sadd.s32 1, %s1164_s16 }
   0x7   : > { %s1479_s22 = smov (%p27_p0, %s26_s22), 0  ;;  %s1481_s23 = smov (!%p27_p0, %s29_s23), %s1180_s20 }
   0x8   : > { %p79_p3 = por %p78_p2, %p77_p1  ;;  %p31_p4 = scmp.ge.s32.totalorder %s1481_s23, 2 }
   0x9   : > { %s65_s24 = ssub.s32 %s1176_s19, %s1479_s22  ;;  %p894_p6 = scmp.ge.s32.totalorder %s1184_s21, 36 }
   0xa   : > { %s1483_s23 = smov (%p31_p4, %s1481_s23), 0 }
   0xb   : > { %s66_s25 = ssub.s32 %s1180_s20, %s1483_s23  ;;  %183 = sbr.rel (%p894_p6) target bundleno = 55 (0x37), region = 16 }
   0xc   : > { %s67_s26 = sor.u32 %s66_s25, %s65_s24 }
   0xd   : > { %p68_p5 = scmp.eq.s32.totalorder %s67_s26, 0 }
   0xf   : > { %s1263_s28 = scalar_select %p68_p5, %s1164_s16, %s70_s27  }
  0x10   : > { %199 = sbr.rel (!%p79_p3) target bundleno = 55 (0x37), region = 24  ;;  %s201_s29 = sand.u32 (%p79_p3), 1, %s1164_s16  }
  0x11   : > { %s897_s30 = sshll.u32 (%p79_p3), %s1180_s20, 1  ;;  %s895_s5 = sshll.u32 (%p79_p3), %s201_s29, 8 }
  0x12   : > { %s1040_s6 = sshll.u32 (%p79_p3), %s1176_s19, 7  ;;  %s1277_s12 = scalar_lea.vmem (%p79_p3), [#allocation3], %s895_s5 }
  0x13   : > { %s207_s7 = sadd.s32 (%p79_p3), %s1040_s6, %s897_s30 }
  0x14   : > { %s899_s8 = sshll.u32 (%p79_p3), %s207_s7, 2 }
  0x15   : > { %s1272_s11 = scalar_lea.vmem %s1468_s1, %s899_s8 }
  0x16   : > { %v300_v0 = vld [vmem:[%s1272_s11] sm:$0xff]  ;;  %v302_v1 = vld [vmem:[%s1272_s11 + $0x10] sm:$0xff] }
  0x17   : > { %v304_v2 = vld [vmem:[%s1272_s11 + $0x20] sm:$0xff]  ;;  %301 = vst [vmem:[%s1277_s12] sm:$0xff] %v300_v0  ;;  %v306_v3 = vld [vmem:[%s1272_s11 + $0x30] sm:$0xff] }
  0x18   : > { %303 = vst [vmem:[%s1277_s12 + $0x8] sm:$0xff] %v302_v1  ;;  %v308_v4 = vld [vmem:[%s1272_s11 + $0x40] sm:$0xff]  ;;  %v310_v5 = vld [vmem:[%s1272_s11 + $0x50] sm:$0xff] }
  0x19   : > { %305 = vst [vmem:[%s1277_s12 + $0x10] sm:$0xff] %v304_v2  ;;  %v312_v6 = vld [vmem:[%s1272_s11 + $0x60] sm:$0xff]  ;;  %v314_v7 = vld [vmem:[%s1272_s11 + $0x70] sm:$0xff] }
  0x1a   : > { %307 = vst [vmem:[%s1277_s12 + $0x18] sm:$0xff] %v306_v3  ;;  %v316_v8 = vld [vmem:[%s1272_s11 + $0x80] sm:$0xff]  ;;  %v318_v9 = vld [vmem:[%s1272_s11 + $0x90] sm:$0xff] }
  0x1b   : > { %309 = vst [vmem:[%s1277_s12 + $0x20] sm:$0xff] %v308_v4  ;;  %v320_v10 = vld [vmem:[%s1272_s11 + $0xa0] sm:$0xff]  ;;  %v322_v11 = vld [vmem:[%s1272_s11 + $0xb0] sm:$0xff] }
  0x1c   : > { %311 = vst [vmem:[%s1277_s12 + $0x28] sm:$0xff] %v310_v5  ;;  %v324_v12 = vld [vmem:[%s1272_s11 + $0xc0] sm:$0xff]  ;;  %v326_v13 = vld [vmem:[%s1272_s11 + $0xd0] sm:$0xff] }
  0x1d   : > { %313 = vst [vmem:[%s1277_s12 + $0x30] sm:$0xff] %v312_v6  ;;  %v328_v14 = vld [vmem:[%s1272_s11 + $0xe0] sm:$0xff]  ;;  %v330_v15 = vld [vmem:[%s1272_s11 + $0xf0] sm:$0xff] }
  0x1e   : > { %315 = vst [vmem:[%s1277_s12 + $0x38] sm:$0xff] %v314_v7  ;;  %v332_v16 = vld [vmem:[%s1272_s11 + $0x100] sm:$0xff]  ;;  %v334_v17 = vld [vmem:[%s1272_s11 + $0x110] sm:$0xff] }
  0x1f   : > { %317 = vst [vmem:[%s1277_s12 + $0x40] sm:$0xff] %v316_v8  ;;  %v336_v18 = vld [vmem:[%s1272_s11 + $0x120] sm:$0xff]  ;;  %v338_v19 = vld [vmem:[%s1272_s11 + $0x130] sm:$0xff] }
  0x20   : > { %319 = vst [vmem:[%s1277_s12 + $0x48] sm:$0xff] %v318_v9  ;;  %v340_v20 = vld [vmem:[%s1272_s11 + $0x140] sm:$0xff]  ;;  %v342_v21 = vld [vmem:[%s1272_s11 + $0x150] sm:$0xff] }
  0x21   : > { %321 = vst [vmem:[%s1277_s12 + $0x50] sm:$0xff] %v320_v10  ;;  %v344_v22 = vld [vmem:[%s1272_s11 + $0x160] sm:$0xff]  ;;  %v346_v23 = vld [vmem:[%s1272_s11 + $0x170] sm:$0xff] }
  0x22   : > { %323 = vst [vmem:[%s1277_s12 + $0x58] sm:$0xff] %v322_v11  ;;  %v348_v24 = vld [vmem:[%s1272_s11 + $0x180] sm:$0xff]  ;;  %v350_v25 = vld [vmem:[%s1272_s11 + $0x190] sm:$0xff] }
  0x23   : > { %325 = vst [vmem:[%s1277_s12 + $0x60] sm:$0xff] %v324_v12  ;;  %v352_v26 = vld [vmem:[%s1272_s11 + $0x1a0] sm:$0xff]  ;;  %v354_v27 = vld [vmem:[%s1272_s11 + $0x1b0] sm:$0xff] }
  0x24   : > { %327 = vst [vmem:[%s1277_s12 + $0x68] sm:$0xff] %v326_v13  ;;  %v356_v28 = vld [vmem:[%s1272_s11 + $0x1c0] sm:$0xff]  ;;  %v358_v29 = vld [vmem:[%s1272_s11 + $0x1d0] sm:$0xff] }
  0x25   : > { %329 = vst [vmem:[%s1277_s12 + $0x70] sm:$0xff] %v328_v14  ;;  %v360_v30 = vld [vmem:[%s1272_s11 + $0x1e0] sm:$0xff]  ;;  %v362_v31 = vld [vmem:[%s1272_s11 + $0x1f0] sm:$0xff] }
  0x26   : > { %331 = vst [vmem:[%s1277_s12 + $0x78] sm:$0xff] %v330_v15 }
  0x27   : > { %333 = vst [vmem:[%s1277_s12 + $0x80] sm:$0xff] %v332_v16 }
  0x28   : > { %335 = vst [vmem:[%s1277_s12 + $0x88] sm:$0xff] %v334_v17 }
  0x29   : > { %337 = vst [vmem:[%s1277_s12 + $0x90] sm:$0xff] %v336_v18 }
  0x2a   : > { %339 = vst [vmem:[%s1277_s12 + $0x98] sm:$0xff] %v338_v19 }
  0x2b   : > { %341 = vst [vmem:[%s1277_s12 + $0xa0] sm:$0xff] %v340_v20 }
  0x2c   : > { %343 = vst [vmem:[%s1277_s12 + $0xa8] sm:$0xff] %v342_v21 }
  0x2d   : > { %345 = vst [vmem:[%s1277_s12 + $0xb0] sm:$0xff] %v344_v22 }
  0x2e   : > { %347 = vst [vmem:[%s1277_s12 + $0xb8] sm:$0xff] %v346_v23 }
  0x2f   : > { %349 = vst [vmem:[%s1277_s12 + $0xc0] sm:$0xff] %v348_v24 }
  0x30   : > { %351 = vst [vmem:[%s1277_s12 + $0xc8] sm:$0xff] %v350_v25 }
  0x31   : > { %353 = vst [vmem:[%s1277_s12 + $0xd0] sm:$0xff] %v352_v26 }
  0x32   : > { %355 = vst [vmem:[%s1277_s12 + $0xd8] sm:$0xff] %v354_v27 }
  0x33   : > { %357 = vst [vmem:[%s1277_s12 + $0xe0] sm:$0xff] %v356_v28 }
  0x34   : > { %359 = vst [vmem:[%s1277_s12 + $0xe8] sm:$0xff] %v358_v29 }
  0x35   : > { %361 = vst [vmem:[%s1277_s12 + $0xf0] sm:$0xff] %v360_v30 }
  0x36   : > { %363 = vst [vmem:[%s1277_s12 + $0xf8] sm:$0xff] %v362_v31 }
  0x37 PF: > { %p900_p7 = scmp.ge.s32.totalorder %s1184_s21, 1  ;;  %p384_p8 = scmp.lt.s32.totalorder %s1184_s21, 37 }
  0x39   : > { %p385_p9 = pnand %p900_p7, %p384_p8 }
  0x3a   : > { %s391_s13 = sand.u32 (!%p385_p9), 1, %s1160_s15   ;;  %s902_s14 = sshll.u32 (!%p385_p9), %s1168_s17, 1 }
  0x3b   : > { %388 = sbr.rel (%p385_p9) target bundleno = 264 (0x108), region = 70  ;;  %s901_s24 = sshll.u32 (!%p385_p9), %s391_s13, 8 }
  0x3c   : > { %p440_p10 = scmp.lt.s32.totalorder (!%p385_p9), %s902_s14, 35  ;;  %s904_s25 = sshll.u32 (!%p385_p9), %s1172_s18, 1 }
  0x3d   : > { %p450_p11 = scmp.lt.s32.totalorder (!%p385_p9), %s904_s25, 3  ;;  %s1366_s13 = scalar_lea.vmem (!%p385_p9), [#allocation3], %s901_s24 }
  0x3e   : > { %p908_p12 = scmp.ne.s32.totalorder (!%p385_p9), %s1168_s17, 0 }
  0x40   : > { %s1485_s14 = smov (!%p440_p10, %s902_s14), 35  ;;  %s1487_s25 = smov (!%p450_p11, %s904_s25), 3 }
  0x41   : > { %s903_s26 = sshll.u32 %s1485_s14, 2  ;;  %s452_s15 = scalar_lea.vmem %s1469_s2, %s1487_s25 }
  0x42   : > { %s1348_s30 = scalar_lea.vmem %s1467_s0, %s903_s26  ;;  %s457_s18 = scalar_lea.vmem %s1470_s3, %s1487_s25 }
  0x43   : > { %s907_s9 = sshll.u32 %s1487_s25, 2  ;;  %472 = sbr.rel (%p908_p12) target bundleno = 75 (0x4b), region = 78 }
  0x44   : > { %s1364_s12 = scalar_lea.vmem %s1471_s4, %s907_s9 }
  0x48   : > { %v1186_v32 = vmov 0.0  }
  0x49   : > { %473 = vst [vmem:[#allocation2] sm:$0xff] %v1186_v32 }
  0x4a   : > { %474 = vst [vmem:[#allocation2 + $0x8] sm:$0xff] %v1186_v32 }
  0x4b PF: > { %v967_v33 = vld [vmem:[%s1366_s13 + $0x70] sm:$0xf]  ;;  %v1056_v34 = vld [vmem:[%s1366_s13 + $0x74] sm:$0xf0]  ;;  %v1055_v38 = vld [vmem:[%s1366_s13 + $0x74] sm:$0xf] }
  0x4c   : > { %v1031_v35 = vld [vmem:[%s1366_s13 + $0xf0] sm:$0xf]  ;;  %v968_v36 = vor.u32 %v1056_v34, %v967_v33  ;;  %v1072_v37 = vld [vmem:[%s1366_s13 + $0xf4] sm:$0xf0]  ;;  %v969_v39 = vld [vmem:[%s1366_s13 + $0x78] sm:$0xf0] }
  0x4d   : > { %v1032_v40 = vor.u32 %v1072_v37, %v1031_v35  ;;  %v972_v41 = vor.u32 %v1055_v38, %v969_v39  ;;  %v1071_v42 = vld [vmem:[%s1366_s13 + $0xf4] sm:$0xf]  ;;  %v1033_v43 = vld [vmem:[%s1366_s13 + $0xf8] sm:$0xf0]  ;;  %v959_v44 = vld [vmem:[%s1366_s13 + $0x60] sm:$0xf] }
  0x4e   : > { %677 = vmatpush.bf16.msra.mxu0 %v968_v36  ;;  %v1036_v45 = vor.u32 %v1071_v42, %v1033_v43  ;;  %v1054_v46 = vld [vmem:[%s1366_s13 + $0x64] sm:$0xf0]  ;;  %v1023_v47 = vld [vmem:[%s1366_s13 + $0xe0] sm:$0xf]  ;;  %v1053_v51 = vld [vmem:[%s1366_s13 + $0x64] sm:$0xf] }
  0x4f   : > { %v1070_v48 = vld [vmem:[%s1366_s13 + $0xe4] sm:$0xf0]  ;;  %690 = vmatpush.bf16.msra.mxu1 %v1032_v40  ;;  %703 = vmatpush.bf16.msra.mxu2 %v972_v41  ;;  %v960_v49 = vor.u32 %v1054_v46, %v959_v44  ;;  %v961_v52 = vld [vmem:[%s1366_s13 + $0x68] sm:$0xf0]  ;;  %v1069_v53 = vld [vmem:[%s1366_s13 + $0xe4] sm:$0xf] }
  0x50   : > { %v1024_v50 = vor.u32 %v1070_v48, %v1023_v47  ;;  %716 = vmatpush.bf16.msra.mxu3 %v1036_v45  ;;  %v964_v54 = vor.u32 %v1053_v51, %v961_v52  ;;  %v1025_v55 = vld [vmem:[%s1366_s13 + $0xe8] sm:$0xf0]  ;;  %v951_v56 = vld [vmem:[%s1366_s13 + $0x50] sm:$0xf]  ;;  %v1052_v57 = vld [vmem:[%s1366_s13 + $0x54] sm:$0xf0] }
  0x51   : > { %v1028_v58 = vor.u32 %v1069_v53, %v1025_v55  ;;  %v1015_v59 = vld [vmem:[%s1366_s13 + $0xd0] sm:$0xf]  ;;  %v1068_v60 = vld [vmem:[%s1366_s13 + $0xd4] sm:$0xf0]  ;;  %v1051_v61 = vld [vmem:[%s1366_s13 + $0x54] sm:$0xf]  ;;  %v952_v62 = vor.u32 %v1052_v57, %v951_v56 }
  0x52   : > { %678 = vmatpush.bf16.msra.mxu0 %v960_v49  ;;  %v953_v63 = vld [vmem:[%s1366_s13 + $0x58] sm:$0xf0]  ;;  %v1067_v0 = vld [vmem:[%s1366_s13 + $0xd4] sm:$0xf]  ;;  %v1016_v2 = vor.u32 %v1068_v60, %v1015_v59  ;;  %v943_v4 = vld [vmem:[%s1366_s13 + $0x40] sm:$0xf] }
  0x53   : > { %v1017_v1 = vld [vmem:[%s1366_s13 + $0xd8] sm:$0xf0]  ;;  %691 = vmatpush.bf16.msra.mxu1 %v1024_v50  ;;  %704 = vmatpush.bf16.msra.mxu2 %v964_v54  ;;  %v956_v3 = vor.u32 %v1051_v61, %v953_v63  ;;  %v1050_v5 = vld [vmem:[%s1366_s13 + $0x44] sm:$0xf0]  ;;  %v1007_v6 = vld [vmem:[%s1366_s13 + $0xc0] sm:$0xf] }
  0x54   : > { %717 = vmatpush.bf16.msra.mxu3 %v1028_v58  ;;  %v1020_v7 = vor.u32 %v1067_v0, %v1017_v1  ;;  %v1066_v8 = vld [vmem:[%s1366_s13 + $0xc4] sm:$0xf0]  ;;  %v1049_v9 = vld [vmem:[%s1366_s13 + $0x44] sm:$0xf]  ;;  %v945_v10 = vld [vmem:[%s1366_s13 + $0x48] sm:$0xf0]  ;;  %v944_v13 = vor.u32 %v1050_v5, %v943_v4 }
  0x55   : > { %v1065_v11 = vld [vmem:[%s1366_s13 + $0xc4] sm:$0xf]  ;;  %v1009_v12 = vld [vmem:[%s1366_s13 + $0xc8] sm:$0xf0]  ;;  %v1008_v14 = vor.u32 %v1066_v8, %v1007_v6  ;;  %v948_v15 = vor.u32 %v1049_v9, %v945_v10  ;;  %v935_v16 = vld [vmem:[%s1366_s13 + $0x30] sm:$0xf] }
  0x56   : > { %679 = vmatpush.bf16.msra.mxu0 %v952_v62  ;;  %v1048_v17 = vld [vmem:[%s1366_s13 + $0x34] sm:$0xf0]  ;;  %v999_v18 = vld [vmem:[%s1366_s13 + $0xb0] sm:$0xf]  ;;  %v1012_v19 = vor.u32 %v1065_v11, %v1009_v12  ;;  %v1047_v21 = vld [vmem:[%s1366_s13 + $0x34] sm:$0xf] }
  0x57   : > { %692 = vmatpush.bf16.msra.mxu1 %v1016_v2  ;;  %705 = vmatpush.bf16.msra.mxu2 %v956_v3  ;;  %v1064_v20 = vld [vmem:[%s1366_s13 + $0xb4] sm:$0xf0]  ;;  %v937_v22 = vld [vmem:[%s1366_s13 + $0x38] sm:$0xf0]  ;;  %v1063_v23 = vld [vmem:[%s1366_s13 + $0xb4] sm:$0xf]  ;;  %v936_v25 = vor.u32 %v1048_v17, %v935_v16 }
  0x58   : > { %718 = vmatpush.bf16.msra.mxu3 %v1020_v7  ;;  %v1001_v24 = vld [vmem:[%s1366_s13 + $0xb8] sm:$0xf0]  ;;  %v1000_v26 = vor.u32 %v1064_v20, %v999_v18  ;;  %v940_v27 = vor.u32 %v1047_v21, %v937_v22  ;;  %v927_v28 = vld [vmem:[%s1366_s13 + $0x20] sm:$0xf]  ;;  %v1046_v29 = vld [vmem:[%s1366_s13 + $0x24] sm:$0xf0] }
  0x59   : > { %v991_v30 = vld [vmem:[%s1366_s13 + $0xa0] sm:$0xf]  ;;  %v1004_v31 = vor.u32 %v1063_v23, %v1001_v24  ;;  %v1062_v32 = vld [vmem:[%s1366_s13 + $0xa4] sm:$0xf0]  ;;  %v1045_v33 = vld [vmem:[%s1366_s13 + $0x24] sm:$0xf]  ;;  %v928_v37 = vor.u32 %v1046_v29, %v927_v28 }
  0x5a   : > { %680 = vmatpush.bf16.msra.mxu0 %v944_v13  ;;  %v929_v34 = vld [vmem:[%s1366_s13 + $0x28] sm:$0xf0]  ;;  %v1061_v35 = vld [vmem:[%s1366_s13 + $0xa4] sm:$0xf]  ;;  %v992_v38 = vor.u32 %v1062_v32, %v991_v30  ;;  %v919_v40 = vld [vmem:[%s1366_s13 + $0x10] sm:$0xf] }
  0x5b   : > { %693 = vmatpush.bf16.msra.mxu1 %v1008_v14  ;;  %706 = vmatpush.bf16.msra.mxu2 %v948_v15  ;;  %v993_v36 = vld [vmem:[%s1366_s13 + $0xa8] sm:$0xf0]  ;;  %v932_v39 = vor.u32 %v1045_v33, %v929_v34  ;;  %v1044_v41 = vld [vmem:[%s1366_s13 + $0x14] sm:$0xf0]  ;;  %v983_v42 = vld [vmem:[%s1366_s13 + $0x90] sm:$0xf] }
  0x5c   : > { %719 = vmatpush.bf16.msra.mxu3 %v1012_v19  ;;  %v996_v43 = vor.u32 %v1061_v35, %v993_v36  ;;  %v1060_v44 = vld [vmem:[%s1366_s13 + $0x94] sm:$0xf0]  ;;  %v1043_v45 = vld [vmem:[%s1366_s13 + $0x14] sm:$0xf]  ;;  %v921_v46 = vld [vmem:[%s1366_s13 + $0x18] sm:$0xf0]  ;;  %v920_v49 = vor.u32 %v1044_v41, %v919_v40 }
  0x5d   : > { %v1059_v47 = vld [vmem:[%s1366_s13 + $0x94] sm:$0xf]  ;;  %v985_v48 = vld [vmem:[%s1366_s13 + $0x98] sm:$0xf0]  ;;  %v984_v51 = vor.u32 %v1060_v44, %v983_v42  ;;  %v924_v52 = vor.u32 %v1043_v45, %v921_v46  ;;  %v911_v53 = vld [vmem:[%s1366_s13] sm:$0xf] }
  0x5e   : > { %681 = vmatpush.bf16.msra.mxu0 %v936_v25  ;;  %v477_v50 = vld [vmem:[%s1348_s30] sm:$0xff]  ;;  %v1042_v54 = vld [vmem:[%s1366_s13 + $0x4] sm:$0xf0]  ;;  %v975_v55 = vld [vmem:[%s1366_s13 + $0x80] sm:$0xf]  ;;  %v988_v56 = vor.u32 %v1059_v47, %v985_v48  ;;  %p1037_p13 = scmp.ne.s32.totalorder %s1168_s17, 17 }
  0x5f   : > { %694 = vmatpush.bf16.msra.mxu1 %v1000_v26  ;;  %707 = vmatpush.bf16.msra.mxu2 %v940_v27  ;;  %v1058_v57 = vld [vmem:[%s1366_s13 + $0x84] sm:$0xf0]  ;;  %v1041_v58 = vld [vmem:[%s1366_s13 + $0x4] sm:$0xf]  ;;  %v913_v59 = vld [vmem:[%s1366_s13 + $0x8] sm:$0xf0]  ;;  %v511_v62 = vunpack.c.l.b16 %v477_v50  ;;  %v912_v63 = vor.u32 %v1042_v54, %v911_v53  ;;  %v512_v0 = vunpack.c.h.b16 %v477_v50 }
  0x60   : > { %720 = vmatpush.bf16.msra.mxu3 %v1004_v31  ;;  %v1057_v60 = vld [vmem:[%s1366_s13 + $0x84] sm:$0xf]  ;;  %v977_v61 = vld [vmem:[%s1366_s13 + $0x88] sm:$0xf0]  ;;  %v976_v1 = vor.u32 %v1058_v57, %v975_v55  ;;  %v916_v2 = vor.u32 %v1041_v58, %v913_v59  ;;  %v475_v7 = vld [vmem:[#allocation2] sm:$0xff] }
  0x61   : > { %v980_v3 = vor.u32 %v1057_v60, %v977_v61  ;;  %v513_v4 = vpack.c.b16 %v511_v62, %v511_v62  ;;  %v514_v5 = vpack.c.b16 %v512_v0, %v512_v0  ;;  %v476_v12 = vld [vmem:[#allocation2 + $0x8] sm:$0xff] }
  0x62   : > { %682 = vmatpush.bf16.msra.mxu0 %v928_v37 }
  0x63   : > { %695 = vmatpush.bf16.msra.mxu1 %v992_v38  ;;  %708 = vmatpush.bf16.msra.mxu2 %v932_v39 }
  0x64   : > { %721 = vmatpush.bf16.msra.mxu3 %v996_v43 }
  0x66   : > { %683 = vmatpush.bf16.msra.mxu0 %v920_v49 }
  0x67   : > { %696 = vmatpush.bf16.msra.mxu1 %v984_v51  ;;  %709 = vmatpush.bf16.msra.mxu2 %v924_v52 }
  0x68   : > { %722 = vmatpush.bf16.msra.mxu3 %v988_v56 }
  0x6a   : > { %684 = vmatpush.bf16.msra.mxu0 %v912_v63 }
  0x6b   : > { %697 = vmatpush.bf16.msra.mxu1 %v976_v1  ;;  %710 = vmatpush.bf16.msra.mxu2 %v916_v2 }
  0x6c   : > { %723 = vmatpush.bf16.msra.mxu3 %v980_v3 }
  0x6d   : > { %685 = vmatmul.bf16.vlgmr.msra.gmra.mxu0 %v513_v4 }
  0x6e   : > { %698 = vmatmul.bf16.vlgmr.msra.gmra.mxu1 %v514_v5  ;;  %711 = vmatmul.bf16.vlgmr.msra.gmra.mxu2 %v513_v4 }
  0x6f   : > { %724 = vmatmul.bf16.vlgmr.msra.gmra.mxu3 %v514_v5 }
  0xea   : > { %v686_v6 = vpop.f32.mrf.mxu0 }
  0xeb   : > { %v699_v8 = vpop.f32.mrf.mxu1 }
  0xec   : > { %v700_v9 = vadd.f32 %v699_v8, %v686_v6 }
  0xee   : > { %v729_v10 = vadd.f32 %v700_v9, %v475_v7 }
  0xf0   : > { %731 = vst [vmem:[#allocation2] sm:$0xff] %v729_v10 }
  0xf1   : > { %v712_v11 = vpop.f32.mrf.mxu2 }
  0xf2   : > { %v725_v13 = vpop.f32.mrf.mxu3  ;;  %v688_v14 = vpop.f32.mrf.mxu0 }
  0xf3   : > { %v726_v15 = vadd.f32 %v725_v13, %v712_v11  ;;  %v701_v16 = vpop.f32.mrf.mxu1 }
  0xf5   : > { %v730_v17 = vadd.f32 %v726_v15, %v476_v12 }
  0xf6   : > { %736 = sbr.rel (%p1037_p13) target bundleno = 264 (0x108), region = 82 }
  0xf7   : > { %732 = vst [vmem:[#allocation2 + $0x8] sm:$0xff] %v730_v17 }
  0xf9   : > { %v714_v18 = vpop.f32.mrf.mxu2 }
  0xfa   : > { %v727_v19 = vpop.f32.mrf.mxu3 }
  0xfb   : > { %v737_v20 = vld [vmem:[#allocation2] sm:$0xff] }
  0xfc   : > { %v739_v22 = vld [vmem:[%s452_s15] sm:$0x3] }
  0xfd   : > { %v741_v23 = vperm.slane %v739_v22, 0  ;;  %v742_v24 = vperm.slane %v739_v22, 1  ;;  %v747_v25 = vld [vmem:[%s457_s18] sm:$0x3] }
  0xfe   : > { %v738_v21 = vld [vmem:[#allocation2 + $0x8] sm:$0xff]  ;;  %v749_v26 = vperm.slane %v747_v25, 0  ;;  %v750_v27 = vperm.slane %v747_v25, 1 }
  0xff   : > { %v745_v28 = vmul.f32 %v741_v23, %v737_v20  ;;  %v746_v29 = vmul.f32 %v742_v24, %v738_v21 }
 0x101   : > { %v753_v30 = vadd.f32 %v749_v26, %v745_v28  ;;  %v754_v31 = vadd.f32 %v750_v27, %v746_v29 }
 0x103   : > { %v755_v32 = vmax.f32 %v753_v30, 0.0  ;;  %v756_v33 = vmax.f32 %v754_v31, 0.0 }
 0x105   : > { %v757_v34 = vpack.c.bf16 %v756_v33, %v755_v32 }
 0x107   : > { %758 = vst [vmem:[%s1364_s12] sm:$0xff] %v757_v34 }
 0x108 PF: > { %s14_s21 = sadd.s32 1, %s1184_s21   ;;  %s1472_s15 = smov %s1164_s16 }
 0x109   : > { %p11_p0 = scmp.ge.s32.totalorder %s14_s21, 38   ;;  %s1473_s16 = smov %s1263_s28 }
 0x10a   : > { %s1474_s17 = smov %s1176_s19  ;;  %s1475_s18 = smov %s1180_s20 }
 0x10b   : > { %s1476_s19 = smov %s1479_s22  ;;  %s1477_s20 = smov %s1483_s23 }
 0x10c   :  { %13 = sbr.rel (!%p11_p0) target bundleno = 4 (0x4), region = 126 }

// kernel: resnet18_forward.43
= control target key start
LH: loop header
LB: loop body
LE: loop exit
PB: predicated region body
PF: predicated region fallthrough
CT: control target
= control target key end

     0   :  { %8 = vsyncpa [#allocation3], 0  ;;  %s336_s15 = smov [#allocation2]   ;;  %s337_s17 = smov 128   ;;  %s456_s0 = inlined_call_operand.vmem [shape: bf16[8,1,512], index: 0, kind: input, shape index: {}]   ;;  %s457_s1 = inlined_call_operand.hbm [shape: f32[512,128], index: 1, kind: input, shape index: {}]   ;;  %s458_s2 = inlined_call_operand.vmem [shape: f32[1,128], index: 2, kind: input, shape index: {}]   ;;  %s459_s3 = inlined_call_operand.vmem [shape: f32[8,128], index: 3, kind: output, shape index: {}]  }
   0x1   :  { %s15_s14 = sshll.u32 %s457_s1, 4  ;;  %s17_s16 = sshll.u32 %s336_s15, 4  ;;  %s16_s14 = int_to_ptr.hbm [resolvable:$true] %s15_s14  ;;  %s18_s16 = int_to_ptr.vmem [resolvable:$true] %s17_s16 }
   0x2   :  { %s338_s18 = smov 8  }
   0x3   :  { %23 = dma.hbm_to_vmem [thread:$0]  %s16_s14, 8192, %s18_s16, [#allocation3], %s337_s17, %s337_s17, %s338_s18  }
   0x4   :  { %334 = dma.done.wait [#allocation3], 8192  }
   0x5   :  { %335 = vsyncadd [#allocation3], 4294959104  ;;  %v101_v0 = vld [vmem:[#allocation2 + $0x178] sm:$0xff]  ;;  %v100_v2 = vld [vmem:[#allocation2 + $0x170] sm:$0xff]  ;;  %vm162_vm0 = vcmask 1041409   ;;  %vm164_vm1 = vcmask 1042434  }
   0x6   :  { %v69_v1 = vld [vmem:[#allocation2 + $0x78] sm:$0xff]  ;;  %241 = vmatpush.msra.mxu2 %v101_v0  ;;  %v68_v4 = vld [vmem:[#allocation2 + $0x70] sm:$0xff]  ;;  %v99_v6 = vld [vmem:[#allocation2 + $0x168] sm:$0xff]  ;;  %vm166_vm2 = vcmask 1043459   ;;  %vm168_vm3 = vcmask 1044484   ;;  %vm170_vm4 = vcmask 1045509  }
   0x7   :  { %201 = vmatpush.msra.mxu0 %v69_v1  ;;  %v117_v3 = vld [vmem:[#allocation2 + $0x1f8] sm:$0xff]  ;;  %v116_v7 = vld [vmem:[#allocation2 + $0x1f0] sm:$0xff]  ;;  %v67_v8 = vld [vmem:[#allocation2 + $0x68] sm:$0xff]  ;;  %vm172_vm5 = vcmask 1046534   ;;  %vm174_vm6 = vcmask 1047559  }
   0x8   :  { %v85_v5 = vld [vmem:[#allocation2 + $0xf8] sm:$0xff]  ;;  %261 = vmatpush.msra.mxu3 %v117_v3  ;;  %242 = vmatpush.msra.mxu2 %v100_v2  ;;  %v84_v9 = vld [vmem:[#allocation2 + $0xf0] sm:$0xff]  ;;  %v115_v10 = vld [vmem:[#allocation2 + $0x1e8] sm:$0xff] }
   0x9   :  { %221 = vmatpush.msra.mxu1 %v85_v5  ;;  %202 = vmatpush.msra.mxu0 %v68_v4  ;;  %v98_v11 = vld [vmem:[#allocation2 + $0x160] sm:$0xff]  ;;  %v83_v13 = vld [vmem:[#allocation2 + $0xe8] sm:$0xff]  ;;  %v97_v16 = vld [vmem:[#allocation2 + $0x158] sm:$0xff] }
   0xa   :  { %262 = vmatpush.msra.mxu3 %v116_v7  ;;  %v66_v12 = vld [vmem:[#allocation2 + $0x60] sm:$0xff]  ;;  %243 = vmatpush.msra.mxu2 %v99_v6  ;;  %v65_v17 = vld [vmem:[#allocation2 + $0x58] sm:$0xff]  ;;  %v96_v20 = vld [vmem:[#allocation2 + $0x150] sm:$0xff] }
   0xb   :  { %222 = vmatpush.msra.mxu1 %v84_v9  ;;  %203 = vmatpush.msra.mxu0 %v67_v8  ;;  %v114_v14 = vld [vmem:[#allocation2 + $0x1e0] sm:$0xff]  ;;  %v113_v18 = vld [vmem:[#allocation2 + $0x1d8] sm:$0xff]  ;;  %v64_v21 = vld [vmem:[#allocation2 + $0x50] sm:$0xff] }
   0xc   :  { %v82_v15 = vld [vmem:[#allocation2 + $0xe0] sm:$0xff]  ;;  %263 = vmatpush.msra.mxu3 %v115_v10  ;;  %244 = vmatpush.msra.mxu2 %v98_v11  ;;  %v81_v19 = vld [vmem:[#allocation2 + $0xd8] sm:$0xff]  ;;  %v112_v22 = vld [vmem:[#allocation2 + $0x1d0] sm:$0xff] }
   0xd   :  { %223 = vmatpush.msra.mxu1 %v83_v13  ;;  %204 = vmatpush.msra.mxu0 %v66_v12  ;;  %v80_v23 = vld [vmem:[#allocation2 + $0xd0] sm:$0xff]  ;;  %v95_v24 = vld [vmem:[#allocation2 + $0x148] sm:$0xff]  ;;  %v94_v28 = vld [vmem:[#allocation2 + $0x140] sm:$0xff] }
   0xe   :  { %264 = vmatpush.msra.mxu3 %v114_v14  ;;  %245 = vmatpush.msra.mxu2 %v97_v16  ;;  %v63_v25 = vld [vmem:[#allocation2 + $0x48] sm:$0xff]  ;;  %v62_v29 = vld [vmem:[#allocation2 + $0x40] sm:$0xff]  ;;  %v93_v32 = vld [vmem:[#allocation2 + $0x138] sm:$0xff] }
   0xf   :  { %224 = vmatpush.msra.mxu1 %v82_v15  ;;  %205 = vmatpush.msra.mxu0 %v65_v17  ;;  %v111_v26 = vld [vmem:[#allocation2 + $0x1c8] sm:$0xff]  ;;  %v110_v30 = vld [vmem:[#allocation2 + $0x1c0] sm:$0xff]  ;;  %v61_v33 = vld [vmem:[#allocation2 + $0x38] sm:$0xff] }
  0x10   :  { %265 = vmatpush.msra.mxu3 %v113_v18  ;;  %246 = vmatpush.msra.mxu2 %v96_v20  ;;  %v79_v27 = vld [vmem:[#allocation2 + $0xc8] sm:$0xff]  ;;  %v78_v31 = vld [vmem:[#allocation2 + $0xc0] sm:$0xff]  ;;  %v109_v34 = vld [vmem:[#allocation2 + $0x1b8] sm:$0xff] }
  0x11   :  { %225 = vmatpush.msra.mxu1 %v81_v19  ;;  %206 = vmatpush.msra.mxu0 %v64_v21  ;;  %v77_v35 = vld [vmem:[#allocation2 + $0xb8] sm:$0xff]  ;;  %v92_v36 = vld [vmem:[#allocation2 + $0x130] sm:$0xff]  ;;  %v91_v40 = vld [vmem:[#allocation2 + $0x128] sm:$0xff] }
  0x12   :  { %266 = vmatpush.msra.mxu3 %v112_v22  ;;  %247 = vmatpush.msra.mxu2 %v95_v24  ;;  %v60_v37 = vld [vmem:[#allocation2 + $0x30] sm:$0xff]  ;;  %v59_v41 = vld [vmem:[#allocation2 + $0x28] sm:$0xff]  ;;  %v90_v42 = vld [vmem:[#allocation2 + $0x120] sm:$0xff] }
  0x13   :  { %226 = vmatpush.msra.mxu1 %v80_v23  ;;  %207 = vmatpush.msra.mxu0 %v63_v25  ;;  %v108_v38 = vld [vmem:[#allocation2 + $0x1b0] sm:$0xff]  ;;  %v107_v43 = vld [vmem:[#allocation2 + $0x1a8] sm:$0xff]  ;;  %v58_v44 = vld [vmem:[#allocation2 + $0x20] sm:$0xff] }
  0x14   :  { %267 = vmatpush.msra.mxu3 %v111_v26  ;;  %248 = vmatpush.msra.mxu2 %v94_v28  ;;  %v76_v39 = vld [vmem:[#allocation2 + $0xb0] sm:$0xff]  ;;  %v75_v45 = vld [vmem:[#allocation2 + $0xa8] sm:$0xff]  ;;  %v288_v46 = vld [vmem:[%s456_s0] sm:$0xff]  }
  0x15   :  { %227 = vmatpush.msra.mxu1 %v79_v27  ;;  %208 = vmatpush.msra.mxu0 %v62_v29  ;;  %v303_v47 = vld [vmem:[%s456_s0 + $0x8] sm:$0xff]   ;;  %v304_v48 = vld [vmem:[%s456_s0 + $0x10] sm:$0xff]   ;;  %v106_v49 = vld [vmem:[#allocation2 + $0x1a0] sm:$0xff]  ;;  %v371_v51 = vunpack.c.l.bf16 %v288_v46  ;;  %v373_v52 = vunpack.c.h.bf16 %v288_v46 }
  0x16   :  { %268 = vmatpush.msra.mxu3 %v110_v30  ;;  %249 = vmatpush.msra.mxu2 %v93_v32  ;;  %v74_v50 = vld [vmem:[#allocation2 + $0xa0] sm:$0xff]  ;;  %v375_v53 = vunpack.c.l.bf16 %v303_v47  ;;  %v377_v54 = vunpack.c.h.bf16 %v303_v47  ;;  %v305_v55 = vld [vmem:[%s456_s0 + $0x18] sm:$0xff]   ;;  %v382_v58 = vunpack.c.l.bf16 %v304_v48  ;;  %v384_v59 = vunpack.c.h.bf16 %v304_v48  ;;  %v88_v4 = vld [vmem:[#allocation2 + $0x110] sm:$0xff] }
  0x17   :  { %228 = vmatpush.msra.mxu1 %v78_v31  ;;  %209 = vmatpush.msra.mxu0 %v61_v33  ;;  %v89_v56 = vld [vmem:[#allocation2 + $0x118] sm:$0xff]  ;;  %v386_v60 = vunpack.c.l.bf16 %v305_v55  ;;  %v388_v61 = vunpack.c.h.bf16 %v305_v55  ;;  %v132_v0 = vperm.slane %v371_v51, 4  ;;  %v136_v1 = vperm.slane %v373_v52, 4  ;;  %v56_v5 = vld [vmem:[#allocation2 + $0x10] sm:$0xff]  ;;  %v87_v15 = vld [vmem:[#allocation2 + $0x108] sm:$0xff] }
  0x18   :  { %269 = vmatpush.msra.mxu3 %v109_v34  ;;  %250 = vmatpush.msra.mxu2 %v92_v36  ;;  %v57_v57 = vld [vmem:[#allocation2 + $0x18] sm:$0xff]  ;;  %v140_v2 = vperm.slane %v375_v53, 4  ;;  %v144_v3 = vperm.slane %v377_v54, 4  ;;  %v148_v6 = vperm.slane %v382_v58, 4  ;;  %v152_v7 = vperm.slane %v384_v59, 4  ;;  %v104_v9 = vld [vmem:[#allocation2 + $0x190] sm:$0xff] }
  0x19   :  { %229 = vmatpush.msra.mxu1 %v77_v35  ;;  %210 = vmatpush.msra.mxu0 %v60_v37  ;;  %v105_v62 = vld [vmem:[#allocation2 + $0x198] sm:$0xff]  ;;  %v156_v8 = vperm.slane %v386_v60, 4  ;;  %v72_v10 = vld [vmem:[#allocation2 + $0x90] sm:$0xff]  ;;  %v183_v11 = vsel %vm162_vm0, %v136_v1, %v132_v0  ;;  %v130_v12 = vperm.slane %v371_v51, 0  ;;  %v134_v13 = vperm.slane %v373_v52, 0  ;;  %v55_v16 = vld [vmem:[#allocation2 + $0x8] sm:$0xff] }
  0x1a   :  { %270 = vmatpush.msra.mxu3 %v108_v38  ;;  %251 = vmatpush.msra.mxu2 %v91_v40  ;;  %v73_v63 = vld [vmem:[#allocation2 + $0x98] sm:$0xff]  ;;  %v138_v14 = vperm.slane %v375_v53, 0  ;;  %v160_v17 = vperm.slane %v388_v61, 4  ;;  %v184_v18 = vsel %vm164_vm1, %v140_v2, %v183_v11  ;;  %v142_v19 = vperm.slane %v377_v54, 0  ;;  %v103_v21 = vld [vmem:[#allocation2 + $0x188] sm:$0xff]  ;;  %v86_v27 = vld [vmem:[#allocation2 + $0x100] sm:$0xff] }
  0x1b   :  { %230 = vmatpush.msra.mxu1 %v76_v39  ;;  %211 = vmatpush.msra.mxu0 %v59_v41  ;;  %v146_v20 = vperm.slane %v382_v58, 0  ;;  %v185_v22 = vsel %vm166_vm2, %v144_v3, %v184_v18  ;;  %v71_v23 = vld [vmem:[#allocation2 + $0x88] sm:$0xff]  ;;  %v150_v24 = vperm.slane %v384_v59, 0  ;;  %v154_v25 = vperm.slane %v386_v60, 0  ;;  %v54_v29 = vld [vmem:[#allocation2] sm:$0xff] }
  0x1c   :  { %271 = vmatpush.msra.mxu3 %v107_v43  ;;  %252 = vmatpush.msra.mxu2 %v90_v42  ;;  %v163_v26 = vsel %vm162_vm0, %v134_v13, %v130_v12  ;;  %v186_v28 = vsel %vm168_vm3, %v148_v6, %v185_v22  ;;  %v133_v31 = vperm.slane %v371_v51, 6  ;;  %v137_v32 = vperm.slane %v373_v52, 6  ;;  %v102_v34 = vld [vmem:[#allocation2 + $0x180] sm:$0xff] }
  0x1d   :  { %231 = vmatpush.msra.mxu1 %v75_v45  ;;  %212 = vmatpush.msra.mxu0 %v58_v44  ;;  %v165_v30 = vsel %vm164_vm1, %v138_v14, %v163_v26  ;;  %v187_v33 = vsel %vm170_vm4, %v152_v7, %v186_v28  ;;  %v158_v35 = vperm.slane %v388_v61, 0  ;;  %v141_v37 = vperm.slane %v375_v53, 6  ;;  %v70_v42 = vld [vmem:[#allocation2 + $0x80] sm:$0xff] }
  0x1e   :  { %272 = vmatpush.msra.mxu3 %v106_v49  ;;  %253 = vmatpush.msra.mxu2 %v89_v56  ;;  %v167_v36 = vsel %vm166_vm2, %v142_v19, %v165_v30  ;;  %v188_v38 = vsel %vm172_vm5, %v156_v8, %v187_v33  ;;  %v145_v40 = vperm.slane %v377_v54, 6  ;;  %v149_v41 = vperm.slane %v382_v58, 6 }
  0x1f   :  { %232 = vmatpush.msra.mxu1 %v74_v50  ;;  %213 = vmatpush.msra.mxu0 %v57_v57  ;;  %v169_v39 = vsel %vm168_vm3, %v146_v20, %v167_v36  ;;  %v189_v43 = vsel %vm174_vm6, %v160_v17, %v188_v38  ;;  %v153_v45 = vperm.slane %v384_v59, 6  ;;  %v157_v46 = vperm.slane %v386_v60, 6 }
  0x20   :  { %273 = vmatpush.msra.mxu3 %v105_v62  ;;  %254 = vmatpush.msra.mxu2 %v88_v4  ;;  %v171_v44 = vsel %vm170_vm4, %v150_v24, %v169_v39  ;;  %v190_v48 = vsel %vm162_vm0, %v137_v32, %v133_v31  ;;  %v131_v49 = vperm.slane %v371_v51, 2  ;;  %v135_v50 = vperm.slane %v373_v52, 2 }
  0x21   :  { %233 = vmatpush.msra.mxu1 %v73_v63  ;;  %214 = vmatpush.msra.mxu0 %v56_v5  ;;  %v173_v47 = vsel %vm172_vm5, %v154_v25, %v171_v44  ;;  %v191_v56 = vsel %vm164_vm1, %v141_v37, %v190_v48  ;;  %v139_v57 = vperm.slane %v375_v53, 2  ;;  %v143_v62 = vperm.slane %v377_v54, 2 }
  0x22   :  { %274 = vmatpush.msra.mxu3 %v104_v9  ;;  %255 = vmatpush.msra.mxu2 %v87_v15  ;;  %v175_v55 = vsel %vm174_vm6, %v158_v35, %v173_v47  ;;  %v161_v63 = vperm.slane %v388_v61, 6  ;;  %v192_v0 = vsel %vm166_vm2, %v145_v40, %v191_v56  ;;  %v147_v1 = vperm.slane %v382_v58, 2 }
  0x23   :  { %234 = vmatpush.msra.mxu1 %v72_v10  ;;  %215 = vmatpush.msra.mxu0 %v55_v16  ;;  %v193_v51 = vsel %vm168_vm3, %v149_v41, %v192_v0  ;;  %v151_v52 = vperm.slane %v384_v59, 2  ;;  %v176_v2 = vsel %vm162_vm0, %v135_v50, %v131_v49  ;;  %v155_v4 = vperm.slane %v386_v60, 2  ;;  %v309_v60 = vld [vmem:[%s458_s2] ss:$0 sm:$0xff] }
  0x24   :  { %275 = vmatpush.msra.mxu3 %v103_v21  ;;  %256 = vmatpush.msra.mxu2 %v86_v27  ;;  %v194_v3 = vsel %vm170_vm4, %v153_v45, %v193_v51  ;;  %v177_v53 = vsel %vm164_vm1, %v139_v57, %v176_v2  ;;  %v159_v5 = vperm.slane %v388_v61, 2 }
  0x25   :  { %235 = vmatpush.msra.mxu1 %v71_v23  ;;  %216 = vmatpush.msra.mxu0 %v54_v29  ;;  %v195_v54 = vsel %vm172_vm5, %v157_v46, %v194_v3  ;;  %v178_v6 = vsel %vm166_vm2, %v143_v62, %v177_v53 }
  0x26   :  { %257 = vmatmul.f32.vlgmr.msra.gmra.mxu2 %v189_v43  ;;  %276 = vmatpush.msra.mxu3 %v102_v34  ;;  %v196_v58 = vsel %vm174_vm6, %v161_v63, %v195_v54  ;;  %v179_v7 = vsel %vm168_vm3, %v147_v1, %v178_v6 }
  0x27   :  { %236 = vmatpush.msra.mxu1 %v70_v42  ;;  %217 = vmatmul.f32.vlgmr.msra.gmra.mxu0 %v175_v55  ;;  %v180_v59 = vsel %vm170_vm4, %v151_v52, %v179_v7 }
  0x28   :  { %277 = vmatmul.f32.vlgmr.msra.gmra.mxu3 %v196_v58  ;;  %v181_v8 = vsel %vm172_vm5, %v155_v4, %v180_v59 }
  0x29   :  { %v182_v9 = vsel %vm174_vm6, %v159_v5, %v181_v8 }
  0x2a   :  { %237 = vmatmul.f32.vlgmr.msra.gmra.mxu1 %v182_v9 }
  0xa4   :  { %v218_v10 = vpop.f32.mrf.mxu0 }
  0xa5   :  { %v219_v61 = vadd.f32 %v309_v60, %v218_v10 }
  0xa7   :  { %v238_v11 = vpop.f32.mrf.mxu1 }
  0xa8   :  { %v239_v13 = vadd.f32 %v238_v11, %v219_v61 }
  0xa9   :  { %v258_v12 = vpop.f32.mrf.mxu2 }
  0xaa   :  { %v259_v14 = vadd.f32 %v258_v12, %v239_v13 }
  0xab   :  { %v278_v15 = vpop.f32.mrf.mxu3 }
  0xac   :  { %v279_v16 = vadd.f32 %v278_v15, %v259_v14 }
  0xae   :  { %281 = vst [vmem:[%s459_s3] sm:$0xff] %v279_v16 }
  0xaf   :  { %286 = vsyncpa [#allocation3], 1 }

</bundles_post_ra>
